<compile_context>
chip_gen: v6e
topology: v6e:2x2x1
jax: 0.10.0
libtpu: 0.0.40
codegen_flags: <defaults>
</compile_context>

<pallas_src>
import functools

import jax
import jax.numpy as jnp
from jax.experimental import pallas as pl
from jax.experimental.pallas import tpu as pltpu

TILE_I = 128      # target-node tile (grid axis 0, "parallel")
TILE_J = 128      # source-node tile (grid axis 1, reduction, "arbitrary", last)
NEG_SLOPE = 0.2
NEG_BIG = -1e30


def _round_up(x, m):
    return (x + m - 1) // m * m


# ---------------------------------------------------------------------------
# Fused GATv2 layer kernel: projection + flash-style masked softmax aggregation
#   xl[j] = x[j] @ Wl + bl      xr[i] = x[i] @ Wr + br
#   e[i,j] = att . LeakyReLU(xl[j] + xr[i])          (edges j -> i only)
#   out[i] = sum_j softmax_j(e[i,j]) * xl[j] + bias  (+ optional ReLU)
# ---------------------------------------------------------------------------
def _gatv2_kernel(bm_ref,                               # SMEM prefetch: block edge mask [ni, nj]
                  x_i_ref, x_j_ref, xT_j_ref, adj_ref,  # tiled inputs
                  wl_ref, wr_ref, wlT_ref,              # weights (full-resident)
                  bl_ref, br_ref, blc_ref,              # biases (row / row / column)
                  attc_ref, attr_ref, bias_ref,         # att vector + output bias
                  out_ref,
                  m_sc, l_sc, acc_sc, xr_sc,            # VMEM scratch
                  *, apply_relu):
    i = pl.program_id(0)
    j = pl.program_id(1)

    @pl.when(j == 0)
    def _init():
        m_sc[...] = jnp.full_like(m_sc, NEG_BIG)
        l_sc[...] = jnp.zeros_like(l_sc)
        acc_sc[...] = jnp.zeros_like(acc_sc)
        # target-tile projection, once per i-row:  xr = x_i @ Wr + br
        xr_sc[...] = (jnp.dot(x_i_ref[...], wr_ref[...],
                              preferred_element_type=jnp.float32) + br_ref[...])

    @pl.when(bm_ref[i, j] != 0)          # skip fully-masked blocks (exact skip)
    def _process():
        xr = xr_sc[...]                                            # [TI, F8]
        # source-tile projections: value operand and transposed logit operand
        xl_v = (jnp.dot(x_j_ref[...], wl_ref[...],
                        preferred_element_type=jnp.float32) + bl_ref[...])   # [TJ, F8]
        xl_T = (jnp.dot(wlT_ref[...], xT_j_ref[...],
                        preferred_element_type=jnp.float32) + blc_ref[...])  # [F8, TJ]

        attc = attc_ref[...]                                       # [F8, 1]
        attr = attr_ref[...]                                       # [1, F8]

        # GATv2 logits with LeakyReLU(z) = 0.2 z + 0.8 relu(z):
        #   s = 0.2*(att.xr + att.xl) + 0.8 * sum_c att[c] * relu(xr[i,c]+xl[j,c])
        a_r = NEG_SLOPE * jnp.sum(xr * attr, axis=1, keepdims=True)      # [TI, 1]
        a_l = NEG_SLOPE * jnp.sum(xl_T * attc, axis=0, keepdims=True)    # [1, TJ]
        z = xr[:, :, None] + xl_T[None, :, :]                            # [TI, F8, TJ]
        r = jnp.maximum(z, 0.0)
        att08 = (1.0 - NEG_SLOPE) * attc                                 # [F8, 1]
        s = (a_r + a_l) + jnp.sum(r * att08[None, :, :], axis=1)         # [TI, TJ]

        mask = adj_ref[...] != 0                                         # int8 adjacency
        s = jnp.where(mask, s, NEG_BIG)

        # online-softmax update (running max / denom / weighted-value accumulator)
        m_prev = m_sc[...]
        m_new = jnp.maximum(m_prev, jnp.max(s, axis=-1, keepdims=True))
        scale = jnp.exp(m_prev - m_new)
        p = jnp.where(mask, jnp.exp(s - m_new), 0.0)                     # [TI, TJ]
        l_sc[...] = scale * l_sc[...] + jnp.sum(p, axis=-1, keepdims=True)
        acc_sc[...] = scale * acc_sc[...] + jnp.dot(
            p, xl_v, preferred_element_type=jnp.float32)
        m_sc[...] = m_new

    @pl.when(j == pl.num_programs(1) - 1)
    def _finalize():
        out = acc_sc[...] / (l_sc[...] + 1e-16) + bias_ref[...]          # PyG softmax eps
        if apply_relu:
            out = jnp.maximum(out, 0.0)
        out_ref[...] = out.astype(out_ref.dtype)


def gatv2_layer(x_pad, xT_pad, adj, block_mask, pp, *, apply_relu):
    n_pad, f8 = x_pad.shape
    ni, nj = n_pad // TILE_I, n_pad // TILE_J
    kernel = functools.partial(_gatv2_kernel, apply_relu=apply_relu)
    return pl.pallas_call(
        kernel,
        out_shape=jax.ShapeDtypeStruct((n_pad, f8), jnp.float32),
        grid_spec=pltpu.PrefetchScalarGridSpec(
            num_scalar_prefetch=1,
            grid=(ni, nj),
            in_specs=[
                pl.BlockSpec((TILE_I, f8), lambda i, j, bm: (i, 0)),      # x (target tile)
                pl.BlockSpec((TILE_J, f8), lambda i, j, bm: (j, 0)),      # x (source tile)
                pl.BlockSpec((f8, TILE_J), lambda i, j, bm: (0, j)),      # x^T (source tile)
                pl.BlockSpec((TILE_I, TILE_J), lambda i, j, bm: (i, j)),  # adj block (int8)
                pl.BlockSpec((f8, f8), lambda i, j, bm: (0, 0)),          # Wl
                pl.BlockSpec((f8, f8), lambda i, j, bm: (0, 0)),          # Wr
                pl.BlockSpec((f8, f8), lambda i, j, bm: (0, 0)),          # Wl^T
                pl.BlockSpec((1, f8), lambda i, j, bm: (0, 0)),           # bl (row)
                pl.BlockSpec((1, f8), lambda i, j, bm: (0, 0)),           # br (row)
                pl.BlockSpec((f8, 1), lambda i, j, bm: (0, 0)),           # bl (column)
                pl.BlockSpec((f8, 1), lambda i, j, bm: (0, 0)),           # att (column)
                pl.BlockSpec((1, f8), lambda i, j, bm: (0, 0)),           # att (row)
                pl.BlockSpec((1, f8), lambda i, j, bm: (0, 0)),           # output bias
            ],
            out_specs=pl.BlockSpec((TILE_I, f8), lambda i, j, bm: (i, 0)),
            scratch_shapes=[
                pltpu.VMEM((TILE_I, 1), jnp.float32),    # running max
                pltpu.VMEM((TILE_I, 1), jnp.float32),    # running denom
                pltpu.VMEM((TILE_I, f8), jnp.float32),   # weighted-value accumulator
                pltpu.VMEM((TILE_I, f8), jnp.float32),   # xr for the current i-row
            ],
        ),
        compiler_params=pltpu.CompilerParams(
            dimension_semantics=("parallel", "arbitrary"),
            vmem_limit_bytes=32 * 1024 * 1024),
    )(block_mask, x_pad, x_pad, xT_pad, adj,
      pp["wl"], pp["wr"], pp["wlT"], pp["bl"], pp["br"], pp["blc"],
      pp["attc"], pp["attr"], pp["bias"])


# ---------------------------------------------------------------------------
# Graph / parameter preparation (pure layout glue; padded rows/channels are
# never attended to and contribute zero)
# ---------------------------------------------------------------------------
def build_graph(edge_index, n_pad):
    """Dense int8 adjacency (adj[i,j]=1 iff edge j->i) + per-block edge table.

    Depends only on edge_index / n_pad: build once per graph and reuse across
    forwards and across both conv layers.
    """
    src, dst = edge_index[0], edge_index[1]
    adj = jnp.zeros((n_pad, n_pad), jnp.int8).at[dst, src].set(1)
    ni, nj = n_pad // TILE_I, n_pad // TILE_J
    block_mask = adj.reshape(ni, TILE_I, nj, TILE_J).astype(jnp.int32).max(axis=(1, 3))
    return adj, block_mask


def _prep_params(p, f, f8):
    def pad_mat(w):
        return jnp.zeros((f8, f8), jnp.float32).at[:f, :f].set(w)

    def pad_row(v):
        return jnp.zeros((1, f8), jnp.float32).at[:, :f].set(v.reshape(1, f))

    wl = pad_mat(p["wl"])
    att_row = pad_row(p["att"])
    bl_row = pad_row(p["bl"])
    return dict(
        wl=wl, wr=pad_mat(p["wr"]), wlT=wl.T,
        bl=bl_row, br=pad_row(p["br"]), blc=bl_row.reshape(f8, 1),
        attc=att_row.reshape(f8, 1), attr=att_row,
        bias=pad_row(p["bias"]),
    )


def gnn_forward(x, edge_index, params1, params2):
    """GNN.forward: x = relu(conv1(x, edge_index)); x = conv2(x, edge_index)."""
    n, f = x.shape
    f8 = _round_up(f, 8)                                    # sublane-align channels
    n_pad = _round_up(_round_up(max(n, 1), TILE_I), TILE_J)

    x_pad = jnp.zeros((n_pad, f8), jnp.float32).at[:n, :f].set(x)
    # NOTE: graph structures depend only on edge_index; hoist build_graph()
    # out of the per-forward path when the graph is static.
    adj, block_mask = build_graph(edge_index, n_pad)

    pp1 = _prep_params(params1, f, f8)
    pp2 = _prep_params(params2, f, f8)

    h = gatv2_layer(x_pad, x_pad.T, adj, block_mask, pp1, apply_relu=True)
    out = gatv2_layer(h, h.T, adj, block_mask, pp2, apply_relu=False)
    return out[:n, :f]


def init_gatv2_params(key, channels):
    """Deterministic glorot-uniform weights, zero biases (as in PyG GATv2Conv)."""
    k0, k1, k2 = jax.random.split(key, 3)
    lim = (6.0 / (channels + channels)) ** 0.5
    zeros = jnp.zeros((1, channels), jnp.float32)
    return dict(
        wl=jax.random.uniform(k0, (channels, channels), jnp.float32, -lim, lim),
        wr=jax.random.uniform(k1, (channels, channels), jnp.float32, -lim, lim),
        att=jax.random.uniform(k2, (1, channels), jnp.float32, -lim, lim),
        bl=zeros, br=zeros, bias=zeros,
    )


# ----- pure-JAX f32 reference for numerical verification -----
def _gatv2_ref(x, p, adj, apply_relu):
    xl = x @ p["wl"] + p["bl"]
    xr = x @ p["wr"] + p["br"]
    e = xr[:, None, :] + xl[None, :, :]
    e = jnp.where(e > 0, e, NEG_SLOPE * e)
    s = jnp.sum(e * p["att"][None, :, :], axis=-1)
    masked = jnp.where(adj > 0, s, NEG_BIG)
    m = jnp.max(masked, axis=-1, keepdims=True)
    pe = jnp.exp(masked - m) * adj
    alpha = pe / (jnp.sum(pe, axis=-1, keepdims=True) + 1e-16)
    out = alpha @ xl + p["bias"]
    return jnp.maximum(out, 0.0) if apply_relu else out


if __name__ == "__main__":
    N, HIDDEN = 200, 32            # small, non-multiple-of-128 node count
    key = jax.random.PRNGKey(0)
    kx, k1, k2 = jax.random.split(key, 3)

    x = jax.random.normal(kx, (N, HIDDEN), jnp.float32)

    # deterministic bidirectional ring graph: row 0 = source, row 1 = target
    ar = jnp.arange(N)
    src = jnp.concatenate([ar, (ar + 1) % N])
    dst = jnp.concatenate([(ar + 1) % N, ar])
    edge_index = jnp.stack([src, dst]).astype(jnp.int32)   # [2, 2N]

    p1 = init_gatv2_params(k1, HIDDEN)
    p2 = init_gatv2_params(k2, HIDDEN)

    out = jax.block_until_ready(gnn_forward(x, edge_index, p1, p2))

    adj_ref = jnp.zeros((N, N), jnp.float32).at[dst, src].set(1.0)
    ref = _gatv2_ref(_gatv2_ref(x, p1, adj_ref, True), p2, adj_ref, False)

    assert out.shape == (N, HIDDEN)
    # full-f32 path now (no bf16 MXU casts, exact division in finalize)
    assert bool(jnp.allclose(out, ref, rtol=1e-2, atol=1e-2)), "mismatch vs reference"
    print("KERNEL_OK")
</pallas_src>

<mosaic_0001>
module attributes {stable_mosaic.version = 11 : i64} {
  func.func @_gatv2_kernel(%arg0: i32, %arg1: i32, %arg2: memref<2x2xi32, #tpu.memory_space<smem>>, %arg3: memref<128x32xf32, #tpu.memory_space<vmem>>, %arg4: memref<128x32xf32, #tpu.memory_space<vmem>>, %arg5: memref<32x128xf32, #tpu.memory_space<vmem>>, %arg6: memref<128x128xi8, #tpu.memory_space<vmem>>, %arg7: memref<32x32xf32, #tpu.memory_space<vmem>>, %arg8: memref<32x32xf32, #tpu.memory_space<vmem>>, %arg9: memref<32x32xf32, #tpu.memory_space<vmem>>, %arg10: memref<1x32xf32, #tpu.memory_space<vmem>>, %arg11: memref<1x32xf32, #tpu.memory_space<vmem>>, %arg12: memref<32x1xf32, #tpu.memory_space<vmem>>, %arg13: memref<32x1xf32, #tpu.memory_space<vmem>>, %arg14: memref<1x32xf32, #tpu.memory_space<vmem>>, %arg15: memref<1x32xf32, #tpu.memory_space<vmem>>, %arg16: memref<128x32xf32, #tpu.memory_space<vmem>>, %arg17: memref<128x1xf32, #tpu.memory_space<vmem>>, %arg18: memref<128x1xf32, #tpu.memory_space<vmem>>, %arg19: memref<128x32xf32, #tpu.memory_space<vmem>>, %arg20: memref<128x32xf32, #tpu.memory_space<vmem>>) attributes {dimension_semantics = [#tpu.dimension_semantics<parallel>, #tpu.dimension_semantics<arbitrary>], iteration_bounds = array<i64: 2, 2>, scalar_prefetch = 1 : i64, scratch_operands = 4 : i64, tpu.core_type = #tpu.core_type<tc>, window_params = [{transform_indices = @transform_0, window_bounds = array<i64: 128, 32>}, {transform_indices = @transform_1, window_bounds = array<i64: 128, 32>}, {transform_indices = @transform_2, window_bounds = array<i64: 32, 128>}, {transform_indices = @transform_3, window_bounds = array<i64: 128, 128>}, {pipeline_mode = #tpu.pipeline_mode<synchronous>, transform_indices = @transform_4, window_bounds = array<i64: 32, 32>}, {pipeline_mode = #tpu.pipeline_mode<synchronous>, transform_indices = @transform_5, window_bounds = array<i64: 32, 32>}, {pipeline_mode = #tpu.pipeline_mode<synchronous>, transform_indices = @transform_6, window_bounds = array<i64: 32, 32>}, {pipeline_mode = #tpu.pipeline_mode<synchronous>, transform_indices = @transform_7, window_bounds = array<i64: 1, 32>}, {pipeline_mode = #tpu.pipeline_mode<synchronous>, transform_indices = @transform_8, window_bounds = array<i64: 1, 32>}, {pipeline_mode = #tpu.pipeline_mode<synchronous>, transform_indices = @transform_9, window_bounds = array<i64: 32, 1>}, {pipeline_mode = #tpu.pipeline_mode<synchronous>, transform_indices = @transform_10, window_bounds = array<i64: 32, 1>}, {pipeline_mode = #tpu.pipeline_mode<synchronous>, transform_indices = @transform_11, window_bounds = array<i64: 1, 32>}, {pipeline_mode = #tpu.pipeline_mode<synchronous>, transform_indices = @transform_12, window_bounds = array<i64: 1, 32>}, {transform_indices = @transform_13, window_bounds = array<i64: 128, 32>}]} {
    %c0_i32 = arith.constant 0 : i32
    %0 = arith.cmpi eq, %arg1, %c0_i32 : i32
    %1 = arith.extui %0 : i1 to i32
    %c0_i32_0 = arith.constant 0 : i32
    %2 = arith.cmpi ne, %1, %c0_i32_0 : i32
    scf.if %2 {
      %cst = arith.constant -1.000000e+30 : f32
      %12 = vector.broadcast %cst : f32 to vector<128x1xf32>
      %c0 = arith.constant 0 : index
      %c0_4 = arith.constant 0 : index
      %13 = vector.load %arg17[%c0, %c0_4] : memref<128x1xf32, #tpu.memory_space<vmem>>, vector<128x1xf32>
      tpu.vector_store %arg17[%c0, %c0_4], %12 {strides = array<i32>} : memref<128x1xf32, #tpu.memory_space<vmem>>, vector<128x1xf32>,
      %cst_5 = arith.constant 0.000000e+00 : f32
      %14 = vector.broadcast %cst_5 : f32 to vector<128x1xf32>
      %c0_6 = arith.constant 0 : index
      %c0_7 = arith.constant 0 : index
      %15 = vector.load %arg18[%c0_6, %c0_7] : memref<128x1xf32, #tpu.memory_space<vmem>>, vector<128x1xf32>
      tpu.vector_store %arg18[%c0_6, %c0_7], %14 {strides = array<i32>} : memref<128x1xf32, #tpu.memory_space<vmem>>, vector<128x1xf32>,
      %cst_8 = arith.constant 0.000000e+00 : f32
      %16 = vector.broadcast %cst_8 : f32 to vector<128x32xf32>
      %c0_9 = arith.constant 0 : index
      %c0_10 = arith.constant 0 : index
      %17 = vector.load %arg19[%c0_9, %c0_10] : memref<128x32xf32, #tpu.memory_space<vmem>>, vector<128x32xf32>
      tpu.vector_store %arg19[%c0_9, %c0_10], %16 {strides = array<i32>} : memref<128x32xf32, #tpu.memory_space<vmem>>, vector<128x32xf32>,
      %c0_11 = arith.constant 0 : index
      %c0_12 = arith.constant 0 : index
      %18 = vector.load %arg3[%c0_11, %c0_12] : memref<128x32xf32, #tpu.memory_space<vmem>>, vector<128x32xf32>
      %c0_13 = arith.constant 0 : index
      %c0_14 = arith.constant 0 : index
      %19 = vector.load %arg8[%c0_13, %c0_14] : memref<32x32xf32, #tpu.memory_space<vmem>>, vector<32x32xf32>
      %cst_15 = arith.constant dense<0.000000e+00> : vector<128x32xf32>
      %20 = tpu.matmul %18, %19, %cst_15 {dimension_numbers = #tpu.dot_dimension_numbers<[1], [0], [0], [1], [0, 0, 1, 1], [], []>} : vector<128x32xf32>, vector<32x32xf32>, vector<128x32xf32> -> vector<128x32xf32>
      %c0_16 = arith.constant 0 : index
      %c0_17 = arith.constant 0 : index
      %21 = vector.load %arg11[%c0_16, %c0_17] : memref<1x32xf32, #tpu.memory_space<vmem>>, vector<1x32xf32>
      %22 = vector.broadcast %21 : vector<1x32xf32> to vector<128x32xf32>
      %23 = arith.addf %20, %22 : vector<128x32xf32>
      %c0_18 = arith.constant 0 : index
      %c0_19 = arith.constant 0 : index
      %24 = vector.load %arg20[%c0_18, %c0_19] : memref<128x32xf32, #tpu.memory_space<vmem>>, vector<128x32xf32>
      tpu.vector_store %arg20[%c0_18, %c0_19], %23 {strides = array<i32>} : memref<128x32xf32, #tpu.memory_space<vmem>>, vector<128x32xf32>,
    } else {
    }
    %3 = arith.index_cast %arg0 : i32 to index
    %4 = arith.index_cast %arg1 : i32 to index
    %5 = memref.load %arg2[%3, %4] : memref<2x2xi32, #tpu.memory_space<smem>>
    %c0_i32_1 = arith.constant 0 : i32
    %6 = arith.cmpi ne, %5, %c0_i32_1 : i32
    %7 = arith.extui %6 : i1 to i32
    %c0_i32_2 = arith.constant 0 : i32
    %8 = arith.cmpi ne, %7, %c0_i32_2 : i32
    scf.if %8 {
      %c0 = arith.constant 0 : index
      %c0_4 = arith.constant 0 : index
      %12 = vector.load %arg20[%c0, %c0_4] : memref<128x32xf32, #tpu.memory_space<vmem>>, vector<128x32xf32>
      %c0_5 = arith.constant 0 : index
      %c0_6 = arith.constant 0 : index
      %13 = vector.load %arg4[%c0_5, %c0_6] : memref<128x32xf32, #tpu.memory_space<vmem>>, vector<128x32xf32>
      %c0_7 = arith.constant 0 : index
      %c0_8 = arith.constant 0 : index
      %14 = vector.load %arg7[%c0_7, %c0_8] : memref<32x32xf32, #tpu.memory_space<vmem>>, vector<32x32xf32>
      %cst = arith.constant dense<0.000000e+00> : vector<128x32xf32>
      %15 = tpu.matmul %13, %14, %cst {dimension_numbers = #tpu.dot_dimension_numbers<[1], [0], [0], [1], [0, 0, 1, 1], [], []>} : vector<128x32xf32>, vector<32x32xf32>, vector<128x32xf32> -> vector<128x32xf32>
      %c0_9 = arith.constant 0 : index
      %c0_10 = arith.constant 0 : index
      %16 = vector.load %arg10[%c0_9, %c0_10] : memref<1x32xf32, #tpu.memory_space<vmem>>, vector<1x32xf32>
      %17 = vector.broadcast %16 : vector<1x32xf32> to vector<128x32xf32>
      %18 = arith.addf %15, %17 : vector<128x32xf32>
      %c0_11 = arith.constant 0 : index
      %c0_12 = arith.constant 0 : index
      %19 = vector.load %arg9[%c0_11, %c0_12] : memref<32x32xf32, #tpu.memory_space<vmem>>, vector<32x32xf32>
      %c0_13 = arith.constant 0 : index
      %c0_14 = arith.constant 0 : index
      %20 = vector.load %arg5[%c0_13, %c0_14] : memref<32x128xf32, #tpu.memory_space<vmem>>, vector<32x128xf32>
      %cst_15 = arith.constant dense<0.000000e+00> : vector<32x128xf32>
      %21 = tpu.matmul %19, %20, %cst_15 {dimension_numbers = #tpu.dot_dimension_numbers<[1], [0], [0], [1], [0, 0, 1, 1], [], []>} : vector<32x32xf32>, vector<32x128xf32>, vector<32x128xf32> -> vector<32x128xf32>
      %c0_16 = arith.constant 0 : index
      %c0_17 = arith.constant 0 : index
      %22 = vector.load %arg12[%c0_16, %c0_17] : memref<32x1xf32, #tpu.memory_space<vmem>>, vector<32x1xf32>
      %23 = vector.broadcast %22 : vector<32x1xf32> to vector<32x128xf32>
      %24 = arith.addf %21, %23 : vector<32x128xf32>
      %c0_18 = arith.constant 0 : index
      %c0_19 = arith.constant 0 : index
      %25 = vector.load %arg13[%c0_18, %c0_19] : memref<32x1xf32, #tpu.memory_space<vmem>>, vector<32x1xf32>
      %c0_20 = arith.constant 0 : index
      %c0_21 = arith.constant 0 : index
      %26 = vector.load %arg14[%c0_20, %c0_21] : memref<1x32xf32, #tpu.memory_space<vmem>>, vector<1x32xf32>
      %27 = vector.broadcast %26 : vector<1x32xf32> to vector<128x32xf32>
      %28 = arith.mulf %12, %27 : vector<128x32xf32>
      %cst_22 = arith.constant dense<0.000000e+00> : vector<128xf32>
      %29 = vector.multi_reduction <add>, %28, %cst_22 [1] : vector<128x32xf32> to vector<128xf32>
      %30 = vector.shape_cast %29 : vector<128xf32> to vector<128x1xf32>
      %cst_23 = arith.constant 2.000000e-01 : f32
      %31 = vector.broadcast %cst_23 : f32 to vector<128x1xf32>
      %32 = arith.mulf %31, %30 : vector<128x1xf32>
      %33 = vector.broadcast %25 : vector<32x1xf32> to vector<32x128xf32>
      %34 = arith.mulf %24, %33 : vector<32x128xf32>
      %cst_24 = arith.constant dense<0.000000e+00> : vector<128xf32>
      %35 = vector.multi_reduction <add>, %34, %cst_24 [0] : vector<32x128xf32> to vector<128xf32>
      %36 = vector.shape_cast %35 : vector<128xf32> to vector<1x128xf32>
      %cst_25 = arith.constant 2.000000e-01 : f32
      %37 = vector.broadcast %cst_25 : f32 to vector<1x128xf32>
      %38 = arith.mulf %37, %36 : vector<1x128xf32>
      %39 = vector.shape_cast %12 : vector<128x32xf32> to vector<128x32x1xf32>
      %40 = vector.shape_cast %24 : vector<32x128xf32> to vector<1x32x128xf32>
      %41 = vector.broadcast %39 : vector<128x32x1xf32> to vector<128x32x128xf32>
      %42 = vector.broadcast %40 : vector<1x32x128xf32> to vector<128x32x128xf32>
      %43 = arith.addf %41, %42 : vector<128x32x128xf32>
      %cst_26 = arith.constant 0.000000e+00 : f32
      %44 = vector.broadcast %cst_26 : f32 to vector<128x32x128xf32>
      %45 = arith.maximumf %43, %44 : vector<128x32x128xf32>
      %cst_27 = arith.constant 8.000000e-01 : f32
      %46 = vector.broadcast %cst_27 : f32 to vector<32x1xf32>
      %47 = arith.mulf %46, %25 : vector<32x1xf32>
      %48 = vector.broadcast %32 : vector<128x1xf32> to vector<128x128xf32>
      %49 = vector.broadcast %38 : vector<1x128xf32> to vector<128x128xf32>
      %50 = arith.addf %48, %49 : vector<128x128xf32>
      %51 = vector.shape_cast %47 : vector<32x1xf32> to vector<1x32x1xf32>
      %52 = vector.broadcast %51 : vector<1x32x1xf32> to vector<128x32x128xf32>
      %53 = arith.mulf %45, %52 : vector<128x32x128xf32>
      %cst_28 = arith.constant dense<0.000000e+00> : vector<128x128xf32>
      %54 = vector.multi_reduction <add>, %53, %cst_28 [1] : vector<128x32x128xf32> to vector<128x128xf32>
      %55 = arith.addf %50, %54 : vector<128x128xf32>
      %c0_29 = arith.constant 0 : index
      %c0_30 = arith.constant 0 : index
      %56 = vector.load %arg6[%c0_29, %c0_30] : memref<128x128xi8, #tpu.memory_space<vmem>>, vector<128x128xi8>
      %c0_i8 = arith.constant 0 : i8
      %57 = vector.broadcast %c0_i8 : i8 to vector<128x128xi8>
      %58 = arith.cmpi ne, %56, %57 : vector<128x128xi8>
      %cst_31 = arith.constant -1.000000e+30 : f32
      %59 = vector.broadcast %cst_31 : f32 to vector<128x128xf32>
      %60 = arith.select %58, %55, %59 : vector<128x128xi1>, vector<128x128xf32>
      %c0_32 = arith.constant 0 : index
      %c0_33 = arith.constant 0 : index
      %61 = vector.load %arg17[%c0_32, %c0_33] : memref<128x1xf32, #tpu.memory_space<vmem>>, vector<128x1xf32>
      %cst_34 = arith.constant dense<0xFF800000> : vector<128xf32>
      %62 = vector.multi_reduction <maximumf>, %60, %cst_34 [1] : vector<128x128xf32> to vector<128xf32>
      %63 = vector.shape_cast %62 : vector<128xf32> to vector<128x1xf32>
      %64 = arith.maximumf %61, %63 : vector<128x1xf32>
      %65 = arith.subf %61, %64 : vector<128x1xf32>
      %66 = math.exp %65 : vector<128x1xf32>
      %67 = vector.broadcast %64 : vector<128x1xf32> to vector<128x128xf32>
      %68 = arith.subf %60, %67 : vector<128x128xf32>
      %69 = math.exp %68 : vector<128x128xf32>
      %cst_35 = arith.constant 0.000000e+00 : f32
      %70 = vector.broadcast %cst_35 : f32 to vector<128x128xf32>
      %71 = arith.select %58, %69, %70 : vector<128x128xi1>, vector<128x128xf32>
      %c0_36 = arith.constant 0 : index
      %c0_37 = arith.constant 0 : index
      %72 = vector.load %arg18[%c0_36, %c0_37] : memref<128x1xf32, #tpu.memory_space<vmem>>, vector<128x1xf32>
      %73 = arith.mulf %66, %72 : vector<128x1xf32>
      %cst_38 = arith.constant dense<0.000000e+00> : vector<128xf32>
      %74 = vector.multi_reduction <add>, %71, %cst_38 [1] : vector<128x128xf32> to vector<128xf32>
      %75 = vector.shape_cast %74 : vector<128xf32> to vector<128x1xf32>
      %76 = arith.addf %73, %75 : vector<128x1xf32>
      %c0_39 = arith.constant 0 : index
      %c0_40 = arith.constant 0 : index
      %77 = vector.load %arg18[%c0_39, %c0_40] : memref<128x1xf32, #tpu.memory_space<vmem>>, vector<128x1xf32>
      tpu.vector_store %arg18[%c0_39, %c0_40], %76 {strides = array<i32>} : memref<128x1xf32, #tpu.memory_space<vmem>>, vector<128x1xf32>,
      %c0_41 = arith.constant 0 : index
      %c0_42 = arith.constant 0 : index
      %78 = vector.load %arg19[%c0_41, %c0_42] : memref<128x32xf32, #tpu.memory_space<vmem>>, vector<128x32xf32>
      %79 = vector.broadcast %66 : vector<128x1xf32> to vector<128x32xf32>
      %80 = arith.mulf %79, %78 : vector<128x32xf32>
      %cst_43 = arith.constant dense<0.000000e+00> : vector<128x32xf32>
      %81 = tpu.matmul %71, %18, %cst_43 {dimension_numbers = #tpu.dot_dimension_numbers<[1], [0], [0], [1], [0, 0, 1, 1], [], []>} : vector<128x128xf32>, vector<128x32xf32>, vector<128x32xf32> -> vector<128x32xf32>
      %82 = arith.addf %80, %81 : vector<128x32xf32>
      %c0_44 = arith.constant 0 : index
      %c0_45 = arith.constant 0 : index
      %83 = vector.load %arg19[%c0_44, %c0_45] : memref<128x32xf32, #tpu.memory_space<vmem>>, vector<128x32xf32>
      tpu.vector_store %arg19[%c0_44, %c0_45], %82 {strides = array<i32>} : memref<128x32xf32, #tpu.memory_space<vmem>>, vector<128x32xf32>,
      %c0_46 = arith.constant 0 : index
      %c0_47 = arith.constant 0 : index
      %84 = vector.load %arg17[%c0_46, %c0_47] : memref<128x1xf32, #tpu.memory_space<vmem>>, vector<128x1xf32>
      tpu.vector_store %arg17[%c0_46, %c0_47], %64 {strides = array<i32>} : memref<128x1xf32, #tpu.memory_space<vmem>>, vector<128x1xf32>,
    } else {
    }
    %c1_i32 = arith.constant 1 : i32
    %9 = arith.cmpi eq, %arg1, %c1_i32 : i32
    %10 = arith.extui %9 : i1 to i32
    %c0_i32_3 = arith.constant 0 : i32
    %11 = arith.cmpi ne, %10, %c0_i32_3 : i32
    scf.if %11 {
      %c0 = arith.constant 0 : index
      %c0_4 = arith.constant 0 : index
      %12 = vector.load %arg19[%c0, %c0_4] : memref<128x32xf32, #tpu.memory_space<vmem>>, vector<128x32xf32>
      %c0_5 = arith.constant 0 : index
      %c0_6 = arith.constant 0 : index
      %13 = vector.load %arg18[%c0_5, %c0_6] : memref<128x1xf32, #tpu.memory_space<vmem>>, vector<128x1xf32>
      %cst = arith.constant 1.000000e-16 : f32
      %14 = vector.broadcast %cst : f32 to vector<128x1xf32>
      %15 = arith.addf %13, %14 : vector<128x1xf32>
      %16 = vector.broadcast %15 : vector<128x1xf32> to vector<128x32xf32>
      %17 = arith.divf %12, %16 : vector<128x32xf32>
      %c0_7 = arith.constant 0 : index
      %c0_8 = arith.constant 0 : index
      %18 = vector.load %arg15[%c0_7, %c0_8] : memref<1x32xf32, #tpu.memory_space<vmem>>, vector<1x32xf32>
      %19 = vector.broadcast %18 : vector<1x32xf32> to vector<128x32xf32>
      %20 = arith.addf %17, %19 : vector<128x32xf32>
      %cst_9 = arith.constant 0.000000e+00 : f32
      %21 = vector.broadcast %cst_9 : f32 to vector<128x32xf32>
      %22 = arith.maximumf %20, %21 : vector<128x32xf32>
      %c0_10 = arith.constant 0 : index
      %c0_11 = arith.constant 0 : index
      %23 = vector.load %arg16[%c0_10, %c0_11] : memref<128x32xf32, #tpu.memory_space<vmem>>, vector<128x32xf32>
      tpu.vector_store %arg16[%c0_10, %c0_11], %22 {strides = array<i32>} : memref<128x32xf32, #tpu.memory_space<vmem>>, vector<128x32xf32>,
    } else {
    }
    return
  }
  func.func @transform_0(%arg0: i32, %arg1: i32, %arg2: memref<2x2xi32, #tpu.memory_space<smem>>) -> (i32, i32) {
    %c0_i32 = arith.constant 0 : i32
    %c0_i32_0 = arith.constant 0 : i32
    return %arg0, %c0_i32 : i32, i32
  }
  func.func @transform_1(%arg0: i32, %arg1: i32, %arg2: memref<2x2xi32, #tpu.memory_space<smem>>) -> (i32, i32) {
    %c0_i32 = arith.constant 0 : i32
    %c0_i32_0 = arith.constant 0 : i32
    return %arg1, %c0_i32 : i32, i32
  }
  func.func @transform_2(%arg0: i32, %arg1: i32, %arg2: memref<2x2xi32, #tpu.memory_space<smem>>) -> (i32, i32) {
    %c0_i32 = arith.constant 0 : i32
    %c0_i32_0 = arith.constant 0 : i32
    return %c0_i32, %arg1 : i32, i32
  }
  func.func @transform_3(%arg0: i32, %arg1: i32, %arg2: memref<2x2xi32, #tpu.memory_space<smem>>) -> (i32, i32) {
    %c0_i32 = arith.constant 0 : i32
    return %arg0, %arg1 : i32, i32
  }
  func.func @transform_4(%arg0: i32, %arg1: i32, %arg2: memref<2x2xi32, #tpu.memory_space<smem>>) -> (i32, i32) {
    %c0_i32 = arith.constant 0 : i32
    %c0_i32_0 = arith.constant 0 : i32
    %c0_i32_1 = arith.constant 0 : i32
    return %c0_i32, %c0_i32_0 : i32, i32
  }
  func.func @transform_5(%arg0: i32, %arg1: i32, %arg2: memref<2x2xi32, #tpu.memory_space<smem>>) -> (i32, i32) {
    %c0_i32 = arith.constant 0 : i32
    %c0_i32_0 = arith.constant 0 : i32
    %c0_i32_1 = arith.constant 0 : i32
    return %c0_i32, %c0_i32_0 : i32, i32
  }
  func.func @transform_6(%arg0: i32, %arg1: i32, %arg2: memref<2x2xi32, #tpu.memory_space<smem>>) -> (i32, i32) {
    %c0_i32 = arith.constant 0 : i32
    %c0_i32_0 = arith.constant 0 : i32
    %c0_i32_1 = arith.constant 0 : i32
    return %c0_i32, %c0_i32_0 : i32, i32
  }
  func.func @transform_7(%arg0: i32, %arg1: i32, %arg2: memref<2x2xi32, #tpu.memory_space<smem>>) -> (i32, i32) {
    %c0_i32 = arith.constant 0 : i32
    %c0_i32_0 = arith.constant 0 : i32
    %c0_i32_1 = arith.constant 0 : i32
    return %c0_i32, %c0_i32_0 : i32, i32
  }
  func.func @transform_8(%arg0: i32, %arg1: i32, %arg2: memref<2x2xi32, #tpu.memory_space<smem>>) -> (i32, i32) {
    %c0_i32 = arith.constant 0 : i32
    %c0_i32_0 = arith.constant 0 : i32
    %c0_i32_1 = arith.constant 0 : i32
    return %c0_i32, %c0_i32_0 : i32, i32
  }
  func.func @transform_9(%arg0: i32, %arg1: i32, %arg2: memref<2x2xi32, #tpu.memory_space<smem>>) -> (i32, i32) {
    %c0_i32 = arith.constant 0 : i32
    %c0_i32_0 = arith.constant 0 : i32
    %c0_i32_1 = arith.constant 0 : i32
    return %c0_i32, %c0_i32_0 : i32, i32
  }
  func.func @transform_10(%arg0: i32, %arg1: i32, %arg2: memref<2x2xi32, #tpu.memory_space<smem>>) -> (i32, i32) {
    %c0_i32 = arith.constant 0 : i32
    %c0_i32_0 = arith.constant 0 : i32
    %c0_i32_1 = arith.constant 0 : i32
    return %c0_i32, %c0_i32_0 : i32, i32
  }
  func.func @transform_11(%arg0: i32, %arg1: i32, %arg2: memref<2x2xi32, #tpu.memory_space<smem>>) -> (i32, i32) {
    %c0_i32 = arith.constant 0 : i32
    %c0_i32_0 = arith.constant 0 : i32
    %c0_i32_1 = arith.constant 0 : i32
    return %c0_i32, %c0_i32_0 : i32, i32
  }
  func.func @transform_12(%arg0: i32, %arg1: i32, %arg2: memref<2x2xi32, #tpu.memory_space<smem>>) -> (i32, i32) {
    %c0_i32 = arith.constant 0 : i32
    %c0_i32_0 = arith.constant 0 : i32
    %c0_i32_1 = arith.constant 0 : i32
    return %c0_i32, %c0_i32_0 : i32, i32
  }
  func.func @transform_13(%arg0: i32, %arg1: i32, %arg2: memref<2x2xi32, #tpu.memory_space<smem>>) -> (i32, i32) {
    %c0_i32 = arith.constant 0 : i32
    %c0_i32_0 = arith.constant 0 : i32
    return %arg0, %c0_i32 : i32, i32
  }
}

</mosaic_0001>

<bundles_post_ra>
// kernel: tpu_custom_call.1
= control target key start
LH: loop header
LB: loop body
LE: loop exit
PB: predicated region body
PF: predicated region fallthrough
CT: control target
= control target key end

     0   :  { %s15381_s0 = inlined_call_operand.vmem [shape: s32[2,2], index: 0, kind: input, shape index: {}]   ;;  %s15382_s1 = inlined_call_operand.vmem [shape: f32[256,32], index: 1, kind: input, shape index: {}]   ;;  %s15383_s2 = inlined_call_operand.vmem [shape: f32[256,32], index: 2, kind: input, shape index: {}]   ;;  %s15384_s3 = inlined_call_operand.vmem [shape: f32[32,256], index: 3, kind: input, shape index: {}]   ;;  %s15385_s4 = inlined_call_operand.vmem [shape: s8[256,256], index: 4, kind: input, shape index: {}]   ;;  %s15386_s5 = inlined_call_operand.vmem [shape: f32[32,32], index: 5, kind: input, shape index: {}]   ;;  %s15387_s6 = inlined_call_operand.vmem [shape: f32[32,32], index: 6, kind: input, shape index: {}]   ;;  %s15388_s7 = inlined_call_operand.vmem [shape: f32[32,32], index: 7, kind: input, shape index: {}]   ;;  %s15389_s8 = inlined_call_operand.vmem [shape: f32[1,32], index: 8, kind: input, shape index: {}]   ;;  %s15390_s9 = inlined_call_operand.vmem [shape: f32[1,32], index: 9, kind: input, shape index: {}]   ;;  %s15391_s10 = inlined_call_operand.vmem [shape: f32[32,1], index: 10, kind: input, shape index: {}]   ;;  %s15392_s11 = inlined_call_operand.vmem [shape: f32[32,1], index: 11, kind: input, shape index: {}]   ;;  %s15393_s12 = inlined_call_operand.vmem [shape: f32[1,32], index: 12, kind: input, shape index: {}]   ;;  %s15394_s13 = inlined_call_operand.vmem [shape: f32[1,32], index: 13, kind: input, shape index: {}]   ;;  %s15395_s14 = inlined_call_operand.vmem [shape: f32[256,32], index: 14, kind: output, shape index: {}]  }
   0x1   :  { %15909 = sst [smem:[#allocation462_spill]] %s15384_s3  ;;  %s19_s15 = sshll.u32 %s15381_s0, 4  ;;  %s20_s15 = int_to_ptr.vmem [resolvable:$true] %s19_s15 }
   0x2   :  { %15910 = sst [smem:[#allocation463_spill]] %s15385_s4  ;;  %s8522_s16 = scalar_lea.vmem %s20_s15, 32 }
   0x3   :  { %15911 = sst [smem:[#allocation464_spill]] %s15386_s5  ;;  %p8523_p0 = scmp.ne.s32.totalorder %s20_s15, %s8522_s16 }
   0x4   :  { %15912 = sst [smem:[#allocation465_spill]] %s15389_s8  ;;  %p8527_p1 = scmp.lt.s32.totalorder %s20_s15, %s20_s15 }
   0x5   :  { %15913 = sst [smem:[#allocation466_spill]] %s15391_s10  ;;  %p8528_p2 = scmp.lt.s32.totalorder %s8522_s16, %s8522_s16 }
   0x6   :  { %15914 = sst [smem:[#allocation467_spill]] %s15392_s11 }
   0x7   :  { %15915 = sst [smem:[#allocation468_spill]] %s15394_s13  ;;  %p8529_p3 = por %p8528_p2, %p8527_p1 }
   0x9   :  { %p8530_p4 = pnand %p8529_p3, %p8523_p0 }
   0xb   :  { %8533 = shalt.err (!%p8530_p4)  }
   0xc   :  { %s8608_s17 = smov [#allocation7]  }
   0xd   :  { %22 = dma.vmem_to_smem %s20_s15, 32, %s8608_s17, [#allocation6] }
   0xe   :  { %8570 = dma.done.wait [#allocation6], 32 }
   0xf   :  { %8571 = vsyncadd [#allocation6], 4294967264 }
  0x10   :  { %24 = sfence }
  0x11   :  { %s8691_s18 = smov 0   ;;  %s8693_s19 = smov 0  }
  0x12   :  { %s8695_s20 = smov 0   ;;  %s8697_s0 = smov 0  }
  0x13   :  { %s8699_s21 = smov 0   ;;  %s8701_s22 = smov 0  }
  0x14   :  { %s8703_s23 = smov 0   ;;  %s8705_s24 = smov 0  }
  0x15   :  { %s8707_s25 = smov 0  }
  0x16 LB: > { %15916 = sst [smem:[#allocation11_spill]] %s8602_s24  ;;  %s39_s26 = sadd.s32 1, %s8598_s23  ;;  %s8606_s25 = sphi %s8707_s25, %s30_s25   ;;  %s8602_s24 = sphi %s8705_s24, %s18209_s24   ;;  %s8598_s23 = sphi %s8703_s23, %s18215_s23   ;;  %s8594_s22 = sphi %s8701_s22, %s18207_s22   ;;  %s8590_s21 = sphi %s8699_s21, %s18214_s21   ;;  %s8586_s0 = sphi %s8697_s0, %s18213_s0   ;;  %s8582_s20 = sphi %s8695_s20, %s18212_s20   ;;  %s8578_s19 = sphi %s8693_s19, %s18211_s19   ;;  %s8574_s18 = sphi %s8691_s18, %s18210_s18  }
  0x17   : > { %s42_s27 = sadd.s32 1, %s8602_s24  ;;  %p40_p5 = scmp.ge.s32.totalorder %s39_s26, 2 }
  0x18   : > { %s101_s28 = sadd.s32 1, %s8586_s0  ;;  %p108_p6 = scmp.ne.s32.totalorder %s8586_s0, %s8582_s20 }
  0x19   : > { %p109_p7 = scmp.eq.s32.totalorder %s8606_s25, 0  ;;  %s18217_s26 = smov (%p40_p5, %s39_s26), 0 }
  0x1a   : > { %15917 = sst [smem:[#allocation12_spill]] %s18217_s26  ;;  %s18219_s27 = smov (!%p40_p5, %s42_s27), %s8602_s24 }
  0x1b   : > { %s98_s29 = ssub.s32 %s8598_s23, %s18217_s26  ;;  %p8747_p8 = por %p109_p7, %p108_p6 }
  0x1c   : > { %p44_p9 = scmp.ge.s32.totalorder %s18219_s27, 2  ;;  %p99_p10 = scmp.eq.s32.totalorder %s98_s29, 0 }
  0x1d   : > { %p136_p11 = scmp.ne.s32.totalorder %s8578_s19, %s8574_s18  ;;  %s129_s8 = sadd.s32 1, %s8578_s19 }
  0x1e   : > { %s18221_s27 = smov (%p44_p9, %s18219_s27), 0  ;;  %p7998_p0 = scmp.ge.s32.totalorder %s8606_s25, 4 }
  0x1f   : > { %15919 = sst [smem:[#allocation13_spill]] %s18221_s27  ;;  %s124_s16 = ssub.s32 %s8602_s24, %s18221_s27 }
  0x20   : > { %s8756_s15 = scalar_select %p99_p10, %s8586_s0, %s101_s28  }
  0x21   : > { %p8760_p12 = por %p136_p11, %p109_p7  ;;  %s126_s13 = sor.u32 %s124_s16, %s98_s29 }
  0x22   : > { %15920 = sst [smem:[#allocation14_spill]] %s8756_s15  ;;  %p127_p13 = scmp.eq.s32.totalorder %s126_s13, 0 }
  0x23   : > { %404 = sbr.rel (%p7998_p0) target bundleno = 64 (0x40), region = 52 }
  0x24   : > { %s8766_s26 = scalar_select %p127_p13, %s8578_s19, %s129_s8  }
  0x28   : > { %425 = sbr.rel (!%p8747_p8) target bundleno = 52 (0x34), region = 64  ;;  %s427_s28 = sand.u32 (%p8747_p8), 1, %s8586_s0  }
  0x29   : > { %s8000_s15 = sshll.u32 (%p8747_p8), %s8598_s23, 3  ;;  %s7999_s27 = sshll.u32 (%p8747_p8), %s427_s28, 5 }
  0x2a   : > { %s15922_s3 = sld [smem:[#allocation462_spill]] (%p8747_p8)  ;;  %s429_s8 = scalar_lea.vmem (%p8747_p8), [#allocation8], %s7999_s27 }
  0x30   : > { %s431_s10 = scalar_lea.vmem %s15922_s3, %s8000_s15 }
  0x31   : > { %v466_v0 = vld [vmem:[%s431_s10] sm:$0xff]  ;;  %v468_v1 = vld [vmem:[%s431_s10 + $0x10] sm:$0xff] }
  0x32   : > { %v470_v2 = vld [vmem:[%s431_s10 + $0x20] sm:$0xff]  ;;  %467 = vst [vmem:[%s429_s8] sm:$0xff] %v466_v0  ;;  %469 = vst [vmem:[%s429_s8 + $0x8] sm:$0xff] %v468_v1  ;;  %v472_v3 = vld [vmem:[%s431_s10 + $0x30] sm:$0xff] }
  0x33   : > { %471 = vst [vmem:[%s429_s8 + $0x10] sm:$0xff] %v470_v2  ;;  %473 = vst [vmem:[%s429_s8 + $0x18] sm:$0xff] %v472_v3 }
  0x34 PF: > { %479 = sbr.rel (!%p8760_p12) target bundleno = 64 (0x40), region = 102  ;;  %s481_s13 = sand.u32 (%p8760_p12), 1, %s8578_s19  }
  0x35   : > { %s8076_s29 = sshll.u32 (%p8760_p12), %s8602_s24, 3  ;;  %s8001_s5 = sshll.u32 (%p8760_p12), %s481_s13, 5 }
  0x36   : > { %s486_s11 = sadd.s32 (%p8760_p12), %s8598_s23, %s8076_s29  ;;  %s15923_s4 = sld [smem:[#allocation463_spill]] (%p8760_p12) }
  0x37   : > { %s8004_s30 = sshll.u32 (%p8760_p12), %s486_s11, 3  ;;  %s483_s10 = scalar_lea.vmem (%p8760_p12), [#allocation9], %s8001_s5 }
  0x3c   : > { %s488_s27 = scalar_lea.vmem %s15923_s4, %s8004_s30 }
  0x3d   : > { %v523_v4 = vld [vmem:[%s488_s27] sm:$0xff]  ;;  %v525_v5 = vld [vmem:[%s488_s27 + $0x10] sm:$0xff] }
  0x3e   : > { %v527_v6 = vld [vmem:[%s488_s27 + $0x20] sm:$0xff]  ;;  %524 = vst [vmem:[%s483_s10] sm:$0xff] %v523_v4  ;;  %526 = vst [vmem:[%s483_s10 + $0x8] sm:$0xff] %v525_v5  ;;  %v529_v7 = vld [vmem:[%s488_s27 + $0x30] sm:$0xff] }
  0x3f   : > { %528 = vst [vmem:[%s483_s10 + $0x10] sm:$0xff] %v527_v6  ;;  %530 = vst [vmem:[%s483_s10 + $0x18] sm:$0xff] %v529_v7 }
  0x40 PF: > { %p8005_p1 = scmp.ge.s32.totalorder %s8606_s25, 1  ;;  %p535_p2 = scmp.lt.s32.totalorder %s8606_s25, 5 }
  0x42   : > { %p536_p3 = pnand %p8005_p1, %p535_p2 }
  0x43   : > { %s542_s17 = sand.u32 (!%p536_p3), 1, %s8582_s20   ;;  %s549_s28 = sand.u32 (!%p536_p3), 1, %s8574_s18  }
  0x44   : > { %539 = sbr.rel (%p536_p3) target bundleno = 2681 (0xa79), region = 140  ;;  %s8006_s8 = sshll.u32 (!%p536_p3), %s542_s17, 5 }
  0x45   : > { %s8007_s13 = sshll.u32 (!%p536_p3), %s549_s28, 5  ;;  %s8008_s29 = sshll.u32 (!%p536_p3), %s8594_s22, 4 }
  0x46   : > { %s8010_s5 = sshll.u32 (!%p536_p3), %s8590_s21, 4  ;;  %p607_p4 = scmp.lt.s32.totalorder (!%p536_p3), %s8008_s29, 31 }
  0x47   : > { %p613_p5 = scmp.lt.s32.totalorder (!%p536_p3), %s8010_s5, 31  ;;  %s8805_s4 = scalar_lea.vmem (!%p536_p3), [#allocation8], %s8006_s8 }
  0x48   : > { %s8807_s24 = scalar_lea.vmem (!%p536_p3), [#allocation9], %s8007_s13  ;;  %p8014_p6 = scmp.ne.s32.totalorder (!%p536_p3), %s8590_s21, 0 }
  0x49   : > { %s18223_s29 = smov (!%p607_p4, %s8008_s29), 31  ;;  %s18225_s5 = smov (!%p613_p5, %s8010_s5), 31 }
  0x4a   : > { %s8009_s11 = sshll.u32 %s18223_s29, 3  ;;  %s8011_s27 = sshll.u32 %s18225_s5, 3 }
  0x4b   : > { %s8793_s16 = scalar_lea.vmem %s15382_s1, %s8009_s11  ;;  %s8798_s20 = scalar_lea.vmem %s15383_s2, %s8011_s27 }
  0x4c   : > { %s8803_s28 = scalar_lea.vmem %s15395_s14, %s8009_s11  ;;  %630 = sbr.rel (%p8014_p6) target bundleno = 301 (0x12d), region = 152 }
  0x51   : > { %vm631_vm0 = vcmask 7168   ;;  %v700_v8 = vld [vmem:[%s15387_s6 + $0x18] sm:$0xff]  ;;  %v699_v9 = vld [vmem:[%s15387_s6 + $0x10] sm:$0xff]  ;;  %v8609_v10 = vmov -1e+30   ;;  %v8610_v11 = vmov 0.0  }
  0x52   : > { %632 = vst.msk [vmem:[#allocation2] sm:$0xff] %vm631_vm0, %v8609_v10  ;;  %633 = vst.msk [vmem:[#allocation2 + $0x8] sm:$0xff] %vm631_vm0, %v8609_v10  ;;  %8157 = vmatprep.subr.mxu0 %v700_v8  ;;  %8291 = vmatprep.subr.mxu1 %v700_v8  ;;  %vm664_vm1 = vcmask 261120   ;;  %v698_v12 = vld [vmem:[%s15387_s6 + $0x8] sm:$0xff]  ;;  %v697_v13 = vld [vmem:[%s15387_s6] sm:$0xff] }
  0x53   : > { %634 = vst.msk [vmem:[#allocation2 + $0x10] sm:$0xff] %vm631_vm0, %v8609_v10  ;;  %635 = vst.msk [vmem:[#allocation2 + $0x18] sm:$0xff] %vm631_vm0, %v8609_v10  ;;  %8158 = vmatpush3.msra.mxu0 %v700_v8  ;;  %8295 = vmatpush3.msra.mxu1 %v700_v8  ;;  %v681_v14 = vld [vmem:[%s8793_s16] sm:$0xff]  ;;  %v682_v16 = vld [vmem:[%s8793_s16 + $0x8] sm:$0xff] }
  0x54   : > { %636 = vst.msk [vmem:[#allocation2 + $0x20] sm:$0xff] %vm631_vm0, %v8609_v10  ;;  %637 = vst.msk [vmem:[#allocation2 + $0x28] sm:$0xff] %vm631_vm0, %v8609_v10  ;;  %8159 = vmatprep.subr.mxu0 %v699_v9  ;;  %8292 = vmatprep.subr.mxu1 %v699_v9  ;;  %v689_v15 = vld [vmem:[%s8793_s16 + $0x40] sm:$0xff]  ;;  %v690_v17 = vld [vmem:[%s8793_s16 + $0x48] sm:$0xff] }
  0x55   : > { %638 = vst.msk [vmem:[#allocation2 + $0x30] sm:$0xff] %vm631_vm0, %v8609_v10  ;;  %639 = vst.msk [vmem:[#allocation2 + $0x38] sm:$0xff] %vm631_vm0, %v8609_v10  ;;  %8160 = vmatpush3.msra.mxu0 %v699_v9  ;;  %8296 = vmatpush3.msra.mxu1 %v699_v9  ;;  %v683_v18 = vld [vmem:[%s8793_s16 + $0x10] sm:$0xff]  ;;  %v684_v20 = vld [vmem:[%s8793_s16 + $0x18] sm:$0xff] }
  0x56   : > { %640 = vst.msk [vmem:[#allocation2 + $0x40] sm:$0xff] %vm631_vm0, %v8609_v10  ;;  %641 = vst.msk [vmem:[#allocation2 + $0x48] sm:$0xff] %vm631_vm0, %v8609_v10  ;;  %8161 = vmatprep.subr.mxu0 %v698_v12  ;;  %8293 = vmatprep.subr.mxu1 %v698_v12  ;;  %v691_v19 = vld [vmem:[%s8793_s16 + $0x50] sm:$0xff]  ;;  %v692_v21 = vld [vmem:[%s8793_s16 + $0x58] sm:$0xff] }
  0x57   : > { %642 = vst.msk [vmem:[#allocation2 + $0x50] sm:$0xff] %vm631_vm0, %v8609_v10  ;;  %643 = vst.msk [vmem:[#allocation2 + $0x58] sm:$0xff] %vm631_vm0, %v8609_v10  ;;  %8162 = vmatpush3.msra.mxu0 %v698_v12  ;;  %8297 = vmatpush3.msra.mxu1 %v698_v12  ;;  %v685_v22 = vld [vmem:[%s8793_s16 + $0x20] sm:$0xff]  ;;  %v686_v24 = vld [vmem:[%s8793_s16 + $0x28] sm:$0xff] }
  0x58   : > { %644 = vst.msk [vmem:[#allocation2 + $0x60] sm:$0xff] %vm631_vm0, %v8609_v10  ;;  %645 = vst.msk [vmem:[#allocation2 + $0x68] sm:$0xff] %vm631_vm0, %v8609_v10  ;;  %8163 = vmatprep.subr.mxu0 %v697_v13  ;;  %8294 = vmatprep.subr.mxu1 %v697_v13  ;;  %v693_v23 = vld [vmem:[%s8793_s16 + $0x60] sm:$0xff]  ;;  %v694_v25 = vld [vmem:[%s8793_s16 + $0x68] sm:$0xff] }
  0x59   : > { %646 = vst.msk [vmem:[#allocation2 + $0x70] sm:$0xff] %vm631_vm0, %v8609_v10  ;;  %647 = vst.msk [vmem:[#allocation2 + $0x78] sm:$0xff] %vm631_vm0, %v8609_v10  ;;  %8164 = vmatpush3.msra.mxu0 %v697_v13  ;;  %8298 = vmatpush3.msra.mxu1 %v697_v13  ;;  %v687_v26 = vld [vmem:[%s8793_s16 + $0x30] sm:$0xff]  ;;  %v688_v28 = vld [vmem:[%s8793_s16 + $0x38] sm:$0xff] }
  0x5a   : > { %648 = vst.msk [vmem:[#allocation3] sm:$0xff] %vm631_vm0, %v8610_v11  ;;  %649 = vst.msk [vmem:[#allocation3 + $0x8] sm:$0xff] %vm631_vm0, %v8610_v11  ;;  %8165 = vmatprep.mubr.msk.f32.mxu0 %vm664_vm1, %v681_v14  ;;  %8177 = vmatprep.mubr.msk.f32.mxu1 %vm664_vm1, %v689_v15  ;;  %v695_v27 = vld [vmem:[%s8793_s16 + $0x70] sm:$0xff]  ;;  %v696_v29 = vld [vmem:[%s8793_s16 + $0x78] sm:$0xff] }
  0x5b   : > { %650 = vst.msk [vmem:[#allocation3 + $0x10] sm:$0xff] %vm631_vm0, %v8610_v11  ;;  %651 = vst.msk [vmem:[#allocation3 + $0x18] sm:$0xff] %vm631_vm0, %v8610_v11  ;;  %8166 = vmatmul.mubr.msk.f32.vlgmr.msra.gmra.mxu0 %vm664_vm1, %v682_v16  ;;  %8178 = vmatmul.mubr.msk.f32.vlgmr.msra.gmra.mxu1 %vm664_vm1, %v690_v17  ;;  %v8015_v30 = vld [vmem:[%s15390_s9] ss:$0 sm:$0xff] }
  0x5c   : > { %652 = vst.msk [vmem:[#allocation3 + $0x20] sm:$0xff] %vm631_vm0, %v8610_v11  ;;  %653 = vst.msk [vmem:[#allocation3 + $0x28] sm:$0xff] %vm631_vm0, %v8610_v11  ;;  %8168 = vmatprep.mubr.msk.f32.mxu0 %vm664_vm1, %v683_v18  ;;  %8180 = vmatprep.mubr.msk.f32.mxu1 %vm664_vm1, %v691_v19 }
  0x5d   : > { %654 = vst.msk [vmem:[#allocation3 + $0x30] sm:$0xff] %vm631_vm0, %v8610_v11  ;;  %655 = vst.msk [vmem:[#allocation3 + $0x38] sm:$0xff] %vm631_vm0, %v8610_v11 }
  0x5e   : > { %656 = vst.msk [vmem:[#allocation3 + $0x40] sm:$0xff] %vm631_vm0, %v8610_v11  ;;  %657 = vst.msk [vmem:[#allocation3 + $0x48] sm:$0xff] %vm631_vm0, %v8610_v11 }
  0x5f   : > { %658 = vst.msk [vmem:[#allocation3 + $0x50] sm:$0xff] %vm631_vm0, %v8610_v11  ;;  %659 = vst.msk [vmem:[#allocation3 + $0x58] sm:$0xff] %vm631_vm0, %v8610_v11  ;;  %8169 = vmatmul.mubr.msk.f32.gmra.mxu0 %vm664_vm1, %v684_v20  ;;  %8181 = vmatmul.mubr.msk.f32.gmra.mxu1 %vm664_vm1, %v692_v21 }
  0x60   : > { %660 = vst.msk [vmem:[#allocation3 + $0x60] sm:$0xff] %vm631_vm0, %v8610_v11  ;;  %661 = vst.msk [vmem:[#allocation3 + $0x68] sm:$0xff] %vm631_vm0, %v8610_v11  ;;  %8171 = vmatprep.mubr.msk.f32.mxu0 %vm664_vm1, %v685_v22  ;;  %8183 = vmatprep.mubr.msk.f32.mxu1 %vm664_vm1, %v693_v23 }
  0x61   : > { %662 = vst.msk [vmem:[#allocation3 + $0x70] sm:$0xff] %vm631_vm0, %v8610_v11  ;;  %663 = vst.msk [vmem:[#allocation3 + $0x78] sm:$0xff] %vm631_vm0, %v8610_v11 }
  0x62   : > { %665 = vst.msk [vmem:[#allocation4] sm:$0xff] %vm664_vm1, %v8610_v11  ;;  %666 = vst.msk [vmem:[#allocation4 + $0x8] sm:$0xff] %vm664_vm1, %v8610_v11 }
  0x63   : > { %667 = vst.msk [vmem:[#allocation4 + $0x10] sm:$0xff] %vm664_vm1, %v8610_v11  ;;  %668 = vst.msk [vmem:[#allocation4 + $0x18] sm:$0xff] %vm664_vm1, %v8610_v11  ;;  %8172 = vmatmul.mubr.msk.f32.gmra.mxu0 %vm664_vm1, %v686_v24  ;;  %8184 = vmatmul.mubr.msk.f32.gmra.mxu1 %vm664_vm1, %v694_v25 }
  0x64   : > { %669 = vst.msk [vmem:[#allocation4 + $0x20] sm:$0xff] %vm664_vm1, %v8610_v11  ;;  %670 = vst.msk [vmem:[#allocation4 + $0x28] sm:$0xff] %vm664_vm1, %v8610_v11  ;;  %8174 = vmatprep.mubr.msk.f32.mxu0 %vm664_vm1, %v687_v26  ;;  %8186 = vmatprep.mubr.msk.f32.mxu1 %vm664_vm1, %v695_v27 }
  0x65   : > { %671 = vst.msk [vmem:[#allocation4 + $0x30] sm:$0xff] %vm664_vm1, %v8610_v11  ;;  %672 = vst.msk [vmem:[#allocation4 + $0x38] sm:$0xff] %vm664_vm1, %v8610_v11 }
  0x66   : > { %673 = vst.msk [vmem:[#allocation4 + $0x40] sm:$0xff] %vm664_vm1, %v8610_v11  ;;  %674 = vst.msk [vmem:[#allocation4 + $0x48] sm:$0xff] %vm664_vm1, %v8610_v11 }
  0x67   : > { %675 = vst.msk [vmem:[#allocation4 + $0x50] sm:$0xff] %vm664_vm1, %v8610_v11  ;;  %676 = vst.msk [vmem:[#allocation4 + $0x58] sm:$0xff] %vm664_vm1, %v8610_v11  ;;  %8175 = vmatmul.mubr.msk.f32.gmra.mxu0 %vm664_vm1, %v688_v28  ;;  %8187 = vmatmul.mubr.msk.f32.gmra.mxu1 %vm664_vm1, %v696_v29 }
  0x68   : > { %677 = vst.msk [vmem:[#allocation4 + $0x60] sm:$0xff] %vm664_vm1, %v8610_v11  ;;  %678 = vst.msk [vmem:[#allocation4 + $0x68] sm:$0xff] %vm664_vm1, %v8610_v11 }
  0x69   : > { %679 = vst.msk [vmem:[#allocation4 + $0x70] sm:$0xff] %vm664_vm1, %v8610_v11  ;;  %680 = vst.msk [vmem:[#allocation4 + $0x78] sm:$0xff] %vm664_vm1, %v8610_v11 }
 0x11b   : > { %v8167_v31 = vpop.f32.mrf.mxu0  ;;  %v8179_v32 = vpop.f32.mrf.mxu1 }
 0x11c   : > { %v828_v33 = vadd.f32 %v8167_v31, %v8015_v30  ;;  %v868_v34 = vadd.f32 %v8179_v32, %v8015_v30 }
 0x11d   : > { %v822_v35 = vpop.f32.mrf.mxu0  ;;  %v862_v36 = vpop.f32.mrf.mxu1 }
 0x11e   : > { %902 = vst.msk [vmem:[#allocation5 + $0x8] sm:$0xff] %vm664_vm1, %v828_v33  ;;  %910 = vst.msk [vmem:[#allocation5 + $0x48] sm:$0xff] %vm664_vm1, %v868_v34  ;;  %v823_v37 = vadd.f32 %v8015_v30, %v822_v35  ;;  %v863_v38 = vadd.f32 %v8015_v30, %v862_v36 }
 0x11f   : > { %v8170_v39 = vpop.f32.mrf.mxu0  ;;  %v8182_v40 = vpop.f32.mrf.mxu1 }
 0x120   : > { %901 = vst.msk [vmem:[#allocation5] sm:$0xff] %vm664_vm1, %v823_v37  ;;  %909 = vst.msk [vmem:[#allocation5 + $0x40] sm:$0xff] %vm664_vm1, %v863_v38  ;;  %v838_v41 = vadd.f32 %v8170_v39, %v8015_v30  ;;  %v878_v42 = vadd.f32 %v8182_v40, %v8015_v30 }
 0x121   : > { %v832_v43 = vpop.f32.mrf.mxu0  ;;  %v872_v44 = vpop.f32.mrf.mxu1 }
 0x122   : > { %904 = vst.msk [vmem:[#allocation5 + $0x18] sm:$0xff] %vm664_vm1, %v838_v41  ;;  %912 = vst.msk [vmem:[#allocation5 + $0x58] sm:$0xff] %vm664_vm1, %v878_v42  ;;  %v833_v45 = vadd.f32 %v8015_v30, %v832_v43  ;;  %v873_v46 = vadd.f32 %v8015_v30, %v872_v44 }
 0x123   : > { %v8173_v47 = vpop.f32.mrf.mxu0  ;;  %v8185_v48 = vpop.f32.mrf.mxu1 }
 0x124   : > { %903 = vst.msk [vmem:[#allocation5 + $0x10] sm:$0xff] %vm664_vm1, %v833_v45  ;;  %911 = vst.msk [vmem:[#allocation5 + $0x50] sm:$0xff] %vm664_vm1, %v873_v46  ;;  %v848_v49 = vadd.f32 %v8173_v47, %v8015_v30  ;;  %v888_v50 = vadd.f32 %v8185_v48, %v8015_v30 }
 0x125   : > { %v842_v51 = vpop.f32.mrf.mxu0  ;;  %v882_v52 = vpop.f32.mrf.mxu1 }
 0x126   : > { %906 = vst.msk [vmem:[#allocation5 + $0x28] sm:$0xff] %vm664_vm1, %v848_v49  ;;  %914 = vst.msk [vmem:[#allocation5 + $0x68] sm:$0xff] %vm664_vm1, %v888_v50  ;;  %v843_v53 = vadd.f32 %v8015_v30, %v842_v51  ;;  %v883_v54 = vadd.f32 %v8015_v30, %v882_v52 }
 0x127   : > { %v8176_v55 = vpop.f32.mrf.mxu0  ;;  %v8188_v56 = vpop.f32.mrf.mxu1 }
 0x128   : > { %905 = vst.msk [vmem:[#allocation5 + $0x20] sm:$0xff] %vm664_vm1, %v843_v53  ;;  %913 = vst.msk [vmem:[#allocation5 + $0x60] sm:$0xff] %vm664_vm1, %v883_v54  ;;  %v858_v57 = vadd.f32 %v8176_v55, %v8015_v30  ;;  %v898_v58 = vadd.f32 %v8188_v56, %v8015_v30 }
 0x129   : > { %v852_v59 = vpop.f32.mrf.mxu0  ;;  %v892_v60 = vpop.f32.mrf.mxu1 }
 0x12a   : > { %908 = vst.msk [vmem:[#allocation5 + $0x38] sm:$0xff] %vm664_vm1, %v858_v57  ;;  %916 = vst.msk [vmem:[#allocation5 + $0x78] sm:$0xff] %vm664_vm1, %v898_v58  ;;  %v853_v61 = vadd.f32 %v8015_v30, %v852_v59  ;;  %v893_v62 = vadd.f32 %v8015_v30, %v892_v60 }
 0x12c   : > { %907 = vst.msk [vmem:[#allocation5 + $0x30] sm:$0xff] %vm664_vm1, %v853_v61  ;;  %915 = vst.msk [vmem:[#allocation5 + $0x70] sm:$0xff] %vm664_vm1, %v893_v62 }
 0x12d PF: > { %s917_s16 = sshra.s32 %s8590_s21, 7  ;;  %s922_s18 = sand.u32 127, %s8590_s21 }
 0x12e   : > { %s919_s17 = sadd.s32 %s8594_s22, %s917_s16 }
 0x12f   : > { %s8032_s29 = sshll.u32 %s919_s17, 7 }
 0x130   : > { %s923_s5 = sadd.s32 %s8032_s29, %s922_s18 }
 0x131   : > { %s924_s3 = sld [smem:[#allocation7 + %s923_s5]] }
 0x137   : > { %p8033_p7 = scmp.eq.s32.totalorder %s924_s3, 0 }
 0x139   : > { %928 = sbr.rel (%p8033_p7) target bundleno = 2497 (0x9c1), region = 156 }
 0x13e   : > { %v1173_v63 = vld [vmem:[%s8805_s4 + $0x18] sm:$0xff]  ;;  %v1172_v0 = vld [vmem:[%s8805_s4 + $0x10] sm:$0xff]  ;;  %v8926_v1 = vld [vmem:[#allocation5 + $0x8] sm:$0xff]  ;;  %vm15881_vm2 = vcmask 261120   ;;  %v15402_v4 = vmov 0   ;;  %s15924_s29 = sld [smem:[#allocation466_spill]]  ;;  %v1420_v59 = vlaneseq }
 0x13f   : > { %8221 = vmatprep.subr.mxu1 %v1173_v63  ;;  %v8931_v2 = vld [vmem:[%s15393_s12] ss:$0 sm:$0xff]  ;;  %8408 = vset.pattern.permute.xlu1 %v15402_v4  ;;  %v1171_v9 = vld [vmem:[%s8805_s4 + $0x8] sm:$0xff]  ;;  %v8950_v11 = vld [vmem:[#allocation5 + $0x10] sm:$0xff]  ;;  %s15925_s22 = sld [smem:[#allocation467_spill]]  ;;  %vm15877_vm7 = vcmask 1041409  }
 0x140   : > { %v8933_v3 = vld [vmem:[#allocation5] sm:$0xff]  ;;  %8222 = vmatpush3.msra.mxu1 %v1173_v63  ;;  %v1307_v5 = vmul.f32 %v8931_v2, %v8926_v1  ;;  %8409 = vset.pattern.permute.xlu0 %v15402_v4  ;;  %v1308_v14 = vmul.f32 %v8931_v2, %v8950_v11  ;;  %v8956_v15 = vld [vmem:[#allocation5 + $0x30] sm:$0xff]  ;;  %v8958_v16 = vld [vmem:[#allocation5 + $0x18] sm:$0xff]  ;;  %v1421_v61 = vshrl.u32 %v1420_v59, 7  ;;  %vm15903_vm8 = vcmask 1042434   ;;  %s17730_s17 = sld [smem:[#allocation464_spill]] }
 0x141   : > { %v1306_v6 = vmul.f32 %v8931_v2, %v8933_v3  ;;  %v1166_v7 = vld [vmem:[%s15388_s7] sm:$0xff]  ;;  %8223 = vmatprep.subr.mxu1 %v1172_v0  ;;  %v1312_v19 = vmul.f32 %v8931_v2, %v8956_v15  ;;  %v1167_v21 = vld [vmem:[%s15388_s7 + $0x8] sm:$0xff]  ;;  %v1309_v22 = vmul.f32 %v8931_v2, %v8958_v16  ;;  %v1168_v24 = vld [vmem:[%s15388_s7 + $0x10] sm:$0xff]  ;;  %vm15900_vm9 = vcmask 1043459   ;;  %s18127_s15 = sld [smem:[#allocation465_spill]] }
 0x142   : > { %v8943_v8 = vld [vmem:[#allocation5 + $0x20] sm:$0xff]  ;;  %8229 = vmatprep.mubr.msk.f32.mxu1 %vm15881_vm2, %v1166_v7  ;;  %8224 = vmatpush3.msra.mxu1 %v1172_v0  ;;  %v1325_v12 = vsel %vm15881_vm2, %v1307_v5, 0.0  ;;  %v1328_v20 = vsel %vm15881_vm2, %v1308_v14, 0.0  ;;  %v8973_v25 = vld [vmem:[#allocation5 + $0x28] sm:$0xff]  ;;  %v1169_v29 = vld [vmem:[%s15388_s7 + $0x18] sm:$0xff]  ;;  %v9019_v0 = vsub.s32 0, %v1421_v61 }
 0x143   : > { %v1310_v10 = vmul.f32 %v8931_v2, %v8943_v8  ;;  %v1322_v13 = vsel %vm15881_vm2, %v1306_v6, 0.0  ;;  %1326 = vadd.xlane.f32.xlu1 %v1325_v12  ;;  %v1170_v17 = vld [vmem:[%s8805_s4] sm:$0xff]  ;;  %8225 = vmatprep.subr.mxu1 %v1171_v9  ;;  %v1340_v26 = vsel %vm15881_vm2, %v1312_v19, 0.0  ;;  %v1331_v28 = vsel %vm15881_vm2, %v1309_v22, 0.0  ;;  %v939_v31 = vld [vmem:[#allocation5 + $0x50] sm:$0xff]  ;;  %v936_v32 = vld [vmem:[#allocation5 + $0x38] sm:$0xff] }
 0x144   : > { %1323 = vadd.xlane.f32.xlu0 %v1322_v13  ;;  %8226 = vmatpush3.msra.mxu1 %v1171_v9  ;;  %v937_v23 = vld [vmem:[#allocation5 + $0x40] sm:$0xff]  ;;  %v1311_v30 = vmul.f32 %v8931_v2, %v8973_v25  ;;  %v1316_v34 = vmul.f32 %v8931_v2, %v939_v31  ;;  %v1313_v36 = vmul.f32 %v8931_v2, %v936_v32  ;;  %v938_v38 = vld [vmem:[#allocation5 + $0x48] sm:$0xff]  ;;  %v943_v43 = vld [vmem:[#allocation5 + $0x70] sm:$0xff]  ;;  %v9032_v9 = vsub.s32 1, %v1421_v61 }
 0x145   : > { %v1334_v18 = vsel %vm15881_vm2, %v1310_v10, 0.0  ;;  %8227 = vmatprep.subr.mxu1 %v1170_v17  ;;  %v1314_v27 = vmul.f32 %v8931_v2, %v937_v23  ;;  %v941_v37 = vld [vmem:[#allocation5 + $0x60] sm:$0xff]  ;;  %v1315_v42 = vmul.f32 %v8931_v2, %v938_v38  ;;  %v940_v44 = vld [vmem:[#allocation5 + $0x58] sm:$0xff]  ;;  %v1320_v46 = vmul.f32 %v8931_v2, %v943_v43  ;;  %v942_v49 = vld [vmem:[#allocation5 + $0x68] sm:$0xff]  ;;  %s15926_s13 = smov %s15925_s22  ;;  %15927 = vst [vmem:[#allocation15_spill] sm:$0xff] %v9019_v0 }
 0x146   : > { %8228 = vmatpush3.msra.mxu1 %v1170_v17  ;;  %v1337_v35 = vsel %vm15881_vm2, %v1311_v30, 0.0  ;;  %v1352_v39 = vsel %vm15881_vm2, %v1316_v34, 0.0  ;;  %v1318_v40 = vmul.f32 %v8931_v2, %v941_v37  ;;  %v1343_v41 = vsel %vm15881_vm2, %v1313_v36, 0.0  ;;  %v944_v53 = vld [vmem:[#allocation5 + $0x78] sm:$0xff]  ;;  %v1176_v57 = vld [vmem:[%s15924_s29 + $0x10] sm:$0xff]  ;;  %v1295_v60 = vld [vmem:[%s15925_s22] sm:$0xff] }
 0x147   : > { %1335 = vadd.xlane.f32.xlu1 %v1334_v18  ;;  %8230 = vmatmul.mubr.msk.f32.vlgmr.msra.gmra.mxu1 %vm15881_vm2, %v1167_v21  ;;  %v1346_v33 = vsel %vm15881_vm2, %v1314_v27, 0.0  ;;  %v1349_v47 = vsel %vm15881_vm2, %v1315_v42, 0.0  ;;  %v1317_v48 = vmul.f32 %v8931_v2, %v940_v44  ;;  %v1364_v50 = vsel %vm15881_vm2, %v1320_v46, 0.0  ;;  %v1177_v58 = vld [vmem:[%s15924_s29 + $0x18] sm:$0xff]  ;;  %v1297_v62 = vld [vmem:[%s15926_s13 + $0x10] sm:$0xff]  ;;  %v1174_v63 = vld [vmem:[%s15924_s29] sm:$0xff] }
 0x148   : > { %1329 = vadd.xlane.f32.xlu0 %v1328_v20  ;;  %8232 = vmatprep.mubr.msk.f32.mxu1 %vm15881_vm2, %v1168_v24  ;;  %v1358_v45 = vsel %vm15881_vm2, %v1318_v40, 0.0  ;;  %v1319_v52 = vmul.f32 %v8931_v2, %v942_v49  ;;  %v1321_v55 = vmul.f32 %v8931_v2, %v944_v53  ;;  %v1298_v2 = vld [vmem:[%s15926_s13 + $0x18] sm:$0xff]  ;;  %v1175_v5 = vld [vmem:[%s15924_s29 + $0x8] sm:$0xff]  ;;  %v1423_v6 = vrot.slane %v8933_v3, %v9019_v0 }
 0x149   : > { %v1355_v51 = vsel %vm15881_vm2, %v1317_v48, 0.0  ;;  %v1296_v7 = vld [vmem:[%s15926_s13 + $0x8] sm:$0xff]  ;;  %v1442_v10 = vrot.slane %v8933_v3, %v9032_v9  ;;  %v9036_v12 = vsub.s32 2, %v1421_v61  ;;  %v9040_v14 = vsub.s32 3, %v1421_v61 }
 0x14a   : > { %v1361_v54 = vsel %vm15881_vm2, %v1319_v52, 0.0  ;;  %v1367_v56 = vsel %vm15881_vm2, %v1321_v55, 0.0  ;;  %v9044_v18 = vsub.s32 4, %v1421_v61  ;;  %v9048_v20 = vsub.s32 5, %v1421_v61 }
 0x14b   : > { %1341 = vadd.xlane.f32.xlu1 %v1340_v26  ;;  %8233 = vmatmul.mubr.msk.f32.gmra.mxu1 %vm15881_vm2, %v1169_v29  ;;  %v1461_v13 = vrot.slane %v8933_v3, %v9036_v12  ;;  %v1480_v17 = vrot.slane %v8933_v3, %v9040_v14  ;;  %v9052_v22 = vsub.s32 6, %v1421_v61  ;;  %v9056_v24 = vsub.s32 7, %v1421_v61 }
 0x14c   : > { %1332 = vadd.xlane.f32.xlu0 %v1331_v28  ;;  %v1499_v19 = vrot.slane %v8933_v3, %v9044_v18  ;;  %v1518_v21 = vrot.slane %v8933_v3, %v9048_v20  ;;  %v1575_v27 = vrot.slane %v8926_v1, %v9019_v0  ;;  %v1594_v28 = vrot.slane %v8926_v1, %v9032_v9 }
 0x14d   : > { %v1537_v23 = vrot.slane %v8933_v3, %v9052_v22  ;;  %v1556_v26 = vrot.slane %v8933_v3, %v9056_v24  ;;  %v1613_v30 = vrot.slane %v8926_v1, %v9036_v12  ;;  %v1632_v34 = vrot.slane %v8926_v1, %v9040_v14 }
 0x14e   : > { %v1670_v44 = vrot.slane %v8926_v1, %v9048_v20  ;;  %v1689_v49 = vrot.slane %v8926_v1, %v9052_v22  ;;  %v1708_v53 = vrot.slane %v8926_v1, %v9056_v24  ;;  %vm15873_vm10 = vcmask 1044484  }
 0x14f   : > { %1347 = vadd.xlane.f32.xlu1 %v1346_v33  ;;  %vm15899_vm11 = vcmask 1045509   ;;  %vm15887_vm12 = vcmask 1046534   ;;  %vm15886_vm13 = vcmask 1047559  }
 0x150   : > { %1338 = vadd.xlane.f32.xlu0 %v1337_v35 }
 0x153   : > { %1353 = vadd.xlane.f32.xlu1 %v1352_v39  ;;  %v1651_v39 = vrot.slane %v8926_v1, %v9044_v18 }
 0x154   : > { %1344 = vadd.xlane.f32.xlu0 %v1343_v41 }
 0x157   : > { %1359 = vadd.xlane.f32.xlu1 %v1358_v45 }
 0x158   : > { %1350 = vadd.xlane.f32.xlu0 %v1349_v47 }
 0x15b   : > { %1365 = vadd.xlane.f32.xlu1 %v1364_v50 }
 0x15c   : > { %1356 = vadd.xlane.f32.xlu0 %v1355_v51 }
 0x160   : > { %1362 = vadd.xlane.f32.xlu0 %v1361_v54 }
 0x164   : > { %1368 = vadd.xlane.f32.xlu0 %v1367_v56 }
 0x16c   : > { %1190 = vperm.xlu1 %8408, %v1176_v57  }
 0x170   : > { %1195 = vperm.xlu1 %8408, %v1177_v58   ;;  %v1727_v58 = vrot.slane %v8950_v11, %v9019_v0 }
 0x174   : > { %1388 = vperm.xlu1 %8408, %v1295_v60  }
 0x178   : > { %1398 = vperm.xlu1 %8408, %v1297_v62   ;;  %v1746_v62 = vrot.slane %v8950_v11, %v9032_v9 }
 0x17a   : > { %1180 = vperm.xlu0 %8409, %v1174_v63  }
 0x17c   : > { %1403 = vperm.xlu1 %8408, %v1298_v2  }
 0x17e   : > { %1185 = vperm.xlu0 %8409, %v1175_v5  }
 0x180   : > { %1429 = vbcast.lane.b32.xlu1 %v1423_v6, 264 }
 0x182   : > { %1393 = vperm.xlu0 %8409, %v1296_v7   ;;  %v1765_v7 = vrot.slane %v8950_v11, %v9036_v12 }
 0x184   : > { %1437 = vbcast.lane.b32.xlu1 %v1423_v6, 280 }
 0x186   : > { %1425 = vbcast.lane.b32.xlu0 %v1423_v6, 256 }
 0x188   : > { %1448 = vbcast.lane.b32.xlu1 %v1442_v10, 264 }
 0x18a   : > { %1433 = vbcast.lane.b32.xlu0 %v1423_v6, 272 }
 0x18c   : > { %1456 = vbcast.lane.b32.xlu1 %v1442_v10, 280 }
 0x18e   : > { %1444 = vbcast.lane.b32.xlu0 %v1442_v10, 256 }
 0x190   : > { %1467 = vbcast.lane.b32.xlu1 %v1461_v13, 264 }
 0x192   : > { %1452 = vbcast.lane.b32.xlu0 %v1442_v10, 272 }
 0x194   : > { %1475 = vbcast.lane.b32.xlu1 %v1461_v13, 280 }
 0x196   : > { %1463 = vbcast.lane.b32.xlu0 %v1461_v13, 256 }
 0x198   : > { %1486 = vbcast.lane.b32.xlu1 %v1480_v17, 264 }
 0x19a   : > { %1471 = vbcast.lane.b32.xlu0 %v1461_v13, 272 }
 0x19c   : > { %1494 = vbcast.lane.b32.xlu1 %v1480_v17, 280 }
 0x19e   : > { %1482 = vbcast.lane.b32.xlu0 %v1480_v17, 256 }
 0x1a0   : > { %1505 = vbcast.lane.b32.xlu1 %v1499_v19, 264 }
 0x1a2   : > { %1490 = vbcast.lane.b32.xlu0 %v1480_v17, 272 }
 0x1a4   : > { %1513 = vbcast.lane.b32.xlu1 %v1499_v19, 280 }
 0x1a6   : > { %1501 = vbcast.lane.b32.xlu0 %v1499_v19, 256 }
 0x1a8   : > { %1524 = vbcast.lane.b32.xlu1 %v1518_v21, 264 }
 0x1aa   : > { %1509 = vbcast.lane.b32.xlu0 %v1499_v19, 272 }
 0x1ac   : > { %1532 = vbcast.lane.b32.xlu1 %v1518_v21, 280 }
 0x1ae   : > { %1520 = vbcast.lane.b32.xlu0 %v1518_v21, 256 }
 0x1b0   : > { %1543 = vbcast.lane.b32.xlu1 %v1537_v23, 264 }
 0x1b2   : > { %1528 = vbcast.lane.b32.xlu0 %v1518_v21, 272  ;;  %v1784_v21 = vrot.slane %v8950_v11, %v9040_v14 }
 0x1b4   : > { %1551 = vbcast.lane.b32.xlu1 %v1537_v23, 280 }
 0x1b6   : > { %1539 = vbcast.lane.b32.xlu0 %v1537_v23, 256 }
 0x1b8   : > { %1562 = vbcast.lane.b32.xlu1 %v1556_v26, 264 }
 0x1ba   : > { %1547 = vbcast.lane.b32.xlu0 %v1537_v23, 272 }
 0x1bc   : > { %1570 = vbcast.lane.b32.xlu1 %v1556_v26, 280 }
 0x1be   : > { %1558 = vbcast.lane.b32.xlu0 %v1556_v26, 256 }
 0x1c0   : > { %1581 = vbcast.lane.b32.xlu1 %v1575_v27, 264 }
 0x1c2   : > { %1566 = vbcast.lane.b32.xlu0 %v1556_v26, 272 }
 0x1c4   : > { %1589 = vbcast.lane.b32.xlu1 %v1575_v27, 280 }
 0x1c6   : > { %1577 = vbcast.lane.b32.xlu0 %v1575_v27, 256 }
 0x1c8   : > { %1600 = vbcast.lane.b32.xlu1 %v1594_v28, 264 }
 0x1ca   : > { %1585 = vbcast.lane.b32.xlu0 %v1575_v27, 272 }
 0x1cc   : > { %v9064_v29 = vpop.xlane.xlu1 %1326  ;;  %1608 = vbcast.lane.b32.xlu1 %v1594_v28, 280 }
 0x1cd   : > { %v9066_v3 = vpop.xlane.xlu0 %1323 }
 0x1ce   : > { %1596 = vbcast.lane.b32.xlu0 %v1594_v28, 256 }
 0x1d0   : > { %v9070_v31 = vpop.xlane.xlu1 %1335  ;;  %1619 = vbcast.lane.b32.xlu1 %v1613_v30, 264 }
 0x1d1   : > { %v9072_v32 = vpop.xlane.xlu0 %1329 }
 0x1d2   : > { %1604 = vbcast.lane.b32.xlu0 %v1594_v28, 272 }
 0x1d4   : > { %v9074_v33 = vpop.xlane.xlu1 %1341  ;;  %1627 = vbcast.lane.b32.xlu1 %v1613_v30, 280 }
 0x1d5   : > { %v9078_v35 = vpop.xlane.xlu0 %1332 }
 0x1d6   : > { %1615 = vbcast.lane.b32.xlu0 %v1613_v30, 256 }
 0x1d8   : > { %v9080_v36 = vpop.xlane.xlu1 %1347  ;;  %1638 = vbcast.lane.b32.xlu1 %v1632_v34, 264 }
 0x1d9   : > { %v9082_v37 = vpop.xlane.xlu0 %1338 }
 0x1da   : > { %1623 = vbcast.lane.b32.xlu0 %v1613_v30, 272  ;;  %v1803_v30 = vrot.slane %v8950_v11, %v9044_v18 }
 0x1dc   : > { %v9084_v38 = vpop.xlane.xlu1 %1353  ;;  %1646 = vbcast.lane.b32.xlu1 %v1632_v34, 280 }
 0x1dd   : > { %v9088_v40 = vpop.xlane.xlu0 %1344 }
 0x1de   : > { %1634 = vbcast.lane.b32.xlu0 %v1632_v34, 256 }
 0x1e0   : > { %v9090_v41 = vpop.xlane.xlu1 %1359  ;;  %1657 = vbcast.lane.b32.xlu1 %v1651_v39, 264 }
 0x1e1   : > { %v9092_v42 = vpop.xlane.xlu0 %1350 }
 0x1e2   : > { %1642 = vbcast.lane.b32.xlu0 %v1632_v34, 272 }
 0x1e4   : > { %v9094_v43 = vpop.xlane.xlu1 %1365  ;;  %1665 = vbcast.lane.b32.xlu1 %v1651_v39, 280 }
 0x1e5   : > { %v9098_v45 = vpop.xlane.xlu0 %1356 }
 0x1e6   : > { %1653 = vbcast.lane.b32.xlu0 %v1651_v39, 256 }
 0x1e8   : > { %v9100_v46 = vpop.permute.xlu1 %1190  ;;  %1676 = vbcast.lane.b32.xlu1 %v1670_v44, 264 }
 0x1e9   : > { %v9102_v47 = vpop.xlane.xlu0 %1362 }
 0x1ea   : > { %1661 = vbcast.lane.b32.xlu0 %v1651_v39, 272 }
 0x1ec   : > { %v9104_v48 = vpop.permute.xlu1 %1195  ;;  %1684 = vbcast.lane.b32.xlu1 %v1670_v44, 280 }
 0x1ed   : > { %v9110_v51 = vpop.xlane.xlu0 %1368 }
 0x1ee   : > { %1672 = vbcast.lane.b32.xlu0 %v1670_v44, 256  ;;  %15928 = vst [vmem:[#allocation16_spill] sm:$0xff] %v9110_v51 }
 0x1f0   : > { %v9108_v50 = vpop.permute.xlu1 %1388  ;;  %1695 = vbcast.lane.b32.xlu1 %v1689_v49, 264 }
 0x1f2   : > { %1680 = vbcast.lane.b32.xlu0 %v1670_v44, 272 }
 0x1f4   : > { %v9112_v52 = vpop.permute.xlu1 %1398  ;;  %1703 = vbcast.lane.b32.xlu1 %v1689_v49, 280 }
 0x1f5   : > { %v9116_v54 = vpop.permute.xlu0 %1180 }
 0x1f6   : > { %1691 = vbcast.lane.b32.xlu0 %v1689_v49, 256 }
 0x1f8   : > { %v9118_v55 = vpop.permute.xlu1 %1403  ;;  %1714 = vbcast.lane.b32.xlu1 %v1708_v53, 264 }
 0x1f9   : > { %v9120_v56 = vpop.permute.xlu0 %1185 }
 0x1fa   : > { %1699 = vbcast.lane.b32.xlu0 %v1689_v49, 272 }
 0x1fc   : > { %1722 = vbcast.lane.b32.xlu1 %v1708_v53, 280  ;;  %v9122_v57 = vpop.permute.xlu1 %1429 }
 0x1fd   : > { %v9126_v59 = vpop.permute.xlu0 %1393 }
 0x1fe   : > { %1710 = vbcast.lane.b32.xlu0 %v1708_v53, 256 }
 0x200   : > { %1733 = vbcast.lane.b32.xlu1 %v1727_v58, 264  ;;  %v9128_v1 = vpop.permute.xlu1 %1437 }
 0x201   : > { %v9130_v60 = vpop.permute.xlu0 %1425 }
 0x202   : > { %1718 = vbcast.lane.b32.xlu0 %v1708_v53, 272  ;;  %v1822_v53 = vrot.slane %v8950_v11, %v9048_v20 }
 0x204   : > { %1741 = vbcast.lane.b32.xlu1 %v1727_v58, 280  ;;  %v9132_v61 = vpop.permute.xlu1 %1448 }
 0x205   : > { %v9136_v63 = vpop.permute.xlu0 %1433 }
 0x206   : > { %1729 = vbcast.lane.b32.xlu0 %v1727_v58, 256 }
 0x208   : > { %1752 = vbcast.lane.b32.xlu1 %v1746_v62, 264  ;;  %v9138_v2 = vpop.permute.xlu1 %1456 }
 0x209   : > { %v9140_v5 = vpop.permute.xlu0 %1444 }
 0x20a   : > { %1737 = vbcast.lane.b32.xlu0 %v1727_v58, 272 }
 0x20c   : > { %1760 = vbcast.lane.b32.xlu1 %v1746_v62, 280  ;;  %v9142_v6 = vpop.permute.xlu1 %1467 }
 0x20d   : > { %v9146_v10 = vpop.permute.xlu0 %1452 }
 0x20e   : > { %1748 = vbcast.lane.b32.xlu0 %v1746_v62, 256 }
 0x210   : > { %1771 = vbcast.lane.b32.xlu1 %v1765_v7, 264  ;;  %v9148_v13 = vpop.permute.xlu1 %1475 }
 0x211   : > { %v9150_v17 = vpop.permute.xlu0 %1463 }
 0x212   : > { %1756 = vbcast.lane.b32.xlu0 %v1746_v62, 272 }
 0x214   : > { %1779 = vbcast.lane.b32.xlu1 %v1765_v7, 280  ;;  %v9152_v19 = vpop.permute.xlu1 %1486 }
 0x215   : > { %v9156_v23 = vpop.permute.xlu0 %1471 }
 0x216   : > { %1767 = vbcast.lane.b32.xlu0 %v1765_v7, 256 }
 0x218   : > { %1790 = vbcast.lane.b32.xlu1 %v1784_v21, 264  ;;  %v9158_v26 = vpop.permute.xlu1 %1494 }
 0x219   : > { %v9160_v27 = vpop.permute.xlu0 %1482 }
 0x21a   : > { %1775 = vbcast.lane.b32.xlu0 %v1765_v7, 272 }
 0x21c   : > { %1798 = vbcast.lane.b32.xlu1 %v1784_v21, 280  ;;  %v9162_v28 = vpop.permute.xlu1 %1505 }
 0x21d   : > { %v9166_v34 = vpop.permute.xlu0 %1490 }
 0x21e   : > { %1786 = vbcast.lane.b32.xlu0 %v1784_v21, 256 }
 0x220   : > { %1809 = vbcast.lane.b32.xlu1 %v1803_v30, 264  ;;  %v9168_v39 = vpop.permute.xlu1 %1513 }
 0x221   : > { %v9170_v44 = vpop.permute.xlu0 %1501 }
 0x222   : > { %1794 = vbcast.lane.b32.xlu0 %v1784_v21, 272  ;;  %v1841_v21 = vrot.slane %v8950_v11, %v9052_v22 }
 0x224   : > { %1817 = vbcast.lane.b32.xlu1 %v1803_v30, 280  ;;  %v9172_v49 = vpop.permute.xlu1 %1524 }
 0x225   : > { %15929 = vst [vmem:[#allocation17_spill] sm:$0xff] %v9172_v49  ;;  %v9176_v58 = vpop.permute.xlu0 %1509 }
 0x226   : > { %15930 = vst [vmem:[#allocation18_spill] sm:$0xff] %v9176_v58  ;;  %1805 = vbcast.lane.b32.xlu0 %v1803_v30, 256 }
 0x228   : > { %1828 = vbcast.lane.b32.xlu1 %v1822_v53, 264  ;;  %v9178_v62 = vpop.permute.xlu1 %1532 }
 0x229   : > { %15931 = vst [vmem:[#allocation19_spill] sm:$0xff] %v9178_v62  ;;  %v9180_v7 = vpop.permute.xlu0 %1520 }
 0x22a   : > { %15932 = vst [vmem:[#allocation20_spill] sm:$0xff] %v9180_v7  ;;  %1813 = vbcast.lane.b32.xlu0 %v1803_v30, 272  ;;  %v1860_v30 = vrot.slane %v8950_v11, %v9056_v24 }
 0x22c   : > { %1836 = vbcast.lane.b32.xlu1 %v1822_v53, 280  ;;  %v9182_v4 = vpop.permute.xlu1 %1543 }
 0x22d   : > { %15933 = vst [vmem:[#allocation21_spill] sm:$0xff] %v9182_v4  ;;  %v9186_v51 = vpop.permute.xlu0 %1528 }
 0x22e   : > { %15934 = vst [vmem:[#allocation22_spill] sm:$0xff] %v9186_v51  ;;  %1824 = vbcast.lane.b32.xlu0 %v1822_v53, 256 }
 0x230   : > { %1847 = vbcast.lane.b32.xlu1 %v1841_v21, 264  ;;  %v9188_v49 = vpop.permute.xlu1 %1551 }
 0x231   : > { %15935 = vst [vmem:[#allocation23_spill] sm:$0xff] %v9188_v49  ;;  %v9190_v58 = vpop.permute.xlu0 %1539 }
 0x232   : > { %15936 = vst [vmem:[#allocation24_spill] sm:$0xff] %v9190_v58  ;;  %1832 = vbcast.lane.b32.xlu0 %v1822_v53, 272  ;;  %v1879_v53 = vrot.slane %v8958_v16, %v9019_v0 }
 0x234   : > { %1855 = vbcast.lane.b32.xlu1 %v1841_v21, 280  ;;  %v9192_v62 = vpop.permute.xlu1 %1562 }
 0x235   : > { %v9196_v7 = vpop.permute.xlu0 %1547 }
 0x236   : > { %15937 = vst [vmem:[#allocation25_spill] sm:$0xff] %v9196_v7  ;;  %1843 = vbcast.lane.b32.xlu0 %v1841_v21, 256 }
 0x238   : > { %1866 = vbcast.lane.b32.xlu1 %v1860_v30, 264  ;;  %v9198_v4 = vpop.permute.xlu1 %1570 }
 0x239   : > { %15938 = vst [vmem:[#allocation26_spill] sm:$0xff] %v9198_v4  ;;  %v9200_v51 = vpop.permute.xlu0 %1558 }
 0x23a   : > { %15939 = vst [vmem:[#allocation27_spill] sm:$0xff] %v9200_v51  ;;  %1851 = vbcast.lane.b32.xlu0 %v1841_v21, 272  ;;  %v1898_v21 = vrot.slane %v8958_v16, %v9032_v9 }
 0x23c   : > { %1874 = vbcast.lane.b32.xlu1 %v1860_v30, 280  ;;  %v9202_v49 = vpop.permute.xlu1 %1581 }
 0x23d   : > { %15940 = vst [vmem:[#allocation28_spill] sm:$0xff] %v9202_v49  ;;  %v9206_v58 = vpop.permute.xlu0 %1566 }
 0x23e   : > { %15941 = vst [vmem:[#allocation29_spill] sm:$0xff] %v9206_v58  ;;  %1862 = vbcast.lane.b32.xlu0 %v1860_v30, 256 }
 0x240   : > { %1885 = vbcast.lane.b32.xlu1 %v1879_v53, 264  ;;  %v9208_v11 = vpop.permute.xlu1 %1589 }
 0x241   : > { %15942 = vst [vmem:[#allocation30_spill] sm:$0xff] %v9208_v11  ;;  %v9210_v7 = vpop.permute.xlu0 %1577 }
 0x242   : > { %15943 = vst [vmem:[#allocation31_spill] sm:$0xff] %v9210_v7  ;;  %1870 = vbcast.lane.b32.xlu0 %v1860_v30, 272  ;;  %v1917_v30 = vrot.slane %v8958_v16, %v9036_v12 }
 0x244   : > { %1893 = vbcast.lane.b32.xlu1 %v1879_v53, 280  ;;  %v9212_v4 = vpop.permute.xlu1 %1600 }
 0x245   : > { %15944 = vst [vmem:[#allocation32_spill] sm:$0xff] %v9212_v4  ;;  %v9216_v51 = vpop.permute.xlu0 %1585 }
 0x246   : > { %15945 = vst [vmem:[#allocation33_spill] sm:$0xff] %v9216_v51  ;;  %1881 = vbcast.lane.b32.xlu0 %v1879_v53, 256 }
 0x248   : > { %1904 = vbcast.lane.b32.xlu1 %v1898_v21, 264  ;;  %v9218_v49 = vpop.permute.xlu1 %1608 }
 0x249   : > { %15946 = vst [vmem:[#allocation34_spill] sm:$0xff] %v9218_v49  ;;  %v9220_v58 = vpop.permute.xlu0 %1596 }
 0x24a   : > { %15947 = vst [vmem:[#allocation35_spill] sm:$0xff] %v9220_v58  ;;  %1889 = vbcast.lane.b32.xlu0 %v1879_v53, 272  ;;  %v1936_v53 = vrot.slane %v8958_v16, %v9040_v14 }
 0x24c   : > { %1912 = vbcast.lane.b32.xlu1 %v1898_v21, 280  ;;  %v9222_v11 = vpop.permute.xlu1 %1619 }
 0x24d   : > { %15948 = vst [vmem:[#allocation36_spill] sm:$0xff] %v9222_v11  ;;  %v9226_v7 = vpop.permute.xlu0 %1604 }
 0x24e   : > { %15949 = vst [vmem:[#allocation37_spill] sm:$0xff] %v9226_v7  ;;  %1900 = vbcast.lane.b32.xlu0 %v1898_v21, 256 }
 0x250   : > { %1923 = vbcast.lane.b32.xlu1 %v1917_v30, 264  ;;  %v9228_v4 = vpop.permute.xlu1 %1627 }
 0x251   : > { %15950 = vst [vmem:[#allocation38_spill] sm:$0xff] %v9228_v4  ;;  %v9230_v51 = vpop.permute.xlu0 %1615 }
 0x252   : > { %15951 = vst [vmem:[#allocation39_spill] sm:$0xff] %v9230_v51  ;;  %1908 = vbcast.lane.b32.xlu0 %v1898_v21, 272  ;;  %v1955_v21 = vrot.slane %v8958_v16, %v9044_v18 }
 0x254   : > { %1931 = vbcast.lane.b32.xlu1 %v1917_v30, 280  ;;  %v9232_v49 = vpop.permute.xlu1 %1638 }
 0x255   : > { %15952 = vst [vmem:[#allocation40_spill] sm:$0xff] %v9232_v49  ;;  %v9236_v58 = vpop.permute.xlu0 %1623 }
 0x256   : > { %15953 = vst [vmem:[#allocation41_spill] sm:$0xff] %v9236_v58  ;;  %1919 = vbcast.lane.b32.xlu0 %v1917_v30, 256 }
 0x258   : > { %1942 = vbcast.lane.b32.xlu1 %v1936_v53, 264  ;;  %v9238_v11 = vpop.permute.xlu1 %1646 }
 0x259   : > { %15954 = vst [vmem:[#allocation42_spill] sm:$0xff] %v9238_v11  ;;  %v9240_v7 = vpop.permute.xlu0 %1634 }
 0x25a   : > { %15955 = vst [vmem:[#allocation43_spill] sm:$0xff] %v9240_v7  ;;  %1927 = vbcast.lane.b32.xlu0 %v1917_v30, 272  ;;  %v1974_v30 = vrot.slane %v8958_v16, %v9048_v20 }
 0x25c   : > { %1950 = vbcast.lane.b32.xlu1 %v1936_v53, 280  ;;  %v9242_v4 = vpop.permute.xlu1 %1657 }
 0x25d   : > { %15956 = vst [vmem:[#allocation44_spill] sm:$0xff] %v9242_v4  ;;  %v9246_v51 = vpop.permute.xlu0 %1642 }
 0x25e   : > { %15957 = vst [vmem:[#allocation45_spill] sm:$0xff] %v9246_v51  ;;  %1938 = vbcast.lane.b32.xlu0 %v1936_v53, 256 }
 0x260   : > { %1961 = vbcast.lane.b32.xlu1 %v1955_v21, 264  ;;  %v9248_v49 = vpop.permute.xlu1 %1665 }
 0x261   : > { %15958 = vst [vmem:[#allocation46_spill] sm:$0xff] %v9248_v49  ;;  %v9250_v58 = vpop.permute.xlu0 %1653 }
 0x262   : > { %15959 = vst [vmem:[#allocation47_spill] sm:$0xff] %v9250_v58  ;;  %1946 = vbcast.lane.b32.xlu0 %v1936_v53, 272  ;;  %v1993_v53 = vrot.slane %v8958_v16, %v9052_v22 }
 0x264   : > { %1969 = vbcast.lane.b32.xlu1 %v1955_v21, 280  ;;  %v9252_v11 = vpop.permute.xlu1 %1676 }
 0x265   : > { %15960 = vst [vmem:[#allocation48_spill] sm:$0xff] %v9252_v11  ;;  %v9256_v7 = vpop.permute.xlu0 %1661 }
 0x266   : > { %15961 = vst [vmem:[#allocation49_spill] sm:$0xff] %v9256_v7  ;;  %1957 = vbcast.lane.b32.xlu0 %v1955_v21, 256 }
 0x268   : > { %1980 = vbcast.lane.b32.xlu1 %v1974_v30, 264  ;;  %v9258_v4 = vpop.permute.xlu1 %1684 }
 0x269   : > { %15962 = vst [vmem:[#allocation50_spill] sm:$0xff] %v9258_v4  ;;  %v9260_v51 = vpop.permute.xlu0 %1672 }
 0x26a   : > { %15963 = vst [vmem:[#allocation51_spill] sm:$0xff] %v9260_v51  ;;  %1965 = vbcast.lane.b32.xlu0 %v1955_v21, 272  ;;  %v2012_v21 = vrot.slane %v8958_v16, %v9056_v24 }
 0x26c   : > { %1988 = vbcast.lane.b32.xlu1 %v1974_v30, 280  ;;  %v9262_v49 = vpop.permute.xlu1 %1695 }
 0x26d   : > { %15964 = vst [vmem:[#allocation52_spill] sm:$0xff] %v9262_v49  ;;  %v9266_v58 = vpop.permute.xlu0 %1680 }
 0x26e   : > { %15965 = vst [vmem:[#allocation53_spill] sm:$0xff] %v9266_v58  ;;  %1976 = vbcast.lane.b32.xlu0 %v1974_v30, 256 }
 0x270   : > { %1999 = vbcast.lane.b32.xlu1 %v1993_v53, 264  ;;  %v9268_v11 = vpop.permute.xlu1 %1703 }
 0x271   : > { %15966 = vst [vmem:[#allocation54_spill] sm:$0xff] %v9268_v11  ;;  %v9270_v7 = vpop.permute.xlu0 %1691 }
 0x272   : > { %15967 = vst [vmem:[#allocation55_spill] sm:$0xff] %v9270_v7  ;;  %1984 = vbcast.lane.b32.xlu0 %v1974_v30, 272  ;;  %v2031_v30 = vrot.slane %v8943_v8, %v9019_v0 }
 0x274   : > { %2007 = vbcast.lane.b32.xlu1 %v1993_v53, 280  ;;  %v9272_v4 = vpop.permute.xlu1 %1714 }
 0x275   : > { %15968 = vst [vmem:[#allocation56_spill] sm:$0xff] %v9272_v4  ;;  %v9276_v51 = vpop.permute.xlu0 %1699 }
 0x276   : > { %15969 = vst [vmem:[#allocation57_spill] sm:$0xff] %v9276_v51  ;;  %1995 = vbcast.lane.b32.xlu0 %v1993_v53, 256 }
 0x278   : > { %2018 = vbcast.lane.b32.xlu1 %v2012_v21, 264  ;;  %v9278_v49 = vpop.permute.xlu1 %1722 }
 0x279   : > { %15970 = vst [vmem:[#allocation58_spill] sm:$0xff] %v9278_v49  ;;  %v9280_v58 = vpop.permute.xlu0 %1710 }
 0x27a   : > { %15971 = vst [vmem:[#allocation59_spill] sm:$0xff] %v9280_v58  ;;  %2003 = vbcast.lane.b32.xlu0 %v1993_v53, 272  ;;  %v2050_v53 = vrot.slane %v8943_v8, %v9032_v9 }
 0x27c   : > { %2026 = vbcast.lane.b32.xlu1 %v2012_v21, 280  ;;  %v9282_v11 = vpop.permute.xlu1 %1733 }
 0x27d   : > { %15972 = vst [vmem:[#allocation60_spill] sm:$0xff] %v9282_v11  ;;  %v9286_v7 = vpop.permute.xlu0 %1718 }
 0x27e   : > { %15973 = vst [vmem:[#allocation61_spill] sm:$0xff] %v9286_v7  ;;  %2014 = vbcast.lane.b32.xlu0 %v2012_v21, 256 }
 0x280   : > { %2037 = vbcast.lane.b32.xlu1 %v2031_v30, 264  ;;  %v9288_v16 = vpop.permute.xlu1 %1741 }
 0x281   : > { %15974 = vst [vmem:[#allocation62_spill] sm:$0xff] %v9288_v16  ;;  %v9290_v51 = vpop.permute.xlu0 %1729 }
 0x282   : > { %15975 = vst [vmem:[#allocation63_spill] sm:$0xff] %v9290_v51  ;;  %2022 = vbcast.lane.b32.xlu0 %v2012_v21, 272  ;;  %v2069_v21 = vrot.slane %v8943_v8, %v9036_v12 }
 0x284   : > { %2045 = vbcast.lane.b32.xlu1 %v2031_v30, 280  ;;  %v9292_v49 = vpop.permute.xlu1 %1752 }
 0x285   : > { %15976 = vst [vmem:[#allocation64_spill] sm:$0xff] %v9292_v49  ;;  %v9296_v58 = vpop.permute.xlu0 %1737 }
 0x286   : > { %15977 = vst [vmem:[#allocation65_spill] sm:$0xff] %v9296_v58  ;;  %2033 = vbcast.lane.b32.xlu0 %v2031_v30, 256 }
 0x288   : > { %2056 = vbcast.lane.b32.xlu1 %v2050_v53, 264  ;;  %v9298_v11 = vpop.permute.xlu1 %1760 }
 0x289   : > { %15978 = vst [vmem:[#allocation66_spill] sm:$0xff] %v9298_v11  ;;  %v9300_v7 = vpop.permute.xlu0 %1748 }
 0x28a   : > { %15979 = vst [vmem:[#allocation67_spill] sm:$0xff] %v9300_v7  ;;  %2041 = vbcast.lane.b32.xlu0 %v2031_v30, 272  ;;  %v2088_v30 = vrot.slane %v8943_v8, %v9040_v14 }
 0x28c   : > { %2064 = vbcast.lane.b32.xlu1 %v2050_v53, 280  ;;  %v9302_v16 = vpop.permute.xlu1 %1771 }
 0x28d   : > { %15980 = vst [vmem:[#allocation68_spill] sm:$0xff] %v9302_v16  ;;  %v9306_v51 = vpop.permute.xlu0 %1756 }
 0x28e   : > { %15981 = vst [vmem:[#allocation69_spill] sm:$0xff] %v9306_v51  ;;  %2052 = vbcast.lane.b32.xlu0 %v2050_v53, 256 }
 0x290   : > { %2075 = vbcast.lane.b32.xlu1 %v2069_v21, 264  ;;  %v9308_v49 = vpop.permute.xlu1 %1779 }
 0x291   : > { %15982 = vst [vmem:[#allocation70_spill] sm:$0xff] %v9308_v49  ;;  %v9310_v58 = vpop.permute.xlu0 %1767 }
 0x292   : > { %15983 = vst [vmem:[#allocation71_spill] sm:$0xff] %v9310_v58  ;;  %2060 = vbcast.lane.b32.xlu0 %v2050_v53, 272  ;;  %v2107_v53 = vrot.slane %v8943_v8, %v9044_v18 }
 0x294   : > { %2083 = vbcast.lane.b32.xlu1 %v2069_v21, 280  ;;  %v9312_v11 = vpop.permute.xlu1 %1790 }
 0x295   : > { %15984 = vst [vmem:[#allocation72_spill] sm:$0xff] %v9312_v11  ;;  %v9316_v7 = vpop.permute.xlu0 %1775 }
 0x296   : > { %15985 = vst [vmem:[#allocation73_spill] sm:$0xff] %v9316_v7  ;;  %2071 = vbcast.lane.b32.xlu0 %v2069_v21, 256 }
 0x298   : > { %2094 = vbcast.lane.b32.xlu1 %v2088_v30, 264  ;;  %v9318_v16 = vpop.permute.xlu1 %1798 }
 0x299   : > { %15986 = vst [vmem:[#allocation74_spill] sm:$0xff] %v9318_v16  ;;  %v9320_v51 = vpop.permute.xlu0 %1786 }
 0x29a   : > { %15987 = vst [vmem:[#allocation75_spill] sm:$0xff] %v9320_v51  ;;  %2079 = vbcast.lane.b32.xlu0 %v2069_v21, 272  ;;  %v2126_v21 = vrot.slane %v8943_v8, %v9048_v20 }
 0x29c   : > { %2102 = vbcast.lane.b32.xlu1 %v2088_v30, 280  ;;  %v9322_v49 = vpop.permute.xlu1 %1809 }
 0x29d   : > { %15988 = vst [vmem:[#allocation76_spill] sm:$0xff] %v9322_v49  ;;  %v9326_v58 = vpop.permute.xlu0 %1794 }
 0x29e   : > { %15989 = vst [vmem:[#allocation77_spill] sm:$0xff] %v9326_v58  ;;  %2090 = vbcast.lane.b32.xlu0 %v2088_v30, 256 }
 0x2a0   : > { %2113 = vbcast.lane.b32.xlu1 %v2107_v53, 264  ;;  %v9328_v11 = vpop.permute.xlu1 %1817 }
 0x2a1   : > { %15990 = vst [vmem:[#allocation78_spill] sm:$0xff] %v9328_v11  ;;  %v9330_v7 = vpop.permute.xlu0 %1805 }
 0x2a2   : > { %15991 = vst [vmem:[#allocation79_spill] sm:$0xff] %v9330_v7  ;;  %2098 = vbcast.lane.b32.xlu0 %v2088_v30, 272  ;;  %v2145_v30 = vrot.slane %v8943_v8, %v9052_v22 }
 0x2a4   : > { %2121 = vbcast.lane.b32.xlu1 %v2107_v53, 280  ;;  %v9332_v16 = vpop.permute.xlu1 %1828 }
 0x2a5   : > { %15992 = vst [vmem:[#allocation80_spill] sm:$0xff] %v9332_v16  ;;  %v9336_v51 = vpop.permute.xlu0 %1813 }
 0x2a6   : > { %15993 = vst [vmem:[#allocation81_spill] sm:$0xff] %v9336_v51  ;;  %2109 = vbcast.lane.b32.xlu0 %v2107_v53, 256 }
 0x2a8   : > { %2132 = vbcast.lane.b32.xlu1 %v2126_v21, 264  ;;  %v9338_v49 = vpop.permute.xlu1 %1836 }
 0x2a9   : > { %15994 = vst [vmem:[#allocation82_spill] sm:$0xff] %v9338_v49  ;;  %v9340_v58 = vpop.permute.xlu0 %1824 }
 0x2aa   : > { %15995 = vst [vmem:[#allocation83_spill] sm:$0xff] %v9340_v58  ;;  %2117 = vbcast.lane.b32.xlu0 %v2107_v53, 272  ;;  %v2164_v53 = vrot.slane %v8943_v8, %v9056_v24 }
 0x2ac   : > { %2140 = vbcast.lane.b32.xlu1 %v2126_v21, 280  ;;  %v9342_v11 = vpop.permute.xlu1 %1847 }
 0x2ad   : > { %15996 = vst [vmem:[#allocation84_spill] sm:$0xff] %v9342_v11  ;;  %v9346_v7 = vpop.permute.xlu0 %1832 }
 0x2ae   : > { %15997 = vst [vmem:[#allocation85_spill] sm:$0xff] %v9346_v7  ;;  %2128 = vbcast.lane.b32.xlu0 %v2126_v21, 256 }
 0x2b0   : > { %2151 = vbcast.lane.b32.xlu1 %v2145_v30, 264  ;;  %v9348_v16 = vpop.permute.xlu1 %1855 }
 0x2b1   : > { %15998 = vst [vmem:[#allocation86_spill] sm:$0xff] %v9348_v16  ;;  %v9350_v51 = vpop.permute.xlu0 %1843 }
 0x2b2   : > { %15999 = vst [vmem:[#allocation87_spill] sm:$0xff] %v9350_v51  ;;  %2136 = vbcast.lane.b32.xlu0 %v2126_v21, 272  ;;  %v2183_v21 = vrot.slane %v8973_v25, %v9019_v0 }
 0x2b4   : > { %2159 = vbcast.lane.b32.xlu1 %v2145_v30, 280  ;;  %v9352_v49 = vpop.permute.xlu1 %1866 }
 0x2b5   : > { %16000 = vst [vmem:[#allocation88_spill] sm:$0xff] %v9352_v49  ;;  %v9356_v58 = vpop.permute.xlu0 %1851 }
 0x2b6   : > { %16001 = vst [vmem:[#allocation89_spill] sm:$0xff] %v9356_v58  ;;  %2147 = vbcast.lane.b32.xlu0 %v2145_v30, 256 }
 0x2b8   : > { %2170 = vbcast.lane.b32.xlu1 %v2164_v53, 264  ;;  %v9358_v11 = vpop.permute.xlu1 %1874 }
 0x2b9   : > { %16002 = vst [vmem:[#allocation90_spill] sm:$0xff] %v9358_v11  ;;  %v9360_v7 = vpop.permute.xlu0 %1862 }
 0x2ba   : > { %16003 = vst [vmem:[#allocation91_spill] sm:$0xff] %v9360_v7  ;;  %2155 = vbcast.lane.b32.xlu0 %v2145_v30, 272  ;;  %v2202_v30 = vrot.slane %v8973_v25, %v9032_v9 }
 0x2bc   : > { %2178 = vbcast.lane.b32.xlu1 %v2164_v53, 280  ;;  %v9362_v16 = vpop.permute.xlu1 %1885 }
 0x2bd   : > { %16004 = vst [vmem:[#allocation92_spill] sm:$0xff] %v9362_v16  ;;  %v9366_v51 = vpop.permute.xlu0 %1870 }
 0x2be   : > { %16005 = vst [vmem:[#allocation93_spill] sm:$0xff] %v9366_v51  ;;  %2166 = vbcast.lane.b32.xlu0 %v2164_v53, 256 }
 0x2c0   : > { %2189 = vbcast.lane.b32.xlu1 %v2183_v21, 264  ;;  %v9368_v8 = vpop.permute.xlu1 %1893 }
 0x2c1   : > { %16006 = vst [vmem:[#allocation94_spill] sm:$0xff] %v9368_v8  ;;  %v9370_v58 = vpop.permute.xlu0 %1881 }
 0x2c2   : > { %16007 = vst [vmem:[#allocation95_spill] sm:$0xff] %v9370_v58  ;;  %2174 = vbcast.lane.b32.xlu0 %v2164_v53, 272  ;;  %v2221_v53 = vrot.slane %v8973_v25, %v9036_v12 }
 0x2c4   : > { %2197 = vbcast.lane.b32.xlu1 %v2183_v21, 280  ;;  %v9372_v11 = vpop.permute.xlu1 %1904 }
 0x2c5   : > { %16008 = vst [vmem:[#allocation96_spill] sm:$0xff] %v9372_v11  ;;  %v9376_v7 = vpop.permute.xlu0 %1889 }
 0x2c6   : > { %16009 = vst [vmem:[#allocation97_spill] sm:$0xff] %v9376_v7  ;;  %2185 = vbcast.lane.b32.xlu0 %v2183_v21, 256 }
 0x2c8   : > { %2208 = vbcast.lane.b32.xlu1 %v2202_v30, 264  ;;  %v9378_v16 = vpop.permute.xlu1 %1912 }
 0x2c9   : > { %16010 = vst [vmem:[#allocation98_spill] sm:$0xff] %v9378_v16  ;;  %v9380_v51 = vpop.permute.xlu0 %1900 }
 0x2ca   : > { %16011 = vst [vmem:[#allocation99_spill] sm:$0xff] %v9380_v51  ;;  %2193 = vbcast.lane.b32.xlu0 %v2183_v21, 272  ;;  %v2240_v21 = vrot.slane %v8973_v25, %v9040_v14 }
 0x2cc   : > { %2216 = vbcast.lane.b32.xlu1 %v2202_v30, 280  ;;  %v9382_v8 = vpop.permute.xlu1 %1923 }
 0x2cd   : > { %16012 = vst [vmem:[#allocation100_spill] sm:$0xff] %v9382_v8  ;;  %v9386_v58 = vpop.permute.xlu0 %1908 }
 0x2ce   : > { %16013 = vst [vmem:[#allocation101_spill] sm:$0xff] %v9386_v58  ;;  %2204 = vbcast.lane.b32.xlu0 %v2202_v30, 256 }
 0x2d0   : > { %2227 = vbcast.lane.b32.xlu1 %v2221_v53, 264  ;;  %v9388_v11 = vpop.permute.xlu1 %1931 }
 0x2d1   : > { %16014 = vst [vmem:[#allocation102_spill] sm:$0xff] %v9388_v11  ;;  %v9390_v7 = vpop.permute.xlu0 %1919 }
 0x2d2   : > { %16015 = vst [vmem:[#allocation103_spill] sm:$0xff] %v9390_v7  ;;  %2212 = vbcast.lane.b32.xlu0 %v2202_v30, 272  ;;  %v2259_v30 = vrot.slane %v8973_v25, %v9044_v18 }
 0x2d4   : > { %2235 = vbcast.lane.b32.xlu1 %v2221_v53, 280  ;;  %v9392_v16 = vpop.permute.xlu1 %1942 }
 0x2d5   : > { %16016 = vst [vmem:[#allocation104_spill] sm:$0xff] %v9392_v16  ;;  %v9396_v51 = vpop.permute.xlu0 %1927 }
 0x2d6   : > { %16017 = vst [vmem:[#allocation105_spill] sm:$0xff] %v9396_v51  ;;  %2223 = vbcast.lane.b32.xlu0 %v2221_v53, 256 }
 0x2d8   : > { %2246 = vbcast.lane.b32.xlu1 %v2240_v21, 264  ;;  %v9398_v8 = vpop.permute.xlu1 %1950 }
 0x2d9   : > { %16018 = vst [vmem:[#allocation106_spill] sm:$0xff] %v9398_v8  ;;  %v9400_v58 = vpop.permute.xlu0 %1938 }
 0x2da   : > { %16019 = vst [vmem:[#allocation107_spill] sm:$0xff] %v9400_v58  ;;  %2231 = vbcast.lane.b32.xlu0 %v2221_v53, 272  ;;  %v2278_v53 = vrot.slane %v8973_v25, %v9048_v20 }
 0x2dc   : > { %2254 = vbcast.lane.b32.xlu1 %v2240_v21, 280  ;;  %v9402_v11 = vpop.permute.xlu1 %1961 }
 0x2dd   : > { %16020 = vst [vmem:[#allocation108_spill] sm:$0xff] %v9402_v11  ;;  %v9406_v7 = vpop.permute.xlu0 %1946 }
 0x2de   : > { %16021 = vst [vmem:[#allocation109_spill] sm:$0xff] %v9406_v7  ;;  %2242 = vbcast.lane.b32.xlu0 %v2240_v21, 256 }
 0x2e0   : > { %2265 = vbcast.lane.b32.xlu1 %v2259_v30, 264  ;;  %v9408_v16 = vpop.permute.xlu1 %1969 }
 0x2e1   : > { %16022 = vst [vmem:[#allocation110_spill] sm:$0xff] %v9408_v16  ;;  %v9410_v51 = vpop.permute.xlu0 %1957 }
 0x2e2   : > { %16023 = vst [vmem:[#allocation111_spill] sm:$0xff] %v9410_v51  ;;  %2250 = vbcast.lane.b32.xlu0 %v2240_v21, 272  ;;  %v2297_v21 = vrot.slane %v8973_v25, %v9052_v22 }
 0x2e4   : > { %2273 = vbcast.lane.b32.xlu1 %v2259_v30, 280  ;;  %v9412_v8 = vpop.permute.xlu1 %1980 }
 0x2e5   : > { %16024 = vst [vmem:[#allocation112_spill] sm:$0xff] %v9412_v8  ;;  %v9416_v58 = vpop.permute.xlu0 %1965 }
 0x2e6   : > { %16025 = vst [vmem:[#allocation113_spill] sm:$0xff] %v9416_v58  ;;  %2261 = vbcast.lane.b32.xlu0 %v2259_v30, 256 }
 0x2e8   : > { %2284 = vbcast.lane.b32.xlu1 %v2278_v53, 264  ;;  %v9418_v11 = vpop.permute.xlu1 %1988 }
 0x2e9   : > { %16026 = vst [vmem:[#allocation114_spill] sm:$0xff] %v9418_v11  ;;  %v9420_v7 = vpop.permute.xlu0 %1976 }
 0x2ea   : > { %16027 = vst [vmem:[#allocation115_spill] sm:$0xff] %v9420_v7  ;;  %2269 = vbcast.lane.b32.xlu0 %v2259_v30, 272  ;;  %v2316_v30 = vrot.slane %v8973_v25, %v9056_v24 }
 0x2ec   : > { %2292 = vbcast.lane.b32.xlu1 %v2278_v53, 280  ;;  %v9422_v16 = vpop.permute.xlu1 %1999 }
 0x2ed   : > { %16028 = vst [vmem:[#allocation116_spill] sm:$0xff] %v9422_v16  ;;  %v9426_v51 = vpop.permute.xlu0 %1984 }
 0x2ee   : > { %16029 = vst [vmem:[#allocation117_spill] sm:$0xff] %v9426_v51  ;;  %2280 = vbcast.lane.b32.xlu0 %v2278_v53, 256 }
 0x2f0   : > { %2303 = vbcast.lane.b32.xlu1 %v2297_v21, 264  ;;  %v9428_v8 = vpop.permute.xlu1 %2007 }
 0x2f1   : > { %16030 = vst [vmem:[#allocation118_spill] sm:$0xff] %v9428_v8  ;;  %v9430_v58 = vpop.permute.xlu0 %1995 }
 0x2f2   : > { %16031 = vst [vmem:[#allocation119_spill] sm:$0xff] %v9430_v58  ;;  %2288 = vbcast.lane.b32.xlu0 %v2278_v53, 272  ;;  %v2335_v53 = vrot.slane %v8956_v15, %v9019_v0 }
 0x2f4   : > { %2311 = vbcast.lane.b32.xlu1 %v2297_v21, 280  ;;  %v9432_v11 = vpop.permute.xlu1 %2018 }
 0x2f5   : > { %16032 = vst [vmem:[#allocation120_spill] sm:$0xff] %v9432_v11  ;;  %v9436_v7 = vpop.permute.xlu0 %2003 }
 0x2f6   : > { %16033 = vst [vmem:[#allocation121_spill] sm:$0xff] %v9436_v7  ;;  %2299 = vbcast.lane.b32.xlu0 %v2297_v21, 256 }
 0x2f8   : > { %2322 = vbcast.lane.b32.xlu1 %v2316_v30, 264  ;;  %v9438_v16 = vpop.permute.xlu1 %2026 }
 0x2f9   : > { %16034 = vst [vmem:[#allocation122_spill] sm:$0xff] %v9438_v16  ;;  %v9440_v51 = vpop.permute.xlu0 %2014 }
 0x2fa   : > { %16035 = vst [vmem:[#allocation123_spill] sm:$0xff] %v9440_v51  ;;  %2307 = vbcast.lane.b32.xlu0 %v2297_v21, 272  ;;  %v2354_v21 = vrot.slane %v8956_v15, %v9032_v9 }
 0x2fc   : > { %2330 = vbcast.lane.b32.xlu1 %v2316_v30, 280  ;;  %v9442_v8 = vpop.permute.xlu1 %2037 }
 0x2fd   : > { %16036 = vst [vmem:[#allocation124_spill] sm:$0xff] %v9442_v8  ;;  %v9446_v58 = vpop.permute.xlu0 %2022 }
 0x2fe   : > { %16037 = vst [vmem:[#allocation125_spill] sm:$0xff] %v9446_v58  ;;  %2318 = vbcast.lane.b32.xlu0 %v2316_v30, 256 }
 0x300   : > { %2341 = vbcast.lane.b32.xlu1 %v2335_v53, 264  ;;  %v9448_v25 = vpop.permute.xlu1 %2045 }
 0x301   : > { %16038 = vst [vmem:[#allocation126_spill] sm:$0xff] %v9448_v25  ;;  %v9450_v7 = vpop.permute.xlu0 %2033 }
 0x302   : > { %16039 = vst [vmem:[#allocation127_spill] sm:$0xff] %v9450_v7  ;;  %2326 = vbcast.lane.b32.xlu0 %v2316_v30, 272  ;;  %v2373_v30 = vrot.slane %v8956_v15, %v9036_v12 }
 0x304   : > { %2349 = vbcast.lane.b32.xlu1 %v2335_v53, 280  ;;  %v9452_v16 = vpop.permute.xlu1 %2056 }
 0x305   : > { %16040 = vst [vmem:[#allocation128_spill] sm:$0xff] %v9452_v16  ;;  %v9456_v51 = vpop.permute.xlu0 %2041 }
 0x306   : > { %16041 = vst [vmem:[#allocation129_spill] sm:$0xff] %v9456_v51  ;;  %2337 = vbcast.lane.b32.xlu0 %v2335_v53, 256 }
 0x308   : > { %2360 = vbcast.lane.b32.xlu1 %v2354_v21, 264  ;;  %v9458_v8 = vpop.permute.xlu1 %2064 }
 0x309   : > { %16042 = vst [vmem:[#allocation130_spill] sm:$0xff] %v9458_v8  ;;  %v9460_v58 = vpop.permute.xlu0 %2052 }
 0x30a   : > { %16043 = vst [vmem:[#allocation131_spill] sm:$0xff] %v9460_v58  ;;  %2345 = vbcast.lane.b32.xlu0 %v2335_v53, 272  ;;  %v2392_v53 = vrot.slane %v8956_v15, %v9040_v14 }
 0x30c   : > { %2368 = vbcast.lane.b32.xlu1 %v2354_v21, 280  ;;  %v9462_v25 = vpop.permute.xlu1 %2075 }
 0x30d   : > { %16044 = vst [vmem:[#allocation132_spill] sm:$0xff] %v9462_v25  ;;  %v9466_v7 = vpop.permute.xlu0 %2060 }
 0x30e   : > { %16045 = vst [vmem:[#allocation133_spill] sm:$0xff] %v9466_v7  ;;  %2356 = vbcast.lane.b32.xlu0 %v2354_v21, 256 }
 0x310   : > { %2379 = vbcast.lane.b32.xlu1 %v2373_v30, 264  ;;  %v9468_v16 = vpop.permute.xlu1 %2083 }
 0x311   : > { %16046 = vst [vmem:[#allocation134_spill] sm:$0xff] %v9468_v16  ;;  %v9470_v51 = vpop.permute.xlu0 %2071 }
 0x312   : > { %16047 = vst [vmem:[#allocation135_spill] sm:$0xff] %v9470_v51  ;;  %2364 = vbcast.lane.b32.xlu0 %v2354_v21, 272  ;;  %v8474_v51 = vld [vmem:[#allocation5 + $0x30] sm:$0xff] }
 0x313   : > { %v2411_v21 = vrot.slane %v8474_v51, %v9044_v18 }
 0x314   : > { %2387 = vbcast.lane.b32.xlu1 %v2373_v30, 280  ;;  %v9472_v8 = vpop.permute.xlu1 %2094 }
 0x315   : > { %16048 = vst [vmem:[#allocation136_spill] sm:$0xff] %v9472_v8  ;;  %v9476_v58 = vpop.permute.xlu0 %2079 }
 0x316   : > { %16049 = vst [vmem:[#allocation137_spill] sm:$0xff] %v9476_v58  ;;  %2375 = vbcast.lane.b32.xlu0 %v2373_v30, 256 }
 0x318   : > { %2398 = vbcast.lane.b32.xlu1 %v2392_v53, 264  ;;  %v9478_v25 = vpop.permute.xlu1 %2102 }
 0x319   : > { %16050 = vst [vmem:[#allocation138_spill] sm:$0xff] %v9478_v25  ;;  %v9480_v7 = vpop.permute.xlu0 %2090 }
 0x31a   : > { %16051 = vst [vmem:[#allocation139_spill] sm:$0xff] %v9480_v7  ;;  %2383 = vbcast.lane.b32.xlu0 %v2373_v30, 272  ;;  %v2430_v30 = vrot.slane %v8474_v51, %v9048_v20 }
 0x31c   : > { %2406 = vbcast.lane.b32.xlu1 %v2392_v53, 280  ;;  %v9482_v16 = vpop.permute.xlu1 %2113 }
 0x31d   : > { %16052 = vst [vmem:[#allocation140_spill] sm:$0xff] %v9482_v16  ;;  %v9485_v11 = vpop.permute.xlu0 %2098 }
 0x31e   : > { %16053 = vst [vmem:[#allocation141_spill] sm:$0xff] %v9485_v11  ;;  %2394 = vbcast.lane.b32.xlu0 %v2392_v53, 256 }
 0x320   : > { %2417 = vbcast.lane.b32.xlu1 %v2411_v21, 264  ;;  %v9487_v15 = vpop.permute.xlu1 %2121 }
 0x321   : > { %16054 = vst [vmem:[#allocation142_spill] sm:$0xff] %v9487_v15  ;;  %v9489_v58 = vpop.permute.xlu0 %2109 }
 0x322   : > { %16055 = vst [vmem:[#allocation143_spill] sm:$0xff] %v9489_v58  ;;  %2402 = vbcast.lane.b32.xlu0 %v2392_v53, 272  ;;  %v2449_v58 = vrot.slane %v8474_v51, %v9052_v22 }
 0x324   : > { %2425 = vbcast.lane.b32.xlu1 %v2411_v21, 280  ;;  %v9491_v25 = vpop.permute.xlu1 %2132 }
 0x325   : > { %16056 = vst [vmem:[#allocation144_spill] sm:$0xff] %v9491_v25  ;;  %v9494_v7 = vpop.permute.xlu0 %2117 }
 0x326   : > { %16057 = vst [vmem:[#allocation145_spill] sm:$0xff] %v9494_v7  ;;  %2413 = vbcast.lane.b32.xlu0 %v2411_v21, 256 }
 0x328   : > { %2436 = vbcast.lane.b32.xlu1 %v2430_v30, 264  ;;  %v9496_v16 = vpop.permute.xlu1 %2140 }
 0x329   : > { %16058 = vst [vmem:[#allocation146_spill] sm:$0xff] %v9496_v16  ;;  %v9498_v8 = vpop.permute.xlu0 %2128 }
 0x32a   : > { %16059 = vst [vmem:[#allocation147_spill] sm:$0xff] %v9498_v8  ;;  %2421 = vbcast.lane.b32.xlu0 %v2411_v21, 272  ;;  %v2468_v8 = vrot.slane %v8474_v51, %v9056_v24 }
 0x32c   : > { %2444 = vbcast.lane.b32.xlu1 %v2430_v30, 280  ;;  %v9500_v11 = vpop.permute.xlu1 %2151 }
 0x32d   : > { %16060 = vst [vmem:[#allocation148_spill] sm:$0xff] %v9500_v11  ;;  %v9503_v53 = vpop.permute.xlu0 %2136 }
 0x32e   : > { %16061 = vst [vmem:[#allocation149_spill] sm:$0xff] %v9503_v53  ;;  %2432 = vbcast.lane.b32.xlu0 %v2430_v30, 256 }
 0x330   : > { %2455 = vbcast.lane.b32.xlu1 %v2449_v58, 264  ;;  %v9505_v25 = vpop.permute.xlu1 %2159 }
 0x331   : > { %16062 = vst [vmem:[#allocation150_spill] sm:$0xff] %v9505_v25  ;;  %v9507_v15 = vpop.permute.xlu0 %2147  ;;  %v9520_v25 = vld [vmem:[#allocation5 + $0x38] sm:$0xff] }
 0x332   : > { %16063 = vst [vmem:[#allocation151_spill] sm:$0xff] %v9507_v15  ;;  %2440 = vbcast.lane.b32.xlu0 %v2430_v30, 272  ;;  %v2487_v30 = vrot.slane %v9520_v25, %v9019_v0  ;;  %v8231_v15 = vpop.f32.mrf.mxu1 }
 0x334   : > { %2463 = vbcast.lane.b32.xlu1 %v2449_v58, 280  ;;  %v9509_v7 = vpop.permute.xlu1 %2170 }
 0x335   : > { %16064 = vst [vmem:[#allocation152_spill] sm:$0xff] %v9509_v7  ;;  %v9512_v21 = vpop.permute.xlu0 %2155 }
 0x336   : > { %16065 = vst [vmem:[#allocation153_spill] sm:$0xff] %v9512_v21  ;;  %2451 = vbcast.lane.b32.xlu0 %v2449_v58, 256 }
 0x338   : > { %2474 = vbcast.lane.b32.xlu1 %v2468_v8, 264  ;;  %v9514_v11 = vpop.permute.xlu1 %2178 }
 0x339   : > { %16066 = vst [vmem:[#allocation154_spill] sm:$0xff] %v9514_v11  ;;  %v9516_v16 = vpop.permute.xlu0 %2166 }
 0x33a   : > { %16067 = vst [vmem:[#allocation155_spill] sm:$0xff] %v9516_v16  ;;  %2459 = vbcast.lane.b32.xlu0 %v2449_v58, 272  ;;  %v2506_v58 = vrot.slane %v9520_v25, %v9032_v9 }
 0x33c   : > { %2482 = vbcast.lane.b32.xlu1 %v2468_v8, 280  ;;  %v9518_v53 = vpop.permute.xlu1 %2189 }
 0x33d   : > { %16068 = vst [vmem:[#allocation156_spill] sm:$0xff] %v9518_v53  ;;  %v9524_v7 = vpop.permute.xlu0 %2174 }
 0x33e   : > { %16069 = vst [vmem:[#allocation157_spill] sm:$0xff] %v9524_v7  ;;  %2470 = vbcast.lane.b32.xlu0 %v2468_v8, 256 }
 0x340   : > { %2493 = vbcast.lane.b32.xlu1 %v2487_v30, 264  ;;  %v9526_v51 = vpop.permute.xlu1 %2197 }
 0x341   : > { %16070 = vst [vmem:[#allocation158_spill] sm:$0xff] %v9526_v51  ;;  %v9528_v21 = vpop.permute.xlu0 %2185 }
 0x342   : > { %16071 = vst [vmem:[#allocation159_spill] sm:$0xff] %v9528_v21  ;;  %2478 = vbcast.lane.b32.xlu0 %v2468_v8, 272  ;;  %v2525_v8 = vrot.slane %v9520_v25, %v9036_v12 }
 0x344   : > { %2501 = vbcast.lane.b32.xlu1 %v2487_v30, 280  ;;  %v9530_v16 = vpop.permute.xlu1 %2208 }
 0x345   : > { %16072 = vst [vmem:[#allocation160_spill] sm:$0xff] %v9530_v16  ;;  %v9534_v53 = vpop.permute.xlu0 %2193 }
 0x346   : > { %16073 = vst [vmem:[#allocation161_spill] sm:$0xff] %v9534_v53  ;;  %2489 = vbcast.lane.b32.xlu0 %v2487_v30, 256 }
 0x348   : > { %2512 = vbcast.lane.b32.xlu1 %v2506_v58, 264  ;;  %v9536_v11 = vpop.permute.xlu1 %2216 }
 0x349   : > { %16074 = vst [vmem:[#allocation162_spill] sm:$0xff] %v9536_v11  ;;  %v9538_v7 = vpop.permute.xlu0 %2204 }
 0x34a   : > { %16075 = vst [vmem:[#allocation163_spill] sm:$0xff] %v9538_v7  ;;  %2497 = vbcast.lane.b32.xlu0 %v2487_v30, 272  ;;  %v2544_v30 = vrot.slane %v9520_v25, %v9040_v14 }
 0x34c   : > { %2520 = vbcast.lane.b32.xlu1 %v2506_v58, 280  ;;  %v9540_v51 = vpop.permute.xlu1 %2227 }
 0x34d   : > { %16076 = vst [vmem:[#allocation164_spill] sm:$0xff] %v9540_v51  ;;  %v9544_v21 = vpop.permute.xlu0 %2212 }
 0x34e   : > { %16077 = vst [vmem:[#allocation165_spill] sm:$0xff] %v9544_v21  ;;  %2508 = vbcast.lane.b32.xlu0 %v2506_v58, 256 }
 0x350   : > { %2531 = vbcast.lane.b32.xlu1 %v2525_v8, 264  ;;  %v9546_v16 = vpop.permute.xlu1 %2235 }
 0x351   : > { %16078 = vst [vmem:[#allocation166_spill] sm:$0xff] %v9546_v16  ;;  %v9548_v53 = vpop.permute.xlu0 %2223 }
 0x352   : > { %16079 = vst [vmem:[#allocation167_spill] sm:$0xff] %v9548_v53  ;;  %2516 = vbcast.lane.b32.xlu0 %v2506_v58, 272  ;;  %v2563_v58 = vrot.slane %v9520_v25, %v9044_v18 }
 0x354   : > { %2539 = vbcast.lane.b32.xlu1 %v2525_v8, 280  ;;  %v9550_v11 = vpop.permute.xlu1 %2246 }
 0x355   : > { %16080 = vst [vmem:[#allocation168_spill] sm:$0xff] %v9550_v11  ;;  %v9554_v7 = vpop.permute.xlu0 %2231 }
 0x356   : > { %16081 = vst [vmem:[#allocation169_spill] sm:$0xff] %v9554_v7  ;;  %2527 = vbcast.lane.b32.xlu0 %v2525_v8, 256 }
 0x358   : > { %2550 = vbcast.lane.b32.xlu1 %v2544_v30, 264  ;;  %v9556_v51 = vpop.permute.xlu1 %2254 }
 0x359   : > { %16082 = vst [vmem:[#allocation170_spill] sm:$0xff] %v9556_v51  ;;  %v9558_v21 = vpop.permute.xlu0 %2242 }
 0x35a   : > { %16083 = vst [vmem:[#allocation171_spill] sm:$0xff] %v9558_v21  ;;  %2535 = vbcast.lane.b32.xlu0 %v2525_v8, 272  ;;  %v2582_v8 = vrot.slane %v9520_v25, %v9048_v20 }
 0x35c   : > { %2558 = vbcast.lane.b32.xlu1 %v2544_v30, 280  ;;  %v9560_v16 = vpop.permute.xlu1 %2265 }
 0x35d   : > { %16084 = vst [vmem:[#allocation172_spill] sm:$0xff] %v9560_v16  ;;  %v9564_v53 = vpop.permute.xlu0 %2250 }
 0x35e   : > { %16085 = vst [vmem:[#allocation173_spill] sm:$0xff] %v9564_v53  ;;  %2546 = vbcast.lane.b32.xlu0 %v2544_v30, 256 }
 0x360   : > { %2569 = vbcast.lane.b32.xlu1 %v2563_v58, 264  ;;  %v9566_v11 = vpop.permute.xlu1 %2273 }
 0x361   : > { %16086 = vst [vmem:[#allocation174_spill] sm:$0xff] %v9566_v11  ;;  %v9568_v7 = vpop.permute.xlu0 %2261 }
 0x362   : > { %16087 = vst [vmem:[#allocation175_spill] sm:$0xff] %v9568_v7  ;;  %2554 = vbcast.lane.b32.xlu0 %v2544_v30, 272  ;;  %v2601_v30 = vrot.slane %v9520_v25, %v9052_v22 }
 0x364   : > { %2577 = vbcast.lane.b32.xlu1 %v2563_v58, 280  ;;  %v9570_v51 = vpop.permute.xlu1 %2284 }
 0x365   : > { %16088 = vst [vmem:[#allocation176_spill] sm:$0xff] %v9570_v51  ;;  %v9574_v21 = vpop.permute.xlu0 %2269 }
 0x366   : > { %16089 = vst [vmem:[#allocation177_spill] sm:$0xff] %v9574_v21  ;;  %2565 = vbcast.lane.b32.xlu0 %v2563_v58, 256 }
 0x368   : > { %2588 = vbcast.lane.b32.xlu1 %v2582_v8, 264  ;;  %v9576_v16 = vpop.permute.xlu1 %2292 }
 0x369   : > { %16090 = vst [vmem:[#allocation178_spill] sm:$0xff] %v9576_v16  ;;  %v9578_v53 = vpop.permute.xlu0 %2280 }
 0x36a   : > { %16091 = vst [vmem:[#allocation179_spill] sm:$0xff] %v9578_v53  ;;  %2573 = vbcast.lane.b32.xlu0 %v2563_v58, 272  ;;  %v2620_v58 = vrot.slane %v9520_v25, %v9056_v24 }
 0x36c   : > { %2596 = vbcast.lane.b32.xlu1 %v2582_v8, 280  ;;  %v9580_v11 = vpop.permute.xlu1 %2303 }
 0x36d   : > { %16092 = vst [vmem:[#allocation180_spill] sm:$0xff] %v9580_v11  ;;  %v9584_v7 = vpop.permute.xlu0 %2288 }
 0x36e   : > { %16093 = vst [vmem:[#allocation181_spill] sm:$0xff] %v9584_v7  ;;  %2584 = vbcast.lane.b32.xlu0 %v2582_v8, 256 }
 0x370   : > { %2607 = vbcast.lane.b32.xlu1 %v2601_v30, 264  ;;  %v9586_v51 = vpop.permute.xlu1 %2311 }
 0x371   : > { %16094 = vst [vmem:[#allocation182_spill] sm:$0xff] %v9586_v51  ;;  %v9588_v21 = vpop.permute.xlu0 %2299 }
 0x372   : > { %16095 = vst [vmem:[#allocation183_spill] sm:$0xff] %v9588_v21  ;;  %2592 = vbcast.lane.b32.xlu0 %v2582_v8, 272  ;;  %v9602_v21 = vld [vmem:[#allocation5 + $0x40] sm:$0xff] }
 0x373   : > { %v2639_v8 = vrot.slane %v9602_v21, %v9019_v0 }
 0x374   : > { %2615 = vbcast.lane.b32.xlu1 %v2601_v30, 280  ;;  %v9590_v16 = vpop.permute.xlu1 %2322 }
 0x375   : > { %16096 = vst [vmem:[#allocation184_spill] sm:$0xff] %v9590_v16  ;;  %v9594_v53 = vpop.permute.xlu0 %2307 }
 0x376   : > { %16097 = vst [vmem:[#allocation185_spill] sm:$0xff] %v9594_v53  ;;  %2603 = vbcast.lane.b32.xlu0 %v2601_v30, 256 }
 0x378   : > { %2626 = vbcast.lane.b32.xlu1 %v2620_v58, 264  ;;  %v9596_v11 = vpop.permute.xlu1 %2330 }
 0x379   : > { %16098 = vst [vmem:[#allocation186_spill] sm:$0xff] %v9596_v11  ;;  %v9598_v7 = vpop.permute.xlu0 %2318 }
 0x37a   : > { %16099 = vst [vmem:[#allocation187_spill] sm:$0xff] %v9598_v7  ;;  %2611 = vbcast.lane.b32.xlu0 %v2601_v30, 272  ;;  %v2658_v30 = vrot.slane %v9602_v21, %v9032_v9 }
 0x37c   : > { %2634 = vbcast.lane.b32.xlu1 %v2620_v58, 280  ;;  %v9600_v51 = vpop.permute.xlu1 %2341 }
 0x37d   : > { %16100 = vst [vmem:[#allocation188_spill] sm:$0xff] %v9600_v51  ;;  %v9606_v16 = vpop.permute.xlu0 %2326 }
 0x37e   : > { %16101 = vst [vmem:[#allocation189_spill] sm:$0xff] %v9606_v16  ;;  %2622 = vbcast.lane.b32.xlu0 %v2620_v58, 256 }
 0x380   : > { %2645 = vbcast.lane.b32.xlu1 %v2639_v8, 264  ;;  %v9608_v25 = vpop.permute.xlu1 %2349 }
 0x381   : > { %16102 = vst [vmem:[#allocation190_spill] sm:$0xff] %v9608_v25  ;;  %v9610_v53 = vpop.permute.xlu0 %2337 }
 0x382   : > { %16103 = vst [vmem:[#allocation191_spill] sm:$0xff] %v9610_v53  ;;  %2630 = vbcast.lane.b32.xlu0 %v2620_v58, 272  ;;  %v2677_v58 = vrot.slane %v9602_v21, %v9036_v12 }
 0x384   : > { %2653 = vbcast.lane.b32.xlu1 %v2639_v8, 280  ;;  %v9612_v7 = vpop.permute.xlu1 %2360 }
 0x385   : > { %16104 = vst [vmem:[#allocation192_spill] sm:$0xff] %v9612_v7  ;;  %v9616_v51 = vpop.permute.xlu0 %2345 }
 0x386   : > { %16105 = vst [vmem:[#allocation193_spill] sm:$0xff] %v9616_v51  ;;  %2641 = vbcast.lane.b32.xlu0 %v2639_v8, 256 }
 0x388   : > { %2664 = vbcast.lane.b32.xlu1 %v2658_v30, 264  ;;  %v9618_v11 = vpop.permute.xlu1 %2368 }
 0x389   : > { %16106 = vst [vmem:[#allocation194_spill] sm:$0xff] %v9618_v11  ;;  %v9620_v16 = vpop.permute.xlu0 %2356 }
 0x38a   : > { %16107 = vst [vmem:[#allocation195_spill] sm:$0xff] %v9620_v16  ;;  %2649 = vbcast.lane.b32.xlu0 %v2639_v8, 272  ;;  %v2696_v8 = vrot.slane %v9602_v21, %v9040_v14 }
 0x38c   : > { %2672 = vbcast.lane.b32.xlu1 %v2658_v30, 280  ;;  %v9622_v25 = vpop.permute.xlu1 %2379 }
 0x38d   : > { %16108 = vst [vmem:[#allocation196_spill] sm:$0xff] %v9622_v25  ;;  %v9626_v53 = vpop.permute.xlu0 %2364 }
 0x38e   : > { %16109 = vst [vmem:[#allocation197_spill] sm:$0xff] %v9626_v53  ;;  %2660 = vbcast.lane.b32.xlu0 %v2658_v30, 256 }
 0x390   : > { %2683 = vbcast.lane.b32.xlu1 %v2677_v58, 264  ;;  %v9628_v7 = vpop.permute.xlu1 %2387 }
 0x391   : > { %16110 = vst [vmem:[#allocation198_spill] sm:$0xff] %v9628_v7  ;;  %v9630_v51 = vpop.permute.xlu0 %2375 }
 0x392   : > { %16111 = vst [vmem:[#allocation199_spill] sm:$0xff] %v9630_v51  ;;  %2668 = vbcast.lane.b32.xlu0 %v2658_v30, 272  ;;  %v2715_v30 = vrot.slane %v9602_v21, %v9044_v18 }
 0x394   : > { %2691 = vbcast.lane.b32.xlu1 %v2677_v58, 280  ;;  %v9632_v11 = vpop.permute.xlu1 %2398 }
 0x395   : > { %16112 = vst [vmem:[#allocation200_spill] sm:$0xff] %v9632_v11  ;;  %v9636_v16 = vpop.permute.xlu0 %2383 }
 0x396   : > { %16113 = vst [vmem:[#allocation201_spill] sm:$0xff] %v9636_v16  ;;  %2679 = vbcast.lane.b32.xlu0 %v2677_v58, 256 }
 0x398   : > { %2702 = vbcast.lane.b32.xlu1 %v2696_v8, 264  ;;  %v9638_v25 = vpop.permute.xlu1 %2406 }
 0x399   : > { %16114 = vst [vmem:[#allocation202_spill] sm:$0xff] %v9638_v25  ;;  %v9640_v53 = vpop.permute.xlu0 %2394 }
 0x39a   : > { %16115 = vst [vmem:[#allocation203_spill] sm:$0xff] %v9640_v53  ;;  %2687 = vbcast.lane.b32.xlu0 %v2677_v58, 272  ;;  %v2734_v58 = vrot.slane %v9602_v21, %v9048_v20 }
 0x39c   : > { %2710 = vbcast.lane.b32.xlu1 %v2696_v8, 280  ;;  %v9642_v7 = vpop.permute.xlu1 %2417 }
 0x39d   : > { %16116 = vst [vmem:[#allocation204_spill] sm:$0xff] %v9642_v7  ;;  %v9646_v51 = vpop.permute.xlu0 %2402 }
 0x39e   : > { %16117 = vst [vmem:[#allocation205_spill] sm:$0xff] %v9646_v51  ;;  %2698 = vbcast.lane.b32.xlu0 %v2696_v8, 256 }
 0x3a0   : > { %2721 = vbcast.lane.b32.xlu1 %v2715_v30, 264  ;;  %v9648_v11 = vpop.permute.xlu1 %2425 }
 0x3a1   : > { %16118 = vst [vmem:[#allocation206_spill] sm:$0xff] %v9648_v11  ;;  %v9650_v16 = vpop.permute.xlu0 %2413 }
 0x3a2   : > { %16119 = vst [vmem:[#allocation207_spill] sm:$0xff] %v9650_v16  ;;  %2706 = vbcast.lane.b32.xlu0 %v2696_v8, 272  ;;  %v2753_v8 = vrot.slane %v9602_v21, %v9052_v22 }
 0x3a4   : > { %2729 = vbcast.lane.b32.xlu1 %v2715_v30, 280  ;;  %v9652_v25 = vpop.permute.xlu1 %2436 }
 0x3a5   : > { %16120 = vst [vmem:[#allocation208_spill] sm:$0xff] %v9652_v25  ;;  %v9656_v53 = vpop.permute.xlu0 %2421 }
 0x3a6   : > { %16121 = vst [vmem:[#allocation209_spill] sm:$0xff] %v9656_v53  ;;  %2717 = vbcast.lane.b32.xlu0 %v2715_v30, 256 }
 0x3a8   : > { %2740 = vbcast.lane.b32.xlu1 %v2734_v58, 264  ;;  %v9658_v7 = vpop.permute.xlu1 %2444 }
 0x3a9   : > { %16122 = vst [vmem:[#allocation210_spill] sm:$0xff] %v9658_v7  ;;  %v9660_v51 = vpop.permute.xlu0 %2432 }
 0x3aa   : > { %16123 = vst [vmem:[#allocation211_spill] sm:$0xff] %v9660_v51  ;;  %2725 = vbcast.lane.b32.xlu0 %v2715_v30, 272  ;;  %v2772_v30 = vrot.slane %v9602_v21, %v9056_v24 }
 0x3ac   : > { %2748 = vbcast.lane.b32.xlu1 %v2734_v58, 280  ;;  %v9662_v11 = vpop.permute.xlu1 %2455 }
 0x3ad   : > { %16124 = vst [vmem:[#allocation212_spill] sm:$0xff] %v9662_v11  ;;  %v9666_v16 = vpop.permute.xlu0 %2440 }
 0x3ae   : > { %16125 = vst [vmem:[#allocation213_spill] sm:$0xff] %v9666_v16  ;;  %2736 = vbcast.lane.b32.xlu0 %v2734_v58, 256 }
 0x3b0   : > { %2759 = vbcast.lane.b32.xlu1 %v2753_v8, 264  ;;  %v9668_v25 = vpop.permute.xlu1 %2463 }
 0x3b1   : > { %16126 = vst [vmem:[#allocation214_spill] sm:$0xff] %v9668_v25  ;;  %v9670_v53 = vpop.permute.xlu0 %2451 }
 0x3b2   : > { %16127 = vst [vmem:[#allocation215_spill] sm:$0xff] %v9670_v53  ;;  %2744 = vbcast.lane.b32.xlu0 %v2734_v58, 272  ;;  %v9684_v53 = vld [vmem:[#allocation5 + $0x48] sm:$0xff] }
 0x3b3   : > { %v2791_v58 = vrot.slane %v9684_v53, %v9019_v0 }
 0x3b4   : > { %2767 = vbcast.lane.b32.xlu1 %v2753_v8, 280  ;;  %v9672_v7 = vpop.permute.xlu1 %2474 }
 0x3b5   : > { %16128 = vst [vmem:[#allocation216_spill] sm:$0xff] %v9672_v7  ;;  %v9676_v51 = vpop.permute.xlu0 %2459 }
 0x3b6   : > { %16129 = vst [vmem:[#allocation217_spill] sm:$0xff] %v9676_v51  ;;  %2755 = vbcast.lane.b32.xlu0 %v2753_v8, 256 }
 0x3b8   : > { %2778 = vbcast.lane.b32.xlu1 %v2772_v30, 264  ;;  %v9678_v11 = vpop.permute.xlu1 %2482 }
 0x3b9   : > { %16130 = vst [vmem:[#allocation218_spill] sm:$0xff] %v9678_v11  ;;  %v9680_v16 = vpop.permute.xlu0 %2470 }
 0x3ba   : > { %16131 = vst [vmem:[#allocation219_spill] sm:$0xff] %v9680_v16  ;;  %2763 = vbcast.lane.b32.xlu0 %v2753_v8, 272  ;;  %v2810_v8 = vrot.slane %v9684_v53, %v9032_v9 }
 0x3bc   : > { %2786 = vbcast.lane.b32.xlu1 %v2772_v30, 280  ;;  %v9682_v25 = vpop.permute.xlu1 %2493 }
 0x3bd   : > { %16132 = vst [vmem:[#allocation220_spill] sm:$0xff] %v9682_v25  ;;  %v9688_v7 = vpop.permute.xlu0 %2478 }
 0x3be   : > { %16133 = vst [vmem:[#allocation221_spill] sm:$0xff] %v9688_v7  ;;  %2774 = vbcast.lane.b32.xlu0 %v2772_v30, 256 }
 0x3c0   : > { %2797 = vbcast.lane.b32.xlu1 %v2791_v58, 264  ;;  %v9690_v21 = vpop.permute.xlu1 %2501 }
 0x3c1   : > { %16134 = vst [vmem:[#allocation222_spill] sm:$0xff] %v9690_v21  ;;  %v9692_v51 = vpop.permute.xlu0 %2489 }
 0x3c2   : > { %16135 = vst [vmem:[#allocation223_spill] sm:$0xff] %v9692_v51  ;;  %2782 = vbcast.lane.b32.xlu0 %v2772_v30, 272  ;;  %v2829_v30 = vrot.slane %v9684_v53, %v9036_v12 }
 0x3c4   : > { %2805 = vbcast.lane.b32.xlu1 %v2791_v58, 280  ;;  %v9694_v16 = vpop.permute.xlu1 %2512 }
 0x3c5   : > { %16136 = vst [vmem:[#allocation224_spill] sm:$0xff] %v9694_v16  ;;  %v9698_v25 = vpop.permute.xlu0 %2497 }
 0x3c6   : > { %16137 = vst [vmem:[#allocation225_spill] sm:$0xff] %v9698_v25  ;;  %2793 = vbcast.lane.b32.xlu0 %v2791_v58, 256 }
 0x3c8   : > { %2816 = vbcast.lane.b32.xlu1 %v2810_v8, 264  ;;  %v9700_v11 = vpop.permute.xlu1 %2520 }
 0x3c9   : > { %16138 = vst [vmem:[#allocation226_spill] sm:$0xff] %v9700_v11  ;;  %v9702_v7 = vpop.permute.xlu0 %2508 }
 0x3ca   : > { %16139 = vst [vmem:[#allocation227_spill] sm:$0xff] %v9702_v7  ;;  %2801 = vbcast.lane.b32.xlu0 %v2791_v58, 272  ;;  %v2848_v58 = vrot.slane %v9684_v53, %v9040_v14 }
 0x3cc   : > { %2824 = vbcast.lane.b32.xlu1 %v2810_v8, 280  ;;  %v9704_v21 = vpop.permute.xlu1 %2531 }
 0x3cd   : > { %16140 = vst [vmem:[#allocation228_spill] sm:$0xff] %v9704_v21  ;;  %v9708_v51 = vpop.permute.xlu0 %2516 }
 0x3ce   : > { %16141 = vst [vmem:[#allocation229_spill] sm:$0xff] %v9708_v51  ;;  %2812 = vbcast.lane.b32.xlu0 %v2810_v8, 256 }
 0x3d0   : > { %2835 = vbcast.lane.b32.xlu1 %v2829_v30, 264  ;;  %v9710_v16 = vpop.permute.xlu1 %2539 }
 0x3d1   : > { %16142 = vst [vmem:[#allocation230_spill] sm:$0xff] %v9710_v16  ;;  %v9712_v25 = vpop.permute.xlu0 %2527 }
 0x3d2   : > { %16143 = vst [vmem:[#allocation231_spill] sm:$0xff] %v9712_v25  ;;  %2820 = vbcast.lane.b32.xlu0 %v2810_v8, 272  ;;  %v2867_v8 = vrot.slane %v9684_v53, %v9044_v18 }
 0x3d4   : > { %2843 = vbcast.lane.b32.xlu1 %v2829_v30, 280  ;;  %v9714_v11 = vpop.permute.xlu1 %2550 }
 0x3d5   : > { %16144 = vst [vmem:[#allocation232_spill] sm:$0xff] %v9714_v11  ;;  %v9718_v7 = vpop.permute.xlu0 %2535 }
 0x3d6   : > { %16145 = vst [vmem:[#allocation233_spill] sm:$0xff] %v9718_v7  ;;  %2831 = vbcast.lane.b32.xlu0 %v2829_v30, 256 }
 0x3d8   : > { %2854 = vbcast.lane.b32.xlu1 %v2848_v58, 264  ;;  %v9720_v21 = vpop.permute.xlu1 %2558 }
 0x3d9   : > { %16146 = vst [vmem:[#allocation234_spill] sm:$0xff] %v9720_v21  ;;  %v9722_v51 = vpop.permute.xlu0 %2546 }
 0x3da   : > { %16147 = vst [vmem:[#allocation235_spill] sm:$0xff] %v9722_v51  ;;  %2839 = vbcast.lane.b32.xlu0 %v2829_v30, 272  ;;  %v2886_v30 = vrot.slane %v9684_v53, %v9048_v20 }
 0x3dc   : > { %2862 = vbcast.lane.b32.xlu1 %v2848_v58, 280  ;;  %v9724_v16 = vpop.permute.xlu1 %2569 }
 0x3dd   : > { %16148 = vst [vmem:[#allocation236_spill] sm:$0xff] %v9724_v16  ;;  %v9728_v25 = vpop.permute.xlu0 %2554 }
 0x3de   : > { %16149 = vst [vmem:[#allocation237_spill] sm:$0xff] %v9728_v25  ;;  %2850 = vbcast.lane.b32.xlu0 %v2848_v58, 256 }
 0x3e0   : > { %2873 = vbcast.lane.b32.xlu1 %v2867_v8, 264  ;;  %v9730_v11 = vpop.permute.xlu1 %2577 }
 0x3e1   : > { %16150 = vst [vmem:[#allocation238_spill] sm:$0xff] %v9730_v11  ;;  %v9732_v7 = vpop.permute.xlu0 %2565 }
 0x3e2   : > { %16151 = vst [vmem:[#allocation239_spill] sm:$0xff] %v9732_v7  ;;  %2858 = vbcast.lane.b32.xlu0 %v2848_v58, 272  ;;  %v2905_v58 = vrot.slane %v9684_v53, %v9052_v22 }
 0x3e4   : > { %2881 = vbcast.lane.b32.xlu1 %v2867_v8, 280  ;;  %v9734_v21 = vpop.permute.xlu1 %2588 }
 0x3e5   : > { %16152 = vst [vmem:[#allocation240_spill] sm:$0xff] %v9734_v21  ;;  %v9738_v51 = vpop.permute.xlu0 %2573 }
 0x3e6   : > { %16153 = vst [vmem:[#allocation241_spill] sm:$0xff] %v9738_v51  ;;  %2869 = vbcast.lane.b32.xlu0 %v2867_v8, 256 }
 0x3e8   : > { %2892 = vbcast.lane.b32.xlu1 %v2886_v30, 264  ;;  %v9740_v16 = vpop.permute.xlu1 %2596 }
 0x3e9   : > { %16154 = vst [vmem:[#allocation242_spill] sm:$0xff] %v9740_v16  ;;  %v9742_v25 = vpop.permute.xlu0 %2584 }
 0x3ea   : > { %16155 = vst [vmem:[#allocation243_spill] sm:$0xff] %v9742_v25  ;;  %2877 = vbcast.lane.b32.xlu0 %v2867_v8, 272  ;;  %v2924_v8 = vrot.slane %v9684_v53, %v9056_v24 }
 0x3ec   : > { %2900 = vbcast.lane.b32.xlu1 %v2886_v30, 280  ;;  %v9744_v11 = vpop.permute.xlu1 %2607 }
 0x3ed   : > { %16156 = vst [vmem:[#allocation244_spill] sm:$0xff] %v9744_v11  ;;  %v9748_v7 = vpop.permute.xlu0 %2592 }
 0x3ee   : > { %16157 = vst [vmem:[#allocation245_spill] sm:$0xff] %v9748_v7  ;;  %2888 = vbcast.lane.b32.xlu0 %v2886_v30, 256 }
 0x3f0   : > { %2911 = vbcast.lane.b32.xlu1 %v2905_v58, 264  ;;  %v9750_v21 = vpop.permute.xlu1 %2615 }
 0x3f1   : > { %16158 = vst [vmem:[#allocation246_spill] sm:$0xff] %v9750_v21  ;;  %v9752_v51 = vpop.permute.xlu0 %2603 }
 0x3f2   : > { %16159 = vst [vmem:[#allocation247_spill] sm:$0xff] %v9752_v51  ;;  %2896 = vbcast.lane.b32.xlu0 %v2886_v30, 272  ;;  %v9766_v51 = vld [vmem:[#allocation5 + $0x50] sm:$0xff] }
 0x3f3   : > { %v2943_v30 = vrot.slane %v9766_v51, %v9019_v0 }
 0x3f4   : > { %2919 = vbcast.lane.b32.xlu1 %v2905_v58, 280  ;;  %v9754_v16 = vpop.permute.xlu1 %2626 }
 0x3f5   : > { %16160 = vst [vmem:[#allocation248_spill] sm:$0xff] %v9754_v16  ;;  %v9758_v25 = vpop.permute.xlu0 %2611 }
 0x3f6   : > { %16161 = vst [vmem:[#allocation249_spill] sm:$0xff] %v9758_v25  ;;  %2907 = vbcast.lane.b32.xlu0 %v2905_v58, 256 }
 0x3f8   : > { %2930 = vbcast.lane.b32.xlu1 %v2924_v8, 264  ;;  %v9760_v11 = vpop.permute.xlu1 %2634 }
 0x3f9   : > { %16162 = vst [vmem:[#allocation250_spill] sm:$0xff] %v9760_v11  ;;  %v9762_v7 = vpop.permute.xlu0 %2622 }
 0x3fa   : > { %16163 = vst [vmem:[#allocation251_spill] sm:$0xff] %v9762_v7  ;;  %2915 = vbcast.lane.b32.xlu0 %v2905_v58, 272  ;;  %v2962_v58 = vrot.slane %v9766_v51, %v9032_v9 }
 0x3fc   : > { %2938 = vbcast.lane.b32.xlu1 %v2924_v8, 280  ;;  %v9764_v21 = vpop.permute.xlu1 %2645 }
 0x3fd   : > { %16164 = vst [vmem:[#allocation252_spill] sm:$0xff] %v9764_v21  ;;  %v9770_v16 = vpop.permute.xlu0 %2630 }
 0x3fe   : > { %16165 = vst [vmem:[#allocation253_spill] sm:$0xff] %v9770_v16  ;;  %2926 = vbcast.lane.b32.xlu0 %v2924_v8, 256 }
 0x400   : > { %2949 = vbcast.lane.b32.xlu1 %v2943_v30, 264  ;;  %v9772_v53 = vpop.permute.xlu1 %2653 }
 0x401   : > { %16166 = vst [vmem:[#allocation254_spill] sm:$0xff] %v9772_v53  ;;  %v9774_v25 = vpop.permute.xlu0 %2641 }
 0x402   : > { %16167 = vst [vmem:[#allocation255_spill] sm:$0xff] %v9774_v25  ;;  %2934 = vbcast.lane.b32.xlu0 %v2924_v8, 272  ;;  %v2981_v8 = vrot.slane %v9766_v51, %v9036_v12 }
 0x404   : > { %2957 = vbcast.lane.b32.xlu1 %v2943_v30, 280  ;;  %v9776_v7 = vpop.permute.xlu1 %2664 }
 0x405   : > { %16168 = vst [vmem:[#allocation256_spill] sm:$0xff] %v9776_v7  ;;  %v9780_v21 = vpop.permute.xlu0 %2649 }
 0x406   : > { %16169 = vst [vmem:[#allocation257_spill] sm:$0xff] %v9780_v21  ;;  %2945 = vbcast.lane.b32.xlu0 %v2943_v30, 256 }
 0x408   : > { %2968 = vbcast.lane.b32.xlu1 %v2962_v58, 264  ;;  %v9782_v11 = vpop.permute.xlu1 %2672 }
 0x409   : > { %16170 = vst [vmem:[#allocation258_spill] sm:$0xff] %v9782_v11  ;;  %v9784_v16 = vpop.permute.xlu0 %2660 }
 0x40a   : > { %16171 = vst [vmem:[#allocation259_spill] sm:$0xff] %v9784_v16  ;;  %2953 = vbcast.lane.b32.xlu0 %v2943_v30, 272  ;;  %v3000_v30 = vrot.slane %v9766_v51, %v9040_v14 }
 0x40c   : > { %2976 = vbcast.lane.b32.xlu1 %v2962_v58, 280  ;;  %v9786_v53 = vpop.permute.xlu1 %2683 }
 0x40d   : > { %16172 = vst [vmem:[#allocation260_spill] sm:$0xff] %v9786_v53  ;;  %v9790_v25 = vpop.permute.xlu0 %2668 }
 0x40e   : > { %16173 = vst [vmem:[#allocation261_spill] sm:$0xff] %v9790_v25  ;;  %2964 = vbcast.lane.b32.xlu0 %v2962_v58, 256 }
 0x410   : > { %2987 = vbcast.lane.b32.xlu1 %v2981_v8, 264  ;;  %v9792_v7 = vpop.permute.xlu1 %2691 }
 0x411   : > { %16174 = vst [vmem:[#allocation262_spill] sm:$0xff] %v9792_v7  ;;  %v9794_v21 = vpop.permute.xlu0 %2679 }
 0x412   : > { %16175 = vst [vmem:[#allocation263_spill] sm:$0xff] %v9794_v21  ;;  %2972 = vbcast.lane.b32.xlu0 %v2962_v58, 272  ;;  %v3019_v58 = vrot.slane %v9766_v51, %v9044_v18 }
 0x414   : > { %2995 = vbcast.lane.b32.xlu1 %v2981_v8, 280  ;;  %v9796_v11 = vpop.permute.xlu1 %2702 }
 0x415   : > { %16176 = vst [vmem:[#allocation264_spill] sm:$0xff] %v9796_v11  ;;  %v9800_v16 = vpop.permute.xlu0 %2687 }
 0x416   : > { %16177 = vst [vmem:[#allocation265_spill] sm:$0xff] %v9800_v16  ;;  %2983 = vbcast.lane.b32.xlu0 %v2981_v8, 256 }
 0x418   : > { %3006 = vbcast.lane.b32.xlu1 %v3000_v30, 264  ;;  %v9802_v53 = vpop.permute.xlu1 %2710 }
 0x419   : > { %16178 = vst [vmem:[#allocation266_spill] sm:$0xff] %v9802_v53  ;;  %v9804_v25 = vpop.permute.xlu0 %2698 }
 0x41a   : > { %16179 = vst [vmem:[#allocation267_spill] sm:$0xff] %v9804_v25  ;;  %2991 = vbcast.lane.b32.xlu0 %v2981_v8, 272  ;;  %v3038_v8 = vrot.slane %v9766_v51, %v9048_v20 }
 0x41c   : > { %3014 = vbcast.lane.b32.xlu1 %v3000_v30, 280  ;;  %v9806_v7 = vpop.permute.xlu1 %2721 }
 0x41d   : > { %16180 = vst [vmem:[#allocation268_spill] sm:$0xff] %v9806_v7  ;;  %v9810_v21 = vpop.permute.xlu0 %2706 }
 0x41e   : > { %16181 = vst [vmem:[#allocation269_spill] sm:$0xff] %v9810_v21  ;;  %3002 = vbcast.lane.b32.xlu0 %v3000_v30, 256 }
 0x420   : > { %3025 = vbcast.lane.b32.xlu1 %v3019_v58, 264  ;;  %v9812_v11 = vpop.permute.xlu1 %2729 }
 0x421   : > { %16182 = vst [vmem:[#allocation270_spill] sm:$0xff] %v9812_v11  ;;  %v9814_v16 = vpop.permute.xlu0 %2717 }
 0x422   : > { %16183 = vst [vmem:[#allocation271_spill] sm:$0xff] %v9814_v16  ;;  %3010 = vbcast.lane.b32.xlu0 %v3000_v30, 272  ;;  %v3057_v30 = vrot.slane %v9766_v51, %v9052_v22 }
 0x424   : > { %3033 = vbcast.lane.b32.xlu1 %v3019_v58, 280  ;;  %v9816_v53 = vpop.permute.xlu1 %2740 }
 0x425   : > { %16184 = vst [vmem:[#allocation272_spill] sm:$0xff] %v9816_v53  ;;  %v9820_v25 = vpop.permute.xlu0 %2725 }
 0x426   : > { %16185 = vst [vmem:[#allocation273_spill] sm:$0xff] %v9820_v25  ;;  %3021 = vbcast.lane.b32.xlu0 %v3019_v58, 256 }
 0x428   : > { %3044 = vbcast.lane.b32.xlu1 %v3038_v8, 264  ;;  %v9822_v7 = vpop.permute.xlu1 %2748 }
 0x429   : > { %16186 = vst [vmem:[#allocation274_spill] sm:$0xff] %v9822_v7  ;;  %v9824_v21 = vpop.permute.xlu0 %2736 }
 0x42a   : > { %16187 = vst [vmem:[#allocation275_spill] sm:$0xff] %v9824_v21  ;;  %3029 = vbcast.lane.b32.xlu0 %v3019_v58, 272  ;;  %v3076_v58 = vrot.slane %v9766_v51, %v9056_v24  ;;  %v1276_v21 = vpop.f32.mrf.mxu1 }
 0x42c   : > { %3052 = vbcast.lane.b32.xlu1 %v3038_v8, 280  ;;  %v9826_v11 = vpop.permute.xlu1 %2759 }
 0x42d   : > { %16188 = vst [vmem:[#allocation276_spill] sm:$0xff] %v9826_v11  ;;  %v9830_v16 = vpop.permute.xlu0 %2744 }
 0x42e   : > { %16189 = vst [vmem:[#allocation277_spill] sm:$0xff] %v9830_v16  ;;  %3040 = vbcast.lane.b32.xlu0 %v3038_v8, 256 }
 0x430   : > { %3063 = vbcast.lane.b32.xlu1 %v3057_v30, 264  ;;  %v9832_v53 = vpop.permute.xlu1 %2767 }
 0x431   : > { %16190 = vst [vmem:[#allocation278_spill] sm:$0xff] %v9832_v53  ;;  %v9834_v25 = vpop.permute.xlu0 %2755  ;;  %v8234_v53 = vpop.f32.mrf.mxu1 }
 0x432   : > { %16191 = vst [vmem:[#allocation279_spill] sm:$0xff] %v9834_v25  ;;  %3048 = vbcast.lane.b32.xlu0 %v3038_v8, 272  ;;  %v9848_v25 = vld [vmem:[#allocation5 + $0x58] sm:$0xff] }
 0x434   : > { %3071 = vbcast.lane.b32.xlu1 %v3057_v30, 280  ;;  %v9836_v7 = vpop.permute.xlu1 %2778 }
 0x435   : > { %16192 = vst [vmem:[#allocation280_spill] sm:$0xff] %v9836_v7  ;;  %v9840_v11 = vpop.permute.xlu0 %2763  ;;  %v3095_v7 = vrot.slane %v9848_v25, %v9019_v0 }
 0x436   : > { %16193 = vst [vmem:[#allocation281_spill] sm:$0xff] %v9840_v11  ;;  %3059 = vbcast.lane.b32.xlu0 %v3057_v30, 256  ;;  %v1286_v11 = vpop.f32.mrf.mxu1 }
 0x438   : > { %3082 = vbcast.lane.b32.xlu1 %v3076_v58, 264  ;;  %v9842_v16 = vpop.permute.xlu1 %2786 }
 0x439   : > { %16194 = vst [vmem:[#allocation282_spill] sm:$0xff] %v9842_v16  ;;  %v9844_v49 = vpop.permute.xlu0 %2774  ;;  %v9857_v16 = vadd.f32 %v1276_v21, %v9116_v54 }
 0x43a   : > { %16195 = vst [vmem:[#allocation283_spill] sm:$0xff] %v9844_v49  ;;  %3067 = vbcast.lane.b32.xlu0 %v3057_v30, 272  ;;  %v9865_v49 = vadd.f32 %v1286_v11, %v9100_v46  ;;  %v9882_v11 = vadd.f32 %v8234_v53, %v9104_v48 }
 0x43b   : > { %16199 = vst [vmem:[#allocation287_spill] sm:$0xff] %v9857_v16 }
 0x43c   : > { %3090 = vbcast.lane.b32.xlu1 %v3076_v58, 280  ;;  %v9846_v8 = vpop.permute.xlu1 %2797  ;;  %16201 = vst [vmem:[#allocation289_spill] sm:$0xff] %v9865_v49  ;;  %16205 = vst [vmem:[#allocation293_spill] sm:$0xff] %v9882_v11 }
 0x43d   : > { %16196 = vst [vmem:[#allocation284_spill] sm:$0xff] %v9846_v8  ;;  %v9852_v51 = vpop.permute.xlu0 %2782  ;;  %v9862_v8 = vadd.f32 %v8231_v15, %v9120_v56  ;;  %v1408_v56 = vmul.f32 %v9112_v52, %v9865_v49  ;;  %v1409_v52 = vmul.f32 %v9118_v55, %v9882_v11 }
 0x43e   : > { %16197 = vst [vmem:[#allocation285_spill] sm:$0xff] %v9852_v51  ;;  %3078 = vbcast.lane.b32.xlu0 %v3076_v58, 256  ;;  %v3114_v51 = vrot.slane %v9848_v25, %v9032_v9 }
 0x43f   : > { %16200 = vst [vmem:[#allocation288_spill] sm:$0xff] %v9862_v8  ;;  %v1407_v21 = vmul.f32 %v9126_v59, %v9862_v8  ;;  %v3133_v59 = vrot.slane %v9848_v25, %v9036_v12 }
 0x440   : > { %3101 = vbcast.lane.b32.xlu1 %v3095_v7, 264  ;;  %v9854_v4 = vpop.permute.xlu1 %2805 }
 0x441   : > { %16198 = vst [vmem:[#allocation286_spill] sm:$0xff] %v9854_v4  ;;  %v9859_v30 = vpop.permute.xlu0 %2793  ;;  %v1406_v4 = vmul.f32 %v9108_v50, %v9857_v16 }
 0x442   : > { %3086 = vbcast.lane.b32.xlu0 %v3076_v58, 272 }
 0x443   : > { %v1410_v15 = vadd.f32 %v1407_v21, %v1406_v4  ;;  %v3152_v21 = vrot.slane %v9848_v25, %v9040_v14 }
 0x444   : > { %3109 = vbcast.lane.b32.xlu1 %v3095_v7, 280  ;;  %v9867_v0 = vpop.permute.xlu1 %2816 }
 0x445   : > { %16202 = vst [vmem:[#allocation290_spill] sm:$0xff] %v9867_v0  ;;  %v9873_v54 = vpop.permute.xlu0 %2801  ;;  %v1411_v50 = vadd.f32 %v1410_v15, %v1408_v56 }
 0x446   : > { %16203 = vst [vmem:[#allocation291_spill] sm:$0xff] %v9873_v54  ;;  %3097 = vbcast.lane.b32.xlu0 %v3095_v7, 256 }
 0x448   : > { %3120 = vbcast.lane.b32.xlu1 %v3114_v51, 264  ;;  %v9879_v46 = vpop.permute.xlu1 %2824 }
 0x449   : > { %16204 = vst [vmem:[#allocation292_spill] sm:$0xff] %v9879_v46  ;;  %v9884_v58 = vpop.permute.xlu0 %2812  ;;  %v1412_v46 = vadd.f32 %v1411_v50, %v1409_v52 }
 0x44a   : > { %16206 = vst [vmem:[#allocation294_spill] sm:$0xff] %v9884_v58  ;;  %3105 = vbcast.lane.b32.xlu0 %v3095_v7, 272  ;;  %v10027_v58 = vadd.f32 %v9136_v63, %v9865_v49  ;;  %v10041_v63 = vadd.f32 %v9148_v13, %v9882_v11  ;;  %v10060_v13 = vadd.f32 %v9158_v26, %v9882_v11  ;;  %v16251_v26 = vld [vmem:[#allocation20_spill] sm:$0xff] }
 0x44b   : > { %v1413_v7 = vrot.slane %v1412_v46, 4 }
 0x44c   : > { %3128 = vbcast.lane.b32.xlu1 %v3114_v51, 280  ;;  %v9886_v54 = vpop.permute.xlu1 %2835  ;;  %16228 = vst [vmem:[#allocation316_spill] sm:$0xff] %v10027_v58  ;;  %16230 = vst [vmem:[#allocation318_spill] sm:$0xff] %v10041_v63 }
 0x44d   : > { %16207 = vst [vmem:[#allocation295_spill] sm:$0xff] %v9886_v54  ;;  %v9892_v0 = vpop.permute.xlu0 %2820  ;;  %v1414_v55 = vadd.f32 %v1413_v7, %v1412_v46  ;;  %v8481_v46 = vld [vmem:[%s15926_s13 + $0x10] sm:$0xff]  ;;  %v9949_v54 = vmul.f32 0.2, %v9074_v33  ;;  %v9969_v33 = vmul.f32 0.2, %v9088_v40 }
 0x44e   : > { %16208 = vst [vmem:[#allocation296_spill] sm:$0xff] %v9892_v0  ;;  %3116 = vbcast.lane.b32.xlu0 %v3114_v51, 256  ;;  %v9922_v7 = vmul.f32 0.8, %v8481_v46  ;;  %v9940_v46 = vmul.f32 0.2, %v9066_v3 }
 0x44f   : > { %v1415_v52 = vrot.slane %v1414_v55, 2  ;;  %v9958_v3 = vmul.f32 0.2, %v9080_v36  ;;  %v9980_v36 = vmul.f32 0.2, %v9090_v41  ;;  %v10000_v41 = vadd.f32 %v9142_v6, %v9862_v8  ;;  %16234 = vst [vmem:[#allocation322_spill] sm:$0xff] %v10060_v13 }
 0x450   : > { %3139 = vbcast.lane.b32.xlu1 %v3133_v59, 264  ;;  %v9894_v48 = vpop.permute.xlu1 %2843  ;;  %v10021_v6 = vmul.f32 0.2, %v9102_v47 }
 0x451   : > { %16209 = vst [vmem:[#allocation297_spill] sm:$0xff] %v9894_v48  ;;  %v9896_v4 = vpop.permute.xlu0 %2831  ;;  %v9937_v48 = vmul.f32 0.2, %v9064_v29  ;;  %v1416_v0 = vadd.f32 %v1415_v52, %v1414_v55  ;;  %v9955_v29 = vmul.f32 0.2, %v9078_v35  ;;  %v9973_v52 = vadd.f32 %v9122_v57, %v9862_v8  ;;  %16225 = vst [vmem:[#allocation313_spill] sm:$0xff] %v10000_v41 }
 0x452   : > { %16210 = vst [vmem:[#allocation298_spill] sm:$0xff] %v9896_v4  ;;  %3124 = vbcast.lane.b32.xlu0 %v3114_v51, 272  ;;  %v9977_v35 = vadd.f32 %v9132_v61, %v9862_v8  ;;  %v9992_v57 = vadd.f32 %v9128_v1, %v9882_v11  ;;  %v9996_v61 = vadd.f32 %v9138_v2, %v9882_v11  ;;  %v10013_v1 = vmul.f32 0.2, %v9094_v43  ;;  %v16320_v41 = vld [vmem:[#allocation51_spill] sm:$0xff] }
 0x453   : > { %16219 = vst [vmem:[#allocation307_spill] sm:$0xff] %v9973_v52  ;;  %v1417_v40 = vrot.slane %v1416_v0, 1  ;;  %v10016_v2 = vmul.f32 0.2, %v9098_v45  ;;  %v10034_v45 = vadd.f32 %v9146_v10, %v9865_v49  ;;  %v10048_v43 = vadd.f32 %v9150_v17, %v9857_v16 }
 0x454   : > { %3147 = vbcast.lane.b32.xlu1 %v3133_v59, 280  ;;  %v9898_v53 = vpop.permute.xlu1 %2854  ;;  %16220 = vst [vmem:[#allocation308_spill] sm:$0xff] %v9977_v35  ;;  %16223 = vst [vmem:[#allocation311_spill] sm:$0xff] %v9992_v57  ;;  %v10056_v10 = vadd.f32 %v9156_v23, %v9865_v49  ;;  %v10067_v17 = vadd.f32 %v9160_v27, %v9857_v16  ;;  %v10075_v23 = vadd.f32 %v9166_v34, %v9865_v49  ;;  %v16245_v57 = vld [vmem:[#allocation19_spill] sm:$0xff]  ;;  %v16322_v35 = vld [vmem:[#allocation52_spill] sm:$0xff] }
 0x455   : > { %16211 = vst [vmem:[#allocation299_spill] sm:$0xff] %v9898_v53  ;;  %v9902_v56 = vpop.permute.xlu0 %2839  ;;  %v9912_v53 = vrot.slane %v9848_v25, %v9044_v18  ;;  %16224 = vst [vmem:[#allocation312_spill] sm:$0xff] %v9996_v61  ;;  %v1418_v47 = vadd.f32 %v1417_v40, %v1416_v0  ;;  %v10052_v0 = vadd.f32 %v9152_v19, %v9862_v8 }
 0x456   : > { %16212 = vst [vmem:[#allocation300_spill] sm:$0xff] %v9902_v56  ;;  %3135 = vbcast.lane.b32.xlu0 %v3133_v59, 256  ;;  %v8480_v56 = vld [vmem:[%s15926_s13] sm:$0xff]  ;;  %16229 = vst [vmem:[#allocation317_spill] sm:$0xff] %v10034_v45  ;;  %v10071_v19 = vadd.f32 %v9162_v28, %v9862_v8  ;;  %v10087_v27 = vadd.f32 %v9170_v44, %v9857_v16  ;;  %v10116_v58 = vadd.f32 %v16245_v57, %v9882_v11  ;;  %v16255_v45 = vld [vmem:[#allocation22_spill] sm:$0xff] }
 0x457   : > { %v9917_v4 = vmul.f32 0.8, %v8480_v56  ;;  %16231 = vst [vmem:[#allocation319_spill] sm:$0xff] %v10048_v43  ;;  %16232 = vst [vmem:[#allocation320_spill] sm:$0xff] %v10052_v0  ;;  %v16278_v0 = vld [vmem:[#allocation33_spill] sm:$0xff]  ;;  %v10348_v52 = vadd.f32 %v16322_v35, %v9862_v8  ;;  %v16331_v35 = vld [vmem:[#allocation56_spill] sm:$0xff] }
 0x458   : > { %3158 = vbcast.lane.b32.xlu1 %v3152_v21, 264  ;;  %v9904_v15 = vpop.permute.xlu1 %2862  ;;  %16233 = vst [vmem:[#allocation321_spill] sm:$0xff] %v10056_v10  ;;  %16235 = vst [vmem:[#allocation323_spill] sm:$0xff] %v10067_v17  ;;  %v16276_v17 = vld [vmem:[#allocation32_spill] sm:$0xff] }
 0x459   : > { %16213 = vst [vmem:[#allocation301_spill] sm:$0xff] %v9904_v15  ;;  %v9906_v50 = vpop.permute.xlu0 %2850  ;;  %v8483_v15 = vld [vmem:[%s15926_s13 + $0x8] sm:$0xff]  ;;  %16236 = vst [vmem:[#allocation324_spill] sm:$0xff] %v10071_v19  ;;  %v16287_v19 = vld [vmem:[#allocation37_spill] sm:$0xff] }
 0x45a   : > { %16214 = vst [vmem:[#allocation302_spill] sm:$0xff] %v9906_v50  ;;  %3143 = vbcast.lane.b32.xlu0 %v3133_v59, 272  ;;  %v9934_v56 = vmul.f32 0.8, %v8483_v15  ;;  %16237 = vst [vmem:[#allocation325_spill] sm:$0xff] %v10075_v23 }
 0x45b   : > { %16240 = vst [vmem:[#allocation328_spill] sm:$0xff] %v10087_v27  ;;  %16246 = vst [vmem:[#allocation19_spill] sm:$0xff] %v10116_v58 }
 0x45c   : > { %3166 = vbcast.lane.b32.xlu1 %v3152_v21, 280  ;;  %v9908_v51 = vpop.permute.xlu1 %2873  ;;  %16323 = vst [vmem:[#allocation52_spill] sm:$0xff] %v10348_v52 }
 0x45d   : > { %16215 = vst [vmem:[#allocation303_spill] sm:$0xff] %v9908_v51  ;;  %v9924_v59 = vpop.permute.xlu0 %2858  ;;  %v8482_v51 = vld [vmem:[%s15926_s13 + $0x18] sm:$0xff] }
 0x45e   : > { %16216 = vst [vmem:[#allocation304_spill] sm:$0xff] %v9924_v59  ;;  %v9929_v50 = vmul.f32 0.8, %v8482_v51  ;;  %3154 = vbcast.lane.b32.xlu0 %v3152_v21, 256  ;;  %v9943_v59 = vmul.f32 0.2, %v9070_v31 }
 0x45f   : > { %v9946_v51 = vmul.f32 0.2, %v9072_v32  ;;  %v9961_v31 = vmul.f32 0.2, %v9082_v37  ;;  %v9966_v32 = vmul.f32 0.2, %v9084_v38  ;;  %v9984_v37 = vadd.f32 %v9130_v60, %v9857_v16 }
 0x460   : > { %3177 = vbcast.lane.b32.xlu1 %v9912_v53, 264  ;;  %v9952_v15 = vpop.permute.xlu1 %2881  ;;  %v9988_v38 = vadd.f32 %v9140_v5, %v9857_v16  ;;  %v10007_v5 = vrot.slane %v9848_v25, %v9048_v20 }
 0x461   : > { %16217 = vst [vmem:[#allocation305_spill] sm:$0xff] %v9952_v15  ;;  %v9963_v55 = vpop.permute.xlu0 %2869  ;;  %16221 = vst [vmem:[#allocation309_spill] sm:$0xff] %v9984_v37  ;;  %v16241_v15 = vld [vmem:[#allocation17_spill] sm:$0xff] }
 0x462   : > { %16218 = vst [vmem:[#allocation306_spill] sm:$0xff] %v9963_v55  ;;  %3162 = vbcast.lane.b32.xlu0 %v3152_v21, 272  ;;  %16222 = vst [vmem:[#allocation310_spill] sm:$0xff] %v9988_v38  ;;  %v10010_v21 = vmul.f32 0.2, %v9092_v42  ;;  %v10092_v34 = vadd.f32 %v16241_v15, %v9862_v8  ;;  %v16253_v38 = vld [vmem:[#allocation21_spill] sm:$0xff] }
 0x463   : > { %v10148_v28 = vadd.f32 %v16253_v38, %v9862_v8  ;;  %v10167_v38 = vadd.f32 %v9192_v62, %v9862_v8  ;;  %v16270_v62 = vld [vmem:[#allocation29_spill] sm:$0xff] }
 0x464   : > { %3185 = vbcast.lane.b32.xlu1 %v9912_v53, 280  ;;  %v10003_v60 = vpop.permute.xlu1 %2892  ;;  %16242 = vst [vmem:[#allocation17_spill] sm:$0xff] %v10092_v34  ;;  %v16257_v34 = vld [vmem:[#allocation23_spill] sm:$0xff]  ;;  %v10188_v13 = vadd.f32 %v16270_v62, %v9865_v49  ;;  %v10207_v62 = vrot.slane %v9848_v25, %v9056_v24 }
 0x465   : > { %16226 = vst [vmem:[#allocation314_spill] sm:$0xff] %v10003_v60  ;;  %v10018_v55 = vpop.permute.xlu0 %2877  ;;  %v10083_v60 = vadd.f32 %v9168_v39, %v9882_v11  ;;  %v10103_v39 = vrot.slane %v9848_v25, %v9052_v22  ;;  %16254 = vst [vmem:[#allocation21_spill] sm:$0xff] %v10148_v28  ;;  %v10220_v25 = vadd.f32 %v16278_v0, %v9865_v49  ;;  %v10300_v28 = vld [vmem:[#allocation5 + $0x60] sm:$0xff] }
 0x466   : > { %16227 = vst [vmem:[#allocation315_spill] sm:$0xff] %v10018_v55  ;;  %3173 = vbcast.lane.b32.xlu0 %v9912_v53, 256  ;;  %v10079_v55 = vmul.f32 0.2, %v1418_v47  ;;  %16261 = vst [vmem:[#allocation333_spill] sm:$0xff] %v10167_v38 }
 0x467   : > { %16239 = vst [vmem:[#allocation327_spill] sm:$0xff] %v10083_v60  ;;  %v16262_v60 = vld [vmem:[#allocation25_spill] sm:$0xff]  ;;  %16271 = vst [vmem:[#allocation29_spill] sm:$0xff] %v10188_v13 }
 0x468   : > { %3196 = vbcast.lane.b32.xlu1 %v10007_v5, 264  ;;  %v10044_v42 = vpop.permute.xlu1 %2900  ;;  %16238 = vst [vmem:[#allocation326_spill] sm:$0xff] %v10079_v55  ;;  %v10123_v15 = vadd.f32 %v10079_v55, %v9958_v3  ;;  %v10136_v44 = vadd.f32 %v10079_v55, %v9946_v51  ;;  %v10140_v3 = vadd.f32 %v10079_v55, %v9937_v48  ;;  %v16266_v48 = vld [vmem:[#allocation27_spill] sm:$0xff]  ;;  %16279 = vst [vmem:[#allocation33_spill] sm:$0xff] %v10220_v25 }
 0x469   : > { %v10062_v40 = vpop.permute.xlu0 %2888  ;;  %v10156_v51 = vadd.f32 %v16257_v34, %v9882_v11  ;;  %v16264_v34 = vld [vmem:[#allocation26_spill] sm:$0xff]  ;;  %v10180_v58 = vadd.f32 %v16266_v48, %v9857_v16  ;;  %v10200_v48 = vadd.f32 %v16276_v17, %v9862_v8  ;;  %v10228_v10 = vadd.f32 %v10079_v55, %v9955_v29 }
 0x46a   : > { %3181 = vbcast.lane.b32.xlu0 %v9912_v53, 272  ;;  %v16243_v53 = vld [vmem:[#allocation18_spill] sm:$0xff]  ;;  %16247 = vst [vmem:[#allocation329_spill] sm:$0xff] %v10123_v15  ;;  %16249 = vst [vmem:[#allocation331_spill] sm:$0xff] %v10136_v44  ;;  %v16285_v15 = vld [vmem:[#allocation36_spill] sm:$0xff]  ;;  %v10251_v17 = vadd.f32 %v16287_v19, %v9865_v49 }
 0x46b   : > { %v10096_v61 = vadd.f32 %v16243_v53, %v9865_v49  ;;  %v10127_v53 = vadd.f32 %v10079_v55, %v9940_v46  ;;  %16250 = vst [vmem:[#allocation332_spill] sm:$0xff] %v10140_v3  ;;  %v10144_v46 = vadd.f32 %v16251_v26, %v9857_v16  ;;  %16258 = vst [vmem:[#allocation23_spill] sm:$0xff] %v10156_v51  ;;  %v16259_v3 = vld [vmem:[#allocation24_spill] sm:$0xff]  ;;  %v16296_v19 = vld [vmem:[#allocation41_spill] sm:$0xff] }
 0x46c   : > { %3204 = vbcast.lane.b32.xlu1 %v10007_v5, 280  ;;  %v10099_v47 = vpop.permute.xlu1 %2911  ;;  %v10163_v26 = vadd.f32 %v16259_v3, %v9857_v16  ;;  %16267 = vst [vmem:[#allocation27_spill] sm:$0xff] %v10180_v58  ;;  %v16268_v3 = vld [vmem:[#allocation28_spill] sm:$0xff]  ;;  %16277 = vst [vmem:[#allocation32_spill] sm:$0xff] %v10200_v48  ;;  %v16298_v48 = vld [vmem:[#allocation42_spill] sm:$0xff] }
 0x46d   : > { %16244 = vst [vmem:[#allocation18_spill] sm:$0xff] %v10096_v61  ;;  %v10109_v63 = vpop.permute.xlu0 %2896  ;;  %16248 = vst [vmem:[#allocation330_spill] sm:$0xff] %v10127_v53  ;;  %v10152_v53 = vadd.f32 %v16255_v45, %v9865_v49  ;;  %v10171_v45 = vadd.f32 %v16262_v60, %v9865_v49  ;;  %v10176_v61 = vadd.f32 %v16264_v34, %v9882_v11  ;;  %v16272_v60 = vld [vmem:[#allocation30_spill] sm:$0xff] }
 0x46e   : > { %3192 = vbcast.lane.b32.xlu0 %v10007_v5, 256  ;;  %16252 = vst [vmem:[#allocation20_spill] sm:$0xff] %v10144_v46  ;;  %16260 = vst [vmem:[#allocation24_spill] sm:$0xff] %v10163_v26  ;;  %v10184_v27 = vadd.f32 %v16268_v3, %v9862_v8  ;;  %v10192_v23 = vadd.f32 %v16272_v60, %v9882_v11  ;;  %v16281_v60 = vld [vmem:[#allocation34_spill] sm:$0xff]  ;;  %v10275_v25 = vadd.f32 %v16298_v48, %v9882_v11 }
 0x46f   : > { %16256 = vst [vmem:[#allocation22_spill] sm:$0xff] %v10152_v53  ;;  %16263 = vst [vmem:[#allocation25_spill] sm:$0xff] %v10171_v45  ;;  %v10239_v43 = vadd.f32 %v16281_v60, %v9882_v11  ;;  %v16308_v45 = vld [vmem:[#allocation47_spill] sm:$0xff]  ;;  %v10325_v53 = vadd.f32 %v10079_v55, %v10010_v21  ;;  %v16318_v46 = vld [vmem:[#allocation50_spill] sm:$0xff] }
 0x470   : > { %3215 = vbcast.lane.b32.xlu1 %v10103_v39, 264  ;;  %v10132_v57 = vpop.permute.xlu1 %2919  ;;  %16265 = vst [vmem:[#allocation26_spill] sm:$0xff] %v10176_v61  ;;  %16269 = vst [vmem:[#allocation28_spill] sm:$0xff] %v10184_v27  ;;  %v16292_v27 = vld [vmem:[#allocation39_spill] sm:$0xff]  ;;  %v10271_v61 = vadd.f32 %v16296_v19, %v9865_v49  ;;  %v10295_v48 = vadd.f32 %v16308_v45, %v9857_v16  ;;  %v10340_v21 = vadd.f32 %v16318_v46, %v9882_v11 }
 0x471   : > { %v10158_v44 = vpop.permute.xlu0 %2907  ;;  %16273 = vst [vmem:[#allocation30_spill] sm:$0xff] %v10192_v23  ;;  %16280 = vst [vmem:[#allocation334_spill] sm:$0xff] %v10228_v10  ;;  %v10247_v10 = vadd.f32 %v16285_v15, %v9862_v8  ;;  %v16290_v23 = vld [vmem:[#allocation38_spill] sm:$0xff] }
 0x472   : > { %3200 = vbcast.lane.b32.xlu0 %v10007_v5, 272  ;;  %v16274_v5 = vld [vmem:[#allocation31_spill] sm:$0xff]  ;;  %16282 = vst [vmem:[#allocation34_spill] sm:$0xff] %v10239_v43  ;;  %16288 = vst [vmem:[#allocation37_spill] sm:$0xff] %v10251_v17  ;;  %v10258_v60 = vadd.f32 %v16290_v23, %v9882_v11 }
 0x473   : > { %v10196_v34 = vadd.f32 %v16274_v5, %v9857_v16  ;;  %v16283_v5 = vld [vmem:[#allocation35_spill] sm:$0xff]  ;;  %16286 = vst [vmem:[#allocation36_spill] sm:$0xff] %v10247_v10  ;;  %16297 = vst [vmem:[#allocation41_spill] sm:$0xff] %v10271_v61  ;;  %v16343_v10 = vld [vmem:[#allocation62_spill] sm:$0xff] }
 0x474   : > { %3223 = vbcast.lane.b32.xlu1 %v10103_v39, 280  ;;  %v10203_v3 = vpop.permute.xlu1 %2930  ;;  %v10243_v29 = vadd.f32 %v16283_v5, %v9857_v16  ;;  %16291 = vst [vmem:[#allocation38_spill] sm:$0xff] %v10258_v60  ;;  %v10262_v5 = vadd.f32 %v16292_v27, %v9857_v16  ;;  %16299 = vst [vmem:[#allocation42_spill] sm:$0xff] %v10275_v25  ;;  %v16300_v23 = vld [vmem:[#allocation43_spill] sm:$0xff]  ;;  %v16302_v27 = vld [vmem:[#allocation44_spill] sm:$0xff] }
 0x475   : > { %16275 = vst [vmem:[#allocation31_spill] sm:$0xff] %v10196_v34  ;;  %v10213_v37 = vpop.permute.xlu0 %2915  ;;  %v16294_v34 = vld [vmem:[#allocation40_spill] sm:$0xff]  ;;  %v10279_v13 = vadd.f32 %v16300_v23, %v9857_v16  ;;  %v10283_v58 = vadd.f32 %v16302_v27, %v9862_v8  ;;  %16309 = vst [vmem:[#allocation47_spill] sm:$0xff] %v10295_v48  ;;  %v16311_v27 = vld [vmem:[#allocation15_spill] sm:$0xff] }
 0x476   : > { %3211 = vbcast.lane.b32.xlu0 %v10103_v39, 256  ;;  %16284 = vst [vmem:[#allocation35_spill] sm:$0xff] %v10243_v29  ;;  %16293 = vst [vmem:[#allocation39_spill] sm:$0xff] %v10262_v5  ;;  %v10266_v15 = vadd.f32 %v16294_v34, %v9862_v8  ;;  %v16304_v34 = vld [vmem:[#allocation45_spill] sm:$0xff]  ;;  %v10304_v26 = vrot.slane %v10300_v28, %v16311_v27  ;;  %v16327_v48 = vld [vmem:[#allocation54_spill] sm:$0xff]  ;;  %v10420_v5 = vadd.f32 %v10079_v55, %v9943_v59 }
 0x477   : > { %16301 = vst [vmem:[#allocation43_spill] sm:$0xff] %v10279_v13  ;;  %16303 = vst [vmem:[#allocation44_spill] sm:$0xff] %v10283_v58  ;;  %v10287_v51 = vadd.f32 %v16304_v34, %v9865_v49  ;;  %v16325_v58 = vld [vmem:[#allocation53_spill] sm:$0xff]  ;;  %v10359_v46 = vadd.f32 %v16327_v48, %v9882_v11  ;;  %v16329_v25 = vld [vmem:[#allocation55_spill] sm:$0xff] }
 0x478   : > { %3234 = vbcast.lane.b32.xlu1 %v10207_v62, 264  ;;  %v10235_v38 = vpop.permute.xlu1 %2938  ;;  %16295 = vst [vmem:[#allocation40_spill] sm:$0xff] %v10266_v15  ;;  %16319 = vst [vmem:[#allocation50_spill] sm:$0xff] %v10340_v21  ;;  %v16337_v48 = vld [vmem:[#allocation59_spill] sm:$0xff]  ;;  %v16354_v29 = vld [vmem:[#allocation66_spill] sm:$0xff] }
 0x479   : > { %v10253_v0 = vpop.permute.xlu0 %2926  ;;  %16305 = vst [vmem:[#allocation45_spill] sm:$0xff] %v10287_v51  ;;  %16328 = vst [vmem:[#allocation54_spill] sm:$0xff] %v10359_v46  ;;  %v10368_v51 = vadd.f32 %v16331_v35, %v9862_v8  ;;  %v10380_v60 = vadd.f32 %v16337_v48, %v9857_v16  ;;  %v10399_v48 = vrot.slane %v10300_v28, %v9032_v9 }
 0x47a   : > { %16289 = vst [vmem:[#allocation335_spill] sm:$0xff] %v10253_v0  ;;  %3219 = vbcast.lane.b32.xlu0 %v10103_v39, 272  ;;  %v16306_v39 = vld [vmem:[#allocation46_spill] sm:$0xff]  ;;  %16348 = vst [vmem:[#allocation340_spill] sm:$0xff] %v10420_v5  ;;  %v10439_v5 = vadd.f32 %v16354_v29, %v9882_v11 }
 0x47b   : > { %v10291_v19 = vadd.f32 %v16306_v39, %v9882_v11  ;;  %v16316_v39 = vld [vmem:[#allocation49_spill] sm:$0xff]  ;;  %16332 = vst [vmem:[#allocation56_spill] sm:$0xff] %v10368_v51  ;;  %16338 = vst [vmem:[#allocation59_spill] sm:$0xff] %v10380_v60  ;;  %v16363_v60 = vld [vmem:[#allocation70_spill] sm:$0xff] }
 0x47c   : > { %3242 = vbcast.lane.b32.xlu1 %v10207_v62, 280  ;;  %v10298_v23 = vpop.permute.xlu1 %2949  ;;  %v10336_v34 = vadd.f32 %v16316_v39, %v9865_v49  ;;  %v10355_v39 = vadd.f32 %v16325_v58, %v9865_v49  ;;  %v16335_v58 = vld [vmem:[#allocation58_spill] sm:$0xff]  ;;  %16355 = vst [vmem:[#allocation66_spill] sm:$0xff] %v10439_v5  ;;  %v16361_v51 = vld [vmem:[#allocation69_spill] sm:$0xff]  ;;  %v10458_v29 = vadd.f32 %v16363_v60, %v9882_v11  ;;  %v16373_v60 = vld [vmem:[#allocation75_spill] sm:$0xff] }
 0x47d   : > { %16307 = vst [vmem:[#allocation46_spill] sm:$0xff] %v10291_v19  ;;  %16310 = vst [vmem:[#allocation336_spill] sm:$0xff] %v10298_v23  ;;  %v10310_v45 = vpop.permute.xlu0 %2934  ;;  %v16312_v23 = vld [vmem:[#allocation48_spill] sm:$0xff]  ;;  %v16333_v19 = vld [vmem:[#allocation57_spill] sm:$0xff]  ;;  %v10376_v13 = vadd.f32 %v16335_v58, %v9882_v11 }
 0x47e   : > { %v10317_v0 = vadd.f32 %v16312_v23, %v9862_v8  ;;  %3230 = vbcast.lane.b32.xlu0 %v10207_v62, 256  ;;  %16314 = vst [vmem:[#allocation48_spill] sm:$0xff] %v10325_v53  ;;  %16317 = vst [vmem:[#allocation49_spill] sm:$0xff] %v10336_v34  ;;  %v10344_v53 = vadd.f32 %v16320_v41, %v9857_v16  ;;  %v10363_v41 = vadd.f32 %v16329_v25, %v9857_v16  ;;  %v16339_v25 = vld [vmem:[#allocation60_spill] sm:$0xff] }
 0x47f   : > { %16326 = vst [vmem:[#allocation53_spill] sm:$0xff] %v10355_v39  ;;  %16336 = vst [vmem:[#allocation58_spill] sm:$0xff] %v10376_v13  ;;  %v10384_v61 = vadd.f32 %v16339_v25, %v9862_v8  ;;  %v16350_v25 = vld [vmem:[#allocation64_spill] sm:$0xff]  ;;  %v10479_v39 = vadd.f32 %v16373_v60, %v9857_v16 }
 0x480   : > { %16313 = vst [vmem:[#allocation15_spill] sm:$0xff] %v10317_v0  ;;  %3253 = vbcast.lane.b32.xlu1 %v10304_v26, 264  ;;  %v10332_v15 = vpop.permute.xlu1 %2957  ;;  %16321 = vst [vmem:[#allocation51_spill] sm:$0xff] %v10344_v53  ;;  %v10372_v0 = vadd.f32 %v16333_v19, %v9865_v49  ;;  %v10392_v19 = vadd.f32 %v16343_v10, %v9882_v11  ;;  %v10431_v43 = vadd.f32 %v16350_v25, %v9862_v8  ;;  %v16356_v10 = vld [vmem:[#allocation67_spill] sm:$0xff]  ;;  %v16367_v13 = vld [vmem:[#allocation72_spill] sm:$0xff] }
 0x481   : > { %16315 = vst [vmem:[#allocation337_spill] sm:$0xff] %v10332_v15  ;;  %v10350_v23 = vpop.permute.xlu0 %2945  ;;  %16330 = vst [vmem:[#allocation55_spill] sm:$0xff] %v10363_v41  ;;  %v10467_v52 = vadd.f32 %v16367_v13, %v9862_v8  ;;  %v16377_v53 = vld [vmem:[#allocation77_spill] sm:$0xff]  ;;  %v16386_v60 = vld [vmem:[#allocation80_spill] sm:$0xff] }
 0x482   : > { %16324 = vst [vmem:[#allocation338_spill] sm:$0xff] %v10350_v23  ;;  %3238 = vbcast.lane.b32.xlu0 %v10207_v62, 272  ;;  %16334 = vst [vmem:[#allocation57_spill] sm:$0xff] %v10372_v0  ;;  %v16341_v62 = vld [vmem:[#allocation61_spill] sm:$0xff]  ;;  %v16346_v23 = vld [vmem:[#allocation63_spill] sm:$0xff]  ;;  %v10487_v13 = vadd.f32 %v16377_v53, %v9865_v49 }
 0x483   : > { %16340 = vst [vmem:[#allocation60_spill] sm:$0xff] %v10384_v61  ;;  %v10388_v35 = vadd.f32 %v16341_v62, %v9865_v49  ;;  %16344 = vst [vmem:[#allocation62_spill] sm:$0xff] %v10392_v19  ;;  %v10412_v15 = vadd.f32 %v16346_v23, %v9857_v16  ;;  %v16352_v62 = vld [vmem:[#allocation65_spill] sm:$0xff]  ;;  %v16384_v19 = vld [vmem:[#allocation79_spill] sm:$0xff] }
 0x484   : > { %3261 = vbcast.lane.b32.xlu1 %v10304_v26, 280  ;;  %v10395_v58 = vpop.permute.xlu1 %2968  ;;  %16351 = vst [vmem:[#allocation64_spill] sm:$0xff] %v10431_v43  ;;  %v10435_v59 = vadd.f32 %v16352_v62, %v9865_v49  ;;  %v10454_v62 = vadd.f32 %v16361_v51, %v9865_v49  ;;  %16364 = vst [vmem:[#allocation70_spill] sm:$0xff] %v10458_v29  ;;  %v16371_v51 = vld [vmem:[#allocation74_spill] sm:$0xff]  ;;  %v10522_v29 = vadd.f32 %v10079_v55, %v9966_v32  ;;  %v16401_v32 = vld [vmem:[#allocation87_spill] sm:$0xff] }
 0x485   : > { %16342 = vst [vmem:[#allocation61_spill] sm:$0xff] %v10388_v35  ;;  %16345 = vst [vmem:[#allocation339_spill] sm:$0xff] %v10395_v58  ;;  %v10405_v17 = vpop.permute.xlu0 %2953  ;;  %v10443_v58 = vadd.f32 %v16356_v10, %v9857_v16  ;;  %v16359_v35 = vld [vmem:[#allocation68_spill] sm:$0xff]  ;;  %v16365_v10 = vld [vmem:[#allocation71_spill] sm:$0xff]  ;;  %v10475_v21 = vadd.f32 %v16371_v51, %v9882_v11  ;;  %v10494_v51 = vrot.slane %v10300_v28, %v9036_v12 }
 0x486   : > { %16347 = vst [vmem:[#allocation63_spill] sm:$0xff] %v10412_v15  ;;  %3249 = vbcast.lane.b32.xlu0 %v10304_v26, 256  ;;  %16353 = vst [vmem:[#allocation65_spill] sm:$0xff] %v10435_v59  ;;  %v10450_v25 = vadd.f32 %v16359_v35, %v9862_v8  ;;  %v10463_v0 = vadd.f32 %v16365_v10, %v9857_v16  ;;  %v16369_v35 = vld [vmem:[#allocation73_spill] sm:$0xff]  ;;  %v10526_v34 = vadd.f32 %v16384_v19, %v9857_v16  ;;  %v16411_v5 = vld [vmem:[#allocation92_spill] sm:$0xff] }
 0x487   : > { %16357 = vst [vmem:[#allocation67_spill] sm:$0xff] %v10443_v58  ;;  %16362 = vst [vmem:[#allocation69_spill] sm:$0xff] %v10454_v62  ;;  %v10471_v41 = vadd.f32 %v16369_v35, %v9865_v49  ;;  %v16388_v15 = vld [vmem:[#allocation81_spill] sm:$0xff]  ;;  %v10610_v62 = vadd.f32 %v10079_v55, %v9961_v31  ;;  %v16422_v59 = vld [vmem:[#allocation96_spill] sm:$0xff] }
 0x488   : > { %3272 = vbcast.lane.b32.xlu1 %v10399_v48, 264  ;;  %v10427_v46 = vpop.permute.xlu1 %2976  ;;  %16360 = vst [vmem:[#allocation68_spill] sm:$0xff] %v10450_v25  ;;  %16366 = vst [vmem:[#allocation71_spill] sm:$0xff] %v10463_v0  ;;  %v10534_v53 = vadd.f32 %v16388_v15, %v9865_v49 }
 0x489   : > { %16349 = vst [vmem:[#allocation341_spill] sm:$0xff] %v10427_v46  ;;  %v10445_v23 = vpop.permute.xlu0 %2964  ;;  %16368 = vst [vmem:[#allocation72_spill] sm:$0xff] %v10467_v52  ;;  %v16397_v52 = vld [vmem:[#allocation85_spill] sm:$0xff] }
 0x48a   : > { %16358 = vst [vmem:[#allocation342_spill] sm:$0xff] %v10445_v23  ;;  %3257 = vbcast.lane.b32.xlu0 %v10304_v26, 272  ;;  %16370 = vst [vmem:[#allocation73_spill] sm:$0xff] %v10471_v41  ;;  %v16375_v26 = vld [vmem:[#allocation76_spill] sm:$0xff]  ;;  %v16380_v23 = vld [vmem:[#allocation78_spill] sm:$0xff]  ;;  %v10553_v15 = vadd.f32 %v16397_v52, %v9865_v49 }
 0x48b   : > { %16372 = vst [vmem:[#allocation74_spill] sm:$0xff] %v10475_v21  ;;  %16374 = vst [vmem:[#allocation75_spill] sm:$0xff] %v10479_v39  ;;  %v10483_v10 = vadd.f32 %v16375_v26, %v9862_v8  ;;  %v10507_v46 = vadd.f32 %v16380_v23, %v9882_v11  ;;  %v10530_v26 = vadd.f32 %v16386_v60, %v9862_v8  ;;  %v16407_v52 = vld [vmem:[#allocation90_spill] sm:$0xff] }
 0x48c   : > { %16378 = vst [vmem:[#allocation77_spill] sm:$0xff] %v10487_v13  ;;  %3280 = vbcast.lane.b32.xlu1 %v10399_v48, 280  ;;  %v10490_v35 = vpop.permute.xlu1 %2987  ;;  %16383 = vst [vmem:[#allocation345_spill] sm:$0xff] %v10522_v29  ;;  %v16393_v29 = vld [vmem:[#allocation83_spill] sm:$0xff]  ;;  %v16395_v13 = vld [vmem:[#allocation84_spill] sm:$0xff]  ;;  %v10574_v0 = vadd.f32 %v16407_v52, %v9882_v11 }
 0x48d   : > { %16376 = vst [vmem:[#allocation76_spill] sm:$0xff] %v10483_v10  ;;  %16379 = vst [vmem:[#allocation343_spill] sm:$0xff] %v10490_v35  ;;  %v10500_v61 = vpop.permute.xlu0 %2972  ;;  %v16390_v35 = vld [vmem:[#allocation82_spill] sm:$0xff]  ;;  %v10545_v19 = vadd.f32 %v16393_v29, %v9857_v16  ;;  %v10549_v60 = vadd.f32 %v16395_v13, %v9862_v8  ;;  %v16403_v29 = vld [vmem:[#allocation88_spill] sm:$0xff] }
 0x48e   : > { %16381 = vst [vmem:[#allocation78_spill] sm:$0xff] %v10507_v46  ;;  %3268 = vbcast.lane.b32.xlu0 %v10399_v48, 256  ;;  %16385 = vst [vmem:[#allocation79_spill] sm:$0xff] %v10526_v34  ;;  %v10538_v10 = vadd.f32 %v16390_v35, %v9882_v11  ;;  %v16399_v35 = vld [vmem:[#allocation86_spill] sm:$0xff]  ;;  %v10562_v46 = vadd.f32 %v16401_v32, %v9857_v16  ;;  %v10566_v41 = vadd.f32 %v16403_v29, %v9862_v8  ;;  %v16405_v13 = vld [vmem:[#allocation89_spill] sm:$0xff] }
 0x48f   : > { %16387 = vst [vmem:[#allocation80_spill] sm:$0xff] %v10530_v26  ;;  %16389 = vst [vmem:[#allocation81_spill] sm:$0xff] %v10534_v53  ;;  %v10558_v39 = vadd.f32 %v16399_v35, %v9882_v11  ;;  %v10570_v25 = vadd.f32 %v16405_v13, %v9865_v49  ;;  %v10582_v32 = vadd.f32 %v16411_v5, %v9862_v8  ;;  %v16418_v52 = vld [vmem:[#allocation94_spill] sm:$0xff]  ;;  %v16456_v34 = vld [vmem:[#allocation111_spill] sm:$0xff] }
 0x490   : > { %3291 = vbcast.lane.b32.xlu1 %v10494_v51, 264  ;;  %v10518_v23 = vpop.permute.xlu1 %2995  ;;  %16391 = vst [vmem:[#allocation82_spill] sm:$0xff] %v10538_v10  ;;  %16394 = vst [vmem:[#allocation83_spill] sm:$0xff] %v10545_v19  ;;  %v10589_v13 = vrot.slane %v10300_v28, %v9040_v14  ;;  %v10621_v43 = vadd.f32 %v16418_v52, %v9882_v11  ;;  %v16452_v19 = vld [vmem:[#allocation109_spill] sm:$0xff] }
 0x491   : > { %16382 = vst [vmem:[#allocation344_spill] sm:$0xff] %v10518_v23  ;;  %v10540_v21 = vpop.permute.xlu0 %2983  ;;  %16396 = vst [vmem:[#allocation84_spill] sm:$0xff] %v10549_v60  ;;  %v10716_v26 = vadd.f32 %v16452_v19, %v9865_v49 }
 0x492   : > { %16392 = vst [vmem:[#allocation346_spill] sm:$0xff] %v10540_v21  ;;  %16398 = vst [vmem:[#allocation85_spill] sm:$0xff] %v10553_v15  ;;  %3276 = vbcast.lane.b32.xlu0 %v10399_v48, 272  ;;  %v16409_v48 = vld [vmem:[#allocation91_spill] sm:$0xff]  ;;  %v16414_v21 = vld [vmem:[#allocation93_spill] sm:$0xff] }
 0x493   : > { %16400 = vst [vmem:[#allocation86_spill] sm:$0xff] %v10558_v39  ;;  %16402 = vst [vmem:[#allocation87_spill] sm:$0xff] %v10562_v46  ;;  %v10578_v35 = vadd.f32 %v16409_v48, %v9857_v16  ;;  %v10602_v23 = vadd.f32 %v16414_v21, %v9865_v49  ;;  %v16420_v48 = vld [vmem:[#allocation95_spill] sm:$0xff] }
 0x494   : > { %16404 = vst [vmem:[#allocation88_spill] sm:$0xff] %v10566_v41  ;;  %16406 = vst [vmem:[#allocation89_spill] sm:$0xff] %v10570_v25  ;;  %3299 = vbcast.lane.b32.xlu1 %v10494_v51, 280  ;;  %v10585_v29 = vpop.permute.xlu1 %3006  ;;  %v10625_v31 = vadd.f32 %v16420_v48, %v9857_v16  ;;  %v16429_v41 = vld [vmem:[#allocation99_spill] sm:$0xff] }
 0x495   : > { %16408 = vst [vmem:[#allocation90_spill] sm:$0xff] %v10574_v0  ;;  %16410 = vst [vmem:[#allocation91_spill] sm:$0xff] %v10578_v35  ;;  %v10595_v58 = vpop.permute.xlu0 %2991  ;;  %v16427_v0 = vld [vmem:[#allocation98_spill] sm:$0xff]  ;;  %v10644_v48 = vadd.f32 %v16429_v41, %v9857_v16  ;;  %v16431_v35 = vld [vmem:[#allocation100_spill] sm:$0xff] }
 0x496   : > { %16412 = vst [vmem:[#allocation92_spill] sm:$0xff] %v10582_v32  ;;  %16413 = vst [vmem:[#allocation347_spill] sm:$0xff] %v10585_v29  ;;  %3287 = vbcast.lane.b32.xlu0 %v10494_v51, 256  ;;  %v16424_v29 = vld [vmem:[#allocation97_spill] sm:$0xff]  ;;  %v10640_v52 = vadd.f32 %v16427_v0, %v9882_v11  ;;  %v16435_v32 = vld [vmem:[#allocation102_spill] sm:$0xff] }
 0x497   : > { %16415 = vst [vmem:[#allocation93_spill] sm:$0xff] %v10602_v23  ;;  %16416 = vst [vmem:[#allocation348_spill] sm:$0xff] %v10610_v62  ;;  %v10629_v62 = vadd.f32 %v16422_v59, %v9862_v8  ;;  %v10633_v5 = vadd.f32 %v16424_v29, %v9865_v49  ;;  %v10648_v59 = vadd.f32 %v16431_v35, %v9862_v8  ;;  %v16433_v29 = vld [vmem:[#allocation101_spill] sm:$0xff]  ;;  %v16437_v0 = vld [vmem:[#allocation103_spill] sm:$0xff] }
 0x498   : > { %3310 = vbcast.lane.b32.xlu1 %v10589_v13, 264  ;;  %v10617_v60 = vpop.permute.xlu1 %3014  ;;  %16419 = vst [vmem:[#allocation94_spill] sm:$0xff] %v10621_v43  ;;  %16421 = vst [vmem:[#allocation95_spill] sm:$0xff] %v10625_v31  ;;  %v10653_v39 = vadd.f32 %v16433_v29, %v9865_v49  ;;  %v10657_v23 = vadd.f32 %v16435_v32, %v9882_v11  ;;  %v10661_v25 = vadd.f32 %v16437_v0, %v9857_v16  ;;  %v16439_v41 = vld [vmem:[#allocation104_spill] sm:$0xff]  ;;  %v16441_v35 = vld [vmem:[#allocation105_spill] sm:$0xff] }
 0x499   : > { %16417 = vst [vmem:[#allocation349_spill] sm:$0xff] %v10617_v60  ;;  %16423 = vst [vmem:[#allocation96_spill] sm:$0xff] %v10629_v62  ;;  %v10635_v21 = vpop.permute.xlu0 %3002  ;;  %v10665_v46 = vadd.f32 %v16439_v41, %v9862_v8  ;;  %v10669_v10 = vadd.f32 %v16441_v35, %v9865_v49  ;;  %v16445_v15 = vld [vmem:[#allocation107_spill] sm:$0xff]  ;;  %v10684_v41 = vrot.slane %v10300_v28, %v9044_v18  ;;  %v16454_v35 = vld [vmem:[#allocation110_spill] sm:$0xff] }
 0x49a   : > { %16425 = vst [vmem:[#allocation97_spill] sm:$0xff] %v10633_v5  ;;  %16426 = vst [vmem:[#allocation350_spill] sm:$0xff] %v10635_v21  ;;  %3295 = vbcast.lane.b32.xlu0 %v10494_v51, 272  ;;  %v16443_v51 = vld [vmem:[#allocation106_spill] sm:$0xff]  ;;  %v10677_v32 = vadd.f32 %v16445_v15, %v9857_v16  ;;  %v16448_v21 = vld [vmem:[#allocation108_spill] sm:$0xff]  ;;  %v10724_v15 = vadd.f32 %v16456_v34, %v9857_v16 }
 0x49b   : > { %16428 = vst [vmem:[#allocation98_spill] sm:$0xff] %v10640_v52  ;;  %16430 = vst [vmem:[#allocation99_spill] sm:$0xff] %v10644_v48  ;;  %v10673_v29 = vadd.f32 %v16443_v51, %v9882_v11  ;;  %v10697_v60 = vadd.f32 %v16448_v21, %v9862_v8  ;;  %v10720_v51 = vadd.f32 %v16454_v35, %v9882_v11  ;;  %v16479_v62 = vld [vmem:[#allocation122_spill] sm:$0xff] }
 0x49c   : > { %16432 = vst [vmem:[#allocation100_spill] sm:$0xff] %v10648_v59  ;;  %16434 = vst [vmem:[#allocation101_spill] sm:$0xff] %v10653_v39  ;;  %3318 = vbcast.lane.b32.xlu1 %v10589_v13, 280  ;;  %v10680_v0 = vpop.permute.xlu1 %3025  ;;  %v10712_v59 = vadd.f32 %v10079_v55, %v10016_v2  ;;  %v16469_v2 = vld [vmem:[#allocation117_spill] sm:$0xff] }
 0x49d   : > { %16436 = vst [vmem:[#allocation102_spill] sm:$0xff] %v10657_v23  ;;  %16438 = vst [vmem:[#allocation103_spill] sm:$0xff] %v10661_v25  ;;  %v10690_v53 = vpop.permute.xlu0 %3010  ;;  %v16465_v23 = vld [vmem:[#allocation115_spill] sm:$0xff] }
 0x49e   : > { %16440 = vst [vmem:[#allocation104_spill] sm:$0xff] %v10665_v46  ;;  %16442 = vst [vmem:[#allocation105_spill] sm:$0xff] %v10669_v10  ;;  %3306 = vbcast.lane.b32.xlu0 %v10589_v13, 256  ;;  %v10743_v34 = vadd.f32 %v16465_v23, %v9857_v16  ;;  %v16475_v23 = vld [vmem:[#allocation120_spill] sm:$0xff] }
 0x49f   : > { %16444 = vst [vmem:[#allocation106_spill] sm:$0xff] %v10673_v29  ;;  %16446 = vst [vmem:[#allocation107_spill] sm:$0xff] %v10677_v32  ;;  %v16463_v32 = vld [vmem:[#allocation114_spill] sm:$0xff]  ;;  %v10764_v39 = vadd.f32 %v16475_v23, %v9862_v8  ;;  %v16486_v23 = vld [vmem:[#allocation124_spill] sm:$0xff] }
 0x4a0   : > { %16447 = vst [vmem:[#allocation351_spill] sm:$0xff] %v10680_v0  ;;  %16449 = vst [vmem:[#allocation108_spill] sm:$0xff] %v10697_v60  ;;  %3329 = vbcast.lane.b32.xlu1 %v10684_v41, 264  ;;  %v10708_v21 = vpop.permute.xlu1 %3033  ;;  %v16458_v0 = vld [vmem:[#allocation112_spill] sm:$0xff]  ;;  %v10739_v35 = vadd.f32 %v16463_v32, %v9882_v11  ;;  %v10752_v60 = vadd.f32 %v16469_v2, %v9865_v49  ;;  %v16473_v32 = vld [vmem:[#allocation119_spill] sm:$0xff]  ;;  %v10772_v2 = vadd.f32 %v16479_v62, %v9882_v11 }
 0x4a1   : > { %16450 = vst [vmem:[#allocation352_spill] sm:$0xff] %v10708_v21  ;;  %16451 = vst [vmem:[#allocation353_spill] sm:$0xff] %v10712_v59  ;;  %v10728_v29 = vadd.f32 %v16458_v0, %v9862_v8  ;;  %v10730_v46 = vpop.permute.xlu0 %3021  ;;  %v16461_v59 = vld [vmem:[#allocation113_spill] sm:$0xff]  ;;  %v16467_v0 = vld [vmem:[#allocation116_spill] sm:$0xff]  ;;  %v10760_v52 = vadd.f32 %v16473_v32, %v9857_v16  ;;  %v10779_v32 = vrot.slane %v10300_v28, %v9048_v20 }
 0x4a2   : > { %16453 = vst [vmem:[#allocation109_spill] sm:$0xff] %v10716_v26  ;;  %16455 = vst [vmem:[#allocation110_spill] sm:$0xff] %v10720_v51  ;;  %v10735_v19 = vadd.f32 %v16461_v59, %v9865_v49  ;;  %3314 = vbcast.lane.b32.xlu0 %v10589_v13, 272  ;;  %v10748_v10 = vadd.f32 %v16467_v0, %v9862_v8  ;;  %v16471_v59 = vld [vmem:[#allocation118_spill] sm:$0xff]  ;;  %v16477_v13 = vld [vmem:[#allocation121_spill] sm:$0xff]  ;;  %v10811_v43 = vadd.f32 %v16486_v23, %v9862_v8 }
 0x4a3   : > { %16457 = vst [vmem:[#allocation111_spill] sm:$0xff] %v10724_v15  ;;  %16459 = vst [vmem:[#allocation112_spill] sm:$0xff] %v10728_v29  ;;  %v10756_v25 = vadd.f32 %v16471_v59, %v9882_v11  ;;  %v10768_v0 = vadd.f32 %v16477_v13, %v9865_v49  ;;  %v16488_v13 = vld [vmem:[#allocation125_spill] sm:$0xff]  ;;  %v16490_v62 = vld [vmem:[#allocation126_spill] sm:$0xff] }
 0x4a4   : > { %16460 = vst [vmem:[#allocation354_spill] sm:$0xff] %v10730_v46  ;;  %16462 = vst [vmem:[#allocation113_spill] sm:$0xff] %v10735_v19  ;;  %3337 = vbcast.lane.b32.xlu1 %v10684_v41, 280  ;;  %v10775_v59 = vpop.permute.xlu1 %3044  ;;  %v16482_v46 = vld [vmem:[#allocation123_spill] sm:$0xff]  ;;  %v10815_v48 = vadd.f32 %v16488_v13, %v9865_v49  ;;  %v10819_v31 = vadd.f32 %v16490_v62, %v9882_v11  ;;  %v16523_v26 = vld [vmem:[#allocation141_spill] sm:$0xff] }
 0x4a5   : > { %16464 = vst [vmem:[#allocation114_spill] sm:$0xff] %v10739_v35  ;;  %16466 = vst [vmem:[#allocation115_spill] sm:$0xff] %v10743_v34  ;;  %v10785_v5 = vpop.permute.xlu0 %3029  ;;  %v10792_v21 = vadd.f32 %v16482_v46, %v9857_v16  ;;  %v10807_v35 = vadd.f32 %v10079_v55, %v9949_v54  ;;  %v16503_v54 = vld [vmem:[#allocation132_spill] sm:$0xff]  ;;  %v16513_v34 = vld [vmem:[#allocation137_spill] sm:$0xff] }
 0x4a6   : > { %16468 = vst [vmem:[#allocation116_spill] sm:$0xff] %v10748_v10  ;;  %16470 = vst [vmem:[#allocation117_spill] sm:$0xff] %v10752_v60  ;;  %3325 = vbcast.lane.b32.xlu0 %v10684_v41, 256  ;;  %v16519_v19 = vld [vmem:[#allocation139_spill] sm:$0xff] }
 0x4a7   : > { %16472 = vst [vmem:[#allocation118_spill] sm:$0xff] %v10756_v25  ;;  %16474 = vst [vmem:[#allocation119_spill] sm:$0xff] %v10760_v52  ;;  %v16497_v25 = vld [vmem:[#allocation129_spill] sm:$0xff]  ;;  %v10906_v51 = vadd.f32 %v16519_v19, %v9857_v16 }
 0x4a8   : > { %16476 = vst [vmem:[#allocation120_spill] sm:$0xff] %v10764_v39  ;;  %16478 = vst [vmem:[#allocation121_spill] sm:$0xff] %v10768_v0  ;;  %3348 = vbcast.lane.b32.xlu1 %v10779_v32, 264  ;;  %v10803_v46 = vpop.permute.xlu1 %3052  ;;  %v10834_v13 = vadd.f32 %v16497_v25, %v9865_v49  ;;  %v16499_v0 = vld [vmem:[#allocation130_spill] sm:$0xff] }
 0x4a9   : > { %16480 = vst [vmem:[#allocation122_spill] sm:$0xff] %v10772_v2  ;;  %16481 = vst [vmem:[#allocation355_spill] sm:$0xff] %v10775_v59  ;;  %v16492_v59 = vld [vmem:[#allocation127_spill] sm:$0xff]  ;;  %v10825_v39 = vpop.permute.xlu0 %3040  ;;  %v10838_v62 = vadd.f32 %v16499_v0, %v9882_v11  ;;  %v16507_v25 = vld [vmem:[#allocation134_spill] sm:$0xff] }
 0x4aa   : > { %16483 = vst [vmem:[#allocation123_spill] sm:$0xff] %v10792_v21  ;;  %16484 = vst [vmem:[#allocation356_spill] sm:$0xff] %v10803_v46  ;;  %v10823_v2 = vadd.f32 %v16492_v59, %v9857_v16  ;;  %3333 = vbcast.lane.b32.xlu0 %v10684_v41, 272  ;;  %v16501_v59 = vld [vmem:[#allocation131_spill] sm:$0xff]  ;;  %v10847_v21 = vadd.f32 %v16503_v54, %v9862_v8  ;;  %v10855_v60 = vadd.f32 %v16507_v25, %v9882_v11  ;;  %v16511_v41 = vld [vmem:[#allocation136_spill] sm:$0xff] }
 0x4ab   : > { %16485 = vst [vmem:[#allocation357_spill] sm:$0xff] %v10807_v35  ;;  %16487 = vst [vmem:[#allocation124_spill] sm:$0xff] %v10811_v43  ;;  %v16495_v35 = vld [vmem:[#allocation128_spill] sm:$0xff]  ;;  %v10843_v10 = vadd.f32 %v16501_v59, %v9857_v16  ;;  %v16509_v0 = vld [vmem:[#allocation135_spill] sm:$0xff]  ;;  %v10863_v59 = vadd.f32 %v16511_v41, %v9862_v8  ;;  %v10867_v54 = vadd.f32 %v16513_v34, %v9865_v49 }
 0x4ac   : > { %16489 = vst [vmem:[#allocation125_spill] sm:$0xff] %v10815_v48  ;;  %16491 = vst [vmem:[#allocation126_spill] sm:$0xff] %v10819_v31  ;;  %v10830_v23 = vadd.f32 %v16495_v35, %v9862_v8  ;;  %v16505_v35 = vld [vmem:[#allocation133_spill] sm:$0xff]  ;;  %v10859_v29 = vadd.f32 %v16509_v0, %v9857_v16  ;;  %3356 = vbcast.lane.b32.xlu1 %v10779_v32, 280  ;;  %v10874_v25 = vrot.slane %v10300_v28, %v9052_v22  ;;  %v16521_v0 = vld [vmem:[#allocation140_spill] sm:$0xff] }
 0x4ad   : > { %16493 = vst [vmem:[#allocation127_spill] sm:$0xff] %v10823_v2  ;;  %16494 = vst [vmem:[#allocation358_spill] sm:$0xff] %v10825_v39  ;;  %v10851_v52 = vadd.f32 %v16505_v35, %v9865_v49  ;;  %v10870_v35 = vpop.permute.xlu1 %3063  ;;  %v10880_v15 = vpop.permute.xlu0 %3048  ;;  %v16516_v39 = vld [vmem:[#allocation138_spill] sm:$0xff]  ;;  %v10910_v41 = vadd.f32 %v16521_v0, %v9862_v8  ;;  %v10914_v34 = vadd.f32 %v16523_v26, %v9865_v49  ;;  %v16546_v31 = vld [vmem:[#allocation152_spill] sm:$0xff] }
 0x4ae   : > { %16496 = vst [vmem:[#allocation128_spill] sm:$0xff] %v10830_v23  ;;  %16498 = vst [vmem:[#allocation129_spill] sm:$0xff] %v10834_v13  ;;  %v10887_v46 = vadd.f32 %v16516_v39, %v9882_v11  ;;  %3344 = vbcast.lane.b32.xlu0 %v10779_v32, 256  ;;  %v16551_v13 = vld [vmem:[#allocation154_spill] sm:$0xff]  ;;  %v16558_v48 = vld [vmem:[#allocation157_spill] sm:$0xff] }
 0x4af   : > { %16500 = vst [vmem:[#allocation130_spill] sm:$0xff] %v10838_v62  ;;  %16502 = vst [vmem:[#allocation131_spill] sm:$0xff] %v10843_v10  ;;  %v10902_v62 = vadd.f32 %v10079_v55, %v9980_v36  ;;  %v16536_v36 = vld [vmem:[#allocation147_spill] sm:$0xff] }
 0x4b0   : > { %16504 = vst [vmem:[#allocation132_spill] sm:$0xff] %v10847_v21  ;;  %16506 = vst [vmem:[#allocation133_spill] sm:$0xff] %v10851_v52  ;;  %3367 = vbcast.lane.b32.xlu1 %v10874_v25, 264  ;;  %v16532_v21 = vld [vmem:[#allocation145_spill] sm:$0xff] }
 0x4b1   : > { %16508 = vst [vmem:[#allocation134_spill] sm:$0xff] %v10855_v60  ;;  %16510 = vst [vmem:[#allocation135_spill] sm:$0xff] %v10859_v29  ;;  %v10898_v39 = vpop.permute.xlu1 %3071  ;;  %v10920_v60 = vpop.permute.xlu0 %3059  ;;  %v10933_v26 = vadd.f32 %v16532_v21, %v9865_v49  ;;  %v16542_v21 = vld [vmem:[#allocation150_spill] sm:$0xff] }
 0x4b2   : > { %16512 = vst [vmem:[#allocation136_spill] sm:$0xff] %v10863_v59  ;;  %16514 = vst [vmem:[#allocation137_spill] sm:$0xff] %v10867_v54  ;;  %v16530_v54 = vld [vmem:[#allocation144_spill] sm:$0xff]  ;;  %3352 = vbcast.lane.b32.xlu0 %v10779_v32, 272  ;;  %v10954_v10 = vadd.f32 %v16542_v21, %v9882_v11  ;;  %v16544_v32 = vld [vmem:[#allocation151_spill] sm:$0xff] }
 0x4b3   : > { %16515 = vst [vmem:[#allocation359_spill] sm:$0xff] %v10870_v35  ;;  %16517 = vst [vmem:[#allocation138_spill] sm:$0xff] %v10887_v46  ;;  %v16525_v35 = vld [vmem:[#allocation142_spill] sm:$0xff]  ;;  %v10929_v0 = vadd.f32 %v16530_v54, %v9862_v8  ;;  %v10942_v46 = vadd.f32 %v16536_v36, %v9857_v16  ;;  %v16540_v54 = vld [vmem:[#allocation149_spill] sm:$0xff]  ;;  %v10962_v36 = vadd.f32 %v16546_v31, %v9862_v8 }
 0x4b4   : > { %16518 = vst [vmem:[#allocation360_spill] sm:$0xff] %v10902_v62  ;;  %16520 = vst [vmem:[#allocation139_spill] sm:$0xff] %v10906_v51  ;;  %v10918_v59 = vadd.f32 %v16525_v35, %v9882_v11  ;;  %v16528_v62 = vld [vmem:[#allocation143_spill] sm:$0xff]  ;;  %v16534_v35 = vld [vmem:[#allocation146_spill] sm:$0xff]  ;;  %v10950_v23 = vadd.f32 %v16540_v54, %v9865_v49  ;;  %3375 = vbcast.lane.b32.xlu1 %v10874_v25, 280  ;;  %v10969_v54 = vrot.slane %v10300_v28, %v9056_v24 }
 0x4b5   : > { %16522 = vst [vmem:[#allocation140_spill] sm:$0xff] %v10910_v41  ;;  %16524 = vst [vmem:[#allocation141_spill] sm:$0xff] %v10914_v34  ;;  %v10925_v19 = vadd.f32 %v16528_v62, %v9857_v16  ;;  %v10938_v29 = vadd.f32 %v16534_v35, %v9882_v11  ;;  %v16538_v62 = vld [vmem:[#allocation148_spill] sm:$0xff]  ;;  %v10958_v35 = vadd.f32 %v16544_v32, %v9857_v16  ;;  %v10975_v2 = vpop.permute.xlu0 %3067  ;;  %v16554_v21 = vld [vmem:[#allocation155_spill] sm:$0xff] }
 0x4b6   : > { %16526 = vst [vmem:[#allocation142_spill] sm:$0xff] %v10918_v59  ;;  %16527 = vst [vmem:[#allocation361_spill] sm:$0xff] %v10920_v60  ;;  %v10946_v52 = vadd.f32 %v16538_v62, %v9862_v8  ;;  %v10965_v62 = vpop.permute.xlu1 %3082  ;;  %v16549_v60 = vld [vmem:[#allocation153_spill] sm:$0xff]  ;;  %3363 = vbcast.lane.b32.xlu0 %v10874_v25, 256  ;;  %v10990_v59 = vadd.f32 %v16551_v13, %v9882_v11  ;;  %v11001_v43 = vadd.f32 %v16554_v21, %v9857_v16  ;;  %v16556_v32 = vld [vmem:[#allocation156_spill] sm:$0xff] }
 0x4b7   : > { %16529 = vst [vmem:[#allocation143_spill] sm:$0xff] %v10925_v19  ;;  %16531 = vst [vmem:[#allocation144_spill] sm:$0xff] %v10929_v0  ;;  %v10982_v28 = vadd.f32 %v16549_v60, %v9865_v49  ;;  %v11005_v13 = vadd.f32 %v16556_v32, %v9862_v8  ;;  %v16581_v51 = vld [vmem:[#allocation167_spill] sm:$0xff]  ;;  %v16587_v34 = vld [vmem:[#allocation170_spill] sm:$0xff] }
 0x4b8   : > { %16533 = vst [vmem:[#allocation145_spill] sm:$0xff] %v10933_v26  ;;  %16535 = vst [vmem:[#allocation146_spill] sm:$0xff] %v10938_v29  ;;  %3386 = vbcast.lane.b32.xlu1 %v10969_v54, 264  ;;  %v16568_v29 = vld [vmem:[#allocation161_spill] sm:$0xff]  ;;  %v11090_v19 = vadd.f32 %v16587_v34, %v9882_v11  ;;  %v16590_v41 = vld [vmem:[#allocation171_spill] sm:$0xff] }
 0x4b9   : > { %16537 = vst [vmem:[#allocation147_spill] sm:$0xff] %v10942_v46  ;;  %16539 = vst [vmem:[#allocation148_spill] sm:$0xff] %v10946_v52  ;;  %v11009_v52 = vadd.f32 %v16558_v48, %v9865_v49  ;;  %v11015_v60 = vpop.permute.xlu0 %3078  ;;  %v11029_v48 = vadd.f32 %v10079_v55, %v9969_v33  ;;  %v16576_v33 = vld [vmem:[#allocation165_spill] sm:$0xff] }
 0x4ba   : > { %16541 = vst [vmem:[#allocation149_spill] sm:$0xff] %v10950_v23  ;;  %16543 = vst [vmem:[#allocation150_spill] sm:$0xff] %v10954_v10  ;;  %v10997_v0 = vpop.permute.xlu1 %3090  ;;  %v16563_v10 = vld [vmem:[#allocation159_spill] sm:$0xff]  ;;  %3371 = vbcast.lane.b32.xlu0 %v10874_v25, 272  ;;  %v11034_v23 = vadd.f32 %v16568_v29, %v9865_v49  ;;  %v16574_v25 = vld [vmem:[#allocation164_spill] sm:$0xff] }
 0x4bb   : > { %16545 = vst [vmem:[#allocation151_spill] sm:$0xff] %v10958_v35  ;;  %16547 = vst [vmem:[#allocation152_spill] sm:$0xff] %v10962_v36  ;;  %v11020_v21 = vadd.f32 %v16563_v10, %v9857_v16  ;;  %v16565_v35 = vld [vmem:[#allocation160_spill] sm:$0xff]  ;;  %v16570_v36 = vld [vmem:[#allocation162_spill] sm:$0xff]  ;;  %v11046_v46 = vadd.f32 %v16574_v25, %v9862_v8 }
 0x4bc   : > { %16548 = vst [vmem:[#allocation362_spill] sm:$0xff] %v10965_v62  ;;  %16550 = vst [vmem:[#allocation153_spill] sm:$0xff] %v10982_v28  ;;  %v16560_v62 = vld [vmem:[#allocation158_spill] sm:$0xff]  ;;  %v11024_v32 = vadd.f32 %v16565_v35, %v9862_v8  ;;  %v11038_v10 = vadd.f32 %v16570_v36, %v9882_v11  ;;  %v16572_v28 = vld [vmem:[#allocation163_spill] sm:$0xff]  ;;  %3394 = vbcast.lane.b32.xlu1 %v10969_v54, 280 }
 0x4bd   : > { %16552 = vst [vmem:[#allocation154_spill] sm:$0xff] %v10990_v59  ;;  %16553 = vst [vmem:[#allocation363_spill] sm:$0xff] %v10997_v0  ;;  %v11013_v31 = vadd.f32 %v16560_v62, %v9882_v11  ;;  %v11042_v35 = vadd.f32 %v16572_v28, %v9857_v16  ;;  %v16578_v62 = vld [vmem:[#allocation166_spill] sm:$0xff]  ;;  %v11059_v59 = vld [vmem:[#allocation5 + $0x68] sm:$0xff] }
 0x4be   : > { %16555 = vst [vmem:[#allocation155_spill] sm:$0xff] %v11001_v43  ;;  %16557 = vst [vmem:[#allocation156_spill] sm:$0xff] %v11005_v13  ;;  %v11054_v29 = vadd.f32 %v16578_v62, %v9882_v11  ;;  %v11057_v36 = vpop.permute.xlu1 %3101  ;;  %v11063_v28 = vrot.slane %v11059_v59, %v16311_v27  ;;  %v11069_v62 = vpop.permute.xlu0 %3086  ;;  %3382 = vbcast.lane.b32.xlu0 %v10969_v54, 256 }
 0x4bf   : > { %16559 = vst [vmem:[#allocation157_spill] sm:$0xff] %v11009_v52  ;;  %16561 = vst [vmem:[#allocation158_spill] sm:$0xff] %v11013_v31 }
 0x4c0   : > { %16562 = vst [vmem:[#allocation364_spill] sm:$0xff] %v11015_v60  ;;  %16564 = vst [vmem:[#allocation159_spill] sm:$0xff] %v11020_v21  ;;  %v16583_v60 = vld [vmem:[#allocation168_spill] sm:$0xff]  ;;  %3405 = vbcast.lane.b32.xlu1 %v11063_v28, 264 }
 0x4c1   : > { %16566 = vst [vmem:[#allocation160_spill] sm:$0xff] %v11024_v32  ;;  %16567 = vst [vmem:[#allocation365_spill] sm:$0xff] %v11029_v48  ;;  %v11050_v48 = vadd.f32 %v16576_v33, %v9865_v49  ;;  %v11079_v0 = vadd.f32 %v16583_v60, %v9862_v8  ;;  %v16585_v33 = vld [vmem:[#allocation169_spill] sm:$0xff]  ;;  %v16596_v32 = vld [vmem:[#allocation174_spill] sm:$0xff] }
 0x4c2   : > { %16569 = vst [vmem:[#allocation161_spill] sm:$0xff] %v11034_v23  ;;  %16571 = vst [vmem:[#allocation162_spill] sm:$0xff] %v11038_v10  ;;  %v11086_v25 = vadd.f32 %v16585_v33, %v9865_v49  ;;  %v11097_v26 = vpop.permute.xlu1 %3109  ;;  %v11101_v33 = vadd.f32 %v16590_v41, %v9857_v16  ;;  %v16592_v10 = vld [vmem:[#allocation172_spill] sm:$0xff]  ;;  %v11113_v60 = vadd.f32 %v16596_v32, %v9882_v11  ;;  %v11115_v31 = vpop.permute.xlu0 %3097  ;;  %v16599_v41 = vld [vmem:[#allocation175_spill] sm:$0xff]  ;;  %3390 = vbcast.lane.b32.xlu0 %v10969_v54, 272 }
 0x4c3   : > { %16573 = vst [vmem:[#allocation163_spill] sm:$0xff] %v11042_v35  ;;  %16575 = vst [vmem:[#allocation164_spill] sm:$0xff] %v11046_v46  ;;  %v11105_v34 = vadd.f32 %v16592_v10, %v9862_v8  ;;  %v11126_v10 = vadd.f32 %v10079_v55, %v10021_v6  ;;  %v16602_v23 = vld [vmem:[#allocation176_spill] sm:$0xff]  ;;  %v11136_v46 = vadd.f32 %v10079_v55, %v10013_v1  ;;  %v16607_v54 = vld [vmem:[#allocation178_spill] sm:$0xff] }
 0x4c4   : > { %16577 = vst [vmem:[#allocation165_spill] sm:$0xff] %v11050_v48  ;;  %16579 = vst [vmem:[#allocation166_spill] sm:$0xff] %v11054_v29  ;;  %v11121_v48 = vadd.f32 %v16599_v41, %v9857_v16  ;;  %v11132_v13 = vadd.f32 %v16602_v23, %v9862_v8  ;;  %v16605_v41 = vld [vmem:[#allocation177_spill] sm:$0xff]  ;;  %v11144_v6 = vadd.f32 %v16607_v54, %v9882_v11  ;;  %v16611_v32 = vld [vmem:[#allocation180_spill] sm:$0xff]  ;;  %3413 = vbcast.lane.b32.xlu1 %v11063_v28, 280 }
 0x4c5   : > { %16580 = vst [vmem:[#allocation366_spill] sm:$0xff] %v11057_v36  ;;  %v11075_v36 = vadd.f32 %v16581_v51, %v9857_v16  ;;  %16584 = vst [vmem:[#allocation168_spill] sm:$0xff] %v11079_v0  ;;  %v16594_v51 = vld [vmem:[#allocation173_spill] sm:$0xff]  ;;  %v11140_v29 = vadd.f32 %v16605_v41, %v9865_v49  ;;  %v11152_v23 = vadd.f32 %v16611_v32, %v9862_v8  ;;  %v16619_v55 = vld [vmem:[#allocation183_spill] sm:$0xff] }
 0x4c6   : > { %16586 = vst [vmem:[#allocation169_spill] sm:$0xff] %v11086_v25  ;;  %16588 = vst [vmem:[#allocation170_spill] sm:$0xff] %v11090_v19  ;;  %v11109_v35 = vadd.f32 %v16594_v51, %v9865_v49  ;;  %v16609_v51 = vld [vmem:[#allocation179_spill] sm:$0xff]  ;;  %v11155_v1 = vpop.permute.xlu1 %3120  ;;  %v11161_v19 = vpop.permute.xlu0 %3105  ;;  %v16615_v0 = vld [vmem:[#allocation181_spill] sm:$0xff]  ;;  %3401 = vbcast.lane.b32.xlu0 %v11063_v28, 256 }
 0x4c7   : > { %16582 = vst [vmem:[#allocation167_spill] sm:$0xff] %v11075_v36  ;;  %16589 = vst [vmem:[#allocation367_spill] sm:$0xff] %v11097_v26  ;;  %v11166_v32 = vadd.f32 %v16615_v0, %v9865_v49  ;;  %v16617_v25 = vld [vmem:[#allocation182_spill] sm:$0xff]  ;;  %v16621_v41 = vld [vmem:[#allocation184_spill] sm:$0xff] }
 0x4c8   : > { %16591 = vst [vmem:[#allocation171_spill] sm:$0xff] %v11101_v33  ;;  %16593 = vst [vmem:[#allocation172_spill] sm:$0xff] %v11105_v34  ;;  %v11170_v36 = vadd.f32 %v16617_v25, %v9882_v11  ;;  %v11174_v33 = vadd.f32 %v16619_v55, %v9857_v16  ;;  %4903 = vperm.xlu1 %8408, %v9934_v56   ;;  %v16632_v34 = vld [vmem:[#allocation189_spill] sm:$0xff]  ;;  %v16634_v55 = vld [vmem:[#allocation190_spill] sm:$0xff] }
 0x4c9   : > { %16595 = vst [vmem:[#allocation173_spill] sm:$0xff] %v11109_v35  ;;  %16597 = vst [vmem:[#allocation174_spill] sm:$0xff] %v11113_v60  ;;  %v16625_v60 = vld [vmem:[#allocation186_spill] sm:$0xff]  ;;  %v16630_v35 = vld [vmem:[#allocation188_spill] sm:$0xff] }
 0x4ca   : > { %16598 = vst [vmem:[#allocation368_spill] sm:$0xff] %v11115_v31  ;;  %16600 = vst [vmem:[#allocation175_spill] sm:$0xff] %v11121_v48  ;;  %v11188_v25 = vadd.f32 %v16625_v60, %v9882_v11  ;;  %v11203_v60 = vadd.f32 %v16630_v35, %v9862_v8  ;;  %v11211_v48 = vadd.f32 %v16634_v55, %v9882_v11  ;;  %v11213_v54 = vpop.permute.xlu0 %3116  ;;  %3409 = vbcast.lane.b32.xlu0 %v11063_v28, 272  ;;  %v16639_v21 = vld [vmem:[#allocation192_spill] sm:$0xff]  ;;  %v16645_v28 = vld [vmem:[#allocation195_spill] sm:$0xff] }
 0x4cb   : > { %16601 = vst [vmem:[#allocation369_spill] sm:$0xff] %v11126_v10  ;;  %16603 = vst [vmem:[#allocation176_spill] sm:$0xff] %v11132_v13  ;;  %v11148_v10 = vadd.f32 %v16609_v51, %v9857_v16  ;;  %v16623_v51 = vld [vmem:[#allocation185_spill] sm:$0xff]  ;;  %v16628_v13 = vld [vmem:[#allocation187_spill] sm:$0xff]  ;;  %v11228_v52 = vadd.f32 %v16639_v21, %v9862_v8  ;;  %v11247_v21 = vrot.slane %v11059_v59, %v9032_v9 }
 0x4cc   : > { %16604 = vst [vmem:[#allocation370_spill] sm:$0xff] %v11136_v46  ;;  %16606 = vst [vmem:[#allocation177_spill] sm:$0xff] %v11140_v29  ;;  %v11180_v46 = vadd.f32 %v16621_v41, %v9862_v8  ;;  %v11184_v0 = vadd.f32 %v16623_v51, %v9865_v49  ;;  %v11195_v41 = vpop.permute.xlu1 %3128  ;;  %v11199_v51 = vadd.f32 %v16628_v13, %v9857_v16  ;;  %v16643_v13 = vld [vmem:[#allocation194_spill] sm:$0xff]  ;;  %4913 = vperm.xlu1 %8408, %v9929_v50   ;;  %v16649_v50 = vld [vmem:[#allocation196_spill] sm:$0xff] }
 0x4cd   : > { %16608 = vst [vmem:[#allocation178_spill] sm:$0xff] %v11144_v6  ;;  %16610 = vst [vmem:[#allocation179_spill] sm:$0xff] %v11148_v10  ;;  %v11207_v29 = vadd.f32 %v16632_v34, %v9865_v49  ;;  %v16637_v6 = vld [vmem:[#allocation191_spill] sm:$0xff]  ;;  %v16653_v55 = vld [vmem:[#allocation198_spill] sm:$0xff] }
 0x4ce   : > { %16612 = vst [vmem:[#allocation180_spill] sm:$0xff] %v11152_v23  ;;  %16613 = vst [vmem:[#allocation371_spill] sm:$0xff] %v11155_v1  ;;  %v11220_v35 = vadd.f32 %v16637_v6, %v9857_v16  ;;  %v16641_v23 = vld [vmem:[#allocation193_spill] sm:$0xff]  ;;  %v11236_v6 = vadd.f32 %v16643_v13, %v9882_v11  ;;  %4898 = vperm.xlu0 %8409, %v9917_v4  }
 0x4cf   : > { %16614 = vst [vmem:[#allocation372_spill] sm:$0xff] %v11161_v19  ;;  %16616 = vst [vmem:[#allocation181_spill] sm:$0xff] %v11166_v32  ;;  %v11232_v56 = vadd.f32 %v16641_v23, %v9865_v49  ;;  %v16655_v23 = vld [vmem:[#allocation199_spill] sm:$0xff]  ;;  %v16668_v4 = vld [vmem:[#allocation205_spill] sm:$0xff] }
 0x4d0   : > { %16618 = vst [vmem:[#allocation182_spill] sm:$0xff] %v11170_v36  ;;  %16620 = vst [vmem:[#allocation183_spill] sm:$0xff] %v11174_v33  ;;  %v11240_v36 = vadd.f32 %v16645_v28, %v9857_v16  ;;  %v11243_v34 = vpop.permute.xlu1 %3139  ;;  %v11272_v10 = vadd.f32 %v16655_v23, %v9857_v16  ;;  %v16657_v28 = vld [vmem:[#allocation200_spill] sm:$0xff]  ;;  %3424 = vbcast.lane.b32.xlu1 %v11247_v21, 264  ;;  %v11290_v23 = vrot.slane %v11059_v59, %v9036_v12  ;;  %v16671_v32 = vld [vmem:[#allocation206_spill] sm:$0xff] }
 0x4d1   : > { %16622 = vst [vmem:[#allocation184_spill] sm:$0xff] %v11180_v46  ;;  %16624 = vst [vmem:[#allocation185_spill] sm:$0xff] %v11184_v0  ;;  %v11258_v46 = vadd.f32 %v16649_v50, %v9862_v8  ;;  %v16651_v0 = vld [vmem:[#allocation197_spill] sm:$0xff]  ;;  %v11276_v50 = vadd.f32 %v16657_v28, %v9862_v8  ;;  %v16662_v28 = vld [vmem:[#allocation202_spill] sm:$0xff] }
 0x4d2   : > { %16626 = vst [vmem:[#allocation186_spill] sm:$0xff] %v11188_v25  ;;  %16627 = vst [vmem:[#allocation373_spill] sm:$0xff] %v11195_v41  ;;  %v11253_v25 = vpop.permute.xlu0 %3124  ;;  %v11262_v33 = vadd.f32 %v16651_v0, %v9865_v49  ;;  %4908 = vperm.xlu0 %8409, %v9922_v7   ;;  %v16679_v7 = vld [vmem:[#allocation210_spill] sm:$0xff] }
 0x4d3   : > { %16629 = vst [vmem:[#allocation187_spill] sm:$0xff] %v11199_v51  ;;  %16631 = vst [vmem:[#allocation188_spill] sm:$0xff] %v11203_v60  ;;  %v11266_v51 = vadd.f32 %v16653_v55, %v9882_v11  ;;  %v16666_v55 = vld [vmem:[#allocation204_spill] sm:$0xff] }
 0x4d4   : > { %16633 = vst [vmem:[#allocation189_spill] sm:$0xff] %v11207_v29  ;;  %16635 = vst [vmem:[#allocation190_spill] sm:$0xff] %v11211_v48  ;;  %v16659_v48 = vld [vmem:[#allocation201_spill] sm:$0xff]  ;;  %v11286_v13 = vpop.permute.xlu1 %3147  ;;  %v11302_v60 = vadd.f32 %v16666_v55, %v9862_v8  ;;  %3443 = vbcast.lane.b32.xlu1 %v11290_v23, 264 }
 0x4d5   : > { %16636 = vst [vmem:[#allocation374_spill] sm:$0xff] %v11213_v54  ;;  %16638 = vst [vmem:[#allocation191_spill] sm:$0xff] %v11220_v35  ;;  %v11280_v0 = vadd.f32 %v16659_v48, %v9865_v49  ;;  %v16664_v48 = vld [vmem:[#allocation203_spill] sm:$0xff]  ;;  %v16695_v55 = vld [vmem:[#allocation217_spill] sm:$0xff] }
 0x4d6   : > { %16640 = vst [vmem:[#allocation192_spill] sm:$0xff] %v11228_v52  ;;  %16642 = vst [vmem:[#allocation193_spill] sm:$0xff] %v11232_v56  ;;  %v11294_v52 = vadd.f32 %v16662_v28, %v9882_v11  ;;  %v11298_v35 = vadd.f32 %v16664_v48, %v9857_v16  ;;  %v11315_v48 = vadd.f32 %v16671_v32, %v9882_v11  ;;  %v16675_v56 = vld [vmem:[#allocation208_spill] sm:$0xff]  ;;  %v16677_v28 = vld [vmem:[#allocation209_spill] sm:$0xff]  ;;  %3420 = vbcast.lane.b32.xlu0 %v11247_v21, 256 }
 0x4d7   : > { %16644 = vst [vmem:[#allocation194_spill] sm:$0xff] %v11236_v6  ;;  %16646 = vst [vmem:[#allocation195_spill] sm:$0xff] %v11240_v36  ;;  %v11306_v6 = vadd.f32 %v16668_v4, %v9865_v49  ;;  %v11308_v36 = vpop.permute.xlu0 %3135  ;;  %v11327_v29 = vadd.f32 %v16675_v56, %v9862_v8  ;;  %v11331_v32 = vadd.f32 %v16677_v28, %v9865_v49  ;;  %v16687_v4 = vld [vmem:[#allocation213_spill] sm:$0xff]  ;;  %v16689_v28 = vld [vmem:[#allocation214_spill] sm:$0xff] }
 0x4d8   : > { %16647 = vst [vmem:[#allocation375_spill] sm:$0xff] %v11243_v34  ;;  %16648 = vst [vmem:[#allocation376_spill] sm:$0xff] %v11253_v25  ;;  %v11338_v43 = vpop.permute.xlu1 %3158  ;;  %v11367_v56 = vadd.f32 %v16689_v28, %v9882_v11  ;;  %v16741_v34 = vld [vmem:[#allocation237_spill] sm:$0xff] }
 0x4d9   : > { %16650 = vst [vmem:[#allocation196_spill] sm:$0xff] %v11258_v46  ;;  %16652 = vst [vmem:[#allocation197_spill] sm:$0xff] %v11262_v33 }
 0x4da   : > { %16654 = vst [vmem:[#allocation198_spill] sm:$0xff] %v11266_v51  ;;  %16656 = vst [vmem:[#allocation199_spill] sm:$0xff] %v11272_v10  ;;  %v11335_v51 = vadd.f32 %v16679_v7, %v9882_v11  ;;  %v16685_v10 = vld [vmem:[#allocation212_spill] sm:$0xff]  ;;  %v16691_v7 = vld [vmem:[#allocation215_spill] sm:$0xff]  ;;  %3439 = vbcast.lane.b32.xlu0 %v11290_v23, 256 }
 0x4db   : > { %16658 = vst [vmem:[#allocation200_spill] sm:$0xff] %v11276_v50  ;;  %16660 = vst [vmem:[#allocation201_spill] sm:$0xff] %v11280_v0  ;;  %v11348_v50 = vpop.permute.xlu0 %3143  ;;  %v16683_v0 = vld [vmem:[#allocation211_spill] sm:$0xff]  ;;  %v11357_v33 = vadd.f32 %v16685_v10, %v9862_v8 }
 0x4dc   : > { %16661 = vst [vmem:[#allocation377_spill] sm:$0xff] %v11286_v13  ;;  %16663 = vst [vmem:[#allocation202_spill] sm:$0xff] %v11294_v52  ;;  %v11353_v46 = vadd.f32 %v16683_v0, %v9857_v16  ;;  %v11361_v52 = vadd.f32 %v16687_v4, %v9865_v49  ;;  %v11371_v0 = vadd.f32 %v16691_v7, %v9857_v16  ;;  %v11385_v28 = vpop.permute.xlu1 %3166  ;;  %v16698_v7 = vld [vmem:[#allocation218_spill] sm:$0xff] }
 0x4dd   : > { %16665 = vst [vmem:[#allocation203_spill] sm:$0xff] %v11298_v35  ;;  %16667 = vst [vmem:[#allocation204_spill] sm:$0xff] %v11302_v60  ;;  %v11389_v35 = vadd.f32 %v16698_v7, %v9882_v11  ;;  %v16702_v60 = vld [vmem:[#allocation220_spill] sm:$0xff] }
 0x4de   : > { %16669 = vst [vmem:[#allocation205_spill] sm:$0xff] %v11306_v6  ;;  %16670 = vst [vmem:[#allocation378_spill] sm:$0xff] %v11308_v36  ;;  %v16673_v36 = vld [vmem:[#allocation207_spill] sm:$0xff]  ;;  %v11397_v4 = vadd.f32 %v16702_v60, %v9862_v8  ;;  %v16704_v6 = vld [vmem:[#allocation221_spill] sm:$0xff]  ;;  %3428 = vbcast.lane.b32.xlu0 %v11247_v21, 272 }
 0x4df   : > { %16672 = vst [vmem:[#allocation206_spill] sm:$0xff] %v11315_v48  ;;  %v11323_v13 = vadd.f32 %v16673_v36, %v9857_v16  ;;  %16676 = vst [vmem:[#allocation208_spill] sm:$0xff] %v11327_v29  ;;  %v11342_v36 = vrot.slane %v11059_v59, %v9040_v14  ;;  %v16693_v48 = vld [vmem:[#allocation216_spill] sm:$0xff] }
 0x4e0   : > { %16678 = vst [vmem:[#allocation209_spill] sm:$0xff] %v11331_v32  ;;  %16680 = vst [vmem:[#allocation210_spill] sm:$0xff] %v11335_v51  ;;  %v11375_v10 = vadd.f32 %v16693_v48, %v9862_v8  ;;  %v16700_v48 = vld [vmem:[#allocation219_spill] sm:$0xff]  ;;  %v11403_v51 = vpop.permute.xlu0 %3154  ;;  %v16711_v7 = vld [vmem:[#allocation224_spill] sm:$0xff]  ;;  %v11430_v60 = vpop.permute.xlu1 %3177 }
 0x4e1   : > { %16674 = vst [vmem:[#allocation207_spill] sm:$0xff] %v11323_v13  ;;  %16681 = vst [vmem:[#allocation379_spill] sm:$0xff] %v11338_v43  ;;  %v11382_v13 = vadd.f32 %v16695_v55, %v9865_v49  ;;  %3458 = vbcast.lane.b32.xlu1 %v11342_v36, 256  ;;  %v11401_v55 = vadd.f32 %v16704_v6, %v9865_v49  ;;  %v11423_v29 = vadd.f32 %v16711_v7, %v9862_v8  ;;  %v16723_v7 = vld [vmem:[#allocation229_spill] sm:$0xff] }
 0x4e2   : > { %16682 = vst [vmem:[#allocation380_spill] sm:$0xff] %v11348_v50  ;;  %16684 = vst [vmem:[#allocation211_spill] sm:$0xff] %v11353_v46  ;;  %v11393_v50 = vadd.f32 %v16700_v48, %v9857_v16  ;;  %v11434_v6 = vrot.slane %v11059_v59, %v9044_v18  ;;  %v11459_v32 = vadd.f32 %v16723_v7, %v9865_v49  ;;  %v11478_v43 = vld [vmem:[#allocation5 + $0x70] sm:$0xff]  ;;  %3462 = vbcast.lane.b32.xlu0 %v11342_v36, 264 }
 0x4e3   : > { %16686 = vst [vmem:[#allocation212_spill] sm:$0xff] %v11357_v33  ;;  %16688 = vst [vmem:[#allocation213_spill] sm:$0xff] %v11361_v52  ;;  %v16719_v52 = vld [vmem:[#allocation227_spill] sm:$0xff]  ;;  %v11531_v54 = vrot.slane %v11478_v43, %v9032_v9 }
 0x4e4   : > { %16690 = vst [vmem:[#allocation214_spill] sm:$0xff] %v11367_v56  ;;  %16692 = vst [vmem:[#allocation215_spill] sm:$0xff] %v11371_v0  ;;  %v16717_v56 = vld [vmem:[#allocation226_spill] sm:$0xff]  ;;  %v11449_v0 = vadd.f32 %v16719_v52, %v9857_v16  ;;  %v11476_v7 = vpop.permute.xlu1 %3185 }
 0x4e5   : > { %16694 = vst [vmem:[#allocation216_spill] sm:$0xff] %v11375_v10  ;;  %16696 = vst [vmem:[#allocation217_spill] sm:$0xff] %v11382_v13  ;;  %3447 = vbcast.lane.b32.xlu1 %v11290_v23, 272  ;;  %v11440_v10 = vpop.permute.xlu0 %3162  ;;  %v11445_v13 = vadd.f32 %v16717_v56, %v9882_v11 }
 0x4e6   : > { %16697 = vst [vmem:[#allocation381_spill] sm:$0xff] %v11385_v28  ;;  %16699 = vst [vmem:[#allocation218_spill] sm:$0xff] %v11389_v35  ;;  %v16707_v28 = vld [vmem:[#allocation222_spill] sm:$0xff]  ;;  %3477 = vbcast.lane.b32.xlu0 %v11434_v6, 256 }
 0x4e7   : > { %16701 = vst [vmem:[#allocation219_spill] sm:$0xff] %v11393_v50  ;;  %16703 = vst [vmem:[#allocation220_spill] sm:$0xff] %v11397_v4  ;;  %v11410_v48 = vadd.f32 %v16707_v28, %v9882_v11  ;;  %v16713_v28 = vld [vmem:[#allocation225_spill] sm:$0xff]  ;;  %v16734_v4 = vld [vmem:[#allocation234_spill] sm:$0xff] }
 0x4e8   : > { %16705 = vst [vmem:[#allocation221_spill] sm:$0xff] %v11401_v55  ;;  %16706 = vst [vmem:[#allocation382_spill] sm:$0xff] %v11403_v51  ;;  %v16709_v51 = vld [vmem:[#allocation223_spill] sm:$0xff]  ;;  %v11427_v33 = vadd.f32 %v16713_v28, %v9865_v49  ;;  %v16725_v28 = vld [vmem:[#allocation230_spill] sm:$0xff] }
 0x4e9   : > { %16708 = vst [vmem:[#allocation222_spill] sm:$0xff] %v11410_v48  ;;  %v11418_v25 = vadd.f32 %v16709_v51, %v9857_v16  ;;  %16712 = vst [vmem:[#allocation224_spill] sm:$0xff] %v11423_v29  ;;  %v16721_v51 = vld [vmem:[#allocation228_spill] sm:$0xff]  ;;  %v11463_v56 = vadd.f32 %v16725_v28, %v9882_v11  ;;  %v16727_v48 = vld [vmem:[#allocation231_spill] sm:$0xff]  ;;  %3481 = vbcast.lane.b32.xlu1 %v11434_v6, 264  ;;  %v11482_v28 = vrot.slane %v11478_v43, %v16311_v27 }
 0x4ea   : > { %16714 = vst [vmem:[#allocation225_spill] sm:$0xff] %v11427_v33  ;;  %16715 = vst [vmem:[#allocation383_spill] sm:$0xff] %v11430_v60  ;;  %v11453_v35 = vadd.f32 %v16721_v51, %v9862_v8  ;;  %v11467_v52 = vadd.f32 %v16727_v48, %v9857_v16  ;;  %v16729_v55 = vld [vmem:[#allocation232_spill] sm:$0xff]  ;;  %v16732_v48 = vld [vmem:[#allocation233_spill] sm:$0xff]  ;;  %v11490_v51 = vadd.f32 %v16734_v4, %v9882_v11 }
 0x4eb   : > { %16710 = vst [vmem:[#allocation223_spill] sm:$0xff] %v11418_v25  ;;  %16716 = vst [vmem:[#allocation384_spill] sm:$0xff] %v11440_v10  ;;  %v11473_v50 = vadd.f32 %v16729_v55, %v9862_v8  ;;  %v11486_v25 = vadd.f32 %v16732_v48, %v9865_v49  ;;  %v16736_v55 = vld [vmem:[#allocation235_spill] sm:$0xff]  ;;  %v16738_v33 = vld [vmem:[#allocation236_spill] sm:$0xff]  ;;  %v11507_v4 = vadd.f32 %v16741_v34, %v9865_v49  ;;  %3553 = vbcast.lane.b32.xlu0 %v11482_v28, 256 }
 0x4ec   : > { %16718 = vst [vmem:[#allocation226_spill] sm:$0xff] %v11445_v13  ;;  %16720 = vst [vmem:[#allocation227_spill] sm:$0xff] %v11449_v0  ;;  %v11494_v29 = vadd.f32 %v16736_v55, %v9857_v16  ;;  %v11498_v46 = vadd.f32 %v16738_v33, %v9862_v8  ;;  %v16745_v48 = vld [vmem:[#allocation239_spill] sm:$0xff]  ;;  %v16747_v34 = vld [vmem:[#allocation240_spill] sm:$0xff]  ;;  %v11527_v55 = vpop.permute.xlu1 %3196 }
 0x4ed   : > { %16722 = vst [vmem:[#allocation228_spill] sm:$0xff] %v11453_v35  ;;  %16724 = vst [vmem:[#allocation229_spill] sm:$0xff] %v11459_v32  ;;  %v11520_v60 = vadd.f32 %v16745_v48, %v9857_v16  ;;  %v11524_v35 = vadd.f32 %v16747_v34, %v9862_v8  ;;  %3557 = vbcast.lane.b32.xlu1 %v11482_v28, 264  ;;  %v16753_v13 = vld [vmem:[#allocation242_spill] sm:$0xff]  ;;  %v16757_v10 = vld [vmem:[#allocation244_spill] sm:$0xff] }
 0x4ee   : > { %16726 = vst [vmem:[#allocation230_spill] sm:$0xff] %v11463_v56  ;;  %16728 = vst [vmem:[#allocation231_spill] sm:$0xff] %v11467_v52  ;;  %v16751_v56 = vld [vmem:[#allocation241_spill] sm:$0xff]  ;;  %v11546_v32 = vadd.f32 %v16753_v13, %v9882_v11  ;;  %v11556_v33 = vadd.f32 %v16757_v10, %v9862_v8  ;;  %v16765_v48 = vld [vmem:[#allocation248_spill] sm:$0xff] }
 0x4ef   : > { %16730 = vst [vmem:[#allocation232_spill] sm:$0xff] %v11473_v50  ;;  %16731 = vst [vmem:[#allocation385_spill] sm:$0xff] %v11476_v7  ;;  %v11500_v7 = vpop.permute.xlu0 %3173  ;;  %v11542_v52 = vadd.f32 %v16751_v56, %v9865_v49  ;;  %v16759_v34 = vld [vmem:[#allocation245_spill] sm:$0xff]  ;;  %v11574_v10 = vadd.f32 %v16765_v48, %v9862_v8  ;;  %3572 = vbcast.lane.b32.xlu0 %v11531_v54, 256 }
 0x4f0   : > { %16733 = vst [vmem:[#allocation233_spill] sm:$0xff] %v11486_v25  ;;  %16735 = vst [vmem:[#allocation234_spill] sm:$0xff] %v11490_v51  ;;  %v11560_v56 = vadd.f32 %v16759_v34, %v9865_v49  ;;  %v11577_v34 = vpop.permute.xlu1 %3204  ;;  %v16770_v51 = vld [vmem:[#allocation250_spill] sm:$0xff] }
 0x4f1   : > { %16737 = vst [vmem:[#allocation235_spill] sm:$0xff] %v11494_v29  ;;  %16739 = vst [vmem:[#allocation236_spill] sm:$0xff] %v11498_v46  ;;  %v16761_v46 = vld [vmem:[#allocation246_spill] sm:$0xff]  ;;  %3576 = vbcast.lane.b32.xlu1 %v11531_v54, 264 }
 0x4f2   : > { %16740 = vst [vmem:[#allocation386_spill] sm:$0xff] %v11500_v7  ;;  %16742 = vst [vmem:[#allocation237_spill] sm:$0xff] %v11507_v4  ;;  %v16743_v7 = vld [vmem:[#allocation238_spill] sm:$0xff]  ;;  %v11564_v13 = vadd.f32 %v16761_v46, %v9882_v11  ;;  %v16763_v4 = vld [vmem:[#allocation247_spill] sm:$0xff] }
 0x4f3   : > { %v11515_v41 = vadd.f32 %v16743_v7, %v9882_v11  ;;  %16746 = vst [vmem:[#allocation239_spill] sm:$0xff] %v11520_v60  ;;  %16748 = vst [vmem:[#allocation240_spill] sm:$0xff] %v11524_v35  ;;  %v11537_v50 = vpop.permute.xlu0 %3181  ;;  %v16755_v7 = vld [vmem:[#allocation243_spill] sm:$0xff]  ;;  %v11570_v29 = vadd.f32 %v16763_v4, %v9857_v16  ;;  %v11585_v60 = vadd.f32 %v16770_v51, %v9882_v11  ;;  %v16774_v35 = vld [vmem:[#allocation252_spill] sm:$0xff]  ;;  %3432 = vbcast.lane.b32.xlu0 %v11247_v21, 280 }
 0x4f4   : > { %16749 = vst [vmem:[#allocation387_spill] sm:$0xff] %v11527_v55  ;;  %16750 = vst [vmem:[#allocation388_spill] sm:$0xff] %v11537_v50  ;;  %v11550_v25 = vadd.f32 %v16755_v7, %v9857_v16  ;;  %v16772_v7 = vld [vmem:[#allocation251_spill] sm:$0xff]  ;;  %v11593_v48 = vadd.f32 %v16774_v35, %v9862_v8  ;;  %v16777_v55 = vld [vmem:[#allocation253_spill] sm:$0xff] }
 0x4f5   : > { %16744 = vst [vmem:[#allocation238_spill] sm:$0xff] %v11515_v41  ;;  %16752 = vst [vmem:[#allocation241_spill] sm:$0xff] %v11542_v52  ;;  %v16768_v41 = vld [vmem:[#allocation249_spill] sm:$0xff]  ;;  %v11589_v4 = vadd.f32 %v16772_v7, %v9857_v16  ;;  %v11602_v51 = vadd.f32 %v16777_v55, %v9865_v49  ;;  %3466 = vbcast.lane.b32.xlu1 %v11342_v36, 272  ;;  %v11623_v7 = vrot.slane %v11059_v59, %v9048_v20  ;;  %v16789_v35 = vld [vmem:[#allocation258_spill] sm:$0xff] }
 0x4f6   : > { %16754 = vst [vmem:[#allocation242_spill] sm:$0xff] %v11546_v32  ;;  %16756 = vst [vmem:[#allocation243_spill] sm:$0xff] %v11550_v25  ;;  %v11581_v46 = vadd.f32 %v16768_v41, %v9865_v49  ;;  %v11619_v32 = vpop.permute.xlu1 %3215  ;;  %v16791_v50 = vld [vmem:[#allocation259_spill] sm:$0xff]  ;;  %v16806_v52 = vld [vmem:[#allocation266_spill] sm:$0xff] }
 0x4f7   : > { %16758 = vst [vmem:[#allocation244_spill] sm:$0xff] %v11556_v33  ;;  %16760 = vst [vmem:[#allocation245_spill] sm:$0xff] %v11560_v56  ;;  %v11595_v0 = vpop.permute.xlu0 %3192  ;;  %v16787_v33 = vld [vmem:[#allocation257_spill] sm:$0xff]  ;;  %v11648_v41 = vadd.f32 %v16791_v50, %v9857_v16  ;;  %3496 = vbcast.lane.b32.xlu0 %v11623_v7, 256 }
 0x4f8   : > { %16762 = vst [vmem:[#allocation246_spill] sm:$0xff] %v11564_v13  ;;  %16764 = vst [vmem:[#allocation247_spill] sm:$0xff] %v11570_v29  ;;  %v11638_v29 = vadd.f32 %v16787_v33, %v9865_v49 }
 0x4f9   : > { %16766 = vst [vmem:[#allocation248_spill] sm:$0xff] %v11574_v10  ;;  %16767 = vst [vmem:[#allocation389_spill] sm:$0xff] %v11577_v34  ;;  %v16781_v34 = vld [vmem:[#allocation255_spill] sm:$0xff]  ;;  %v16785_v10 = vld [vmem:[#allocation256_spill] sm:$0xff]  ;;  %3500 = vbcast.lane.b32.xlu1 %v11623_v7, 264 }
 0x4fa   : > { %16769 = vst [vmem:[#allocation249_spill] sm:$0xff] %v11581_v46  ;;  %16771 = vst [vmem:[#allocation250_spill] sm:$0xff] %v11585_v60  ;;  %v11616_v55 = vadd.f32 %v16781_v34, %v9857_v16  ;;  %v11634_v13 = vadd.f32 %v16785_v10, %v9862_v8  ;;  %v11642_v46 = vadd.f32 %v16789_v35, %v9882_v11  ;;  %v16793_v34 = vld [vmem:[#allocation260_spill] sm:$0xff]  ;;  %v16795_v60 = vld [vmem:[#allocation261_spill] sm:$0xff]  ;;  %v11668_v50 = vpop.permute.xlu1 %3223 }
 0x4fb   : > { %16773 = vst [vmem:[#allocation251_spill] sm:$0xff] %v11589_v4  ;;  %16775 = vst [vmem:[#allocation252_spill] sm:$0xff] %v11593_v48  ;;  %v11629_v19 = vpop.permute.xlu0 %3200  ;;  %v11652_v10 = vadd.f32 %v16793_v34, %v9862_v8  ;;  %v11656_v33 = vadd.f32 %v16795_v60, %v9865_v49  ;;  %v16797_v35 = vld [vmem:[#allocation262_spill] sm:$0xff]  ;;  %v11672_v34 = vrot.slane %v11478_v43, %v9036_v12  ;;  %v16802_v60 = vld [vmem:[#allocation264_spill] sm:$0xff] }
 0x4fc   : > { %16776 = vst [vmem:[#allocation390_spill] sm:$0xff] %v11595_v0  ;;  %16778 = vst [vmem:[#allocation253_spill] sm:$0xff] %v11602_v51  ;;  %v16779_v0 = vld [vmem:[#allocation254_spill] sm:$0xff]  ;;  %v11661_v4 = vadd.f32 %v16797_v35, %v9882_v11  ;;  %v11676_v25 = vadd.f32 %v16802_v60, %v9862_v8  ;;  %v16804_v51 = vld [vmem:[#allocation265_spill] sm:$0xff] }
 0x4fd   : > { %v11610_v1 = vadd.f32 %v16779_v0, %v9882_v11  ;;  %16782 = vst [vmem:[#allocation255_spill] sm:$0xff] %v11616_v55  ;;  %16783 = vst [vmem:[#allocation391_spill] sm:$0xff] %v11619_v32  ;;  %v16799_v0 = vld [vmem:[#allocation263_spill] sm:$0xff]  ;;  %v11680_v35 = vadd.f32 %v16804_v51, %v9865_v49  ;;  %v16811_v32 = vld [vmem:[#allocation268_spill] sm:$0xff]  ;;  %3595 = vbcast.lane.b32.xlu1 %v11672_v34, 264  ;;  %3591 = vbcast.lane.b32.xlu0 %v11672_v34, 256 }
 0x4fe   : > { %16784 = vst [vmem:[#allocation392_spill] sm:$0xff] %v11629_v19  ;;  %16786 = vst [vmem:[#allocation256_spill] sm:$0xff] %v11634_v13  ;;  %v11665_v56 = vadd.f32 %v16799_v0, %v9857_v16  ;;  %v11684_v0 = vadd.f32 %v16806_v52, %v9882_v11  ;;  %v16808_v55 = vld [vmem:[#allocation267_spill] sm:$0xff]  ;;  %v11697_v51 = vadd.f32 %v16811_v32, %v9862_v8  ;;  %v11714_v21 = vpop.permute.xlu1 %3234  ;;  %v11716_v52 = vld [vmem:[#allocation5 + $0x78] sm:$0xff] }
 0x4ff   : > { %16780 = vst [vmem:[#allocation254_spill] sm:$0xff] %v11610_v1  ;;  %16788 = vst [vmem:[#allocation257_spill] sm:$0xff] %v11638_v29  ;;  %v11688_v1 = vadd.f32 %v16808_v55, %v9857_v16  ;;  %v11690_v48 = vpop.permute.xlu0 %3211  ;;  %v11720_v55 = vrot.slane %v11716_v52, %v16311_v27  ;;  %v16820_v29 = vld [vmem:[#allocation271_spill] sm:$0xff]  ;;  %v16826_v60 = vld [vmem:[#allocation274_spill] sm:$0xff] }
 0x500   : > { %16790 = vst [vmem:[#allocation258_spill] sm:$0xff] %v11642_v46  ;;  %16792 = vst [vmem:[#allocation259_spill] sm:$0xff] %v11648_v41  ;;  %v16822_v41 = vld [vmem:[#allocation272_spill] sm:$0xff]  ;;  %v11745_v31 = vadd.f32 %v16826_v60, %v9882_v11  ;;  %v16834_v19 = vld [vmem:[#allocation278_spill] sm:$0xff] }
 0x501   : > { %16794 = vst [vmem:[#allocation260_spill] sm:$0xff] %v11652_v10  ;;  %16796 = vst [vmem:[#allocation261_spill] sm:$0xff] %v11656_v33  ;;  %v11735_v27 = vadd.f32 %v16822_v41, %v9862_v8  ;;  %v16828_v33 = vld [vmem:[#allocation275_spill] sm:$0xff]  ;;  %3709 = vbcast.lane.b32.xlu1 %v11720_v55, 264  ;;  %v16851_v13 = vld [vmem:[#allocation285_spill] sm:$0xff]  ;;  %3705 = vbcast.lane.b32.xlu0 %v11720_v55, 256 }
 0x502   : > { %16798 = vst [vmem:[#allocation262_spill] sm:$0xff] %v11661_v4  ;;  %16800 = vst [vmem:[#allocation263_spill] sm:$0xff] %v11665_v56  ;;  %v11731_v56 = vadd.f32 %v16820_v29, %v9857_v16  ;;  %v11749_v29 = vadd.f32 %v16828_v33, %v9857_v16  ;;  %v11765_v60 = vpop.permute.xlu1 %3242  ;;  %v11769_v33 = vrot.slane %v11716_v52, %v9032_v9  ;;  %v16870_v9 = vld [vmem:[#allocation297_spill] sm:$0xff] }
 0x503   : > { %16801 = vst [vmem:[#allocation393_spill] sm:$0xff] %v11668_v50  ;;  %16803 = vst [vmem:[#allocation264_spill] sm:$0xff] %v11676_v25  ;;  %v16815_v50 = vld [vmem:[#allocation270_spill] sm:$0xff] }
 0x504   : > { %16805 = vst [vmem:[#allocation265_spill] sm:$0xff] %v11680_v35  ;;  %16807 = vst [vmem:[#allocation266_spill] sm:$0xff] %v11684_v0  ;;  %v11711_v32 = vadd.f32 %v16815_v50, %v9882_v11  ;;  %v11726_v50 = vpop.permute.xlu0 %3219  ;;  %v16830_v35 = vld [vmem:[#allocation276_spill] sm:$0xff] }
 0x505   : > { %16809 = vst [vmem:[#allocation267_spill] sm:$0xff] %v11688_v1  ;;  %16810 = vst [vmem:[#allocation394_spill] sm:$0xff] %v11690_v48  ;;  %v16813_v48 = vld [vmem:[#allocation269_spill] sm:$0xff]  ;;  %v11753_v41 = vadd.f32 %v16830_v35, %v9862_v8  ;;  %v16838_v35 = vld [vmem:[#allocation279_spill] sm:$0xff]  ;;  %3728 = vbcast.lane.b32.xlu1 %v11769_v33, 264  ;;  %3724 = vbcast.lane.b32.xlu0 %v11769_v33, 256 }
 0x506   : > { %16812 = vst [vmem:[#allocation268_spill] sm:$0xff] %v11697_v51  ;;  %v11705_v26 = vadd.f32 %v16813_v48, %v9865_v49  ;;  %16816 = vst [vmem:[#allocation270_spill] sm:$0xff] %v11711_v32  ;;  %v16824_v48 = vld [vmem:[#allocation273_spill] sm:$0xff]  ;;  %v11773_v46 = vadd.f32 %v16838_v35, %v9857_v16  ;;  %v16840_v0 = vld [vmem:[#allocation280_spill] sm:$0xff] }
 0x507   : > { %16817 = vst [vmem:[#allocation395_spill] sm:$0xff] %v11714_v21  ;;  %16818 = vst [vmem:[#allocation396_spill] sm:$0xff] %v11720_v55  ;;  %v11739_v4 = vadd.f32 %v16824_v48, %v9865_v49  ;;  %v16832_v48 = vld [vmem:[#allocation277_spill] sm:$0xff]  ;;  %v16844_v51 = vld [vmem:[#allocation282_spill] sm:$0xff] }
 0x508   : > { %16814 = vst [vmem:[#allocation269_spill] sm:$0xff] %v11705_v26  ;;  %16819 = vst [vmem:[#allocation397_spill] sm:$0xff] %v11726_v50  ;;  %v11758_v1 = vadd.f32 %v16832_v48, %v9865_v49  ;;  %v11762_v26 = vadd.f32 %v16834_v19, %v9882_v11  ;;  %v11777_v48 = vadd.f32 %v16840_v0, %v9862_v8  ;;  %v16842_v32 = vld [vmem:[#allocation281_spill] sm:$0xff]  ;;  %v11787_v10 = vpop.permute.xlu0 %3230  ;;  %v16859_v50 = vld [vmem:[#allocation291_spill] sm:$0xff] }
 0x509   : > { %16821 = vst [vmem:[#allocation271_spill] sm:$0xff] %v11731_v56  ;;  %16823 = vst [vmem:[#allocation272_spill] sm:$0xff] %v11735_v27  ;;  %v11781_v19 = vadd.f32 %v16842_v32, %v9865_v49  ;;  %v11785_v25 = vadd.f32 %v16844_v51, %v9882_v11  ;;  %v11815_v32 = vpop.permute.xlu1 %3253  ;;  %v16861_v35 = vld [vmem:[#allocation292_spill] sm:$0xff]  ;;  %3485 = vbcast.lane.b32.xlu1 %v11434_v6, 272  ;;  %v16879_v27 = vld [vmem:[#allocation301_spill] sm:$0xff]  ;;  %3451 = vbcast.lane.b32.xlu0 %v11290_v23, 280 }
 0x50a   : > { %16825 = vst [vmem:[#allocation273_spill] sm:$0xff] %v11739_v4  ;;  %16827 = vst [vmem:[#allocation274_spill] sm:$0xff] %v11745_v31  ;;  %v16853_v4 = vld [vmem:[#allocation286_spill] sm:$0xff]  ;;  %v11969_v23 = vadd.f32 %v10203_v3, %v9862_v8  ;;  %v16913_v3 = vld [vmem:[#allocation339_spill] sm:$0xff] }
 0x50b   : > { %16829 = vst [vmem:[#allocation275_spill] sm:$0xff] %v11749_v29  ;;  %16831 = vst [vmem:[#allocation276_spill] sm:$0xff] %v11753_v41  ;;  %v11812_v56 = vadd.f32 %v16853_v4, %v9882_v11  ;;  %v11826_v4 = vadd.f32 %v9859_v30, %v9857_v16 }
 0x50c   : > { %16833 = vst [vmem:[#allocation277_spill] sm:$0xff] %v11758_v1  ;;  %16835 = vst [vmem:[#allocation278_spill] sm:$0xff] %v11762_v26  ;;  %v11821_v51 = vpop.permute.xlu0 %3238  ;;  %v16857_v1 = vld [vmem:[#allocation290_spill] sm:$0xff] }
 0x50d   : > { %16836 = vst [vmem:[#allocation398_spill] sm:$0xff] %v11765_v60  ;;  %16837 = vst [vmem:[#allocation399_spill] sm:$0xff] %v11769_v33  ;;  %v16847_v60 = vld [vmem:[#allocation283_spill] sm:$0xff]  ;;  %v11830_v26 = vadd.f32 %v16857_v1, %v9862_v8 }
 0x50e   : > { %16839 = vst [vmem:[#allocation279_spill] sm:$0xff] %v11773_v46  ;;  %16841 = vst [vmem:[#allocation280_spill] sm:$0xff] %v11777_v48  ;;  %v11794_v0 = vadd.f32 %v16847_v60, %v9857_v16  ;;  %v11808_v60 = vadd.f32 %v16851_v13, %v9865_v49  ;;  %v11834_v46 = vadd.f32 %v16859_v50, %v9865_v49  ;;  %v16863_v13 = vld [vmem:[#allocation294_spill] sm:$0xff]  ;;  %v16874_v50 = vld [vmem:[#allocation299_spill] sm:$0xff] }
 0x50f   : > { %16843 = vst [vmem:[#allocation281_spill] sm:$0xff] %v11781_v19  ;;  %16845 = vst [vmem:[#allocation282_spill] sm:$0xff] %v11785_v25  ;;  %v11844_v30 = vadd.f32 %v16863_v13, %v9857_v16  ;;  %v16865_v19 = vld [vmem:[#allocation295_spill] sm:$0xff]  ;;  %v11861_v13 = vrot.slane %v11059_v59, %v9052_v22  ;;  %v16872_v25 = vld [vmem:[#allocation298_spill] sm:$0xff] }
 0x510   : > { %16846 = vst [vmem:[#allocation400_spill] sm:$0xff] %v11787_v10  ;;  %16848 = vst [vmem:[#allocation283_spill] sm:$0xff] %v11794_v0  ;;  %v16849_v10 = vld [vmem:[#allocation284_spill] sm:$0xff]  ;;  %v11848_v1 = vadd.f32 %v16865_v19, %v9862_v8  ;;  %v11865_v19 = vadd.f32 %v16870_v9, %v9882_v11  ;;  %v11879_v29 = vpop.permute.xlu0 %3249  ;;  %v16883_v9 = vld [vmem:[#allocation303_spill] sm:$0xff] }
 0x511   : > { %v11802_v21 = vadd.f32 %v16849_v10, %v9862_v8  ;;  %16852 = vst [vmem:[#allocation285_spill] sm:$0xff] %v11808_v60  ;;  %16854 = vst [vmem:[#allocation286_spill] sm:$0xff] %v11812_v56  ;;  %v11840_v10 = vadd.f32 %v16861_v35, %v9882_v11  ;;  %v16867_v0 = vld [vmem:[#allocation296_spill] sm:$0xff]  ;;  %v11857_v35 = vpop.permute.xlu1 %3261  ;;  %v11899_v48 = vadd.f32 %v16883_v9, %v9862_v8  ;;  %3519 = vbcast.lane.b32.xlu1 %v11861_v13, 264 }
 0x512   : > { %16855 = vst [vmem:[#allocation401_spill] sm:$0xff] %v11821_v51  ;;  %16856 = vst [vmem:[#allocation402_spill] sm:$0xff] %v11826_v4  ;;  %v11854_v31 = vadd.f32 %v16867_v0, %v9865_v49  ;;  %v11873_v0 = vadd.f32 %v16874_v50, %v9862_v8  ;;  %v16876_v56 = vld [vmem:[#allocation300_spill] sm:$0xff]  ;;  %v16887_v50 = vld [vmem:[#allocation305_spill] sm:$0xff]  ;;  %v11935_v9 = vadd.f32 %v10044_v42, %v9882_v11  ;;  %3515 = vbcast.lane.b32.xlu0 %v11861_v13, 256 }
 0x513   : > { %16850 = vst [vmem:[#allocation284_spill] sm:$0xff] %v11802_v21  ;;  %16858 = vst [vmem:[#allocation290_spill] sm:$0xff] %v11830_v26  ;;  %v11869_v21 = vadd.f32 %v16872_v25, %v9857_v16  ;;  %v11877_v60 = vadd.f32 %v16876_v56, %v9865_v49  ;;  %v11886_v25 = vadd.f32 %v16879_v27, %v9882_v11  ;;  %v16885_v27 = vld [vmem:[#allocation304_spill] sm:$0xff] }
 0x514   : > { %16860 = vst [vmem:[#allocation291_spill] sm:$0xff] %v11834_v46  ;;  %16862 = vst [vmem:[#allocation292_spill] sm:$0xff] %v11840_v10  ;;  %v11903_v26 = vadd.f32 %v16885_v27, %v9865_v49  ;;  %v11907_v10 = vadd.f32 %v16887_v50, %v9882_v11  ;;  %v11953_v42 = vrot.slane %v11478_v43, %v9040_v14 }
 0x515   : > { %16864 = vst [vmem:[#allocation294_spill] sm:$0xff] %v11844_v30  ;;  %16866 = vst [vmem:[#allocation295_spill] sm:$0xff] %v11848_v1  ;;  %v11910_v56 = vpop.permute.xlu1 %3272  ;;  %v11916_v1 = vpop.permute.xlu0 %3257  ;;  %v16891_v30 = vld [vmem:[#allocation314_spill] sm:$0xff]  ;;  %3580 = vbcast.lane.b32.xlu1 %v11531_v54, 272  ;;  %v11965_v27 = vadd.f32 %v10158_v44, %v9857_v16 }
 0x516   : > { %16868 = vst [vmem:[#allocation296_spill] sm:$0xff] %v11854_v31  ;;  %16869 = vst [vmem:[#allocation403_spill] sm:$0xff] %v11857_v35  ;;  %v16889_v31 = vld [vmem:[#allocation306_spill] sm:$0xff]  ;;  %v11925_v46 = vadd.f32 %v16891_v30, %v9862_v8  ;;  %v11943_v30 = vadd.f32 %v10099_v47, %v9862_v8  ;;  %v11961_v47 = vadd.f32 %v10132_v57, %v9882_v11  ;;  %3561 = vbcast.lane.b32.xlu0 %v11482_v28, 272 }
 0x517   : > { %16871 = vst [vmem:[#allocation297_spill] sm:$0xff] %v11865_v19  ;;  %16873 = vst [vmem:[#allocation298_spill] sm:$0xff] %v11869_v21  ;;  %v11921_v50 = vadd.f32 %v16889_v31, %v9857_v16  ;;  %v11939_v31 = vadd.f32 %v10062_v40, %v9857_v16  ;;  %v11957_v40 = vadd.f32 %v10109_v63, %v9865_v49  ;;  %v16906_v63 = vld [vmem:[#allocation336_spill] sm:$0xff] }
 0x518   : > { %16875 = vst [vmem:[#allocation299_spill] sm:$0xff] %v11873_v0  ;;  %16877 = vst [vmem:[#allocation300_spill] sm:$0xff] %v11877_v60  ;;  %v11978_v57 = vadd.f32 %v10213_v37, %v9865_v49  ;;  %v11994_v37 = vadd.f32 %v16906_v63, %v9862_v8  ;;  %v16920_v63 = vld [vmem:[#allocation343_spill] sm:$0xff]  ;;  %v12177_v0 = vrot.slane %v11716_v52, %v9040_v14 }
 0x519   : > { %16878 = vst [vmem:[#allocation404_spill] sm:$0xff] %v11879_v29  ;;  %16880 = vst [vmem:[#allocation301_spill] sm:$0xff] %v11886_v25  ;;  %v16881_v29 = vld [vmem:[#allocation302_spill] sm:$0xff]  ;;  %v11949_v35 = vpop.permute.xlu1 %3280  ;;  %v11986_v25 = vadd.f32 %v10235_v38, %v9882_v11  ;;  %3614 = vbcast.lane.b32.xlu1 %v11953_v42, 264  ;;  %v12005_v38 = vrot.slane %v11716_v52, %v9036_v12  ;;  %v12270_v60 = vrot.slane %v11478_v43, %v9052_v22 }
 0x51a   : > { %v11894_v51 = vadd.f32 %v16881_v29, %v9857_v16  ;;  %16884 = vst [vmem:[#allocation303_spill] sm:$0xff] %v11899_v48  ;;  %16886 = vst [vmem:[#allocation304_spill] sm:$0xff] %v11903_v26  ;;  %v16893_v29 = vld [vmem:[#allocation315_spill] sm:$0xff]  ;;  %v16918_v48 = vld [vmem:[#allocation342_spill] sm:$0xff]  ;;  %3610 = vbcast.lane.b32.xlu0 %v11953_v42, 256 }
 0x51b   : > { %16888 = vst [vmem:[#allocation305_spill] sm:$0xff] %v11907_v10  ;;  %16890 = vst [vmem:[#allocation306_spill] sm:$0xff] %v11921_v50  ;;  %v11929_v19 = vadd.f32 %v16893_v29, %v9865_v49  ;;  %v11971_v29 = vpop.permute.xlu0 %3268  ;;  %v16904_v10 = vld [vmem:[#allocation335_spill] sm:$0xff]  ;;  %v16930_v50 = vld [vmem:[#allocation349_spill] sm:$0xff] }
 0x51c   : > { %16882 = vst [vmem:[#allocation302_spill] sm:$0xff] %v11894_v51  ;;  %16892 = vst [vmem:[#allocation314_spill] sm:$0xff] %v11925_v46  ;;  %v11990_v41 = vadd.f32 %v16904_v10, %v9857_v16  ;;  %v11998_v46 = vadd.f32 %v10310_v45, %v9865_v49  ;;  %v12030_v10 = vadd.f32 %v10405_v17, %v9865_v49  ;;  %v16916_v45 = vld [vmem:[#allocation341_spill] sm:$0xff] }
 0x51d   : > { %16894 = vst [vmem:[#allocation315_spill] sm:$0xff] %v11929_v19  ;;  %16895 = vst [vmem:[#allocation405_spill] sm:$0xff] %v11935_v9  ;;  %v12001_v44 = vpop.permute.xlu1 %3291  ;;  %v16909_v9 = vld [vmem:[#allocation337_spill] sm:$0xff]  ;;  %v16911_v19 = vld [vmem:[#allocation338_spill] sm:$0xff]  ;;  %3747 = vbcast.lane.b32.xlu1 %v12005_v38, 264  ;;  %v12081_v26 = vadd.f32 %v16930_v50, %v9882_v11 }
 0x51e   : > { %16896 = vst [vmem:[#allocation406_spill] sm:$0xff] %v11939_v31  ;;  %16897 = vst [vmem:[#allocation407_spill] sm:$0xff] %v11943_v30  ;;  %v12016_v31 = vadd.f32 %v16909_v9, %v9882_v11  ;;  %v12020_v12 = vadd.f32 %v16911_v19, %v9857_v16  ;;  %v12034_v9 = vadd.f32 %v16916_v45, %v9882_v11  ;;  %v16939_v50 = vld [vmem:[#allocation354_spill] sm:$0xff]  ;;  %3743 = vbcast.lane.b32.xlu0 %v12005_v38, 256 }
 0x51f   : > { %16898 = vst [vmem:[#allocation408_spill] sm:$0xff] %v11957_v40  ;;  %16899 = vst [vmem:[#allocation409_spill] sm:$0xff] %v11961_v47  ;;  %v12011_v30 = vpop.permute.xlu0 %3276  ;;  %v12024_v40 = vadd.f32 %v16913_v3, %v9862_v8  ;;  %v12038_v19 = vadd.f32 %v16918_v48, %v9857_v16  ;;  %v12052_v45 = vadd.f32 %v10500_v61, %v9865_v49  ;;  %v16923_v48 = vld [vmem:[#allocation344_spill] sm:$0xff]  ;;  %v16925_v3 = vld [vmem:[#allocation346_spill] sm:$0xff] }
 0x520   : > { %16900 = vst [vmem:[#allocation410_spill] sm:$0xff] %v11965_v27  ;;  %16901 = vst [vmem:[#allocation411_spill] sm:$0xff] %v11969_v23  ;;  %v12060_v23 = vadd.f32 %v16925_v3, %v9857_v16  ;;  %v16927_v47 = vld [vmem:[#allocation347_spill] sm:$0xff]  ;;  %v16932_v61 = vld [vmem:[#allocation350_spill] sm:$0xff]  ;;  %v12097_v27 = vrot.slane %v11059_v59, %v9056_v24 }
 0x521   : > { %16902 = vst [vmem:[#allocation412_spill] sm:$0xff] %v11978_v57  ;;  %16903 = vst [vmem:[#allocation413_spill] sm:$0xff] %v11986_v25  ;;  %v12045_v25 = vadd.f32 %v16920_v63, %v9862_v8  ;;  %v12048_v17 = vpop.permute.xlu1 %3299  ;;  %v12056_v57 = vadd.f32 %v16923_v48, %v9882_v11  ;;  %v12064_v63 = vadd.f32 %v16927_v47, %v9862_v8  ;;  %3504 = vbcast.lane.b32.xlu1 %v11623_v7, 272 }
 0x522   : > { %16905 = vst [vmem:[#allocation335_spill] sm:$0xff] %v11990_v41  ;;  %16907 = vst [vmem:[#allocation336_spill] sm:$0xff] %v11994_v37  ;;  %v12073_v48 = vadd.f32 %v10595_v58, %v9865_v49  ;;  %v12086_v41 = vadd.f32 %v16932_v61, %v9857_v16  ;;  %v16934_v58 = vld [vmem:[#allocation351_spill] sm:$0xff]  ;;  %3470 = vbcast.lane.b32.xlu0 %v11342_v36, 280 }
 0x523   : > { %16908 = vst [vmem:[#allocation414_spill] sm:$0xff] %v11998_v46  ;;  %16910 = vst [vmem:[#allocation337_spill] sm:$0xff] %v12016_v31  ;;  %v12066_v37 = vpop.permute.xlu0 %3287  ;;  %v16941_v46 = vld [vmem:[#allocation355_spill] sm:$0xff]  ;;  %v12182_v31 = vadd.f32 %v10975_v2, %v9865_v49 }
 0x524   : > { %16912 = vst [vmem:[#allocation338_spill] sm:$0xff] %v12020_v12  ;;  %16914 = vst [vmem:[#allocation339_spill] sm:$0xff] %v12024_v40  ;;  %v12090_v40 = vadd.f32 %v16934_v58, %v9862_v8  ;;  %v12122_v58 = vadd.f32 %v16941_v46, %v9862_v8  ;;  %v16949_v61 = vld [vmem:[#allocation359_spill] sm:$0xff] }
 0x525   : > { %16915 = vst [vmem:[#allocation415_spill] sm:$0xff] %v12030_v10  ;;  %16917 = vst [vmem:[#allocation341_spill] sm:$0xff] %v12034_v9  ;;  %v12093_v3 = vpop.permute.xlu1 %3310  ;;  %v12108_v9 = vadd.f32 %v10690_v53, %v9865_v49  ;;  %v12126_v53 = vadd.f32 %v10785_v5, %v9865_v49  ;;  %3538 = vbcast.lane.b32.xlu1 %v12097_v27, 264  ;;  %v12143_v5 = vrot.slane %v11478_v43, %v9044_v18  ;;  %v16966_v2 = vld [vmem:[#allocation367_spill] sm:$0xff] }
 0x526   : > { %16919 = vst [vmem:[#allocation342_spill] sm:$0xff] %v12038_v19  ;;  %16921 = vst [vmem:[#allocation343_spill] sm:$0xff] %v12045_v25  ;;  %v16937_v19 = vld [vmem:[#allocation352_spill] sm:$0xff]  ;;  %3534 = vbcast.lane.b32.xlu0 %v12097_v27, 256  ;;  %v12217_v12 = vadd.f32 %v16966_v2, %v9882_v11  ;;  %v12237_v2 = vrot.slane %v11716_v52, %v9044_v18  ;;  %v16984_v18 = vld [vmem:[#allocation377_spill] sm:$0xff] }
 0x527   : > { %16922 = vst [vmem:[#allocation416_spill] sm:$0xff] %v12052_v45  ;;  %16924 = vst [vmem:[#allocation344_spill] sm:$0xff] %v12056_v57  ;;  %v12103_v25 = vpop.permute.xlu0 %3295  ;;  %v12112_v59 = vadd.f32 %v16937_v19, %v9882_v11  ;;  %v12116_v45 = vadd.f32 %v16939_v50, %v9857_v16  ;;  %v16944_v19 = vld [vmem:[#allocation356_spill] sm:$0xff]  ;;  %v16946_v57 = vld [vmem:[#allocation358_spill] sm:$0xff]  ;;  %v12151_v50 = vadd.f32 %v10880_v15, %v9865_v49 }
 0x528   : > { %16926 = vst [vmem:[#allocation346_spill] sm:$0xff] %v12060_v23  ;;  %16928 = vst [vmem:[#allocation347_spill] sm:$0xff] %v12064_v63  ;;  %v12130_v47 = vadd.f32 %v16944_v19, %v9882_v11  ;;  %v12147_v19 = vadd.f32 %v16949_v61, %v9862_v8  ;;  %v16953_v63 = vld [vmem:[#allocation361_spill] sm:$0xff]  ;;  %v16955_v15 = vld [vmem:[#allocation362_spill] sm:$0xff] }
 0x529   : > { %16929 = vst [vmem:[#allocation417_spill] sm:$0xff] %v12073_v48  ;;  %16931 = vst [vmem:[#allocation349_spill] sm:$0xff] %v12081_v26  ;;  %v12136_v48 = vadd.f32 %v16946_v57, %v9857_v16  ;;  %v12139_v46 = vpop.permute.xlu1 %3318  ;;  %v12155_v57 = vadd.f32 %v10898_v39, %v9882_v11  ;;  %v12169_v10 = vadd.f32 %v16955_v15, %v9862_v8  ;;  %v16959_v15 = vld [vmem:[#allocation363_spill] sm:$0xff]  ;;  %3629 = vbcast.lane.b32.xlu1 %v12143_v5, 256 }
 0x52a   : > { %16933 = vst [vmem:[#allocation350_spill] sm:$0xff] %v12086_v41  ;;  %16935 = vst [vmem:[#allocation351_spill] sm:$0xff] %v12090_v40  ;;  %v12159_v40 = vadd.f32 %v16953_v63, %v9857_v16  ;;  %v6861_v41 = vld [vmem:[%s8807_s24 + $0x10] sm:$0xff]  ;;  %v12186_v23 = vadd.f32 %v16959_v15, %v9882_v11  ;;  %v16961_v15 = vld [vmem:[#allocation364_spill] sm:$0xff]  ;;  %v12213_v39 = vadd.f32 %v11069_v62, %v9865_v49  ;;  %3599 = vbcast.lane.b32.xlu0 %v11672_v34, 272 }
 0x52b   : > { %16936 = vst [vmem:[#allocation418_spill] sm:$0xff] %v12108_v9  ;;  %16938 = vst [vmem:[#allocation352_spill] sm:$0xff] %v12112_v59  ;;  %v12161_v26 = vpop.permute.xlu0 %3306  ;;  %vm6865_vm3 = vnez %v6861_v41  ;;  %v12209_v41 = vrot.slane %v11478_v43, %v9048_v20 }
 0x52c   : > { %16940 = vst [vmem:[#allocation354_spill] sm:$0xff] %v12116_v45  ;;  %16942 = vst [vmem:[#allocation355_spill] sm:$0xff] %v12122_v58  ;;  %v16963_v58 = vld [vmem:[#allocation366_spill] sm:$0xff]  ;;  %v16993_v45 = vld [vmem:[#allocation381_spill] sm:$0xff] }
 0x52d   : > { %16943 = vst [vmem:[#allocation419_spill] sm:$0xff] %v12126_v53  ;;  %16945 = vst [vmem:[#allocation356_spill] sm:$0xff] %v12130_v47  ;;  %v12189_v36 = vpop.permute.xlu1 %3329  ;;  %v12200_v47 = vadd.f32 %v16961_v15, %v9857_v16  ;;  %v16968_v15 = vld [vmem:[#allocation368_spill] sm:$0xff]  ;;  %3713 = vbcast.lane.b32.xlu1 %v11720_v55, 272 }
 0x52e   : > { %16947 = vst [vmem:[#allocation358_spill] sm:$0xff] %v12136_v48  ;;  %16948 = vst [vmem:[#allocation420_spill] sm:$0xff] %v12143_v5  ;;  %v12204_v48 = vadd.f32 %v16963_v58, %v9862_v8  ;;  %v12221_v61 = vadd.f32 %v16968_v15, %v9857_v16  ;;  %v16970_v58 = vmov 0   ;;  %v16974_v15 = vld [vmem:[#allocation372_spill] sm:$0xff]  ;;  %3633 = vbcast.lane.b32.xlu0 %v12143_v5, 264 }
 0x52f   : > { %16950 = vst [vmem:[#allocation359_spill] sm:$0xff] %v12147_v19  ;;  %16951 = vst [vmem:[#allocation421_spill] sm:$0xff] %v12151_v50  ;;  %v12195_v63 = vpop.permute.xlu0 %3314  ;;  %v12224_v14 = vsel %vm6865_vm3, 16843009, %v16970_v58  ;;  %v16972_v19 = vld [vmem:[#allocation371_spill] sm:$0xff]  ;;  %v12241_v50 = vadd.f32 %v16974_v15, %v9865_v49  ;;  %v16982_v15 = vld [vmem:[#allocation376_spill] sm:$0xff] }
 0x530   : > { %16952 = vst [vmem:[#allocation422_spill] sm:$0xff] %v12155_v57  ;;  %16954 = vst [vmem:[#allocation361_spill] sm:$0xff] %v12159_v40  ;;  %v12230_v40 = vadd.f32 %v16972_v19, %v9862_v8  ;;  %v16978_v57 = vld [vmem:[#allocation374_spill] sm:$0xff]  ;;  %v12261_v9 = vadd.f32 %v16982_v15, %v9865_v49  ;;  %v12275_v15 = vadd.f32 %v16984_v18, %v9882_v11 }
 0x531   : > { %16956 = vst [vmem:[#allocation362_spill] sm:$0xff] %v12169_v10  ;;  %16957 = vst [vmem:[#allocation423_spill] sm:$0xff] %v12177_v0  ;;  %v12233_v62 = vpop.permute.xlu1 %3337  ;;  %v16976_v10 = vld [vmem:[#allocation373_spill] sm:$0xff]  ;;  %v12249_v19 = vadd.f32 %v16978_v57, %v9857_v16  ;;  %v16988_v57 = vld [vmem:[#allocation379_spill] sm:$0xff]  ;;  %3762 = vbcast.lane.b32.xlu1 %v12177_v0, 256 }
 0x532   : > { %16958 = vst [vmem:[#allocation424_spill] sm:$0xff] %v12182_v31  ;;  %16960 = vst [vmem:[#allocation363_spill] sm:$0xff] %v12186_v23  ;;  %v12245_v31 = vadd.f32 %v16976_v10, %v9882_v11  ;;  %v16980_v23 = vld [vmem:[#allocation375_spill] sm:$0xff]  ;;  %v6879_v10 = vunpack.c.0.s8 %v12224_v14  ;;  %v16995_v18 = vld [vmem:[#allocation382_spill] sm:$0xff]  ;;  %3732 = vbcast.lane.b32.xlu0 %v11769_v33, 272 }
 0x533   : > { %16962 = vst [vmem:[#allocation364_spill] sm:$0xff] %v12200_v47  ;;  %16964 = vst [vmem:[#allocation366_spill] sm:$0xff] %v12204_v48  ;;  %v12253_v59 = vadd.f32 %v16980_v23, %v9862_v8  ;;  %v12255_v53 = vpop.permute.xlu0 %3325  ;;  %v16986_v48 = vld [vmem:[#allocation378_spill] sm:$0xff]  ;;  %v17015_v33 = vld [vmem:[#allocation392_spill] sm:$0xff] }
 0x534   : > { %16965 = vst [vmem:[#allocation425_spill] sm:$0xff] %v12213_v39  ;;  %16967 = vst [vmem:[#allocation367_spill] sm:$0xff] %v12217_v12  ;;  %v12279_v47 = vadd.f32 %v16986_v48, %v9857_v16  ;;  %v12283_v39 = vadd.f32 %v16988_v57, %v9862_v8  ;;  %v6903_v23 = vpack.c.b16 %v6879_v10, %v6879_v10  ;;  %v16997_v48 = vld [vmem:[#allocation383_spill] sm:$0xff] }
 0x535   : > { %16969 = vst [vmem:[#allocation368_spill] sm:$0xff] %v12221_v61  ;;  %16971 = vst [vmem:[#allocation426_spill] sm:$0xff] %v12224_v14  ;;  %v12286_v51 = vpop.permute.xlu1 %3348  ;;  %v16990_v61 = vld [vmem:[#allocation380_spill] sm:$0xff]  ;;  %v12302_v14 = vrot.slane %v11716_v52, %v9048_v20  ;;  %3489 = vbcast.lane.b32.xlu1 %v11434_v6, 280  ;;  %v12369_v55 = vadd.f32 %v17015_v33, %v9865_v49  ;;  %v17021_v6 = vld [vmem:[#allocation395_spill] sm:$0xff] }
 0x536   : > { %16973 = vst [vmem:[#allocation371_spill] sm:$0xff] %v12230_v40  ;;  %16975 = vst [vmem:[#allocation372_spill] sm:$0xff] %v12241_v50  ;;  %v12297_v57 = vadd.f32 %v16990_v61, %v9865_v49  ;;  %v12306_v40 = vadd.f32 %v16993_v45, %v9882_v11  ;;  %v16999_v61 = vld [vmem:[#allocation384_spill] sm:$0xff]  ;;  %v17001_v45 = vld [vmem:[#allocation385_spill] sm:$0xff]  ;;  %3766 = vbcast.lane.b32.xlu0 %v12177_v0, 264 }
 0x537   : > { %16977 = vst [vmem:[#allocation373_spill] sm:$0xff] %v12245_v31  ;;  %16979 = vst [vmem:[#allocation374_spill] sm:$0xff] %v12249_v19  ;;  %v12292_v12 = vpop.permute.xlu0 %3333  ;;  %v12314_v31 = vadd.f32 %v16997_v48, %v9862_v8  ;;  %v12325_v50 = vadd.f32 %v17001_v45, %v9882_v11  ;;  %v17003_v48 = vld [vmem:[#allocation386_spill] sm:$0xff]  ;;  %v17007_v20 = vld [vmem:[#allocation388_spill] sm:$0xff] }
 0x538   : > { %16981 = vst [vmem:[#allocation375_spill] sm:$0xff] %v12253_v59  ;;  %16983 = vst [vmem:[#allocation376_spill] sm:$0xff] %v12261_v9  ;;  %v12310_v59 = vadd.f32 %v16995_v18, %v9857_v16  ;;  %v12318_v9 = vadd.f32 %v16999_v61, %v9865_v49  ;;  %v12332_v21 = vadd.f32 %v17003_v48, %v9857_v16  ;;  %v17005_v61 = vld [vmem:[#allocation387_spill] sm:$0xff]  ;;  %v17009_v19 = vld [vmem:[#allocation389_spill] sm:$0xff] }
 0x539   : > { %16985 = vst [vmem:[#allocation377_spill] sm:$0xff] %v12275_v15  ;;  %16987 = vst [vmem:[#allocation378_spill] sm:$0xff] %v12279_v47  ;;  %v12328_v18 = vpop.permute.xlu1 %3356  ;;  %v12336_v4 = vadd.f32 %v17005_v61, %v9862_v8  ;;  %v12340_v10 = vadd.f32 %v17007_v20, %v9865_v49  ;;  %v12344_v45 = vadd.f32 %v17009_v19, %v9882_v11  ;;  %v17011_v15 = vld [vmem:[#allocation390_spill] sm:$0xff]  ;;  %3565 = vbcast.lane.b32.xlu1 %v11482_v28, 280  ;;  %v17017_v28 = vld [vmem:[#allocation393_spill] sm:$0xff] }
 0x53a   : > { %16989 = vst [vmem:[#allocation379_spill] sm:$0xff] %v12283_v39  ;;  %16991 = vst [vmem:[#allocation380_spill] sm:$0xff] %v12297_v57  ;;  %v12351_v48 = vadd.f32 %v17011_v15, %v9857_v16  ;;  %v12356_v61 = vrot.slane %v11478_v43, %v9056_v24  ;;  %v6904_v20 = vpack.c.b8 %v6903_v23, %v6903_v23  ;;  %v17013_v15 = vld [vmem:[#allocation391_spill] sm:$0xff]  ;;  %v17025_v33 = vld [vmem:[#allocation398_spill] sm:$0xff]  ;;  %3523 = vbcast.lane.b32.xlu0 %v11861_v13, 272 }
 0x53b   : > { %16992 = vst [vmem:[#allocation427_spill] sm:$0xff] %v12302_v14  ;;  %16994 = vst [vmem:[#allocation381_spill] sm:$0xff] %v12306_v40  ;;  %v12346_v39 = vpop.permute.xlu0 %3344  ;;  %v12365_v57 = vadd.f32 %v17013_v15, %v9862_v8  ;;  %v12376_v23 = vrot.slane %v11716_v52, %v9052_v22  ;;  %v12387_v19 = vadd.f32 %v17017_v28, %v9882_v11  ;;  %v17023_v15 = vld [vmem:[#allocation397_spill] sm:$0xff]  ;;  %v17027_v28 = vld [vmem:[#allocation400_spill] sm:$0xff] }
 0x53c   : > { %16996 = vst [vmem:[#allocation382_spill] sm:$0xff] %v12310_v59  ;;  %16998 = vst [vmem:[#allocation383_spill] sm:$0xff] %v12314_v31  ;;  %vm6927_vm4 = vnez %v6904_v20  ;;  %v12396_v47 = vadd.f32 %v17021_v6, %v9862_v8  ;;  %v12400_v14 = vadd.f32 %v17023_v15, %v9865_v49  ;;  %v12414_v6 = vadd.f32 %v11815_v32, %v9862_v8 }
 0x53d   : > { %17000 = vst [vmem:[#allocation384_spill] sm:$0xff] %v12318_v9  ;;  %17002 = vst [vmem:[#allocation385_spill] sm:$0xff] %v12325_v50  ;;  %v12372_v43 = vpop.permute.xlu1 %3367  ;;  %v17019_v50 = vld [vmem:[#allocation394_spill] sm:$0xff]  ;;  %3618 = vbcast.lane.b32.xlu1 %v11953_v42, 272  ;;  %v12435_v32 = vrot.slane %v11716_v52, %v9056_v24  ;;  %v12483_v40 = vadd.f32 %v12011_v30, %v9865_v49  ;;  %v12487_v31 = vadd.f32 %v12048_v17, %v9882_v11  ;;  %v17133_v9 = vld [vmem:[#allocation261_spill] sm:$0xff] }
 0x53e   : > { %17004 = vst [vmem:[#allocation386_spill] sm:$0xff] %v12332_v21  ;;  %17006 = vst [vmem:[#allocation387_spill] sm:$0xff] %v12336_v4  ;;  %v12391_v22 = vadd.f32 %v17019_v50, %v9857_v16  ;;  %v12408_v4 = vadd.f32 %v17027_v28, %v9857_v16  ;;  %v17032_v28 = vld [vmem:[#allocation403_spill] sm:$0xff]  ;;  %v17034_v50 = vld [vmem:[#allocation404_spill] sm:$0xff]  ;;  %v12464_v21 = vadd.f32 %v11949_v35, %v9882_v11  ;;  %3584 = vbcast.lane.b32.xlu0 %v11531_v54, 280 }
 0x53f   : > { %17008 = vst [vmem:[#allocation388_spill] sm:$0xff] %v12340_v10  ;;  %17010 = vst [vmem:[#allocation389_spill] sm:$0xff] %v12344_v45  ;;  %v12382_v5 = vpop.permute.xlu0 %3352  ;;  %v12404_v45 = vadd.f32 %v17025_v33, %v9882_v11  ;;  %v12425_v10 = vadd.f32 %v17032_v28, %v9882_v11  ;;  %v12429_v20 = vadd.f32 %v17034_v50, %v9857_v16  ;;  %v17134_v59 = vmax.f32 %v17133_v9, 0.0  ;;  %v17142_v9 = vld [vmem:[#allocation278_spill] sm:$0xff] }
 0x540   : > { %17012 = vst [vmem:[#allocation390_spill] sm:$0xff] %v12351_v48  ;;  %17014 = vst [vmem:[#allocation391_spill] sm:$0xff] %v12365_v57  ;;  %v17030_v48 = vld [vmem:[#allocation401_spill] sm:$0xff]  ;;  %v12444_v28 = vadd.f32 %v11910_v56, %v9862_v8  ;;  %v12448_v50 = vadd.f32 %v11916_v1, %v9865_v49  ;;  %v12473_v1 = vadd.f32 %v11971_v29, %v9857_v16 }
 0x541   : > { %17016 = vst [vmem:[#allocation392_spill] sm:$0xff] %v12369_v55  ;;  %17018 = vst [vmem:[#allocation393_spill] sm:$0xff] %v12387_v19  ;;  %v12418_v15 = vadd.f32 %v17030_v48, %v9865_v49  ;;  %v12421_v33 = vpop.permute.xlu1 %3375  ;;  %v12438_v48 = vsel %vm6927_vm4, 16843009, %v16970_v58  ;;  %v6859_v19 = vld [vmem:[%s8807_s24] sm:$0xff]  ;;  %3652 = vbcast.lane.b32.xlu1 %v12209_v41, 264  ;;  %v12479_v35 = vadd.f32 %v12001_v44, %v9862_v8 }
 0x542   : > { %17020 = vst [vmem:[#allocation394_spill] sm:$0xff] %v12391_v22  ;;  %17022 = vst [vmem:[#allocation395_spill] sm:$0xff] %v12396_v47  ;;  %vm6863_vm5 = vnez %v6859_v19  ;;  %v12491_v29 = vadd.f32 %v12066_v37, %v9857_v16  ;;  %v12495_v54 = vadd.f32 %v12093_v3, %v9862_v8  ;;  %v12499_v44 = vadd.f32 %v12103_v25, %v9865_v49 }
 0x543   : > { %17024 = vst [vmem:[#allocation397_spill] sm:$0xff] %v12400_v14  ;;  %17026 = vst [vmem:[#allocation398_spill] sm:$0xff] %v12404_v45  ;;  %v12431_v57 = vpop.permute.xlu0 %3363  ;;  %v12467_v52 = vsel %vm6863_vm5, 16843009, %v16970_v58  ;;  %v12503_v30 = vadd.f32 %v12139_v46, %v9882_v11  ;;  %v12509_v37 = vadd.f32 %v12161_v26, %v9857_v16  ;;  %v12513_v3 = vadd.f32 %v12189_v36, %v9862_v8 }
 0x544   : > { %17028 = vst [vmem:[#allocation400_spill] sm:$0xff] %v12408_v4  ;;  %17029 = vst [vmem:[#allocation428_spill] sm:$0xff] %v12414_v6  ;;  %v6871_v19 = vunpack.c.0.s8 %v12467_v52  ;;  %v12517_v25 = vadd.f32 %v12195_v63, %v9865_v49  ;;  %v12526_v24 = vadd.f32 %v12255_v53, %v9857_v16  ;;  %v12530_v26 = vadd.f32 %v12286_v51, %v9862_v8 }
 0x545   : > { %17031 = vst [vmem:[#allocation401_spill] sm:$0xff] %v12418_v15  ;;  %17033 = vst [vmem:[#allocation403_spill] sm:$0xff] %v12425_v10  ;;  %v3387_v22 = vpop.permute.xlu1 %3386  ;;  %3781 = vbcast.lane.b32.xlu1 %v12237_v2, 256  ;;  %3648 = vbcast.lane.b32.xlu0 %v12209_v41, 256  ;;  %v12558_v63 = vadd.f32 %v12346_v39, %v9857_v16  ;;  %v12578_v39 = vadd.f32 %v12431_v57, %v9857_v16  ;;  %v17121_v15 = vld [vmem:[#allocation266_spill] sm:$0xff] }
 0x546   : > { %17035 = vst [vmem:[#allocation404_spill] sm:$0xff] %v12429_v20  ;;  %17036 = vst [vmem:[#allocation429_spill] sm:$0xff] %v12435_v32  ;;  %v6887_v56 = vpack.c.b16 %v6871_v19, %v6871_v19  ;;  %v12522_v19 = vadd.f32 %v12233_v62, %v9882_v11  ;;  %v12581_v53 = vadd.f32 %v3387_v22, %v9862_v8  ;;  %v17122_v47 = vmax.f32 %v17121_v15, 0.0 }
 0x547   : > { %17037 = vst [vmem:[#allocation430_spill] sm:$0xff] %v12438_v48  ;;  %17038 = vst [vmem:[#allocation431_spill] sm:$0xff] %v12444_v28  ;;  %v3372_v55 = vpop.permute.xlu0 %3371 }
 0x548   : > { %17039 = vst [vmem:[#allocation432_spill] sm:$0xff] %v12448_v50  ;;  %17040 = vst [vmem:[#allocation433_spill] sm:$0xff] %v12464_v21  ;;  %v6888_v21 = vpack.c.b8 %v6887_v56, %v6887_v56  ;;  %v12546_v56 = vadd.f32 %v12292_v12, %v9865_v49  ;;  %v12562_v12 = vadd.f32 %v12372_v43, %v9862_v8 }
 0x549   : > { %17041 = vst [vmem:[#allocation434_spill] sm:$0xff] %v12467_v52  ;;  %17042 = vst [vmem:[#allocation435_spill] sm:$0xff] %v12473_v1  ;;  %v3395_v17 = vpop.permute.xlu1 %3394  ;;  %3508 = vbcast.lane.b32.xlu1 %v11623_v7, 280  ;;  %v12553_v7 = vadd.f32 %v12328_v18, %v9882_v11  ;;  %3751 = vbcast.lane.b32.xlu0 %v12005_v38, 272  ;;  %v12566_v1 = vadd.f32 %v12382_v5, %v9865_v49  ;;  %v17137_v52 = vld [vmem:[#allocation279_spill] sm:$0xff] }
 0x54a   : > { %17043 = vst [vmem:[#allocation436_spill] sm:$0xff] %v12479_v35  ;;  %17044 = vst [vmem:[#allocation437_spill] sm:$0xff] %v12483_v40  ;;  %vm12568_vm6 = vnez %v6888_v21  ;;  %v12574_v18 = vadd.f32 %v12421_v33, %v9882_v11  ;;  %v12584_v43 = vadd.f32 %v3372_v55, %v9865_v49  ;;  %v12589_v36 = vadd.f32 %v3395_v17, %v9882_v11  ;;  %v17112_v35 = vld [vmem:[#allocation255_spill] sm:$0xff] }
 0x54b   : > { %17045 = vst [vmem:[#allocation438_spill] sm:$0xff] %v12487_v31  ;;  %17046 = vst [vmem:[#allocation439_spill] sm:$0xff] %v12491_v29  ;;  %v3383_v46 = vpop.permute.xlu0 %3382 }
 0x54c   : > { %17047 = vst [vmem:[#allocation440_spill] sm:$0xff] %v12495_v54  ;;  %17048 = vst [vmem:[#allocation441_spill] sm:$0xff] %v12499_v44  ;;  %v12592_v33 = vadd.f32 %v3383_v46, %v9857_v16  ;;  %v17106_v54 = vld [vmem:[#allocation254_spill] sm:$0xff] }
 0x54d   : > { %17049 = vst [vmem:[#allocation442_spill] sm:$0xff] %v12503_v30  ;;  %17050 = vst [vmem:[#allocation443_spill] sm:$0xff] %v12509_v37  ;;  %v3406_v51 = vpop.permute.xlu1 %3405  ;;  %3603 = vbcast.lane.b32.xlu1 %v11672_v34, 280  ;;  %3785 = vbcast.lane.b32.xlu0 %v12237_v2, 264  ;;  %v12604_v34 = vsel %vm12568_vm6, 16843009, %v16970_v58 }
 0x54e   : > { %17051 = vst [vmem:[#allocation444_spill] sm:$0xff] %v12513_v3  ;;  %17052 = vst [vmem:[#allocation445_spill] sm:$0xff] %v12517_v25  ;;  %v4269_v57 = vadd.f32 %v3406_v51, %v9862_v8  ;;  %v17097_v3 = vld [vmem:[#allocation313_spill] sm:$0xff]  ;;  %v17107_v37 = vmax.f32 %v17106_v54, 0.0  ;;  %v17110_v44 = vld [vmem:[#allocation262_spill] sm:$0xff] }
 0x54f   : > { %17053 = vst [vmem:[#allocation446_spill] sm:$0xff] %v12522_v19  ;;  %17054 = vst [vmem:[#allocation447_spill] sm:$0xff] %v12526_v24  ;;  %v3391_v28 = vpop.permute.xlu0 %3390  ;;  %v17098_v24 = vmax.f32 %v17097_v3, 0.0  ;;  %v17108_v3 = vld [vmem:[#allocation258_spill] sm:$0xff]  ;;  %v17135_v58 = vld [vmem:[#allocation265_spill] sm:$0xff] }
 0x550   : > { %17055 = vst [vmem:[#allocation448_spill] sm:$0xff] %v12530_v26  ;;  %17056 = vst [vmem:[#allocation449_spill] sm:$0xff] %v12546_v56  ;;  %v12596_v22 = vadd.f32 %v3391_v28, %v9865_v49  ;;  %v17109_v31 = vmax.f32 %v17108_v3, 0.0 }
 0x551   : > { %17057 = vst [vmem:[#allocation450_spill] sm:$0xff] %v12553_v7  ;;  %17058 = vst [vmem:[#allocation451_spill] sm:$0xff] %v12558_v63  ;;  %v3414_v21 = vpop.permute.xlu1 %3413  ;;  %3667 = vbcast.lane.b32.xlu1 %v12270_v60, 256  ;;  %v4781_v7 = vmax.f32 %v4269_v57, 0.0  ;;  %3542 = vbcast.lane.b32.xlu0 %v12097_v27, 272 }
 0x552   : > { %17059 = vst [vmem:[#allocation452_spill] sm:$0xff] %v12562_v12  ;;  %17060 = vst [vmem:[#allocation453_spill] sm:$0xff] %v12566_v1  ;;  %v4271_v55 = vadd.f32 %v3414_v21, %v9882_v11  ;;  %v17081_v12 = vld [vmem:[#allocation268_spill] sm:$0xff] }
 0x553   : > { %17063 = vst [vmem:[#allocation454_spill] sm:$0xff] %v12574_v18  ;;  %17064 = vst [vmem:[#allocation455_spill] sm:$0xff] %v12578_v39  ;;  %v3402_v50 = vpop.permute.xlu0 %3401 }
 0x554   : > { %17065 = vst [vmem:[#allocation456_spill] sm:$0xff] %v12581_v53  ;;  %17066 = vst [vmem:[#allocation457_spill] sm:$0xff] %v12584_v43  ;;  %v4268_v62 = vadd.f32 %v3402_v50, %v9857_v16  ;;  %v4783_v18 = vmax.f32 %v4271_v55, 0.0  ;;  %v17071_v53 = vld [vmem:[#allocation252_spill] sm:$0xff] }
 0x555   : > { %17067 = vst [vmem:[#allocation458_spill] sm:$0xff] %v12589_v36  ;;  %17068 = vst [vmem:[#allocation459_spill] sm:$0xff] %v12592_v33  ;;  %v12615_v10 = vpop.permute.xlu1 %4903  ;;  %v17072_v43 = vmax.f32 %v17071_v53, 0.0  ;;  %v17073_v36 = vld [vmem:[#allocation256_spill] sm:$0xff]  ;;  %v17082_v53 = vmax.f32 %v17081_v12, 0.0 }
 0x556   : > { %17069 = vst [vmem:[#allocation460_spill] sm:$0xff] %v12596_v22  ;;  %17070 = vst [vmem:[#allocation461_spill] sm:$0xff] %v12604_v34  ;;  %v4780_v21 = vmax.f32 %v4268_v62, 0.0  ;;  %v5333_v26 = vmul.f32 %v12615_v10, %v4781_v7  ;;  %v17074_v46 = vmax.f32 %v17073_v36, 0.0  ;;  %v17075_v33 = vld [vmem:[#allocation260_spill] sm:$0xff]  ;;  %v17139_v34 = vld [vmem:[#allocation427_spill] sm:$0xff] }
 0x557   : > { %v3410_v51 = vpop.permute.xlu0 %3409  ;;  %v5173_v17 = vmul.f32 %v12615_v10, %v17072_v43  ;;  %v17076_v28 = vmax.f32 %v17075_v33, 0.0  ;;  %v17077_v55 = vld [vmem:[#allocation396_spill] sm:$0xff]  ;;  %v12642_v43 = vmul.f32 %v12615_v10, %v17082_v53  ;;  %v17090_v53 = vld [vmem:[#allocation307_spill] sm:$0xff] }
 0x558   : > { %v4270_v50 = vadd.f32 %v3410_v51, %v9865_v49  ;;  %v5177_v57 = vmul.f32 %v12615_v10, %v17074_v46  ;;  %3717 = vbcast.lane.b32.xlu1 %v17077_v55, 280  ;;  %v17079_v51 = vld [vmem:[#allocation264_spill] sm:$0xff]  ;;  %v17091_v19 = vmax.f32 %v17090_v53, 0.0 }
 0x559   : > { %v5181_v5 = vmul.f32 %v12615_v10, %v17076_v28  ;;  %v12634_v62 = vpop.permute.xlu1 %4913  ;;  %v17080_v22 = vmax.f32 %v17079_v51, 0.0  ;;  %v17083_v36 = vld [vmem:[#allocation272_spill] sm:$0xff] }
 0x55a   : > { %17078 = vst [vmem:[#allocation252_spill] sm:$0xff] %v12634_v62  ;;  %v17084_v39 = vmax.f32 %v17083_v36, 0.0  ;;  %v17085_v33 = vld [vmem:[#allocation276_spill] sm:$0xff]  ;;  %v4782_v1 = vmax.f32 %v4270_v50, 0.0  ;;  %v12664_v36 = vmul.f32 %v12615_v10, %v17091_v19 }
 0x55b   : > { %v5185_v7 = vmul.f32 %v12615_v10, %v17080_v22  ;;  %v17086_v28 = vmax.f32 %v17085_v33, 0.0  ;;  %v12654_v63 = vpop.permute.xlu0 %4898  ;;  %v17088_v51 = vld [vmem:[#allocation280_spill] sm:$0xff] }
 0x55c   : > { %v12647_v46 = vmul.f32 %v12615_v10, %v17084_v39  ;;  %17087 = vst [vmem:[#allocation256_spill] sm:$0xff] %v12654_v63  ;;  %v17089_v22 = vmax.f32 %v17088_v51, 0.0  ;;  %17092 = vst [vmem:[#allocation260_spill] sm:$0xff] %v12664_v36  ;;  %v17093_v39 = vld [vmem:[#allocation308_spill] sm:$0xff]  ;;  %v5332_v50 = vmul.f32 %v12654_v63, %v4780_v21  ;;  %v12676_v51 = vmul.f32 %v12615_v10, %v17098_v24 }
 0x55d   : > { %v12652_v55 = vmul.f32 %v12615_v10, %v17086_v28  ;;  %v17094_v56 = vmax.f32 %v17093_v39, 0.0  ;;  %v17096_v28 = vld [vmem:[#allocation420_spill] sm:$0xff]  ;;  %v5175_v21 = vmul.f32 %v12634_v62, %v17107_v37  ;;  %v5179_v24 = vmul.f32 %v12634_v62, %v17109_v31  ;;  %3770 = vbcast.lane.b32.xlu1 %v12177_v0, 272  ;;  %v17116_v37 = vld [vmem:[#allocation263_spill] sm:$0xff] }
 0x55e   : > { %v12659_v12 = vmul.f32 %v12615_v10, %v17089_v22  ;;  %3637 = vbcast.lane.b32.xlu0 %v17096_v28, 272  ;;  %17099 = vst [vmem:[#allocation264_spill] sm:$0xff] %v12676_v51  ;;  %v17100_v22 = vld [vmem:[#allocation320_spill] sm:$0xff]  ;;  %v17117_v6 = vmax.f32 %v17116_v37, 0.0  ;;  %v17118_v31 = vld [vmem:[#allocation267_spill] sm:$0xff]  ;;  %v6364_v45 = vadd.f32 %v5333_v26, %v5332_v50  ;;  %v17143_v51 = vmax.f32 %v17142_v9, 0.0 }
 0x55f   : > { %v12669_v33 = vmul.f32 %v12615_v10, %v17094_v56  ;;  %v17101_v30 = vmax.f32 %v17100_v22, 0.0  ;;  %v17103_v19 = vld [vmem:[#allocation324_spill] sm:$0xff]  ;;  %v5335_v56 = vmul.f32 %v12634_v62, %v4783_v18  ;;  %v17111_v22 = vmax.f32 %v17110_v44, 0.0  ;;  %v17114_v18 = vld [vmem:[#allocation259_spill] sm:$0xff]  ;;  %v17147_v28 = vld [vmem:[#allocation282_spill] sm:$0xff] }
 0x560   : > { %v17104_v25 = vmax.f32 %v17103_v19, 0.0  ;;  %v3425_v19 = vpop.permute.xlu1 %3424  ;;  %v17115_v40 = vmax.f32 %v17114_v18, 0.0  ;;  %v5180_v3 = vmul.f32 %v12654_v63, %v17117_v6  ;;  %v17119_v20 = vmax.f32 %v17118_v31, 0.0  ;;  %v17127_v31 = vld [vmem:[#allocation257_spill] sm:$0xff]  ;;  %v17129_v50 = vld [vmem:[#allocation275_spill] sm:$0xff] }
 0x561   : > { %17095 = vst [vmem:[#allocation396_spill] sm:$0xff] %v12669_v33  ;;  %v12681_v53 = vmul.f32 %v12615_v10, %v17101_v30  ;;  %v5183_v30 = vmul.f32 %v12634_v62, %v17111_v22  ;;  %v12711_v22 = vpop.permute.xlu0 %4908  ;;  %v17128_v26 = vmax.f32 %v17127_v31, 0.0  ;;  %v17136_v31 = vmax.f32 %v17135_v58, 0.0  ;;  %3804 = vbcast.lane.b32.xlu1 %v17139_v34, 264  ;;  %v17144_v33 = vld [vmem:[#allocation283_spill] sm:$0xff] }
 0x562   : > { %v12686_v39 = vmul.f32 %v12615_v10, %v17104_v25  ;;  %v17113_v25 = vmax.f32 %v17112_v35, 0.0  ;;  %v5176_v54 = vmul.f32 %v12654_v63, %v17115_v40  ;;  %v5184_v44 = vmul.f32 %v12654_v63, %v17119_v20  ;;  %17120 = vst [vmem:[#allocation276_spill] sm:$0xff] %v12711_v22  ;;  %v17125_v40 = vld [vmem:[#allocation270_spill] sm:$0xff]  ;;  %3671 = vbcast.lane.b32.xlu0 %v12270_v60, 264 }
 0x563   : > { %17102 = vst [vmem:[#allocation268_spill] sm:$0xff] %v12681_v53  ;;  %v5187_v35 = vmul.f32 %v12634_v62, %v17122_v47  ;;  %v17126_v37 = vmax.f32 %v17125_v40, 0.0  ;;  %v5334_v20 = vmul.f32 %v12711_v22, %v4782_v1  ;;  %v5174_v15 = vmul.f32 %v12711_v22, %v17128_v26 }
 0x564   : > { %17105 = vst [vmem:[#allocation272_spill] sm:$0xff] %v12686_v39  ;;  %v5172_v29 = vmul.f32 %v12654_v63, %v17113_v25  ;;  %v17123_v25 = vld [vmem:[#allocation271_spill] sm:$0xff]  ;;  %v17130_v47 = vmax.f32 %v17129_v50, 0.0  ;;  %v5178_v1 = vmul.f32 %v12711_v22, %v17134_v59  ;;  %v5182_v26 = vmul.f32 %v12711_v22, %v17136_v31  ;;  %v17140_v39 = vld [vmem:[#allocation269_spill] sm:$0xff] }
 0x565   : > { %v17124_v4 = vmax.f32 %v17123_v25, 0.0  ;;  %v12724_v6 = vmul.f32 %v12634_v62, %v17126_v37  ;;  %v4273_v37 = vadd.f32 %v3425_v19, %v9862_v8  ;;  %v17138_v50 = vmax.f32 %v17137_v52, 0.0  ;;  %v3421_v52 = vpop.permute.xlu0 %3420  ;;  %3622 = vbcast.lane.b32.xlu1 %v11953_v42, 280 }
 0x566   : > { %v12734_v25 = vmul.f32 %v12654_v63, %v17130_v47  ;;  %v17141_v53 = vmax.f32 %v17140_v39, 0.0  ;;  %v12760_v59 = vmul.f32 %v12634_v62, %v17143_v51  ;;  %v6004_v58 = vadd.f32 %v5173_v17, %v5172_v29 }
 0x567   : > { %v12719_v18 = vmul.f32 %v12654_v63, %v17124_v4  ;;  %v17131_v4 = vld [vmem:[#allocation274_spill] sm:$0xff]  ;;  %v12751_v47 = vmul.f32 %v12654_v63, %v17138_v50  ;;  %v17145_v50 = vmax.f32 %v17144_v33, 0.0  ;;  %v6013_v48 = vadd.f32 %v5177_v57, %v5176_v54 }
 0x568   : > { %v17132_v14 = vmax.f32 %v17131_v4, 0.0  ;;  %v3444_v4 = vpop.permute.xlu1 %3443  ;;  %v5186_v19 = vmul.f32 %v12711_v22, %v17141_v53  ;;  %v4272_v39 = vadd.f32 %v3421_v52, %v9857_v16  ;;  %v6005_v9 = vadd.f32 %v6004_v58, %v5174_v15 }
 0x569   : > { %v4277_v31 = vadd.f32 %v3444_v4, %v9862_v8  ;;  %v12766_v36 = vmul.f32 %v12654_v63, %v17145_v50  ;;  %v6031_v0 = vadd.f32 %v5185_v7, %v5184_v44  ;;  %v4785_v51 = vmax.f32 %v4273_v37, 0.0  ;;  %v3440_v52 = vpop.permute.xlu0 %3439  ;;  %3686 = vbcast.lane.b32.xlu1 %v12356_v61, 256 }
 0x56a   : > { %v12739_v40 = vmul.f32 %v12634_v62, %v17132_v14  ;;  %v6365_v14 = vadd.f32 %v6364_v45, %v5334_v20  ;;  %v6022_v45 = vadd.f32 %v5181_v5, %v5180_v3  ;;  %v17146_v20 = vld [vmem:[#allocation399_spill] sm:$0xff]  ;;  %v6014_v29 = vadd.f32 %v6013_v48, %v5178_v1 }
 0x56b   : > { %3736 = vbcast.lane.b32.xlu0 %v17146_v20, 280  ;;  %v4789_v32 = vmax.f32 %v4277_v31, 0.0  ;;  %v17148_v50 = vmax.f32 %v17147_v28, 0.0  ;;  %v6006_v5 = vadd.f32 %v6005_v9, %v5175_v21  ;;  %v6032_v54 = vadd.f32 %v6031_v0, %v5186_v19 }
 0x56c   : > { %v6366_v53 = vadd.f32 %v6365_v14, %v5335_v56  ;;  %v6023_v17 = vadd.f32 %v6022_v45, %v5182_v26  ;;  %v3459_v4 = vpop.permute.xlu1 %3458  ;;  %v4784_v3 = vmax.f32 %v4272_v39, 0.0  ;;  %v17149_v56 = vld [vmem:[#allocation273_spill] sm:$0xff]  ;;  %v6015_v48 = vadd.f32 %v6014_v29, %v5179_v24 }
 0x56d   : > { %v12774_v57 = vmul.f32 %v12634_v62, %v17148_v50  ;;  %v17150_v15 = vmax.f32 %v17149_v56, 0.0  ;;  %v4280_v42 = vadd.f32 %v3459_v4, %v9857_v16  ;;  %v4276_v37 = vadd.f32 %v3440_v52, %v9857_v16  ;;  %v3429_v20 = vpop.permute.xlu0 %3428  ;;  %3755 = vbcast.lane.b32.xlu1 %v12005_v38, 280  ;;  %v17153_v38 = vld [vmem:[#allocation281_spill] sm:$0xff] }
 0x56e   : > { %v6367_v33 = vrot.slane %v6366_v53, 4  ;;  %v6024_v44 = vadd.f32 %v6023_v17, %v5183_v30  ;;  %v6007_v1 = vrot.slane %v6006_v5, 4  ;;  %v5337_v21 = vmul.f32 %v12615_v10, %v4785_v51 }
 0x56f   : > { %v12779_v7 = vmul.f32 %v12711_v22, %v17150_v15  ;;  %3800 = vbcast.lane.b32.xlu0 %v17139_v34, 256  ;;  %v5341_v0 = vmul.f32 %v12615_v10, %v4789_v32  ;;  %v6016_v26 = vrot.slane %v6015_v48, 4  ;;  %v4788_v19 = vmax.f32 %v4276_v37, 0.0 }
 0x570   : > { %v6368_v28 = vadd.f32 %v6367_v33, %v6366_v53  ;;  %v6025_v14 = vrot.slane %v6024_v44, 4  ;;  %v3448_v58 = vpop.permute.xlu1 %3447  ;;  %v6008_v30 = vadd.f32 %v6007_v1, %v6006_v5  ;;  %v6033_v31 = vadd.f32 %v6032_v54, %v5187_v35 }
 0x571   : > { %v5336_v45 = vmul.f32 %v12654_v63, %v4784_v3  ;;  %v4278_v39 = vadd.f32 %v3448_v58, %v9865_v49  ;;  %v6017_v53 = vadd.f32 %v6016_v26, %v6015_v48  ;;  %v4792_v29 = vmax.f32 %v4280_v42, 0.0  ;;  %v17155_v58 = vld [vmem:[#allocation285_spill] sm:$0xff]  ;;  %3819 = vbcast.lane.b32.xlu1 %v12376_v23, 256 }
 0x572   : > { %v6369_v24 = vrot.slane %v6368_v28, 2  ;;  %v6026_v9 = vadd.f32 %v6025_v14, %v6024_v44  ;;  %v4274_v51 = vadd.f32 %v3429_v20, %v9865_v49  ;;  %v6009_v17 = vrot.slane %v6008_v30, 2  ;;  %v3463_v44 = vpop.permute.xlu0 %3462 }
 0x573   : > { %3527 = vbcast.lane.b32.xlu0 %v11861_v13, 280  ;;  %v5340_v4 = vmul.f32 %v12654_v63, %v4788_v19  ;;  %v4790_v33 = vmax.f32 %v4278_v39, 0.0  ;;  %v6018_v50 = vrot.slane %v6017_v53, 2  ;;  %v6034_v56 = vrot.slane %v6033_v31, 4 }
 0x574   : > { %v6370_v32 = vadd.f32 %v6369_v24, %v6368_v28  ;;  %v6027_v5 = vrot.slane %v6026_v9, 2  ;;  %v4786_v35 = vmax.f32 %v4274_v51, 0.0  ;;  %v3482_v54 = vpop.permute.xlu1 %3481  ;;  %v6010_v52 = vadd.f32 %v6009_v17, %v6008_v30  ;;  %v17151_v28 = vld [vmem:[#allocation277_spill] sm:$0xff] }
 0x575   : > { %v5342_v15 = vmul.f32 %v12711_v22, %v4790_v33  ;;  %v4285_v48 = vadd.f32 %v3482_v54, %v9862_v8  ;;  %v6019_v13 = vadd.f32 %v6018_v50, %v6017_v53  ;;  %v4281_v37 = vadd.f32 %v3463_v44, %v9862_v8  ;;  %3546 = vbcast.lane.b32.xlu1 %v12097_v27, 280 }
 0x576   : > { %v6371_v3 = vrot.slane %v6370_v32, 1  ;;  %v6028_v42 = vadd.f32 %v6027_v5, %v6026_v9  ;;  %v17152_v1 = vmax.f32 %v17151_v28, 0.0  ;;  %v17154_v14 = vmax.f32 %v17153_v38, 0.0  ;;  %v3478_v28 = vpop.permute.xlu0 %3477 }
 0x577   : > { %3656 = vbcast.lane.b32.xlu0 %v12209_v41, 272  ;;  %v17156_v24 = vmax.f32 %v17155_v58, 0.0  ;;  %v6373_v39 = vadd.f32 %v5337_v21, %v5336_v45  ;;  %v6382_v20 = vadd.f32 %v5341_v0, %v5340_v4  ;;  %v5338_v53 = vmul.f32 %v12711_v22, %v4786_v35 }
 0x578   : > { %v5194_v26 = vmul.f32 %v12711_v22, %v17152_v1  ;;  %v5198_v19 = vmul.f32 %v12711_v22, %v17154_v14  ;;  %v6040_v9 = vadd.f32 %v12642_v43, %v12719_v18  ;;  %v5344_v51 = vmul.f32 %v12654_v63, %v4792_v29  ;;  %v3558_v17 = vpop.permute.xlu1 %3557 }
 0x579   : > { %v5202_v30 = vmul.f32 %v12711_v22, %v17156_v24  ;;  %v12811_v33 = vadd.f32 %v6371_v3, %v6370_v32  ;;  %v6011_v50 = vrot.slane %v6010_v52, 1  ;;  %v6035_v5 = vadd.f32 %v6034_v56, %v6033_v31  ;;  %3675 = vbcast.lane.b32.xlu1 %v12270_v60, 272 }
 0x57a   : > { %v12813_v54 = vadd.f32 %v6382_v20, %v5342_v15  ;;  %v4797_v44 = vmax.f32 %v4285_v48, 0.0  ;;  %v6020_v21 = vrot.slane %v6019_v13, 1  ;;  %v6029_v0 = vrot.slane %v6028_v42, 1  ;;  %v3554_v1 = vpop.permute.xlu0 %3553 }
 0x57b   : > { %v4793_v45 = vmax.f32 %v4281_v37, 0.0  ;;  %v4284_v4 = vadd.f32 %v3478_v28, %v9857_v16  ;;  %3690 = vbcast.lane.b32.xlu0 %v12356_v61, 264  ;;  %v6036_v43 = vrot.slane %v6035_v5, 2  ;;  %v6041_v18 = vadd.f32 %v6040_v9, %v12779_v7 }
 0x57c   : > { %v12818_v29 = vadd.f32 %v6373_v39, %v5338_v53  ;;  %v4301_v32 = vadd.f32 %v3558_v17, %v9862_v8  ;;  %v6049_v31 = vadd.f32 %v12647_v46, %v12734_v25  ;;  %v6058_v35 = vadd.f32 %v12652_v55, %v12751_v47  ;;  %v3577_v56 = vpop.permute.xlu1 %3576 }
 0x57d   : > { %v4796_v3 = vmax.f32 %v4284_v4, 0.0  ;;  %v12826_v15 = vadd.f32 %v6011_v50, %v6010_v52  ;;  %v6042_v48 = vadd.f32 %v6041_v18, %v12724_v6  ;;  %v6067_v7 = vadd.f32 %v12659_v12, %v12766_v36  ;;  %3808 = vbcast.lane.b32.xlu1 %v17139_v34, 272 }
 0x57e   : > { %v4305_v37 = vadd.f32 %v3577_v56, %v9862_v8  ;;  %v6037_v38 = vadd.f32 %v6036_v43, %v6035_v5  ;;  %v6050_v46 = vadd.f32 %v6049_v31, %v5194_v26  ;;  %v6059_v25 = vadd.f32 %v6058_v35, %v5198_v19  ;;  %v17157_v56 = vld [vmem:[#allocation420_spill] sm:$0xff] }
 0x57f   : > { %v5349_v55 = vmul.f32 %v12615_v10, %v4797_v44  ;;  %v5345_v47 = vmul.f32 %v12615_v10, %v4793_v45  ;;  %3789 = vbcast.lane.b32.xlu0 %v12237_v2, 272  ;;  %v6021_v27 = vadd.f32 %v6020_v21, %v6019_v13  ;;  %v6043_v52 = vrot.slane %v6042_v48, 4  ;;  %v3573_v13 = vpop.permute.xlu0 %3572 }
 0x580   : > { %v4813_v14 = vmax.f32 %v4301_v32, 0.0  ;;  %v6051_v6 = vadd.f32 %v6050_v46, %v12739_v40  ;;  %v6060_v58 = vadd.f32 %v6059_v25, %v12760_v59  ;;  %v6068_v12 = vadd.f32 %v6067_v7, %v5202_v30  ;;  %v3467_v19 = vpop.permute.xlu1 %3466 }
 0x581   : > { %v5348_v36 = vmul.f32 %v12654_v63, %v4796_v3  ;;  %v4300_v26 = vadd.f32 %v3554_v1, %v9857_v16  ;;  %v6030_v24 = vadd.f32 %v6029_v0, %v6028_v42  ;;  %v6044_v39 = vadd.f32 %v6043_v52, %v6042_v48  ;;  %v17158_v52 = vld [vmem:[#allocation429_spill] sm:$0xff] }
 0x582   : > { %v4817_v20 = vmax.f32 %v4305_v37, 0.0  ;;  %v6038_v53 = vrot.slane %v6037_v38, 1  ;;  %v6052_v9 = vrot.slane %v6051_v6, 4  ;;  %v6061_v17 = vrot.slane %v6060_v58, 4  ;;  %3842 = vbcast.lane.b32.xlu1 %v17158_v52, 264 }
 0x583   : > { %v12840_v40 = vadd.f32 %v5345_v47, %v5344_v51  ;;  %v4282_v59 = vadd.f32 %v3467_v19, %v9865_v49  ;;  %3823 = vbcast.lane.b32.xlu0 %v12376_v23, 264  ;;  %v6045_v30 = vrot.slane %v6044_v39, 2  ;;  %v6069_v50 = vadd.f32 %v6068_v12, %v12774_v57  ;;  %v3433_v57 = vpop.permute.xlu0 %3432 }
 0x584   : > { %v12846_v42 = vmul.f32 %v12615_v10, %v4813_v14  ;;  %v4304_v5 = vadd.f32 %v3573_v13, %v9857_v16  ;;  %v6053_v44 = vadd.f32 %v6052_v9, %v6051_v6  ;;  %v6062_v28 = vadd.f32 %v6061_v17, %v6060_v58  ;;  %v3501_v51 = vpop.permute.xlu1 %3500 }
 0x585   : > { %v12849_v21 = vadd.f32 %v5349_v55, %v5348_v36  ;;  %v4812_v0 = vmax.f32 %v4300_v26, 0.0  ;;  %v6046_v45 = vadd.f32 %v6045_v30, %v6044_v39  ;;  %v6070_v4 = vrot.slane %v6069_v50, 4 }
 0x586   : > { %v12853_v43 = vmul.f32 %v12615_v10, %v4817_v20  ;;  %v6039_v18 = vadd.f32 %v6038_v53, %v6037_v38  ;;  %v6054_v32 = vrot.slane %v6053_v44, 2  ;;  %v6063_v31 = vrot.slane %v6062_v28, 2  ;;  %v17160_v53 = vld [vmem:[#allocation430_spill] sm:$0xff]  ;;  %3694 = vbcast.lane.b32.xlu1 %v12356_v61, 272 }
 0x587   : > { %v4794_v35 = vmax.f32 %v4282_v59, 0.0  ;;  %v4275_v3 = vadd.f32 %v3433_v57, %v9882_v11  ;;  %3641 = vbcast.lane.b32.xlu0 %v17157_v56, 280  ;;  %v6047_v48 = vrot.slane %v6046_v45, 1  ;;  %v6071_v7 = vadd.f32 %v6070_v4, %v6069_v50  ;;  %v3497_v12 = vpop.permute.xlu0 %3496 }
 0x588   : > { %v4816_v37 = vmax.f32 %v4304_v5, 0.0  ;;  %v6055_v1 = vadd.f32 %v6054_v32, %v6053_v44  ;;  %v6064_v46 = vadd.f32 %v6063_v31, %v6062_v28  ;;  %v6771_v25 = vsel %vm15877_vm7, %v6021_v27, %v12826_v15  ;;  %v3596_v14 = vpop.permute.xlu1 %3595  ;;  %v17159_v15 = vld [vmem:[#allocation423_spill] sm:$0xff] }
 0x589   : > { %v5364_v55 = vmul.f32 %v12654_v63, %v4812_v0  ;;  %v4289_v38 = vadd.f32 %v3501_v51, %v9862_v8  ;;  %v4787_v47 = vmax.f32 %v4275_v3, 0.0  ;;  %v6072_v6 = vrot.slane %v6071_v7, 2 }
 0x58a   : > { %v4309_v58 = vadd.f32 %v3596_v14, %v9862_v8  ;;  %v6048_v36 = vadd.f32 %v6047_v48, %v6046_v45  ;;  %v6056_v26 = vrot.slane %v6055_v1, 1  ;;  %v6065_v19 = vrot.slane %v6064_v46, 1  ;;  %3827 = vbcast.lane.b32.xlu1 %v12376_v23, 272 }
 0x58b   : > { %v5339_v39 = vmul.f32 %v12634_v62, %v4787_v47  ;;  %v4288_v20 = vadd.f32 %v3497_v12, %v9857_v16  ;;  %3774 = vbcast.lane.b32.xlu0 %v17159_v15, 280  ;;  %v6073_v27 = vadd.f32 %v6072_v6, %v6071_v7  ;;  %v6772_v13 = vsel %vm15903_vm8, %v6030_v24, %v6771_v25  ;;  %v3592_v57 = vpop.permute.xlu0 %3591  ;;  %v17165_v6 = vld [vmem:[#allocation329_spill] sm:$0xff] }
 0x58c   : > { %v17161_v9 = vunpack.c.0.s8 %v17160_v53  ;;  %v17162_v17 = vmov 0  ;;  %v5346_v59 = vmul.f32 %v12711_v22, %v4794_v35  ;;  %v5368_v30 = vmul.f32 %v12654_v63, %v4816_v37  ;;  %v3710_v0 = vpop.permute.xlu1 %3709 }
 0x58d   : > { %v6057_v50 = vadd.f32 %v6056_v26, %v6055_v1  ;;  %v6773_v5 = vsel %vm15900_vm9, %v6039_v18, %v6772_v13  ;;  %v6375_v44 = vadd.f32 %v12818_v29, %v5339_v39  ;;  %v4800_v28 = vmax.f32 %v4288_v20, 0.0 }
 0x58e   : > { %vm12869_vm14 = vcmp.ne.s32.totalorder %v17161_v9, 0  ;;  %v6074_v24 = vrot.slane %v6073_v27, 1  ;;  %v6774_v51 = vsel %vm15873_vm10, %v6048_v36, %v6773_v5  ;;  %v4801_v45 = vmax.f32 %v4289_v38, 0.0  ;;  %v17170_v9 = vld [vmem:[#allocation311_spill] sm:$0xff]  ;;  %3812 = vbcast.lane.b32.xlu1 %v17139_v34, 280  ;;  %v17177_v34 = vld [vmem:[#allocation312_spill] sm:$0xff] }
 0x58f   : > { %v17163_v17 = vsel %vm12869_vm14, 4294967295, %v17162_v17  ;;  %v4333_v4 = vadd.f32 %v3710_v0, %v9862_v8  ;;  %v6066_v32 = vadd.f32 %v6065_v19, %v6064_v46  ;;  %v6775_v31 = vsel %vm15899_vm11, %v6057_v50, %v6774_v51  ;;  %3838 = vbcast.lane.b32.xlu0 %v17158_v52, 256  ;;  %v17166_v19 = vld [vmem:[#allocation309_spill] sm:$0xff] }
 0x590   : > { %17164 = vst [vmem:[#allocation280_spill] sm:$0xff] %v17163_v17  ;;  %v6376_v35 = vrot.slane %v6375_v44, 4  ;;  %v4821_v3 = vmax.f32 %v4309_v58, 0.0  ;;  %v4308_v18 = vadd.f32 %v3592_v57, %v9857_v16  ;;  %v6075_v29 = vadd.f32 %v6074_v24, %v6073_v27  ;;  %v3729_v38 = vpop.permute.xlu1 %3728  ;;  %v17168_v27 = vld [vmem:[#allocation316_spill] sm:$0xff] }
 0x591   : > { %v12884_v56 = vadd.f32 %v12846_v42, %v5364_v55  ;;  %v12887_v48 = vadd.f32 %v12840_v40, %v5346_v59  ;;  %v5352_v7 = vmul.f32 %v12654_v63, %v4800_v28  ;;  %v6776_v37 = vsel %vm15887_vm12, %v6066_v32, %v6775_v31  ;;  %v3706_v55 = vpop.permute.xlu0 %3705  ;;  %v17175_v32 = vld [vmem:[#allocation317_spill] sm:$0xff] }
 0x592   : > { %v6377_v1 = vadd.f32 %v6376_v35, %v6375_v44  ;;  %v4845_v46 = vmax.f32 %v4333_v4, 0.0  ;;  %v4820_v25 = vmax.f32 %v4308_v18, 0.0  ;;  %v6777_v47 = vsel %vm15886_vm13, %v6075_v29, %v6776_v37  ;;  %v17179_v37 = vld [vmem:[#allocation319_spill] sm:$0xff]  ;;  %3698 = vbcast.lane.b32.xlu1 %v12356_v61, 280 }
 0x593   : > { %v12894_v14 = vadd.f32 %v12853_v43, %v5368_v30  ;;  %v5353_v42 = vmul.f32 %v12615_v10, %v4801_v45  ;;  %v4337_v40 = vadd.f32 %v3729_v38, %v9862_v8  ;;  %v6851_v58 = vadd.f32 %v6777_v47, %v17165_v6  ;;  %3660 = vbcast.lane.b32.xlu0 %v12209_v41, 280  ;;  %v17173_v45 = vld [vmem:[#allocation310_spill] sm:$0xff] }
 0x594   : > { %v6378_v12 = vrot.slane %v6377_v1, 2  ;;  %v5373_v36 = vmul.f32 %v12615_v10, %v4821_v3  ;;  %v4332_v26 = vadd.f32 %v3706_v55, %v9857_v16  ;;  %v17167_v39 = vmax.f32 %v17166_v19, 0.0  ;;  %v3486_v28 = vpop.permute.xlu1 %3485 }
 0x595   : > { %v12907_v43 = vadd.f32 %v5353_v42, %v5352_v7  ;;  %v5372_v15 = vmul.f32 %v12654_v63, %v4820_v25  ;;  %v17169_v13 = vmax.f32 %v17168_v27, 0.0  ;;  %v17171_v59 = vmax.f32 %v17170_v9, 0.0  ;;  %v3725_v24 = vpop.permute.xlu0 %3724  ;;  %v17181_v42 = vld [vmem:[#allocation321_spill] sm:$0xff] }
 0x596   : > { %v12905_v20 = vmul.f32 %v12654_v63, %v17167_v39  ;;  %v6379_v41 = vadd.f32 %v6378_v12, %v6377_v1  ;;  %v5397_v50 = vmul.f32 %v12615_v10, %v4845_v46  ;;  %v4849_v5 = vmax.f32 %v4337_v40, 0.0  ;;  %3850 = vbcast.lane.b32.xlu1 %v17158_v52, 280 }
 0x597   : > { %v12913_v53 = vmul.f32 %v12711_v22, %v17169_v13  ;;  %v12918_v30 = vmul.f32 %v12634_v62, %v17171_v59  ;;  %v4844_v44 = vmax.f32 %v4332_v26, 0.0  ;;  %v4286_v0 = vadd.f32 %v3486_v28, %v9865_v49  ;;  %3793 = vbcast.lane.b32.xlu0 %v12237_v2, 280  ;;  %v17183_v26 = vld [vmem:[#allocation318_spill] sm:$0xff]  ;;  %v17185_v13 = vld [vmem:[#allocation323_spill] sm:$0xff] }
 0x598   : > { %v12925_v51 = vsel %vm12869_vm14, %v6851_v58, -1e+30  ;;  %v17174_v4 = vmax.f32 %v17173_v45, 0.0  ;;  %v17176_v31 = vmax.f32 %v17175_v32, 0.0  ;;  %v6380_v3 = vrot.slane %v6379_v41, 1  ;;  %v3520_v12 = vpop.permute.xlu1 %3519 }
 0x599   : > { %17172 = vst [vmem:[#allocation307_spill] sm:$0xff] %v12925_v51  ;;  %v4336_v18 = vadd.f32 %v3725_v24, %v9857_v16  ;;  %v17178_v29 = vmax.f32 %v17177_v34, 0.0  ;;  %v17180_v1 = vmax.f32 %v17179_v37, 0.0  ;;  %v12943_v25 = vadd.f32 %v5373_v36, %v5372_v15  ;;  %v3452_v27 = vpop.permute.xlu0 %3451  ;;  %v17195_v37 = vld [vmem:[#allocation327_spill] sm:$0xff] }
 0x59a   : > { %v4920_v57 = vmul.f32 %v12654_v63, %v17174_v4  ;;  %v4922_v35 = vmul.f32 %v12711_v22, %v17176_v31  ;;  %v5396_v38 = vmul.f32 %v12654_v63, %v4844_v44  ;;  %v4798_v47 = vmax.f32 %v4286_v0, 0.0  ;;  %v17189_v0 = vld [vmem:[#allocation322_spill] sm:$0xff]  ;;  %v17191_v4 = vld [vmem:[#allocation328_spill] sm:$0xff] }
 0x59b   : > { %v12938_v7 = vmul.f32 %v12634_v62, %v17178_v29  ;;  %v4924_v46 = vmul.f32 %v12654_v63, %v17180_v1  ;;  %v17182_v40 = vmax.f32 %v17181_v42, 0.0  ;;  %v6381_v6 = vadd.f32 %v6380_v3, %v6379_v41  ;;  %v17187_v41 = vld [vmem:[#allocation325_spill] sm:$0xff]  ;;  %3679 = vbcast.lane.b32.xlu0 %v12270_v60, 280 }
 0x59c   : > { %v5401_v2 = vmul.f32 %v12615_v10, %v4849_v5  ;;  %v4848_v58 = vmax.f32 %v4336_v18, 0.0  ;;  %v17184_v19 = vmax.f32 %v17183_v26, 0.0  ;;  %v5350_v36 = vmul.f32 %v12711_v22, %v4798_v47  ;;  %v17193_v18 = vld [vmem:[#allocation18_spill] sm:$0xff]  ;;  %v17197_v47 = vld [vmem:[#allocation20_spill] sm:$0xff]  ;;  %v17200_v26 = vld [vmem:[#allocation17_spill] sm:$0xff] }
 0x59d   : > { %v4926_v55 = vmul.f32 %v12711_v22, %v17182_v40  ;;  %v4293_v15 = vadd.f32 %v3520_v12, %v9862_v8  ;;  %v17186_v9 = vmax.f32 %v17185_v13, 0.0  ;;  %v17188_v44 = vmax.f32 %v17187_v41, 0.0  ;;  %v3581_v12 = vpop.permute.xlu1 %3580  ;;  %v3516_v41 = vpop.permute.xlu0 %3515 }
 0x59e   : > { %v4927_v39 = vmul.f32 %v12634_v62, %v17184_v19  ;;  %v5400_v61 = vmul.f32 %v12654_v63, %v4848_v58  ;;  %v4279_v28 = vadd.f32 %v3452_v27, %v9882_v11  ;;  %v17190_v24 = vmax.f32 %v17189_v0, 0.0 }
 0x59f   : > { %v4928_v59 = vmul.f32 %v12654_v63, %v17186_v9  ;;  %v12962_v5 = vmul.f32 %v12711_v22, %v17188_v44  ;;  %v17192_v32 = vmax.f32 %v17191_v4, 0.0  ;;  %v12977_v3 = vadd.f32 %v5397_v50, %v5396_v38  ;;  %v17202_v44 = vld [vmem:[#allocation22_spill] sm:$0xff]  ;;  %3846 = vbcast.lane.b32.xlu0 %v17158_v52, 272 }
 0x5a0   : > { %v12970_v45 = vmul.f32 %v12634_v62, %v17190_v24  ;;  %v17194_v34 = vmax.f32 %v17193_v18, 0.0  ;;  %v17196_v1 = vmax.f32 %v17195_v37, 0.0  ;;  %v17198_v42 = vmax.f32 %v17197_v47, 0.0  ;;  %v17209_v18 = vld [vmem:[#allocation21_spill] sm:$0xff] }
 0x5a1   : > { %v12975_v31 = vmul.f32 %v12654_v63, %v17192_v32  ;;  %v12996_v58 = vsel %vm15877_vm7, %v6381_v6, %v12811_v33  ;;  %v4805_v50 = vmax.f32 %v4293_v15, 0.0  ;;  %v4791_v38 = vmax.f32 %v4279_v28, 0.0  ;;  %v17204_v6 = vld [vmem:[#allocation19_spill] sm:$0xff]  ;;  %v17211_v47 = vld [vmem:[#allocation25_spill] sm:$0xff] }
 0x5a2   : > { %v12982_v29 = vmul.f32 %v12711_v22, %v17194_v34  ;;  %v12987_v60 = vmul.f32 %v12634_v62, %v17196_v1  ;;  %v12992_v40 = vmul.f32 %v12654_v63, %v17198_v42  ;;  %17199 = vst [vmem:[#allocation308_spill] sm:$0xff] %v12996_v58  ;;  %v17201_v19 = vmax.f32 %v17200_v26, 0.0 }
 0x5a3   : > { %v13005_v13 = vadd.f32 %v12849_v21, %v5350_v36  ;;  %v4306_v9 = vadd.f32 %v3581_v12, %v9865_v49  ;;  %v17203_v0 = vmax.f32 %v17202_v44, 0.0  ;;  %v17205_v15 = vmax.f32 %v17204_v6, 0.0  ;;  %v17207_v21 = vld [vmem:[#allocation24_spill] sm:$0xff]  ;;  %v3615_v44 = vpop.permute.xlu1 %3614  ;;  %3831 = vbcast.lane.b32.xlu0 %v12376_v23, 280 }
 0x5a4   : > { %v13002_v27 = vmul.f32 %v12615_v10, %v17201_v19  ;;  %v13018_v24 = vadd.f32 %v5401_v2, %v5400_v61  ;;  %v5343_v4 = vmul.f32 %v12634_v62, %v4791_v38  ;;  %v17208_v36 = vmax.f32 %v17207_v21, 0.0  ;;  %v17213_v61 = vld [vmem:[#allocation260_spill] sm:$0xff] }
 0x5a5   : > { %v13011_v33 = vmul.f32 %v12711_v22, %v17203_v0  ;;  %v13016_v28 = vmul.f32 %v12634_v62, %v17205_v15  ;;  %v17210_v34 = vmax.f32 %v17209_v18, 0.0  ;;  %v4292_v1 = vadd.f32 %v3516_v41, %v9857_v16  ;;  %v17214_v38 = vld [vmem:[#allocation396_spill] sm:$0xff]  ;;  %v17215_v0 = vld [vmem:[#allocation23_spill] sm:$0xff]  ;;  %v3562_v18 = vpop.permute.xlu0 %3561 }
 0x5a6   : > { %17206 = vst [vmem:[#allocation313_spill] sm:$0xff] %v13018_v24  ;;  %v13025_v32 = vmul.f32 %v12654_v63, %v17208_v36  ;;  %v17212_v42 = vmax.f32 %v17211_v47, 0.0  ;;  %v5428_v52 = vadd.f32 %v17213_v61, %v12905_v20  ;;  %v5437_v12 = vadd.f32 %v17214_v38, %v4920_v57  ;;  %v17217_v41 = vld [vmem:[#allocation264_spill] sm:$0xff] }
 0x5a7   : > { %v13030_v37 = vmul.f32 %v12615_v10, %v17210_v34  ;;  %v5357_v26 = vmul.f32 %v12615_v10, %v4805_v50  ;;  %v6384_v19 = vadd.f32 %v12813_v54, %v5343_v4  ;;  %v17216_v6 = vmax.f32 %v17215_v0, 0.0  ;;  %v17218_v34 = vld [vmem:[#allocation27_spill] sm:$0xff]  ;;  %v17220_v4 = vld [vmem:[#allocation333_spill] sm:$0xff]  ;;  %v3748_v23 = vpop.permute.xlu1 %3747 }
 0x5a8   : > { %v13036_v2 = vmul.f32 %v12711_v22, %v17212_v42  ;;  %v5446_v21 = vadd.f32 %v17217_v41, %v4924_v46  ;;  %v4818_v36 = vmax.f32 %v4306_v9, 0.0  ;;  %v17219_v47 = vmax.f32 %v17218_v34, 0.0  ;;  %v17222_v0 = vld [vmem:[#allocation29_spill] sm:$0xff]  ;;  %v17224_v34 = vld [vmem:[#allocation268_spill] sm:$0xff] }
 0x5a9   : > { %v13046_v15 = vmul.f32 %v12634_v62, %v17216_v6  ;;  %v5429_v57 = vadd.f32 %v5428_v52, %v12913_v53  ;;  %v5438_v50 = vadd.f32 %v5437_v12, %v4922_v35  ;;  %v6385_v42 = vrot.slane %v6384_v19, 4 }
 0x5aa   : > { %v13052_v20 = vmul.f32 %v12654_v63, %v17219_v47  ;;  %v4302_v54 = vadd.f32 %v3562_v18, %v9865_v49  ;;  %v17221_v61 = vmax.f32 %v17220_v4, 0.0  ;;  %v5447_v46 = vadd.f32 %v5446_v21, %v4926_v55 }
 0x5ab   : > { %v4804_v9 = vmax.f32 %v4292_v1, 0.0  ;;  %v17223_v6 = vmax.f32 %v17222_v0, 0.0  ;;  %v5430_v53 = vadd.f32 %v5429_v57, %v12918_v30  ;;  %v5439_v35 = vadd.f32 %v5438_v50, %v12938_v7  ;;  %v3611_v1 = vpop.permute.xlu0 %3610 }
 0x5ac   : > { %v13060_v38 = vmul.f32 %v12615_v10, %v17221_v61  ;;  %v6386_v52 = vadd.f32 %v6385_v42, %v6384_v19  ;;  %v4313_v12 = vadd.f32 %v3615_v44, %v9862_v8  ;;  %v5448_v18 = vadd.f32 %v5447_v46, %v4927_v39 }
 0x5ad   : > { %v13065_v41 = vmul.f32 %v12711_v22, %v17223_v6  ;;  %v5455_v47 = vadd.f32 %v17224_v34, %v4928_v59  ;;  %v5370_v4 = vmul.f32 %v12711_v22, %v4818_v36  ;;  %v4814_v55 = vmax.f32 %v4302_v54, 0.0  ;;  %v3505_v36 = vpop.permute.xlu1 %3504 }
 0x5ae   : > { %v5431_v21 = vrot.slane %v5430_v53, 4  ;;  %v5440_v61 = vrot.slane %v5439_v35, 4  ;;  %v6387_v0 = vrot.slane %v6386_v52, 2  ;;  %v4341_v6 = vadd.f32 %v3748_v23, %v9862_v8 }
 0x5af   : > { %v4312_v30 = vadd.f32 %v3611_v1, %v9857_v16  ;;  %v5449_v57 = vrot.slane %v5448_v18, 4  ;;  %v5356_v7 = vmul.f32 %v12654_v63, %v4804_v9  ;;  %v5456_v39 = vadd.f32 %v5455_v47, %v12962_v5  ;;  %v3744_v17 = vpop.permute.xlu0 %3743 }
 0x5b0   : > { %v5432_v19 = vadd.f32 %v5431_v21, %v5430_v53  ;;  %v5441_v44 = vadd.f32 %v5440_v61, %v5439_v35  ;;  %v6388_v50 = vadd.f32 %v6387_v0, %v6386_v52  ;;  %v4825_v59 = vmax.f32 %v4313_v12, 0.0  ;;  %v17226_v21 = vld [vmem:[#allocation26_spill] sm:$0xff] }
 0x5b1   : > { %v4824_v42 = vmax.f32 %v4312_v30, 0.0  ;;  %v5450_v54 = vadd.f32 %v5449_v57, %v5448_v18  ;;  %v5366_v46 = vmul.f32 %v12711_v22, %v4814_v55  ;;  %v4290_v34 = vadd.f32 %v3505_v36, %v9865_v49  ;;  %v3539_v55 = vpop.permute.xlu1 %3538 }
 0x5b2   : > { %v5433_v23 = vrot.slane %v5432_v19, 2  ;;  %v5442_v58 = vrot.slane %v5441_v44, 2  ;;  %v6389_v1 = vrot.slane %v6388_v50, 1  ;;  %v4853_v24 = vmax.f32 %v4341_v6, 0.0 }
 0x5b3   : > { %v4340_v9 = vadd.f32 %v3744_v17, %v9857_v16  ;;  %v5451_v53 = vrot.slane %v5450_v54, 2  ;;  %v5376_v35 = vmul.f32 %v12654_v63, %v4824_v42  ;;  %v4802_v5 = vmax.f32 %v4290_v34, 0.0 }
 0x5b4   : > { %v5434_v52 = vadd.f32 %v5433_v23, %v5432_v19  ;;  %v5457_v12 = vadd.f32 %v5456_v39, %v12970_v45  ;;  %v13082_v18 = vadd.f32 %v12894_v14, %v5370_v4  ;;  %v17227_v61 = vmax.f32 %v17226_v21, 0.0  ;;  %v3471_v19 = vpop.permute.xlu0 %3470  ;;  %v17230_v23 = vld [vmem:[#allocation272_spill] sm:$0xff] }
 0x5b5   : > { %v4852_v47 = vmax.f32 %v4340_v9, 0.0  ;;  %v5443_v6 = vadd.f32 %v5442_v58, %v5441_v44  ;;  %v13089_v30 = vadd.f32 %v5357_v26, %v5356_v7  ;;  %v5377_v17 = vmul.f32 %v12615_v10, %v4825_v59  ;;  %v3630_v59 = vpop.permute.xlu1 %3629 }
 0x5b6   : > { %17225 = vst [vmem:[#allocation320_spill] sm:$0xff] %v13082_v18  ;;  %v13087_v0 = vmul.f32 %v12634_v62, %v17227_v61  ;;  %v13093_v57 = vadd.f32 %v12884_v56, %v5366_v46  ;;  %v5452_v45 = vadd.f32 %v5451_v53, %v5450_v54  ;;  %v13095_v39 = vadd.f32 %v6389_v1, %v6388_v50 }
 0x5b7   : > { %17228 = vst [vmem:[#allocation324_spill] sm:$0xff] %v13089_v30  ;;  %v5405_v14 = vmul.f32 %v12615_v10, %v4853_v24  ;;  %v4283_v4 = vadd.f32 %v3471_v19, %v9882_v11  ;;  %v5458_v42 = vrot.slane %v5457_v12, 4  ;;  %v13099_v36 = vadd.f32 %v5377_v17, %v5376_v35 }
 0x5b8   : > { %17229 = vst [vmem:[#allocation254_spill] sm:$0xff] %v13095_v39  ;;  %v5354_v58 = vmul.f32 %v12711_v22, %v4802_v5  ;;  %v4297_v26 = vadd.f32 %v3539_v55, %v9862_v8  ;;  %v5435_v7 = vrot.slane %v5434_v52, 1  ;;  %v5404_v44 = vmul.f32 %v12654_v63, %v4852_v47  ;;  %v3535_v34 = vpop.permute.xlu0 %3534  ;;  %v17307_v39 = vld [vmem:[#allocation93_spill] sm:$0xff] }
 0x5b9   : > { %v4795_v56 = vmax.f32 %v4283_v4, 0.0  ;;  %v5444_v46 = vrot.slane %v5443_v6, 1  ;;  %v5459_v54 = vadd.f32 %v5458_v42, %v5457_v12  ;;  %v4316_v50 = vadd.f32 %v3630_v59, %v9857_v16 }
 0x5ba   : > { %v5453_v24 = vrot.slane %v5452_v45, 1  ;;  %v5464_v1 = vadd.f32 %v17230_v23, %v12975_v31  ;;  %v5473_v9 = vadd.f32 %v13002_v27, %v12992_v40  ;;  %v4296_v35 = vadd.f32 %v3535_v34, %v9857_v16  ;;  %v3714_v40 = vpop.permute.xlu1 %3713  ;;  %7031 = vmax.xlane.f32.xlu1 %v12925_v51  ;;  %v17301_v51 = vld [vmem:[#allocation86_spill] sm:$0xff] }
 0x5bb   : > { %v5347_v53 = vmul.f32 %v12634_v62, %v4795_v56  ;;  %v5460_v5 = vrot.slane %v5459_v54, 2  ;;  %v5482_v47 = vadd.f32 %v13030_v37, %v13025_v32  ;;  %v13114_v12 = vadd.f32 %v12907_v43, %v5354_v58 }
 0x5bc   : > { %v4809_v55 = vmax.f32 %v4297_v26, 0.0  ;;  %v5465_v21 = vadd.f32 %v5464_v1, %v12982_v29  ;;  %v5474_v61 = vadd.f32 %v5473_v9, %v13011_v33  ;;  %v4808_v17 = vmax.f32 %v4296_v35, 0.0  ;;  %v3600_v42 = vpop.permute.xlu0 %3599 }
 0x5bd   : > { %17231 = vst [vmem:[#allocation258_spill] sm:$0xff] %v13114_v12  ;;  %v6393_v31 = vadd.f32 %v12887_v48, %v5347_v53  ;;  %v13119_v27 = vadd.f32 %v5435_v7, %v5434_v52  ;;  %v5483_v19 = vadd.f32 %v5482_v47, %v13036_v2  ;;  %v4334_v4 = vadd.f32 %v3714_v40, %v9865_v49 }
 0x5be   : > { %v5445_v32 = vadd.f32 %v5444_v46, %v5443_v6  ;;  %v5466_v43 = vadd.f32 %v5465_v21, %v12987_v60  ;;  %v5475_v37 = vadd.f32 %v5474_v61, %v13016_v28  ;;  %v13125_v58 = vadd.f32 %v5405_v14, %v5404_v44  ;;  %v3763_v6 = vpop.permute.xlu1 %3762 }
 0x5bf   : > { %v6394_v29 = vrot.slane %v6393_v31, 4  ;;  %v4828_v33 = vmax.f32 %v4316_v50, 0.0  ;;  %v5461_v26 = vadd.f32 %v5460_v5, %v5459_v54  ;;  %v4310_v48 = vadd.f32 %v3600_v42, %v9865_v49 }
 0x5c0   : > { %17232 = vst [vmem:[#allocation262_spill] sm:$0xff] %v13125_v58  ;;  %v5467_v56 = vrot.slane %v5466_v43, 4  ;;  %v5476_v52 = vrot.slane %v5475_v37, 4  ;;  %v5484_v7 = vadd.f32 %v5483_v19, %v13046_v15  ;;  %v5360_v59 = vmul.f32 %v12654_v63, %v4808_v17  ;;  %v3634_v28 = vpop.permute.xlu0 %3633 }
 0x5c1   : > { %v6395_v2 = vadd.f32 %v6394_v29, %v6393_v31  ;;  %v4846_v34 = vmax.f32 %v4334_v4, 0.0  ;;  %v5454_v46 = vadd.f32 %v5453_v24, %v5452_v45  ;;  %v5361_v60 = vmul.f32 %v12615_v10, %v4809_v55 }
 0x5c2   : > { %v5468_v14 = vadd.f32 %v5467_v56, %v5466_v43  ;;  %v5477_v44 = vadd.f32 %v5476_v52, %v5475_v37  ;;  %v5491_v54 = vadd.f32 %v13060_v38, %v13052_v20  ;;  %v4317_v23 = vadd.f32 %v3634_v28, %v9862_v8  ;;  %v3490_v55 = vpop.permute.xlu1 %3489 }
 0x5c3   : > { %v6396_v50 = vrot.slane %v6395_v2, 2  ;;  %v5462_v1 = vrot.slane %v5461_v26, 1  ;;  %v5485_v9 = vrot.slane %v5484_v7, 4  ;;  %v13135_v15 = vmul.f32 %v12654_v63, %v4828_v33 }
 0x5c4   : > { %v4822_v53 = vmax.f32 %v4310_v48, 0.0  ;;  %v5469_v35 = vrot.slane %v5468_v14, 2  ;;  %v5478_v5 = vrot.slane %v5477_v44, 2  ;;  %v13137_v45 = vadd.f32 %v5361_v60, %v5360_v59  ;;  %v3733_v61 = vpop.permute.xlu0 %3732 }
 0x5c5   : > { %v5398_v24 = vmul.f32 %v12711_v22, %v4846_v34  ;;  %v4344_v47 = vadd.f32 %v3763_v6, %v9857_v16  ;;  %v5486_v21 = vadd.f32 %v5485_v9, %v5484_v7  ;;  %v6397_v20 = vadd.f32 %v6396_v50, %v6395_v2 }
 0x5c6   : > { %17233 = vst [vmem:[#allocation255_spill] sm:$0xff] %v13137_v45  ;;  %v4287_v38 = vadd.f32 %v3490_v55, %v9882_v11  ;;  %v5470_v31 = vadd.f32 %v5469_v35, %v5468_v14  ;;  %v5479_v17 = vadd.f32 %v5478_v5, %v5477_v44  ;;  %v4829_v40 = vmax.f32 %v4317_v23, 0.0  ;;  %v3566_v52 = vpop.permute.xlu1 %3565 }
 0x5c7   : > { %v4338_v19 = vadd.f32 %v3733_v61, %v9865_v49  ;;  %v5463_v4 = vadd.f32 %v5462_v1, %v5461_v26  ;;  %v5487_v42 = vrot.slane %v5486_v21, 2  ;;  %v5374_v43 = vmul.f32 %v12711_v22, %v4822_v53 }
 0x5c8   : > { %v4799_v37 = vmax.f32 %v4287_v38, 0.0  ;;  %v5471_v29 = vrot.slane %v5470_v31, 1  ;;  %v5492_v33 = vadd.f32 %v5491_v54, %v13065_v41  ;;  %v13146_v48 = vadd.f32 %v12977_v3, %v5398_v24  ;;  %v3767_v60 = vpop.permute.xlu0 %3766 }
 0x5c9   : > { %v4856_v56 = vmax.f32 %v4344_v47, 0.0  ;;  %v5480_v7 = vrot.slane %v5479_v17, 1  ;;  %v5488_v2 = vadd.f32 %v5487_v42, %v5486_v21  ;;  %v6398_v59 = vrot.slane %v6397_v20, 1 }
 0x5ca   : > { %17234 = vst [vmem:[#allocation259_spill] sm:$0xff] %v13146_v48  ;;  %v5351_v34 = vmul.f32 %v12634_v62, %v4799_v37  ;;  %v4850_v26 = vmax.f32 %v4338_v19, 0.0  ;;  %v4303_v6 = vadd.f32 %v3566_v52, %v9882_v11  ;;  %v5381_v28 = vmul.f32 %v12615_v10, %v4829_v40  ;;  %v3619_v5 = vpop.permute.xlu1 %3618 }
 0x5cb   : > { %v5472_v14 = vadd.f32 %v5471_v29, %v5470_v31  ;;  %v5493_v41 = vadd.f32 %v5492_v33, %v13087_v0  ;;  %v6709_v3 = vsel %vm15877_vm7, %v5445_v32, %v13119_v27  ;;  %v4345_v23 = vadd.f32 %v3767_v60, %v9862_v8  ;;  %v17243_v33 = vld [vmem:[#allocation313_spill] sm:$0xff] }
 0x5cc   : > { %v6402_v44 = vadd.f32 %v13005_v13, %v5351_v34  ;;  %v4815_v54 = vmax.f32 %v4303_v6, 0.0  ;;  %v6711_v50 = vsel %vm15903_vm8, %v5454_v46, %v6709_v3  ;;  %v5481_v1 = vadd.f32 %v5480_v7, %v5479_v17  ;;  %v17247_v6 = vld [vmem:[#allocation60_spill] sm:$0xff]  ;;  %v17251_v3 = vld [vmem:[#allocation62_spill] sm:$0xff] }
 0x5cd   : > { %v5489_v9 = vrot.slane %v5488_v2, 1  ;;  %v5494_v53 = vrot.slane %v5493_v41, 4  ;;  %v6713_v35 = vsel %vm15900_vm9, %v5463_v4, %v6711_v50  ;;  %v5402_v47 = vmul.f32 %v12711_v22, %v4850_v26  ;;  %v17237_v4 = vld [vmem:[#allocation461_spill] sm:$0xff] }
 0x5ce   : > { %v6403_v24 = vrot.slane %v6402_v44, 4  ;;  %v5367_v0 = vmul.f32 %v12634_v62, %v4815_v54  ;;  %v6715_v27 = vsel %vm15873_vm10, %v5472_v14, %v6713_v35  ;;  %v13163_v13 = vadd.f32 %v12943_v25, %v5374_v43  ;;  %v17255_v35 = vld [vmem:[#allocation64_spill] sm:$0xff] }
 0x5cf   : > { %v5495_v32 = vadd.f32 %v5494_v53, %v5493_v41  ;;  %v4857_v46 = vmax.f32 %v4345_v23, 0.0  ;;  %v4314_v55 = vadd.f32 %v3619_v5, %v9865_v49  ;;  %v13167_v21 = vmul.f32 %v12654_v63, %v4856_v56 }
 0x5d0   : > { %17235 = vst [vmem:[#allocation263_spill] sm:$0xff] %v13163_v13  ;;  %v6404_v38 = vadd.f32 %v6403_v24, %v6402_v44  ;;  %v6438_v61 = vadd.f32 %v13093_v57, %v5367_v0  ;;  %v6717_v31 = vsel %vm15899_vm11, %v5481_v1, %v6715_v27  ;;  %v13171_v17 = vadd.f32 %v6398_v59, %v6397_v20  ;;  %v17253_v1 = vld [vmem:[#allocation67_spill] sm:$0xff]  ;;  %v17257_v0 = vld [vmem:[#allocation69_spill] sm:$0xff] }
 0x5d1   : > { %v5490_v40 = vadd.f32 %v5489_v9, %v5488_v2  ;;  %v5496_v19 = vrot.slane %v5495_v32, 2  ;;  %v17238_v42 = vunpack.c.0.s8 %v17237_v4  ;;  %v17239_v25 = vmov 0  ;;  %v17245_v2 = vld [vmem:[#allocation63_spill] sm:$0xff]  ;;  %v17299_v4 = vld [vmem:[#allocation89_spill] sm:$0xff] }
 0x5d2   : > { %17236 = vst [vmem:[#allocation267_spill] sm:$0xff] %v13171_v17  ;;  %v4826_v43 = vmax.f32 %v4314_v55, 0.0  ;;  %v13180_v37 = vadd.f32 %v5381_v28, %v13135_v15  ;;  %v6405_v29 = vrot.slane %v6404_v38, 2  ;;  %v13183_v56 = vadd.f32 %v17243_v33, %v5402_v47  ;;  %v17249_v28 = vld [vmem:[#allocation65_spill] sm:$0xff] }
 0x5d3   : > { %vm13175_vm15 = vcmp.ne.s32.totalorder %v17238_v42, 0  ;;  %v6439_v57 = vrot.slane %v6438_v61, 4  ;;  %v5497_v52 = vadd.f32 %v5496_v19, %v5495_v32  ;;  %v6719_v20 = vsel %vm15887_vm12, %v5490_v40, %v6717_v31  ;;  %v17261_v31 = vld [vmem:[#allocation71_spill] sm:$0xff] }
 0x5d4   : > { %v17240_v25 = vsel %vm13175_vm15, 4294967295, %v17239_v25  ;;  %17242 = vst [vmem:[#allocation271_spill] sm:$0xff] %v13180_v37  ;;  %17244 = vst [vmem:[#allocation270_spill] sm:$0xff] %v13183_v56  ;;  %v13187_v7 = vmul.f32 %v12615_v10, %v4857_v46  ;;  %v17246_v59 = vmax.f32 %v17245_v2, 0.0  ;;  %v17248_v15 = vmax.f32 %v17247_v6, 0.0  ;;  %v17259_v46 = vld [vmem:[#allocation66_spill] sm:$0xff] }
 0x5d5   : > { %17241 = vst [vmem:[#allocation266_spill] sm:$0xff] %v17240_v25  ;;  %v13192_v26 = vadd.f32 %v6439_v57, %v6438_v61  ;;  %v17250_v14 = vmax.f32 %v17249_v28, 0.0  ;;  %v17252_v44 = vmax.f32 %v17251_v3, 0.0  ;;  %v5498_v50 = vrot.slane %v5497_v52, 1  ;;  %v17269_v28 = vld [vmem:[#allocation75_spill] sm:$0xff]  ;;  %v17309_v56 = vld [vmem:[#allocation90_spill] sm:$0xff] }
 0x5d6   : > { %v4980_v34 = vmul.f32 %v12654_v63, %v17246_v59  ;;  %v4981_v60 = vmul.f32 %v12615_v10, %v17248_v15  ;;  %v13204_v23 = vmul.f32 %v12711_v22, %v4826_v43  ;;  %v17254_v9 = vmax.f32 %v17253_v1, 0.0  ;;  %v17263_v43 = vld [vmem:[#allocation68_spill] sm:$0xff]  ;;  %v17267_v59 = vld [vmem:[#allocation70_spill] sm:$0xff] }
 0x5d7   : > { %v4982_v41 = vmul.f32 %v12711_v22, %v17250_v14  ;;  %v4983_v54 = vmul.f32 %v12634_v62, %v17252_v44  ;;  %v17256_v5 = vmax.f32 %v17255_v35, 0.0  ;;  %v13212_v47 = vadd.f32 %v6405_v29, %v6404_v38  ;;  %v17265_v29 = vld [vmem:[#allocation73_spill] sm:$0xff]  ;;  %v17271_v44 = vld [vmem:[#allocation72_spill] sm:$0xff] }
 0x5d8   : > { %v4984_v53 = vmul.f32 %v12654_v63, %v17254_v9  ;;  %v17258_v27 = vmax.f32 %v17257_v0, 0.0  ;;  %v17260_v55 = vmax.f32 %v17259_v46, 0.0  ;;  %v17262_v40 = vmax.f32 %v17261_v31, 0.0  ;;  %v17275_v0 = vld [vmem:[#allocation74_spill] sm:$0xff] }
 0x5d9   : > { %v4985_v24 = vmul.f32 %v12615_v10, %v17256_v5  ;;  %v5499_v42 = vadd.f32 %v5498_v50, %v5497_v52  ;;  %v17264_v33 = vmax.f32 %v17263_v43, 0.0  ;;  %v17266_v57 = vmax.f32 %v17265_v29, 0.0  ;;  %v17273_v50 = vld [vmem:[#allocation77_spill] sm:$0xff]  ;;  %v17279_v43 = vld [vmem:[#allocation76_spill] sm:$0xff] }
 0x5da   : > { %v4986_v32 = vmul.f32 %v12711_v22, %v17258_v27  ;;  %v4987_v61 = vmul.f32 %v12634_v62, %v17260_v55  ;;  %v4988_v19 = vmul.f32 %v12654_v63, %v17262_v40  ;;  %v17268_v6 = vmax.f32 %v17267_v59, 0.0  ;;  %v17277_v55 = vld [vmem:[#allocation79_spill] sm:$0xff] }
 0x5db   : > { %v4989_v38 = vmul.f32 %v12615_v10, %v17264_v33  ;;  %v4990_v2 = vmul.f32 %v12711_v22, %v17266_v57  ;;  %v17270_v14 = vmax.f32 %v17269_v28, 0.0  ;;  %v17272_v1 = vmax.f32 %v17271_v44, 0.0  ;;  %v17281_v57 = vld [vmem:[#allocation330_spill] sm:$0xff] }
 0x5dc   : > { %v4991_v15 = vmul.f32 %v12634_v62, %v17268_v6  ;;  %v17274_v9 = vmax.f32 %v17273_v50, 0.0  ;;  %v6721_v5 = vsel %vm15886_vm13, %v5499_v42, %v6719_v20  ;;  %v17276_v27 = vmax.f32 %v17275_v0, 0.0  ;;  %v17282_v6 = vld [vmem:[#allocation81_spill] sm:$0xff]  ;;  %v17284_v44 = vld [vmem:[#allocation78_spill] sm:$0xff]  ;;  %v17288_v0 = vld [vmem:[#allocation80_spill] sm:$0xff] }
 0x5dd   : > { %v4992_v3 = vmul.f32 %v12654_v63, %v17270_v14  ;;  %v4993_v52 = vmul.f32 %v12615_v10, %v17272_v1  ;;  %v17278_v31 = vmax.f32 %v17277_v55, 0.0  ;;  %v17280_v33 = vmax.f32 %v17279_v43, 0.0  ;;  %v17286_v1 = vld [vmem:[#allocation83_spill] sm:$0xff] }
 0x5de   : > { %v4994_v35 = vmul.f32 %v12711_v22, %v17274_v9  ;;  %v4995_v46 = vmul.f32 %v12634_v62, %v17276_v27  ;;  %v6843_v59 = vadd.f32 %v6721_v5, %v17281_v57  ;;  %v17283_v28 = vmax.f32 %v17282_v6, 0.0 }
 0x5df   : > { %v4996_v40 = vmul.f32 %v12654_v63, %v17278_v31  ;;  %v4997_v29 = vmul.f32 %v12615_v10, %v17280_v33  ;;  %v17285_v20 = vmax.f32 %v17284_v44, 0.0  ;;  %v17287_v50 = vmax.f32 %v17286_v1, 0.0  ;;  %v17290_v31 = vld [vmem:[#allocation85_spill] sm:$0xff]  ;;  %v17292_v33 = vld [vmem:[#allocation82_spill] sm:$0xff] }
 0x5e0   : > { %v4998_v14 = vmul.f32 %v12711_v22, %v17283_v28  ;;  %v17289_v27 = vmax.f32 %v17288_v0, 0.0  ;;  %v17291_v43 = vmax.f32 %v17290_v31, 0.0  ;;  %v17293_v57 = vmax.f32 %v17292_v33, 0.0  ;;  %v17294_v28 = vld [vmem:[#allocation87_spill] sm:$0xff] }
 0x5e1   : > { %v4999_v42 = vmul.f32 %v12634_v62, %v17285_v20  ;;  %v5000_v9 = vmul.f32 %v12654_v63, %v17287_v50  ;;  %v17295_v44 = vmax.f32 %v17294_v28, 0.0  ;;  %v13276_v1 = vsel %vm13175_vm15, %v6843_v59, -1e+30  ;;  %v17297_v50 = vld [vmem:[#allocation84_spill] sm:$0xff]  ;;  %v17303_v28 = vld [vmem:[#allocation91_spill] sm:$0xff] }
 0x5e2   : > { %v5001_v55 = vmul.f32 %v12615_v10, %v17289_v27  ;;  %v5002_v5 = vmul.f32 %v12711_v22, %v17291_v43  ;;  %v5003_v6 = vmul.f32 %v12634_v62, %v17293_v57  ;;  %17296 = vst [vmem:[#allocation257_spill] sm:$0xff] %v13276_v1  ;;  %v17298_v0 = vmax.f32 %v17297_v50, 0.0  ;;  %7015 = vmax.xlane.f32.xlu0 %v13276_v1  ;;  %v17305_v59 = vld [vmem:[#allocation88_spill] sm:$0xff] }
 0x5e3   : > { %v5004_v20 = vmul.f32 %v12654_v63, %v17295_v44  ;;  %v17300_v31 = vmax.f32 %v17299_v4, 0.0  ;;  %v17302_v33 = vmax.f32 %v17301_v51, 0.0  ;;  %v17304_v44 = vmax.f32 %v17303_v28, 0.0 }
 0x5e4   : > { %v5005_v27 = vmul.f32 %v12615_v10, %v17298_v0  ;;  %v17306_v17 = vmax.f32 %v17305_v59, 0.0  ;;  %v17308_v0 = vmax.f32 %v17307_v39, 0.0  ;;  %v5572_v37 = vadd.f32 %v4981_v60, %v4980_v34 }
 0x5e5   : > { %v5006_v43 = vmul.f32 %v12711_v22, %v17300_v31  ;;  %v5007_v57 = vmul.f32 %v12634_v62, %v17302_v33  ;;  %v5008_v25 = vmul.f32 %v12654_v63, %v17304_v44  ;;  %v17310_v31 = vmax.f32 %v17309_v56, 0.0 }
 0x5e6   : > { %v5009_v50 = vmul.f32 %v12615_v10, %v17306_v17  ;;  %v5010_v4 = vmul.f32 %v12711_v22, %v17308_v0  ;;  %v5581_v33 = vadd.f32 %v4985_v24, %v4984_v53  ;;  %v5590_v45 = vadd.f32 %v4989_v38, %v4988_v19 }
 0x5e7   : > { %v5011_v51 = vmul.f32 %v12634_v62, %v17310_v31  ;;  %v5599_v1 = vadd.f32 %v4993_v52, %v4992_v3  ;;  %v5608_v48 = vadd.f32 %v4997_v29, %v4996_v40  ;;  %v5617_v28 = vadd.f32 %v5001_v55, %v5000_v9 }
 0x5e8   : > { %v5626_v58 = vadd.f32 %v5005_v27, %v5004_v20  ;;  %v5635_v44 = vadd.f32 %v5009_v50, %v5008_v25  ;;  %v5573_v13 = vadd.f32 %v5572_v37, %v4982_v41  ;;  %v5582_v59 = vadd.f32 %v5581_v33, %v4986_v32 }
 0x5e9   : > { %v5591_v12 = vadd.f32 %v5590_v45, %v4990_v2  ;;  %v5600_v17 = vadd.f32 %v5599_v1, %v4994_v35  ;;  %v5609_v30 = vadd.f32 %v5608_v48, %v4998_v14  ;;  %v5618_v39 = vadd.f32 %v5617_v28, %v5002_v5 }
 0x5ea   : > { %v5627_v18 = vadd.f32 %v5626_v58, %v5006_v43  ;;  %v5636_v0 = vadd.f32 %v5635_v44, %v5010_v4  ;;  %v5574_v16 = vadd.f32 %v5573_v13, %v4983_v54  ;;  %v5583_v56 = vadd.f32 %v5582_v59, %v4987_v61 }
 0x5eb   : > { %v5592_v11 = vadd.f32 %v5591_v12, %v4991_v15  ;;  %v5601_v31 = vadd.f32 %v5600_v17, %v4995_v46  ;;  %v5610_v34 = vadd.f32 %v5609_v30, %v4999_v42  ;;  %v5619_v60 = vadd.f32 %v5618_v39, %v5003_v6 }
 0x5ec   : > { %v5628_v53 = vadd.f32 %v5627_v18, %v5007_v57  ;;  %v5637_v24 = vadd.f32 %v5636_v0, %v5011_v51  ;;  %v5575_v19 = vrot.slane %v5574_v16, 4  ;;  %v5584_v38 = vrot.slane %v5583_v56, 4 }
 0x5ed   : > { %v5593_v3 = vrot.slane %v5592_v11, 4  ;;  %v5602_v25 = vrot.slane %v5601_v31, 4  ;;  %v5611_v37 = vrot.slane %v5610_v34, 4  ;;  %v5620_v41 = vrot.slane %v5619_v60, 4 }
 0x5ee   : > { %v5629_v45 = vrot.slane %v5628_v53, 4  ;;  %v5638_v32 = vrot.slane %v5637_v24, 4  ;;  %v5576_v48 = vadd.f32 %v5575_v19, %v5574_v16  ;;  %v5585_v2 = vadd.f32 %v5584_v38, %v5583_v56 }
 0x5ef   : > { %v5594_v58 = vadd.f32 %v5593_v3, %v5592_v11  ;;  %v5603_v52 = vadd.f32 %v5602_v25, %v5601_v31  ;;  %v5612_v13 = vadd.f32 %v5611_v37, %v5610_v34  ;;  %v5621_v54 = vadd.f32 %v5620_v41, %v5619_v60  ;;  %v17311_v60 = vld [vmem:[#allocation434_spill] sm:$0xff]  ;;  %v17314_v3 = vld [vmem:[#allocation28_spill] sm:$0xff] }
 0x5f0   : > { %v5630_v12 = vadd.f32 %v5629_v45, %v5628_v53  ;;  %v5639_v61 = vadd.f32 %v5638_v32, %v5637_v24  ;;  %v5577_v30 = vrot.slane %v5576_v48, 2  ;;  %v5586_v15 = vrot.slane %v5585_v2, 2  ;;  %v17312_v24 = vld [vmem:[#allocation31_spill] sm:$0xff]  ;;  %v17316_v45 = vld [vmem:[#allocation33_spill] sm:$0xff] }
 0x5f1   : > { %v5595_v18 = vrot.slane %v5594_v58, 2  ;;  %v5604_v35 = vrot.slane %v5603_v52, 2  ;;  %v5613_v46 = vrot.slane %v5612_v13, 2  ;;  %v5622_v40 = vrot.slane %v5621_v54, 2 }
 0x5f2   : > { %v5631_v29 = vrot.slane %v5630_v12, 2  ;;  %v5640_v14 = vrot.slane %v5639_v61, 2  ;;  %v5578_v42 = vadd.f32 %v5577_v30, %v5576_v48  ;;  %v5587_v9 = vadd.f32 %v5586_v15, %v5585_v2  ;;  %v17318_v2 = vld [vmem:[#allocation30_spill] sm:$0xff]  ;;  %v17322_v15 = vld [vmem:[#allocation32_spill] sm:$0xff] }
 0x5f3   : > { %v5596_v55 = vadd.f32 %v5595_v18, %v5594_v58  ;;  %v5605_v5 = vadd.f32 %v5604_v35, %v5603_v52  ;;  %v5614_v16 = vadd.f32 %v5613_v46, %v5612_v13  ;;  %v5623_v6 = vadd.f32 %v5622_v40, %v5621_v54  ;;  %v17320_v13 = vld [vmem:[#allocation35_spill] sm:$0xff]  ;;  %v17324_v46 = vld [vmem:[#allocation37_spill] sm:$0xff] }
 0x5f4   : > { %v5632_v11 = vadd.f32 %v5631_v29, %v5630_v12  ;;  %v5641_v20 = vadd.f32 %v5640_v14, %v5639_v61  ;;  %v5579_v1 = vrot.slane %v5578_v42, 1  ;;  %v5588_v27 = vrot.slane %v5587_v9, 1 }
 0x5f5   : > { %v5597_v43 = vrot.slane %v5596_v55, 1  ;;  %v5606_v57 = vrot.slane %v5605_v5, 1  ;;  %v5615_v50 = vrot.slane %v5614_v16, 1  ;;  %v5624_v4 = vrot.slane %v5623_v6, 1 }
 0x5f6   : > { %v5633_v51 = vrot.slane %v5632_v11, 1  ;;  %v5642_v33 = vrot.slane %v5641_v20, 1  ;;  %v5580_v28 = vadd.f32 %v5579_v1, %v5578_v42  ;;  %v5589_v44 = vadd.f32 %v5588_v27, %v5587_v9  ;;  %v17326_v42 = vld [vmem:[#allocation34_spill] sm:$0xff] }
 0x5f7   : > { %v5598_v59 = vadd.f32 %v5597_v43, %v5596_v55  ;;  %v5607_v17 = vadd.f32 %v5606_v57, %v5605_v5  ;;  %v5616_v39 = vadd.f32 %v5615_v50, %v5614_v16  ;;  %v5625_v0 = vadd.f32 %v5624_v4, %v5623_v6  ;;  %v17328_v5 = vld [vmem:[#allocation39_spill] sm:$0xff]  ;;  %v17332_v57 = vld [vmem:[#allocation41_spill] sm:$0xff] }
 0x5f8   : > { %v5634_v56 = vadd.f32 %v5633_v51, %v5632_v11  ;;  %v5643_v31 = vadd.f32 %v5642_v33, %v5641_v20  ;;  %v6729_v34 = vsel %vm15877_vm7, %v5589_v44, %v5580_v28  ;;  %v6873_v53 = vunpack.c.2.s8 %v17311_v60  ;;  %v17330_v11 = vld [vmem:[#allocation36_spill] sm:$0xff]  ;;  %v17334_v51 = vld [vmem:[#allocation38_spill] sm:$0xff] }
 0x5f9   : > { %v17313_v19 = vmax.f32 %v17312_v24, 0.0  ;;  %v17315_v25 = vmax.f32 %v17314_v3, 0.0  ;;  %v6730_v41 = vsel %vm15903_vm8, %v5598_v59, %v6729_v34  ;;  %v17317_v32 = vmax.f32 %v17316_v45, 0.0  ;;  %v17336_v59 = vld [vmem:[#allocation43_spill] sm:$0xff]  ;;  %v17338_v34 = vld [vmem:[#allocation40_spill] sm:$0xff] }
 0x5fa   : > { %v17319_v58 = vmax.f32 %v17318_v2, 0.0  ;;  %v17321_v54 = vmax.f32 %v17320_v13, 0.0  ;;  %v6731_v61 = vsel %vm15900_vm9, %v5607_v17, %v6730_v41  ;;  %v6891_v30 = vpack.c.b16 %v6873_v53, %v6873_v53  ;;  %v17342_v41 = vld [vmem:[#allocation42_spill] sm:$0xff]  ;;  %v17346_v13 = vld [vmem:[#allocation331_spill] sm:$0xff] }
 0x5fb   : > { %v4948_v38 = vmul.f32 %v12654_v63, %v17313_v19  ;;  %v4949_v37 = vmul.f32 %v12615_v10, %v17315_v25  ;;  %v4950_v48 = vmul.f32 %v12711_v22, %v17317_v32  ;;  %v17323_v18 = vmax.f32 %v17322_v15, 0.0  ;;  %v17348_v15 = vld [vmem:[#allocation44_spill] sm:$0xff] }
 0x5fc   : > { %v4951_v52 = vmul.f32 %v12634_v62, %v17319_v58  ;;  %v4952_v12 = vmul.f32 %v12654_v63, %v17321_v54  ;;  %v17325_v40 = vmax.f32 %v17324_v46, 0.0  ;;  %v6732_v14 = vsel %vm15873_vm10, %v5616_v39, %v6731_v61 }
 0x5fd   : > { %v4953_v35 = vmul.f32 %v12615_v10, %v17323_v18  ;;  %v17327_v9 = vmax.f32 %v17326_v42, 0.0  ;;  %v17329_v16 = vmax.f32 %v17328_v5, 0.0  ;;  %v17331_v20 = vmax.f32 %v17330_v11, 0.0  ;;  %v17354_v11 = vld [vmem:[#allocation51_spill] sm:$0xff] }
 0x5fe   : > { %v4954_v29 = vmul.f32 %v12711_v22, %v17325_v40  ;;  %v6733_v27 = vsel %vm15899_vm11, %v5625_v0, %v6732_v14  ;;  %v6892_v43 = vpack.c.b8 %v6891_v30, %v6891_v30  ;;  %v17333_v50 = vmax.f32 %v17332_v57, 0.0  ;;  %v17340_v0 = vld [vmem:[#allocation45_spill] sm:$0xff] }
 0x5ff   : > { %v4955_v55 = vmul.f32 %v12634_v62, %v17327_v9  ;;  %v4956_v6 = vmul.f32 %v12654_v63, %v17329_v16  ;;  %v4957_v1 = vmul.f32 %v12615_v10, %v17331_v20  ;;  %v17335_v33 = vmax.f32 %v17334_v51, 0.0  ;;  %v17350_v40 = vld [vmem:[#allocation49_spill] sm:$0xff]  ;;  %v17352_v9 = vld [vmem:[#allocation46_spill] sm:$0xff] }
 0x600   : > { %v4958_v4 = vmul.f32 %v12711_v22, %v17333_v50  ;;  %v6734_v44 = vsel %vm15887_vm12, %v5634_v56, %v6733_v27  ;;  %v17337_v17 = vmax.f32 %v17336_v59, 0.0  ;;  %v17339_v53 = vmax.f32 %v17338_v34, 0.0  ;;  %v17344_v56 = vld [vmem:[#allocation47_spill] sm:$0xff]  ;;  %v17358_v51 = vld [vmem:[#allocation53_spill] sm:$0xff]  ;;  %v17360_v59 = vld [vmem:[#allocation50_spill] sm:$0xff] }
 0x601   : > { %v4959_v28 = vmul.f32 %v12634_v62, %v17335_v33  ;;  %v17341_v19 = vmax.f32 %v17340_v0, 0.0  ;;  %v6735_v25 = vsel %vm15886_vm13, %v5643_v31, %v6734_v44  ;;  %vm6921_vm0 = vnez %v6892_v43  ;;  %v17356_v43 = vld [vmem:[#allocation15_spill] sm:$0xff] }
 0x602   : > { %v4960_v39 = vmul.f32 %v12654_v63, %v17337_v17  ;;  %v4961_v24 = vmul.f32 %v12615_v10, %v17339_v53  ;;  %v17343_v45 = vmax.f32 %v17342_v41, 0.0  ;;  %v17345_v2 = vmax.f32 %v17344_v56, 0.0  ;;  %v17362_v53 = vld [vmem:[#allocation55_spill] sm:$0xff] }
 0x603   : > { %v4962_v3 = vmul.f32 %v12711_v22, %v17341_v19  ;;  %v6845_v54 = vadd.f32 %v6735_v25, %v17346_v13  ;;  %v17347_v61 = vmov 0   ;;  %v17349_v18 = vmax.f32 %v17348_v15, 0.0  ;;  %v17364_v25 = vld [vmem:[#allocation52_spill] sm:$0xff]  ;;  %v17371_v15 = vld [vmem:[#allocation54_spill] sm:$0xff] }
 0x604   : > { %v4963_v32 = vmul.f32 %v12634_v62, %v17343_v45  ;;  %v4964_v58 = vmul.f32 %v12654_v63, %v17345_v2  ;;  %v6937_v30 = vsel %vm6921_vm0, 16843009, %v17347_v61  ;;  %v17351_v14 = vmax.f32 %v17350_v40, 0.0  ;;  %v17369_v2 = vld [vmem:[#allocation57_spill] sm:$0xff] }
 0x605   : > { %v4965_v46 = vmul.f32 %v12615_v10, %v17349_v18  ;;  %v6953_v42 = vunpack.c.0.s8 %v6937_v30  ;;  %v17353_v5 = vmax.f32 %v17352_v9, 0.0  ;;  %v17355_v20 = vmax.f32 %v17354_v11, 0.0 }
 0x606   : > { %v4966_v31 = vmul.f32 %v12711_v22, %v17351_v14  ;;  %v17357_v57 = vmax.f32 %v17356_v43, 0.0  ;;  %v17359_v33 = vmax.f32 %v17358_v51, 0.0  ;;  %v17361_v17 = vmax.f32 %v17360_v59, 0.0  ;;  %v17373_v14 = vld [vmem:[#allocation59_spill] sm:$0xff]  ;;  %v17380_v59 = vld [vmem:[#allocation58_spill] sm:$0xff] }
 0x607   : > { %v4967_v16 = vmul.f32 %v12634_v62, %v17353_v5  ;;  %v4968_v27 = vmul.f32 %v12654_v63, %v17355_v20  ;;  %v17363_v0 = vmax.f32 %v17362_v53, 0.0  ;;  %v17365_v41 = vmax.f32 %v17364_v25, 0.0 }
 0x608   : > { %v4969_v50 = vmul.f32 %v12615_v10, %v17357_v57  ;;  %v4970_v44 = vmul.f32 %v12711_v22, %v17359_v33  ;;  %v4971_v34 = vmul.f32 %v12634_v62, %v17361_v17  ;;  %vm13388_vm1 = vcmp.ne.s32.totalorder %v6953_v42, 0  ;;  %v17376_v42 = vld [vmem:[#allocation56_spill] sm:$0xff]  ;;  %v17378_v57 = vld [vmem:[#allocation61_spill] sm:$0xff] }
 0x609   : > { %v4972_v19 = vmul.f32 %v12654_v63, %v17363_v0  ;;  %v4973_v45 = vmul.f32 %v12615_v10, %v17365_v41  ;;  %v17366_v56 = vmov 0  ;;  %v17370_v13 = vmax.f32 %v17369_v2, 0.0 }
 0x60a   : > { %v17367_v56 = vsel %vm13388_vm1, 4294967295, %v17366_v56  ;;  %v17372_v18 = vmax.f32 %v17371_v15, 0.0  ;;  %v17374_v9 = vmax.f32 %v17373_v14, 0.0  ;;  %v13403_v11 = vsel %vm13388_vm1, %v6845_v54, -1e+30 }
 0x60b   : > { %17368 = vst [vmem:[#allocation275_spill] sm:$0xff] %v17367_v56  ;;  %v4974_v30 = vmul.f32 %v12711_v22, %v17370_v13  ;;  %17375 = vst [vmem:[#allocation274_spill] sm:$0xff] %v13403_v11  ;;  %v17377_v20 = vmax.f32 %v17376_v42, 0.0  ;;  %v17379_v51 = vmax.f32 %v17378_v57, 0.0  ;;  %v17381_v17 = vmax.f32 %v17380_v59, 0.0  ;;  %7019 = vmax.xlane.f32.xlu1 %v13403_v11 }
 0x60c   : > { %v4975_v40 = vmul.f32 %v12634_v62, %v17372_v18  ;;  %v4976_v5 = vmul.f32 %v12654_v63, %v17374_v9  ;;  %v5500_v0 = vadd.f32 %v4949_v37, %v4948_v38  ;;  %v5509_v25 = vadd.f32 %v4953_v35, %v4952_v12 }
 0x60d   : > { %v4977_v43 = vmul.f32 %v12615_v10, %v17377_v20  ;;  %v4978_v33 = vmul.f32 %v12711_v22, %v17379_v51  ;;  %v4979_v53 = vmul.f32 %v12634_v62, %v17381_v17  ;;  %v5518_v41 = vadd.f32 %v4957_v1, %v4956_v6 }
 0x60e   : > { %v5527_v2 = vadd.f32 %v4961_v24, %v4960_v39  ;;  %v5536_v54 = vadd.f32 %v4965_v46, %v4964_v58  ;;  %v5545_v13 = vadd.f32 %v4969_v50, %v4968_v27  ;;  %v5554_v15 = vadd.f32 %v4973_v45, %v4972_v19 }
 0x60f   : > { %v5563_v18 = vadd.f32 %v4977_v43, %v4976_v5  ;;  %v5501_v14 = vadd.f32 %v5500_v0, %v4950_v48  ;;  %v5510_v9 = vadd.f32 %v5509_v25, %v4954_v29  ;;  %v5519_v42 = vadd.f32 %v5518_v41, %v4958_v4 }
 0x610   : > { %v5528_v20 = vadd.f32 %v5527_v2, %v4962_v3  ;;  %v5537_v57 = vadd.f32 %v5536_v54, %v4966_v31  ;;  %v5546_v51 = vadd.f32 %v5545_v13, %v4970_v44  ;;  %v5555_v56 = vadd.f32 %v5554_v15, %v4974_v30 }
 0x611   : > { %v5564_v59 = vadd.f32 %v5563_v18, %v4978_v33  ;;  %v5502_v61 = vadd.f32 %v5501_v14, %v4951_v52  ;;  %v5511_v17 = vadd.f32 %v5510_v9, %v4955_v55  ;;  %v5520_v62 = vadd.f32 %v5519_v42, %v4959_v28  ;;  %v3524_v14 = vpop.permute.xlu0 %3523 }
 0x612   : > { %v5529_v11 = vadd.f32 %v5528_v20, %v4963_v32  ;;  %v5538_v38 = vadd.f32 %v5537_v57, %v4967_v16  ;;  %v5547_v37 = vadd.f32 %v5546_v51, %v4971_v34  ;;  %v5556_v12 = vadd.f32 %v5555_v56, %v4975_v40 }
 0x613   : > { %v5565_v35 = vadd.f32 %v5564_v59, %v4979_v53  ;;  %v5503_v6 = vrot.slane %v5502_v61, 4  ;;  %v5512_v1 = vrot.slane %v5511_v17, 4  ;;  %v5521_v39 = vrot.slane %v5520_v62, 4 }
 0x614   : > { %v5530_v24 = vrot.slane %v5529_v11, 4  ;;  %v5539_v48 = vrot.slane %v5538_v38, 4  ;;  %v5548_v29 = vrot.slane %v5547_v37, 4  ;;  %v5557_v4 = vrot.slane %v5556_v12, 4 }
 0x615   : > { %v5566_v3 = vrot.slane %v5565_v35, 4  ;;  %v5504_v58 = vadd.f32 %v5503_v6, %v5502_v61  ;;  %v5513_v46 = vadd.f32 %v5512_v1, %v5511_v17  ;;  %v5522_v31 = vadd.f32 %v5521_v39, %v5520_v62 }
 0x616   : > { %v5531_v27 = vadd.f32 %v5530_v24, %v5529_v11  ;;  %v5540_v52 = vadd.f32 %v5539_v48, %v5538_v38  ;;  %v5549_v55 = vadd.f32 %v5548_v29, %v5547_v37  ;;  %v5558_v28 = vadd.f32 %v5557_v4, %v5556_v12  ;;  %v3653_v12 = vpop.permute.xlu1 %3652 }
 0x617   : > { %v5567_v32 = vadd.f32 %v5566_v3, %v5565_v35  ;;  %v5505_v16 = vrot.slane %v5504_v58, 2  ;;  %v5514_v50 = vrot.slane %v5513_v46, 2  ;;  %v5523_v44 = vrot.slane %v5522_v31, 2 }
 0x618   : > { %v5532_v34 = vrot.slane %v5531_v27, 2  ;;  %v5541_v19 = vrot.slane %v5540_v52, 2  ;;  %v5550_v45 = vrot.slane %v5549_v55, 2  ;;  %v5559_v56 = vrot.slane %v5558_v28, 2 }
 0x619   : > { %v5568_v30 = vrot.slane %v5567_v32, 2  ;;  %v5506_v40 = vadd.f32 %v5505_v16, %v5504_v58  ;;  %v5515_v5 = vadd.f32 %v5514_v50, %v5513_v46  ;;  %v5524_v43 = vadd.f32 %v5523_v44, %v5522_v31  ;;  %v17387_v31 = vld [vmem:[#allocation92_spill] sm:$0xff]  ;;  %v17391_v44 = vld [vmem:[#allocation94_spill] sm:$0xff] }
 0x61a   : > { %v5533_v33 = vadd.f32 %v5532_v34, %v5531_v27  ;;  %v5542_v61 = vadd.f32 %v5541_v19, %v5540_v52  ;;  %v5551_v53 = vadd.f32 %v5550_v45, %v5549_v55  ;;  %v5560_v62 = vadd.f32 %v5559_v56, %v5558_v28  ;;  %v17389_v55 = vld [vmem:[#allocation97_spill] sm:$0xff]  ;;  %v17393_v19 = vld [vmem:[#allocation252_spill] sm:$0xff]  ;;  %v17394_v56 = vld [vmem:[#allocation99_spill] sm:$0xff] }
 0x61b   : > { %v5569_v11 = vadd.f32 %v5568_v30, %v5567_v32  ;;  %v5507_v0 = vrot.slane %v5506_v40, 1  ;;  %v5516_v25 = vrot.slane %v5515_v5, 1  ;;  %v5525_v41 = vrot.slane %v5524_v43, 1 }
 0x61c   : > { %v5534_v2 = vrot.slane %v5533_v33, 1  ;;  %v5543_v54 = vrot.slane %v5542_v61, 1  ;;  %v5552_v13 = vrot.slane %v5551_v53, 1  ;;  %v5561_v15 = vrot.slane %v5560_v62, 1 }
 0x61d   : > { %v5570_v18 = vrot.slane %v5569_v11, 1  ;;  %v13417_v9 = vadd.f32 %v13187_v7, %v13167_v21  ;;  %v5508_v42 = vadd.f32 %v5507_v0, %v5506_v40  ;;  %v5517_v20 = vadd.f32 %v5516_v25, %v5515_v5  ;;  %v17400_v0 = vld [vmem:[#allocation98_spill] sm:$0xff] }
 0x61e   : > { %v5526_v57 = vadd.f32 %v5525_v41, %v5524_v43  ;;  %v17383_v59 = vrot.slane %v13192_v26, 2  ;;  %v13427_v38 = vadd.f32 %v13099_v36, %v13204_v23  ;;  %v5535_v37 = vadd.f32 %v5534_v2, %v5533_v33  ;;  %v17385_v23 = vld [vmem:[#allocation95_spill] sm:$0xff]  ;;  %v17396_v43 = vld [vmem:[#allocation96_spill] sm:$0xff] }
 0x61f   : > { %17382 = vst [vmem:[#allocation261_spill] sm:$0xff] %v13417_v9  ;;  %v5544_v35 = vadd.f32 %v5543_v54, %v5542_v61  ;;  %v6722_v21 = vsel %vm15877_vm7, %v5517_v20, %v5508_v42  ;;  %v6872_v7 = vunpack.c.1.s8 %v17311_v60  ;;  %v13432_v6 = vadd.f32 %v3524_v14, %v9865_v49  ;;  %v17402_v54 = vld [vmem:[#allocation103_spill] sm:$0xff]  ;;  %v17406_v20 = vld [vmem:[#allocation332_spill] sm:$0xff] }
 0x620   : > { %v13423_v17 = vadd.f32 %v17383_v59, %v13192_v26  ;;  %17384 = vst [vmem:[#allocation265_spill] sm:$0xff] %v13427_v38  ;;  %v5553_v1 = vadd.f32 %v5552_v13, %v5551_v53  ;;  %v5562_v39 = vadd.f32 %v5561_v15, %v5560_v62  ;;  %v5571_v24 = vadd.f32 %v5570_v18, %v5569_v11  ;;  %v17398_v53 = vld [vmem:[#allocation101_spill] sm:$0xff]  ;;  %v17404_v18 = vld [vmem:[#allocation100_spill] sm:$0xff] }
 0x621   : > { %v6723_v26 = vsel %vm15903_vm8, %v5526_v57, %v6722_v21  ;;  %v6889_v29 = vpack.c.b16 %v6872_v7, %v6872_v7  ;;  %v13437_v36 = vadd.f32 %v3653_v12, %v9862_v8  ;;  %v17386_v4 = vmax.f32 %v17385_v23, 0.0  ;;  %v17408_v12 = vld [vmem:[#allocation105_spill] sm:$0xff]  ;;  %v17410_v7 = vld [vmem:[#allocation102_spill] sm:$0xff]  ;;  %v17414_v23 = vld [vmem:[#allocation104_spill] sm:$0xff] }
 0x622   : > { %v6724_v48 = vsel %vm15900_vm9, %v5535_v37, %v6723_v26  ;;  %v17388_v27 = vmax.f32 %v17387_v31, 0.0  ;;  %v17390_v28 = vmax.f32 %v17389_v55, 0.0  ;;  %v17392_v34 = vmax.f32 %v17391_v44, 0.0  ;;  %v17412_v26 = vld [vmem:[#allocation107_spill] sm:$0xff]  ;;  %v17416_v31 = vld [vmem:[#allocation109_spill] sm:$0xff] }
 0x623   : > { %v5012_v3 = vmul.f32 %v12654_v63, %v17386_v4  ;;  %v6725_v58 = vsel %vm15873_vm10, %v5544_v35, %v6724_v48  ;;  %v6890_v50 = vpack.c.b8 %v6889_v29, %v6889_v29  ;;  %v17395_v30 = vmax.f32 %v17394_v56, 0.0  ;;  %v17420_v44 = vld [vmem:[#allocation111_spill] sm:$0xff] }
 0x624   : > { %v5013_v52 = vmul.f32 %v12615_v10, %v17388_v27  ;;  %v5014_v32 = vmul.f32 %v12711_v22, %v17390_v28  ;;  %v6726_v16 = vsel %vm15899_vm11, %v5553_v1, %v6725_v58  ;;  %v5015_v45 = vmul.f32 %v17393_v19, %v17392_v34  ;;  %v17418_v28 = vld [vmem:[#allocation106_spill] sm:$0xff] }
 0x625   : > { %v5016_v40 = vmul.f32 %v12654_v63, %v17395_v30  ;;  %v6727_v5 = vsel %vm15887_vm12, %v5562_v39, %v6726_v16  ;;  %v17397_v33 = vmax.f32 %v17396_v43, 0.0  ;;  %v17399_v62 = vmax.f32 %v17398_v53, 0.0  ;;  %v17422_v30 = vld [vmem:[#allocation108_spill] sm:$0xff] }
 0x626   : > { %v17401_v25 = vmax.f32 %v17400_v0, 0.0  ;;  %v6728_v2 = vsel %vm15886_vm13, %v5571_v24, %v6727_v5  ;;  %vm6920_vm3 = vnez %v6890_v50  ;;  %v17403_v13 = vmax.f32 %v17402_v54, 0.0 }
 0x627   : > { %v5017_v61 = vmul.f32 %v12615_v10, %v17397_v33  ;;  %v5018_v11 = vmul.f32 %v12711_v22, %v17399_v62  ;;  %v17405_v14 = vmax.f32 %v17404_v18, 0.0  ;;  %v6844_v57 = vadd.f32 %v6728_v2, %v17406_v20  ;;  %v17424_v33 = vld [vmem:[#allocation113_spill] sm:$0xff]  ;;  %v17433_v20 = vld [vmem:[#allocation112_spill] sm:$0xff] }
 0x628   : > { %v5019_v41 = vmul.f32 %v17393_v19, %v17401_v25  ;;  %v5020_v15 = vmul.f32 %v12654_v63, %v17403_v13  ;;  %v17407_v59 = vmov 0   ;;  %v17409_v35 = vmax.f32 %v17408_v12, 0.0  ;;  %v17429_v25 = vld [vmem:[#allocation110_spill] sm:$0xff]  ;;  %v17431_v13 = vld [vmem:[#allocation115_spill] sm:$0xff] }
 0x629   : > { %v5021_v42 = vmul.f32 %v12615_v10, %v17405_v14  ;;  %v6936_v37 = vsel %vm6920_vm3, 16843009, %v17407_v59  ;;  %v17411_v1 = vmax.f32 %v17410_v7, 0.0  ;;  %v17413_v48 = vmax.f32 %v17412_v26, 0.0  ;;  %v17436_v7 = vld [vmem:[#allocation117_spill] sm:$0xff]  ;;  %v17438_v26 = vld [vmem:[#allocation114_spill] sm:$0xff] }
 0x62a   : > { %v5022_v21 = vmul.f32 %v12711_v22, %v17409_v35  ;;  %v6952_v24 = vunpack.c.0.s8 %v6936_v37  ;;  %v17415_v4 = vmax.f32 %v17414_v23, 0.0  ;;  %v17417_v27 = vmax.f32 %v17416_v31, 0.0 }
 0x62b   : > { %v5023_v39 = vmul.f32 %v17393_v19, %v17411_v1  ;;  %v5024_v29 = vmul.f32 %v12654_v63, %v17413_v48  ;;  %v17419_v16 = vmax.f32 %v17418_v28, 0.0  ;;  %v17421_v34 = vmax.f32 %v17420_v44, 0.0  ;;  %v17442_v28 = vld [vmem:[#allocation116_spill] sm:$0xff] }
 0x62c   : > { %v5025_v58 = vmul.f32 %v12615_v10, %v17415_v4  ;;  %v5026_v55 = vmul.f32 %v12711_v22, %v17417_v27  ;;  %v17423_v5 = vmax.f32 %v17422_v30, 0.0  ;;  %v17425_v53 = vmax.f32 %v17424_v33, 0.0  ;;  %v17440_v4 = vld [vmem:[#allocation119_spill] sm:$0xff] }
 0x62d   : > { %v5027_v50 = vmul.f32 %v17393_v19, %v17419_v16  ;;  %v5028_v56 = vmul.f32 %v12654_v63, %v17421_v34  ;;  %vm13503_vm4 = vcmp.ne.s32.totalorder %v6952_v24, 0  ;;  %v17426_v0 = vmov 0 }
 0x62e   : > { %v5029_v43 = vmul.f32 %v12615_v10, %v17423_v5  ;;  %v5030_v62 = vmul.f32 %v12711_v22, %v17425_v53  ;;  %v17427_v0 = vsel %vm13503_vm4, 4294967295, %v17426_v0  ;;  %v17430_v2 = vmax.f32 %v17429_v25, 0.0  ;;  %v17446_v5 = vld [vmem:[#allocation118_spill] sm:$0xff]  ;;  %v17448_v25 = vld [vmem:[#allocation123_spill] sm:$0xff] }
 0x62f   : > { %17428 = vst [vmem:[#allocation279_spill] sm:$0xff] %v17427_v0  ;;  %v17432_v18 = vmax.f32 %v17431_v13, 0.0  ;;  %v17434_v37 = vmax.f32 %v17433_v20, 0.0  ;;  %v13518_v35 = vsel %vm13503_vm4, %v6844_v57, -1e+30  ;;  %v17437_v1 = vmax.f32 %v17436_v7, 0.0 }
 0x630   : > { %v5031_v54 = vmul.f32 %v17393_v19, %v17430_v2  ;;  %17435 = vst [vmem:[#allocation427_spill] sm:$0xff] %v13518_v35  ;;  %v17439_v48 = vmax.f32 %v17438_v26, 0.0  ;;  %v17441_v31 = vmax.f32 %v17440_v4, 0.0  ;;  %7017 = vmax.xlane.f32.xlu0 %v13518_v35  ;;  %v17443_v16 = vmax.f32 %v17442_v28, 0.0  ;;  %v17444_v57 = vld [vmem:[#allocation121_spill] sm:$0xff] }
 0x631   : > { %v5032_v14 = vmul.f32 %v12654_v63, %v17432_v18  ;;  %v5033_v12 = vmul.f32 %v12615_v10, %v17434_v37  ;;  %v5034_v24 = vmul.f32 %v12711_v22, %v17437_v1  ;;  %v17445_v34 = vmax.f32 %v17444_v57, 0.0  ;;  %v17450_v18 = vld [vmem:[#allocation120_spill] sm:$0xff]  ;;  %v17452_v7 = vld [vmem:[#allocation125_spill] sm:$0xff] }
 0x632   : > { %v5035_v23 = vmul.f32 %v17393_v19, %v17439_v48  ;;  %v5036_v27 = vmul.f32 %v12654_v63, %v17441_v31  ;;  %v5037_v44 = vmul.f32 %v12615_v10, %v17443_v16  ;;  %v17447_v33 = vmax.f32 %v17446_v5, 0.0  ;;  %v17454_v48 = vld [vmem:[#allocation122_spill] sm:$0xff] }
 0x633   : > { %v5038_v30 = vmul.f32 %v12711_v22, %v17445_v34  ;;  %v17449_v2 = vmax.f32 %v17448_v25, 0.0  ;;  %v17451_v20 = vmax.f32 %v17450_v18, 0.0  ;;  %v17453_v1 = vmax.f32 %v17452_v7, 0.0 }
 0x634   : > { %v5039_v53 = vmul.f32 %v17393_v19, %v17447_v33  ;;  %v17455_v4 = vmax.f32 %v17454_v48, 0.0  ;;  %v5644_v28 = vadd.f32 %v5013_v52, %v5012_v3  ;;  %v5653_v16 = vadd.f32 %v5017_v61, %v5016_v40 }
 0x635   : > { %v5040_v13 = vmul.f32 %v12654_v63, %v17449_v2  ;;  %v5041_v37 = vmul.f32 %v12615_v10, %v17451_v20  ;;  %v5042_v26 = vmul.f32 %v12711_v22, %v17453_v1  ;;  %v5662_v57 = vadd.f32 %v5021_v42, %v5020_v15 }
 0x636   : > { %v5043_v31 = vmul.f32 %v17393_v19, %v17455_v4  ;;  %v5671_v34 = vadd.f32 %v5025_v58, %v5024_v29  ;;  %v5680_v5 = vadd.f32 %v5029_v43, %v5028_v56  ;;  %v5645_v33 = vadd.f32 %v5644_v28, %v5014_v32 }
 0x637   : > { %v5689_v25 = vadd.f32 %v5033_v12, %v5032_v14  ;;  %v5698_v2 = vadd.f32 %v5037_v44, %v5036_v27  ;;  %v5707_v46 = vadd.f32 %v5041_v37, %v5040_v13  ;;  %v5654_v18 = vadd.f32 %v5653_v16, %v5018_v11 }
 0x638   : > { %v5663_v51 = vadd.f32 %v5662_v57, %v5022_v21  ;;  %v5672_v20 = vadd.f32 %v5671_v34, %v5026_v55  ;;  %v5681_v0 = vadd.f32 %v5680_v5, %v5030_v62  ;;  %v5646_v7 = vadd.f32 %v5645_v33, %v5015_v45 }
 0x639   : > { %v5690_v35 = vadd.f32 %v5689_v25, %v5034_v24  ;;  %v5699_v1 = vadd.f32 %v5698_v2, %v5038_v30  ;;  %v5708_v9 = vadd.f32 %v5707_v46, %v5042_v26  ;;  %v5655_v48 = vadd.f32 %v5654_v18, %v5019_v41 }
 0x63a   : > { %v5664_v38 = vadd.f32 %v5663_v51, %v5023_v39  ;;  %v5673_v4 = vadd.f32 %v5672_v20, %v5027_v50  ;;  %v5682_v3 = vadd.f32 %v5681_v0, %v5031_v54  ;;  %v5647_v52 = vrot.slane %v5646_v7, 4 }
 0x63b   : > { %v5691_v40 = vadd.f32 %v5690_v35, %v5035_v23  ;;  %v5700_v61 = vadd.f32 %v5699_v1, %v5039_v53  ;;  %v5709_v15 = vadd.f32 %v5708_v9, %v5043_v31  ;;  %v5656_v32 = vrot.slane %v5655_v48, 4 }
 0x63c   : > { %v5665_v42 = vrot.slane %v5664_v38, 4  ;;  %v5674_v29 = vrot.slane %v5673_v4, 4  ;;  %v5683_v58 = vrot.slane %v5682_v3, 4  ;;  %v5648_v11 = vadd.f32 %v5647_v52, %v5646_v7 }
 0x63d   : > { %v5692_v21 = vrot.slane %v5691_v40, 4  ;;  %v5701_v55 = vrot.slane %v5700_v61, 4  ;;  %v5710_v56 = vrot.slane %v5709_v15, 4  ;;  %v5657_v45 = vadd.f32 %v5656_v32, %v5655_v48  ;;  %v17458_v32 = vld [vmem:[#allocation284_spill] sm:$0xff] }
 0x63e   : > { %v5666_v43 = vadd.f32 %v5665_v42, %v5664_v38  ;;  %v5675_v62 = vadd.f32 %v5674_v29, %v5673_v4  ;;  %v5684_v46 = vadd.f32 %v5683_v58, %v5682_v3  ;;  %v5649_v41 = vrot.slane %v5648_v11, 2  ;;  %v17460_v58 = vld [vmem:[#allocation291_spill] sm:$0xff] }
 0x63f   : > { %v5693_v51 = vadd.f32 %v5692_v21, %v5691_v40  ;;  %v5702_v39 = vadd.f32 %v5701_v55, %v5700_v61  ;;  %v5711_v50 = vadd.f32 %v5710_v56, %v5709_v15  ;;  %v5658_v0 = vrot.slane %v5657_v45, 2  ;;  %v17456_v40 = vld [vmem:[#allocation402_spill] sm:$0xff] }
 0x640   : > { %v5667_v54 = vrot.slane %v5666_v43, 2  ;;  %v5676_v14 = vrot.slane %v5675_v62, 2  ;;  %v5685_v9 = vrot.slane %v5684_v46, 2  ;;  %v5650_v12 = vadd.f32 %v5649_v41, %v5648_v11 }
 0x641   : > { %v5694_v35 = vrot.slane %v5693_v51, 2  ;;  %v5703_v24 = vrot.slane %v5702_v39, 2  ;;  %v5712_v23 = vrot.slane %v5711_v50, 2  ;;  %v5659_v27 = vadd.f32 %v5658_v0, %v5657_v45  ;;  %v17462_v45 = vld [vmem:[#allocation286_spill] sm:$0xff] }
 0x642   : > { %v5668_v44 = vadd.f32 %v5667_v54, %v5666_v43  ;;  %v5677_v30 = vadd.f32 %v5676_v14, %v5675_v62  ;;  %v5686_v53 = vadd.f32 %v5685_v9, %v5684_v46  ;;  %v5651_v13 = vrot.slane %v5650_v12, 1  ;;  %v17464_v62 = vld [vmem:[#allocation294_spill] sm:$0xff]  ;;  %v17468_v54 = vld [vmem:[#allocation296_spill] sm:$0xff] }
 0x643   : > { %v5695_v38 = vadd.f32 %v5694_v35, %v5693_v51  ;;  %v5704_v37 = vadd.f32 %v5703_v24, %v5702_v39  ;;  %v5713_v26 = vadd.f32 %v5712_v23, %v5711_v50  ;;  %v5660_v31 = vrot.slane %v5659_v27, 1  ;;  %v17466_v39 = vld [vmem:[#allocation290_spill] sm:$0xff] }
 0x644   : > { %v5669_v28 = vrot.slane %v5668_v44, 1  ;;  %v5678_v16 = vrot.slane %v5677_v30, 1  ;;  %v5687_v57 = vrot.slane %v5686_v53, 1  ;;  %v5652_v34 = vadd.f32 %v5651_v13, %v5650_v12  ;;  %v17470_v12 = vld [vmem:[#allocation292_spill] sm:$0xff]  ;;  %v17474_v13 = vld [vmem:[#allocation295_spill] sm:$0xff] }
 0x645   : > { %v5696_v5 = vrot.slane %v5695_v38, 1  ;;  %v5705_v33 = vrot.slane %v5704_v37, 1  ;;  %v5714_v25 = vrot.slane %v5713_v26, 1  ;;  %v5661_v2 = vadd.f32 %v5660_v31, %v5659_v27  ;;  %v17476_v31 = vld [vmem:[#allocation300_spill] sm:$0xff] }
 0x646   : > { %v5670_v18 = vadd.f32 %v5669_v28, %v5668_v44  ;;  %v5679_v20 = vadd.f32 %v5678_v16, %v5677_v30  ;;  %v5688_v7 = vadd.f32 %v5687_v57, %v5686_v53  ;;  %v6874_v3 = vunpack.c.3.s8 %v17311_v60  ;;  %v17472_v44 = vld [vmem:[#allocation298_spill] sm:$0xff]  ;;  %v17478_v57 = vld [vmem:[#allocation297_spill] sm:$0xff] }
 0x647   : > { %v5697_v1 = vadd.f32 %v5696_v5, %v5695_v38  ;;  %v5706_v48 = vadd.f32 %v5705_v33, %v5704_v37  ;;  %v5715_v4 = vadd.f32 %v5714_v25, %v5713_v26  ;;  %v6736_v52 = vsel %vm15877_vm7, %v5661_v2, %v5652_v34  ;;  %v17480_v33 = vld [vmem:[#allocation302_spill] sm:$0xff] }
 0x648   : > { %v17457_v61 = vmax.f32 %v17456_v40, 0.0  ;;  %v17459_v42 = vmax.f32 %v17458_v32, 0.0  ;;  %v17461_v11 = vmax.f32 %v17460_v58, 0.0  ;;  %v6737_v55 = vsel %vm15903_vm8, %v5670_v18, %v6736_v52 }
 0x649   : > { %v6893_v56 = vpack.c.b16 %v6874_v3, %v6874_v3  ;;  %v17463_v43 = vmax.f32 %v17462_v45, 0.0  ;;  %v17465_v46 = vmax.f32 %v17464_v62, 0.0  ;;  %v6738_v51 = vsel %vm15900_vm9, %v5679_v20, %v6737_v55  ;;  %v17482_v20 = vld [vmem:[#allocation299_spill] sm:$0xff]  ;;  %v17488_v55 = vld [vmem:[#allocation306_spill] sm:$0xff] }
 0x64a   : > { %v5204_v15 = vmul.f32 %v12654_v63, %v17457_v61  ;;  %v5205_v29 = vmul.f32 %v12615_v10, %v17459_v42  ;;  %v5206_v21 = vmul.f32 %v12711_v22, %v17461_v11  ;;  %v17467_v50 = vmax.f32 %v17466_v39, 0.0  ;;  %v17486_v42 = vld [vmem:[#allocation301_spill] sm:$0xff]  ;;  %v17490_v45 = vld [vmem:[#allocation334_spill] sm:$0xff] }
 0x64b   : > { %v5207_v60 = vmul.f32 %v17393_v19, %v17463_v43  ;;  %v5208_v41 = vmul.f32 %v12654_v63, %v17465_v46  ;;  %v17469_v14 = vmax.f32 %v17468_v54, 0.0  ;;  %v17471_v35 = vmax.f32 %v17470_v12, 0.0  ;;  %v17491_v46 = vld [vmem:[#allocation303_spill] sm:$0xff] }
 0x64c   : > { %v5209_v0 = vmul.f32 %v12615_v10, %v17467_v50  ;;  %v6739_v23 = vsel %vm15873_vm10, %v5688_v7, %v6738_v51  ;;  %v6894_v27 = vpack.c.b8 %v6893_v56, %v6893_v56  ;;  %v17473_v30 = vmax.f32 %v17472_v44, 0.0  ;;  %v17493_v50 = vld [vmem:[#allocation315_spill] sm:$0xff] }
 0x64d   : > { %v5210_v9 = vmul.f32 %v12711_v22, %v17469_v14  ;;  %v5211_v24 = vmul.f32 %v17393_v19, %v17471_v35  ;;  %v17475_v38 = vmax.f32 %v17474_v13, 0.0  ;;  %v6740_v26 = vsel %vm15899_vm11, %v5697_v1, %v6739_v23  ;;  %v17484_v1 = vld [vmem:[#allocation304_spill] sm:$0xff]  ;;  %v17495_v14 = vld [vmem:[#allocation305_spill] sm:$0xff]  ;;  %v17497_v23 = vld [vmem:[#allocation406_spill] sm:$0xff] }
 0x64e   : > { %v5212_v53 = vmul.f32 %v12654_v63, %v17473_v30  ;;  %v17477_v28 = vmax.f32 %v17476_v31, 0.0  ;;  %v17479_v34 = vmax.f32 %v17478_v57, 0.0  ;;  %v17481_v25 = vmax.f32 %v17480_v33, 0.0  ;;  %v17499_v30 = vld [vmem:[#allocation314_spill] sm:$0xff] }
 0x64f   : > { %v5213_v37 = vmul.f32 %v12615_v10, %v17475_v38  ;;  %v6741_v18 = vsel %vm15887_vm12, %v5706_v48, %v6740_v26  ;;  %vm6922_vm5 = vnez %v6894_v27  ;;  %v17483_v7 = vmax.f32 %v17482_v20, 0.0  ;;  %v17501_v26 = vld [vmem:[#allocation408_spill] sm:$0xff] }
 0x650   : > { %v5214_v16 = vmul.f32 %v12711_v22, %v17477_v28  ;;  %v5215_v5 = vmul.f32 %v17393_v19, %v17479_v34  ;;  %v5216_v2 = vmul.f32 %v12654_v63, %v17481_v25  ;;  %v17485_v52 = vmax.f32 %v17484_v1, 0.0  ;;  %v17506_v34 = vld [vmem:[#allocation405_spill] sm:$0xff]  ;;  %v17510_v1 = vld [vmem:[#allocation407_spill] sm:$0xff] }
 0x651   : > { %v5217_v3 = vmul.f32 %v12615_v10, %v17483_v7  ;;  %v6742_v61 = vsel %vm15886_vm13, %v5715_v4, %v6741_v18  ;;  %v6938_v32 = vsel %vm6922_vm5, 16843009, %v17407_v59  ;;  %v17487_v58 = vmax.f32 %v17486_v42, 0.0  ;;  %v17508_v18 = vld [vmem:[#allocation410_spill] sm:$0xff]  ;;  %v17513_v42 = vld [vmem:[#allocation412_spill] sm:$0xff] }
 0x652   : > { %v5218_v40 = vmul.f32 %v12711_v22, %v17485_v52  ;;  %v17489_v56 = vmax.f32 %v17488_v55, 0.0  ;;  %v6846_v43 = vadd.f32 %v6742_v61, %v17490_v45  ;;  %v6954_v62 = vunpack.c.0.s8 %v6938_v32 }
 0x653   : > { %v5219_v11 = vmul.f32 %v17393_v19, %v17487_v58  ;;  %v17492_v51 = vmax.f32 %v17491_v46, 0.0  ;;  %v17494_v54 = vmax.f32 %v17493_v50, 0.0  ;;  %v17496_v12 = vmax.f32 %v17495_v14, 0.0  ;;  %v17517_v46 = vld [vmem:[#allocation335_spill] sm:$0xff] }
 0x654   : > { %v5220_v48 = vmul.f32 %v12654_v63, %v17489_v56  ;;  %v17498_v27 = vmax.f32 %v17497_v23, 0.0  ;;  %v17500_v13 = vmax.f32 %v17499_v30, 0.0  ;;  %v17502_v31 = vmax.f32 %v17501_v26, 0.0  ;;  %v17515_v56 = vld [vmem:[#allocation409_spill] sm:$0xff] }
 0x655   : > { %v5221_v39 = vmul.f32 %v12615_v10, %v17492_v51  ;;  %v5222_v4 = vmul.f32 %v12711_v22, %v17494_v54  ;;  %v5223_v35 = vmul.f32 %v17393_v19, %v17496_v12  ;;  %vm13630_vm6 = vcmp.ne.s32.totalorder %v6954_v62, 0  ;;  %v17519_v54 = vld [vmem:[#allocation411_spill] sm:$0xff]  ;;  %v17523_v30 = vld [vmem:[#allocation413_spill] sm:$0xff] }
 0x656   : > { %v5224_v44 = vmul.f32 %v12654_v63, %v17498_v27  ;;  %v5225_v38 = vmul.f32 %v12615_v10, %v17500_v13  ;;  %v5226_v28 = vmul.f32 %v12711_v22, %v17502_v31  ;;  %v17503_v57 = vmov 0 }
 0x657   : > { %v17504_v57 = vsel %vm13630_vm6, 4294967295, %v17503_v57  ;;  %v17507_v33 = vmax.f32 %v17506_v34, 0.0  ;;  %v17509_v20 = vmax.f32 %v17508_v18, 0.0  ;;  %v17511_v52 = vmax.f32 %v17510_v1, 0.0 }
 0x658   : > { %17505 = vst [vmem:[#allocation269_spill] sm:$0xff] %v17504_v57  ;;  %v13645_v32 = vsel %vm13630_vm6, %v6846_v43, -1e+30  ;;  %v17514_v58 = vmax.f32 %v17513_v42, 0.0  ;;  %v17516_v45 = vmax.f32 %v17515_v56, 0.0  ;;  %v17518_v51 = vmax.f32 %v17517_v46, 0.0 }
 0x659   : > { %v5227_v25 = vmul.f32 %v17393_v19, %v17507_v33  ;;  %v5228_v7 = vmul.f32 %v12654_v63, %v17509_v20  ;;  %v5229_v61 = vmul.f32 %v12615_v10, %v17511_v52  ;;  %17512 = vst [vmem:[#allocation278_spill] sm:$0xff] %v13645_v32  ;;  %7021 = vmax.xlane.f32.xlu1 %v13645_v32  ;;  %v17520_v14 = vmax.f32 %v17519_v54, 0.0  ;;  %v17521_v43 = vld [vmem:[#allocation414_spill] sm:$0xff] }
 0x65a   : > { %v5230_v55 = vmul.f32 %v12711_v22, %v17514_v58  ;;  %v5231_v62 = vmul.f32 %v17393_v19, %v17516_v45  ;;  %v5232_v50 = vmul.f32 %v12654_v63, %v17518_v51  ;;  %v17522_v23 = vmax.f32 %v17521_v43, 0.0 }
 0x65b   : > { %v5233_v12 = vmul.f32 %v12615_v10, %v17520_v14  ;;  %v17524_v13 = vmax.f32 %v17523_v30, 0.0  ;;  %v6076_v31 = vadd.f32 %v5205_v29, %v5204_v15  ;;  %v6085_v34 = vadd.f32 %v5209_v0, %v5208_v41 }
 0x65c   : > { %v5234_v27 = vmul.f32 %v12711_v22, %v17522_v23  ;;  %v6094_v33 = vadd.f32 %v5213_v37, %v5212_v53  ;;  %v6103_v18 = vadd.f32 %v5217_v3, %v5216_v2  ;;  %v6112_v20 = vadd.f32 %v5221_v39, %v5220_v48 }
 0x65d   : > { %v5235_v26 = vmul.f32 %v17393_v19, %v17524_v13  ;;  %v6077_v1 = vadd.f32 %v6076_v31, %v5206_v21  ;;  %v6121_v52 = vadd.f32 %v5225_v38, %v5224_v44  ;;  %v6130_v42 = vadd.f32 %v5229_v61, %v5228_v7 }
 0x65e   : > { %v6139_v58 = vadd.f32 %v5233_v12, %v5232_v50  ;;  %v6086_v56 = vadd.f32 %v6085_v34, %v5210_v9  ;;  %v6095_v45 = vadd.f32 %v6094_v33, %v5214_v16  ;;  %v6104_v46 = vadd.f32 %v6103_v18, %v5218_v40 }
 0x65f   : > { %v6113_v51 = vadd.f32 %v6112_v20, %v5222_v4  ;;  %v6078_v54 = vadd.f32 %v6077_v1, %v5207_v60  ;;  %v6122_v14 = vadd.f32 %v6121_v52, %v5226_v28  ;;  %v6131_v43 = vadd.f32 %v6130_v42, %v5230_v55 }
 0x660   : > { %v6140_v23 = vadd.f32 %v6139_v58, %v5234_v27  ;;  %v6087_v30 = vadd.f32 %v6086_v56, %v5211_v24  ;;  %v6096_v57 = vadd.f32 %v6095_v45, %v5215_v5  ;;  %v6105_v13 = vadd.f32 %v6104_v46, %v5219_v11 }
 0x661   : > { %v6114_v15 = vadd.f32 %v6113_v51, %v5223_v35  ;;  %v6079_v29 = vrot.slane %v6078_v54, 4  ;;  %v6123_v41 = vadd.f32 %v6122_v14, %v5227_v25  ;;  %v6132_v0 = vadd.f32 %v6131_v43, %v5231_v62  ;;  %v3585_v51 = vpop.permute.xlu0 %3584 }
 0x662   : > { %v6141_v53 = vadd.f32 %v6140_v23, %v5235_v26  ;;  %v6088_v21 = vrot.slane %v6087_v30, 4  ;;  %v6097_v37 = vrot.slane %v6096_v57, 4  ;;  %v6106_v2 = vrot.slane %v6105_v13, 4 }
 0x663   : > { %v6115_v3 = vrot.slane %v6114_v15, 4  ;;  %v6080_v9 = vadd.f32 %v6079_v29, %v6078_v54  ;;  %v6124_v16 = vrot.slane %v6123_v41, 4  ;;  %v6133_v40 = vrot.slane %v6132_v0, 4 }
 0x664   : > { %v6142_v48 = vrot.slane %v6141_v53, 4  ;;  %v6089_v60 = vadd.f32 %v6088_v21, %v6087_v30  ;;  %v6098_v39 = vadd.f32 %v6097_v37, %v6096_v57  ;;  %v6107_v4 = vadd.f32 %v6106_v2, %v6105_v13  ;;  %v3782_v21 = vpop.permute.xlu1 %3781 }
 0x665   : > { %v6116_v44 = vadd.f32 %v6115_v3, %v6114_v15  ;;  %v6081_v24 = vrot.slane %v6080_v9, 2  ;;  %v6125_v5 = vadd.f32 %v6124_v16, %v6123_v41  ;;  %v6134_v11 = vadd.f32 %v6133_v40, %v6132_v0  ;;  %v17528_v0 = vld [vmem:[#allocation426_spill] sm:$0xff]  ;;  %v17529_v3 = vld [vmem:[#allocation293_spill] sm:$0xff] }
 0x666   : > { %v6143_v35 = vadd.f32 %v6142_v48, %v6141_v53  ;;  %v6090_v38 = vrot.slane %v6089_v60, 2  ;;  %v6099_v28 = vrot.slane %v6098_v39, 2  ;;  %v6108_v25 = vrot.slane %v6107_v4, 2 }
 0x667   : > { %v6117_v7 = vrot.slane %v6116_v44, 2  ;;  %v6082_v61 = vadd.f32 %v6081_v24, %v6080_v9  ;;  %v6126_v55 = vrot.slane %v6125_v5, 2  ;;  %v6135_v62 = vrot.slane %v6134_v11, 2  ;;  %v17531_v24 = vld [vmem:[#allocation127_spill] sm:$0xff] }
 0x668   : > { %v6144_v50 = vrot.slane %v6143_v35, 2  ;;  %v6091_v12 = vadd.f32 %v6090_v38, %v6089_v60  ;;  %v6100_v27 = vadd.f32 %v6099_v28, %v6098_v39  ;;  %v6109_v26 = vadd.f32 %v6108_v25, %v6107_v4  ;;  %v17530_v4 = vld [vmem:[#allocation287_spill] sm:$0xff]  ;;  %v17533_v28 = vld [vmem:[#allocation124_spill] sm:$0xff] }
 0x669   : > { %v6118_v31 = vadd.f32 %v6117_v7, %v6116_v44  ;;  %v6083_v34 = vrot.slane %v6082_v61, 1  ;;  %v6127_v57 = vadd.f32 %v6126_v55, %v6125_v5  ;;  %v6136_v33 = vadd.f32 %v6135_v62, %v6134_v11 }
 0x66a   : > { %v6145_v18 = vadd.f32 %v6144_v50, %v6143_v35  ;;  %v6092_v20 = vrot.slane %v6091_v12, 1  ;;  %v6101_v1 = vrot.slane %v6100_v27, 1  ;;  %v6110_v52 = vrot.slane %v6109_v26, 1 }
 0x66b   : > { %v6119_v42 = vrot.slane %v6118_v31, 1  ;;  %v6084_v58 = vadd.f32 %v6083_v34, %v6082_v61  ;;  %v6128_v56 = vrot.slane %v6127_v57, 1  ;;  %v6137_v45 = vrot.slane %v6136_v33, 1  ;;  %v17535_v61 = vld [vmem:[#allocation129_spill] sm:$0xff]  ;;  %v17539_v34 = vld [vmem:[#allocation131_spill] sm:$0xff] }
 0x66c   : > { %v6146_v46 = vrot.slane %v6145_v18, 1  ;;  %v17525_v54 = vrot.slane %v13212_v47, 1  ;;  %v6093_v23 = vadd.f32 %v6092_v20, %v6091_v12  ;;  %v6102_v30 = vadd.f32 %v6101_v1, %v6100_v27  ;;  %v17537_v27 = vld [vmem:[#allocation126_spill] sm:$0xff]  ;;  %v17541_v20 = vld [vmem:[#allocation128_spill] sm:$0xff] }
 0x66d   : > { %v17527_v13 = vmax.f32 %v13432_v6, 0.0  ;;  %v6111_v41 = vadd.f32 %v6110_v52, %v6109_v26  ;;  %v6880_v53 = vunpack.c.1.s8 %v17528_v0  ;;  %v6120_v37 = vadd.f32 %v6119_v42, %v6118_v31  ;;  %v17543_v42 = vld [vmem:[#allocation133_spill] sm:$0xff] }
 0x66e   : > { %v13669_v14 = vadd.f32 %v17525_v54, %v13212_v47  ;;  %v6129_v2 = vadd.f32 %v6128_v56, %v6127_v57  ;;  %v6778_v47 = vsel %vm15877_vm7, %v6093_v23, %v6084_v58  ;;  %v4307_v9 = vadd.f32 %v3585_v51, %v17529_v3  ;;  %v17545_v51 = vld [vmem:[#allocation320_spill] sm:$0xff]  ;;  %v17546_v23 = vld [vmem:[#allocation130_spill] sm:$0xff] }
 0x66f   : > { %v13675_v15 = vmul.f32 %v12711_v22, %v17527_v13  ;;  %v6138_v16 = vadd.f32 %v6137_v45, %v6136_v33  ;;  %v6147_v40 = vadd.f32 %v6146_v46, %v6145_v18  ;;  %v6779_v48 = vsel %vm15903_vm8, %v6102_v30, %v6778_v47 }
 0x670   : > { %17526 = vst [vmem:[#allocation283_spill] sm:$0xff] %v13669_v14  ;;  %v6905_v6 = vpack.c.b16 %v6880_v53, %v6880_v53  ;;  %v6780_v60 = vsel %vm15900_vm9, %v6111_v41, %v6779_v48  ;;  %v4819_v39 = vmax.f32 %v4307_v9, 0.0  ;;  %v13684_v44 = vadd.f32 %v3782_v21, %v17530_v4  ;;  %v17548_v41 = vld [vmem:[#allocation48_spill] sm:$0xff] }
 0x671   : > { %v17532_v5 = vmax.f32 %v17531_v24, 0.0  ;;  %v6781_v35 = vsel %vm15873_vm10, %v6120_v37, %v6780_v60  ;;  %v17534_v25 = vmax.f32 %v17533_v28, 0.0  ;;  %v17536_v55 = vmax.f32 %v17535_v61, 0.0  ;;  %v17549_v37 = vld [vmem:[#allocation135_spill] sm:$0xff]  ;;  %v17551_v9 = vld [vmem:[#allocation132_spill] sm:$0xff]  ;;  %v17555_v24 = vld [vmem:[#allocation134_spill] sm:$0xff] }
 0x672   : > { %v6906_v38 = vpack.c.b8 %v6905_v6, %v6905_v6  ;;  %v6782_v50 = vsel %vm15899_vm11, %v6129_v2, %v6781_v35  ;;  %v5371_v12 = vmul.f32 %v17393_v19, %v4819_v39  ;;  %v17538_v26 = vmax.f32 %v17537_v27, 0.0  ;;  %v17553_v6 = vld [vmem:[#allocation137_spill] sm:$0xff] }
 0x673   : > { %v5044_v11 = vmul.f32 %v12654_v63, %v17532_v5  ;;  %v5045_v7 = vmul.f32 %v12615_v10, %v17534_v25  ;;  %v5046_v62 = vmul.f32 %v12711_v22, %v17536_v55  ;;  %v17540_v57 = vmax.f32 %v17539_v34, 0.0  ;;  %v17562_v55 = vld [vmem:[#allocation136_spill] sm:$0xff]  ;;  %v17564_v27 = vld [vmem:[#allocation141_spill] sm:$0xff] }
 0x674   : > { %v5047_v31 = vmul.f32 %v17393_v19, %v17538_v26  ;;  %v6783_v18 = vsel %vm15887_vm12, %v6138_v16, %v6782_v50  ;;  %vm6928_vm0 = vnez %v6906_v38  ;;  %v17542_v1 = vmax.f32 %v17541_v20, 0.0  ;;  %v17557_v38 = vld [vmem:[#allocation139_spill] sm:$0xff] }
 0x675   : > { %v5048_v33 = vmul.f32 %v12654_v63, %v17540_v57  ;;  %v17544_v58 = vmax.f32 %v17543_v42, 0.0  ;;  %v6784_v45 = vsel %vm15886_vm13, %v6147_v40, %v6783_v18  ;;  %v6944_v46 = vsel %vm6928_vm0, 16843009, %v17407_v59  ;;  %v17566_v57 = vld [vmem:[#allocation138_spill] sm:$0xff] }
 0x676   : > { %v5049_v52 = vmul.f32 %v12615_v10, %v17542_v1  ;;  %v6447_v54 = vadd.f32 %v17545_v51, %v5371_v12  ;;  %v17547_v30 = vmax.f32 %v17546_v23, 0.0  ;;  %v6852_v53 = vadd.f32 %v6784_v45, %v17548_v41  ;;  %v17571_v51 = vld [vmem:[#allocation140_spill] sm:$0xff]  ;;  %v17573_v41 = vld [vmem:[#allocation145_spill] sm:$0xff] }
 0x677   : > { %v5050_v56 = vmul.f32 %v12711_v22, %v17544_v58  ;;  %v6960_v21 = vunpack.c.0.s8 %v6944_v46  ;;  %v17550_v2 = vmax.f32 %v17549_v37, 0.0  ;;  %v17552_v16 = vmax.f32 %v17551_v9, 0.0  ;;  %v17569_v58 = vld [vmem:[#allocation143_spill] sm:$0xff] }
 0x678   : > { %v5051_v13 = vmul.f32 %v17393_v19, %v17547_v30  ;;  %v6448_v40 = vrot.slane %v6447_v54, 4  ;;  %v17554_v60 = vmax.f32 %v17553_v6, 0.0  ;;  %v17556_v5 = vmax.f32 %v17555_v24, 0.0  ;;  %v17579_v6 = vld [vmem:[#allocation144_spill] sm:$0xff] }
 0x679   : > { %v5052_v47 = vmul.f32 %v12654_v63, %v17550_v2  ;;  %v5053_v48 = vmul.f32 %v12615_v10, %v17552_v16  ;;  %v17558_v28 = vmax.f32 %v17557_v38, 0.0  ;;  %vm13733_vm3 = vcmp.ne.s32.totalorder %v6960_v21, 0  ;;  %v17575_v2 = vld [vmem:[#allocation142_spill] sm:$0xff]  ;;  %v17577_v16 = vld [vmem:[#allocation147_spill] sm:$0xff]  ;;  %v17581_v38 = vld [vmem:[#allocation149_spill] sm:$0xff] }
 0x67a   : > { %v5054_v39 = vmul.f32 %v12711_v22, %v17554_v60  ;;  %v5055_v35 = vmul.f32 %v17393_v19, %v17556_v5  ;;  %v17559_v61 = vmov 0  ;;  %v17563_v50 = vmax.f32 %v17562_v55, 0.0 }
 0x67b   : > { %v5056_v25 = vmul.f32 %v12654_v63, %v17558_v28  ;;  %v17560_v61 = vsel %vm13733_vm3, 4294967295, %v17559_v61  ;;  %v17565_v26 = vmax.f32 %v17564_v27, 0.0  ;;  %v17567_v18 = vmax.f32 %v17566_v57, 0.0  ;;  %v17585_v57 = vld [vmem:[#allocation151_spill] sm:$0xff] }
 0x67c   : > { %17561 = vst [vmem:[#allocation399_spill] sm:$0xff] %v17560_v61  ;;  %v5057_v12 = vmul.f32 %v12615_v10, %v17563_v50  ;;  %v13748_v1 = vsel %vm13733_vm3, %v6852_v53, -1e+30  ;;  %v6449_v42 = vadd.f32 %v6448_v40, %v6447_v54  ;;  %v17570_v45 = vmax.f32 %v17569_v58, 0.0  ;;  %v17583_v50 = vld [vmem:[#allocation146_spill] sm:$0xff] }
 0x67d   : > { %v5058_v34 = vmul.f32 %v12711_v22, %v17565_v26  ;;  %v5059_v20 = vmul.f32 %v17393_v19, %v17567_v18  ;;  %17568 = vst [vmem:[#allocation282_spill] sm:$0xff] %v13748_v1  ;;  %v17572_v23 = vmax.f32 %v17571_v51, 0.0  ;;  %7033 = vmax.xlane.f32.xlu0 %v13748_v1  ;;  %v17574_v21 = vmax.f32 %v17573_v41, 0.0  ;;  %v17589_v41 = vld [vmem:[#allocation153_spill] sm:$0xff] }
 0x67e   : > { %v5060_v46 = vmul.f32 %v12654_v63, %v17570_v45  ;;  %v17576_v9 = vmax.f32 %v17575_v2, 0.0  ;;  %v17578_v54 = vmax.f32 %v17577_v16, 0.0  ;;  %v17580_v60 = vmax.f32 %v17579_v6, 0.0  ;;  %v17587_v45 = vld [vmem:[#allocation148_spill] sm:$0xff]  ;;  %v17593_v6 = vld [vmem:[#allocation155_spill] sm:$0xff] }
 0x67f   : > { %v5061_v30 = vmul.f32 %v12615_v10, %v17572_v23  ;;  %v5062_v37 = vmul.f32 %v12711_v22, %v17574_v21  ;;  %v6450_v5 = vrot.slane %v6449_v42, 2  ;;  %v17582_v28 = vmax.f32 %v17581_v38, 0.0 }
 0x680   : > { %v5063_v53 = vmul.f32 %v17393_v19, %v17576_v9  ;;  %v5064_v40 = vmul.f32 %v12654_v63, %v17578_v54  ;;  %v5065_v24 = vmul.f32 %v12615_v10, %v17580_v60  ;;  %v17584_v27 = vmax.f32 %v17583_v50, 0.0  ;;  %v17591_v9 = vld [vmem:[#allocation150_spill] sm:$0xff] }
 0x681   : > { %v5066_v55 = vmul.f32 %v12711_v22, %v17582_v28  ;;  %v17586_v18 = vmax.f32 %v17585_v57, 0.0  ;;  %v17588_v51 = vmax.f32 %v17587_v45, 0.0  ;;  %v17590_v21 = vmax.f32 %v17589_v41, 0.0  ;;  %v17595_v28 = vld [vmem:[#allocation152_spill] sm:$0xff]  ;;  %v17597_v57 = vld [vmem:[#allocation157_spill] sm:$0xff] }
 0x682   : > { %v5067_v26 = vmul.f32 %v17393_v19, %v17584_v27  ;;  %v17592_v16 = vmax.f32 %v17591_v9, 0.0  ;;  %v17594_v60 = vmax.f32 %v17593_v6, 0.0  ;;  %v17596_v50 = vmax.f32 %v17595_v28, 0.0 }
 0x683   : > { %v5068_v58 = vmul.f32 %v12654_v63, %v17586_v18  ;;  %v5069_v23 = vmul.f32 %v12615_v10, %v17588_v51  ;;  %v5070_v2 = vmul.f32 %v12711_v22, %v17590_v21  ;;  %v17598_v18 = vmax.f32 %v17597_v57, 0.0 }
 0x684   : > { %v5071_v54 = vmul.f32 %v17393_v19, %v17592_v16  ;;  %v5072_v38 = vmul.f32 %v12654_v63, %v17594_v60  ;;  %v5073_v27 = vmul.f32 %v12615_v10, %v17596_v50  ;;  %v5716_v51 = vadd.f32 %v5045_v7, %v5044_v11  ;;  %v17599_v50 = vld [vmem:[#allocation154_spill] sm:$0xff] }
 0x685   : > { %v5074_v45 = vmul.f32 %v12711_v22, %v17598_v18  ;;  %v5725_v41 = vadd.f32 %v5049_v52, %v5048_v33  ;;  %v5734_v29 = vadd.f32 %v5053_v48, %v5052_v47  ;;  %v5743_v21 = vadd.f32 %v5057_v12, %v5056_v25 }
 0x686   : > { %v5752_v43 = vadd.f32 %v5061_v30, %v5060_v46  ;;  %v5761_v9 = vadd.f32 %v5065_v24, %v5064_v40  ;;  %v13796_v61 = vadd.f32 %v6450_v5, %v6449_v42  ;;  %v5717_v16 = vadd.f32 %v5716_v51, %v5046_v62 }
 0x687   : > { %v5726_v6 = vadd.f32 %v5725_v41, %v5050_v56  ;;  %v5770_v32 = vadd.f32 %v5069_v23, %v5068_v58  ;;  %v5735_v60 = vadd.f32 %v5734_v29, %v5054_v39  ;;  %v5744_v1 = vadd.f32 %v5743_v21, %v5058_v34 }
 0x688   : > { %v5753_v28 = vadd.f32 %v5752_v43, %v5062_v37  ;;  %v5762_v14 = vadd.f32 %v5761_v9, %v5066_v55  ;;  %v17600_v8 = vmax.f32 %v17599_v50, 0.0  ;;  %v5718_v18 = vadd.f32 %v5717_v16, %v5047_v31 }
 0x689   : > { %v5727_v11 = vadd.f32 %v5726_v6, %v5051_v13  ;;  %v5771_v7 = vadd.f32 %v5770_v32, %v5070_v2  ;;  %v5736_v33 = vadd.f32 %v5735_v60, %v5055_v35  ;;  %v5745_v52 = vadd.f32 %v5744_v1, %v5059_v20 }
 0x68a   : > { %v5075_v57 = vmul.f32 %v17393_v19, %v17600_v8  ;;  %v5754_v47 = vadd.f32 %v5753_v28, %v5063_v53  ;;  %v5763_v48 = vadd.f32 %v5762_v14, %v5067_v26  ;;  %v5719_v62 = vrot.slane %v5718_v18, 4  ;;  %v6860_v28 = vld [vmem:[%s8807_s24 + $0x8] sm:$0xff] }
 0x68b   : > { %v5728_v56 = vrot.slane %v5727_v11, 4  ;;  %v5772_v12 = vadd.f32 %v5771_v7, %v5071_v54  ;;  %v5737_v29 = vrot.slane %v5736_v33, 4  ;;  %v5746_v39 = vrot.slane %v5745_v52, 4 }
 0x68c   : > { %v5755_v43 = vrot.slane %v5754_v47, 4  ;;  %v5764_v34 = vrot.slane %v5763_v48, 4  ;;  %v5720_v42 = vadd.f32 %v5719_v62, %v5718_v18  ;;  %v5779_v8 = vadd.f32 %v5073_v27, %v5072_v38 }
 0x68d   : > { %v5729_v46 = vadd.f32 %v5728_v56, %v5727_v11  ;;  %v5773_v30 = vrot.slane %v5772_v12, 4  ;;  %v5738_v31 = vadd.f32 %v5737_v29, %v5736_v33  ;;  %v5747_v13 = vadd.f32 %v5746_v39, %v5745_v52  ;;  %v17602_v39 = vld [vmem:[#allocation338_spill] sm:$0xff] }
 0x68e   : > { %v5756_v32 = vadd.f32 %v5755_v43, %v5754_v47  ;;  %v5765_v35 = vadd.f32 %v5764_v34, %v5763_v48  ;;  %v5721_v20 = vrot.slane %v5720_v42, 2  ;;  %v5780_v37 = vadd.f32 %v5779_v8, %v5074_v45 }
 0x68f   : > { %v5730_v1 = vrot.slane %v5729_v46, 2  ;;  %v5774_v14 = vadd.f32 %v5773_v30, %v5772_v12  ;;  %v5739_v53 = vrot.slane %v5738_v31, 2  ;;  %v5748_v40 = vrot.slane %v5747_v13, 2 }
 0x690   : > { %v5757_v24 = vrot.slane %v5756_v32, 2  ;;  %v5766_v5 = vrot.slane %v5765_v35, 2  ;;  %v5722_v55 = vadd.f32 %v5721_v20, %v5720_v42  ;;  %v5781_v23 = vadd.f32 %v5780_v37, %v5075_v57  ;;  %v17604_v42 = vld [vmem:[#allocation336_spill] sm:$0xff] }
 0x691   : > { %v5731_v26 = vadd.f32 %v5730_v1, %v5729_v46  ;;  %v5775_v58 = vrot.slane %v5774_v14, 2  ;;  %v5740_v2 = vadd.f32 %v5739_v53, %v5738_v31  ;;  %v5749_v54 = vadd.f32 %v5748_v40, %v5747_v13  ;;  %v17610_v40 = vld [vmem:[#allocation342_spill] sm:$0xff] }
 0x692   : > { %v5758_v38 = vadd.f32 %v5757_v24, %v5756_v32  ;;  %v5767_v27 = vadd.f32 %v5766_v5, %v5765_v35  ;;  %v5723_v51 = vrot.slane %v5722_v55, 1  ;;  %v5782_v9 = vrot.slane %v5781_v23, 4  ;;  %v17606_v32 = vld [vmem:[#allocation415_spill] sm:$0xff] }
 0x693   : > { %v5732_v41 = vrot.slane %v5731_v26, 1  ;;  %v5776_v21 = vadd.f32 %v5775_v58, %v5774_v14  ;;  %v5741_v16 = vrot.slane %v5740_v2, 1  ;;  %v5750_v6 = vrot.slane %v5749_v54, 1  ;;  %v17608_v14 = vld [vmem:[#allocation337_spill] sm:$0xff] }
 0x694   : > { %v5759_v45 = vrot.slane %v5758_v38, 1  ;;  %v5768_v60 = vrot.slane %v5767_v27, 1  ;;  %v5724_v50 = vadd.f32 %v5723_v51, %v5722_v55  ;;  %v5783_v7 = vadd.f32 %v5782_v9, %v5781_v23  ;;  %v17612_v55 = vld [vmem:[#allocation339_spill] sm:$0xff] }
 0x695   : > { %v5733_v18 = vadd.f32 %v5732_v41, %v5731_v26  ;;  %v5777_v11 = vrot.slane %v5776_v21, 1  ;;  %v5742_v33 = vadd.f32 %v5741_v16, %v5740_v2  ;;  %v5751_v52 = vadd.f32 %v5750_v6, %v5749_v54  ;;  %v17618_v6 = vld [vmem:[#allocation346_spill] sm:$0xff] }
 0x696   : > { %v5760_v57 = vadd.f32 %v5759_v45, %v5758_v38  ;;  %v5769_v47 = vadd.f32 %v5768_v60, %v5767_v27  ;;  %v5784_v62 = vrot.slane %v5783_v7, 2  ;;  %vm6864_vm5 = vnez %v6860_v28  ;;  %v17614_v38 = vld [vmem:[#allocation416_spill] sm:$0xff]  ;;  %v17620_v28 = vld [vmem:[#allocation343_spill] sm:$0xff] }
 0x697   : > { %v5778_v48 = vadd.f32 %v5777_v11, %v5776_v21  ;;  %v6743_v56 = vsel %vm15877_vm7, %v5733_v18, %v5724_v50  ;;  %v13806_v29 = vsel %vm6864_vm5, 16843009, %v17407_v59  ;;  %v17603_v43 = vmax.f32 %v17602_v39, 0.0  ;;  %v17616_v21 = vld [vmem:[#allocation341_spill] sm:$0xff] }
 0x698   : > { %v6744_v12 = vsel %vm15903_vm8, %v5742_v33, %v6743_v56  ;;  %17601 = vst [vmem:[#allocation273_spill] sm:$0xff] %v13806_v29  ;;  %v17605_v46 = vmax.f32 %v17604_v42, 0.0  ;;  %v5785_v8 = vadd.f32 %v5784_v62, %v5783_v7  ;;  %v6875_v13 = vunpack.c.0.s8 %v13806_v29  ;;  %v17622_v33 = vld [vmem:[#allocation417_spill] sm:$0xff]  ;;  %v17626_v56 = vld [vmem:[#allocation350_spill] sm:$0xff] }
 0x699   : > { %v5236_v34 = vmul.f32 %v12654_v63, %v17603_v43  ;;  %v6745_v31 = vsel %vm15900_vm9, %v5751_v52, %v6744_v12  ;;  %v17607_v35 = vmax.f32 %v17606_v32, 0.0  ;;  %v17609_v37 = vmax.f32 %v17608_v14, 0.0  ;;  %v17628_v43 = vld [vmem:[#allocation347_spill] sm:$0xff]  ;;  %v17632_v32 = vld [vmem:[#allocation349_spill] sm:$0xff] }
 0x69a   : > { %v5237_v30 = vmul.f32 %v12615_v10, %v17605_v46  ;;  %v6746_v1 = vsel %vm15873_vm10, %v5760_v57, %v6745_v31  ;;  %v17611_v24 = vmax.f32 %v17610_v40, 0.0  ;;  %v17613_v26 = vmax.f32 %v17612_v55, 0.0  ;;  %v17630_v31 = vld [vmem:[#allocation418_spill] sm:$0xff]  ;;  %v17636_v55 = vld [vmem:[#allocation351_spill] sm:$0xff] }
 0x69b   : > { %v5238_v20 = vmul.f32 %v12711_v22, %v17607_v35  ;;  %v5239_v53 = vmul.f32 %v17393_v19, %v17609_v37  ;;  %v5786_v23 = vrot.slane %v5785_v8, 1  ;;  %v6747_v2 = vsel %vm15899_vm11, %v5769_v47, %v6746_v1  ;;  %v17624_v47 = vld [vmem:[#allocation344_spill] sm:$0xff]  ;;  %v17634_v37 = vld [vmem:[#allocation354_spill] sm:$0xff] }
 0x69c   : > { %v5240_v5 = vmul.f32 %v12654_v63, %v17611_v24  ;;  %v5241_v58 = vmul.f32 %v12615_v10, %v17613_v26  ;;  %v6895_v54 = vpack.c.b16 %v6875_v13, %v6875_v13  ;;  %v17615_v27 = vmax.f32 %v17614_v38, 0.0 }
 0x69d   : > { %v6748_v41 = vsel %vm15887_vm12, %v5778_v48, %v6747_v2  ;;  %v17617_v9 = vmax.f32 %v17616_v21, 0.0  ;;  %v17619_v45 = vmax.f32 %v17618_v6, 0.0  ;;  %v17621_v50 = vmax.f32 %v17620_v28, 0.0  ;;  %v17638_v2 = vld [vmem:[#allocation340_spill] sm:$0xff] }
 0x69e   : > { %v5242_v51 = vmul.f32 %v12711_v22, %v17615_v27  ;;  %v5787_v11 = vadd.f32 %v5786_v23, %v5785_v8  ;;  %v6896_v7 = vpack.c.b8 %v6895_v54, %v6895_v54  ;;  %v17623_v52 = vmax.f32 %v17622_v33, 0.0  ;;  %v17639_v27 = vld [vmem:[#allocation419_spill] sm:$0xff]  ;;  %v17641_v6 = vld [vmem:[#allocation352_spill] sm:$0xff] }
 0x69f   : > { %v5243_v16 = vmul.f32 %v17393_v19, %v17617_v9  ;;  %v5244_v60 = vmul.f32 %v12654_v63, %v17619_v45  ;;  %v5245_v18 = vmul.f32 %v12615_v10, %v17621_v50  ;;  %v17625_v48 = vmax.f32 %v17624_v47, 0.0  ;;  %v17643_v50 = vld [vmem:[#allocation358_spill] sm:$0xff]  ;;  %v17645_v33 = vld [vmem:[#allocation355_spill] sm:$0xff] }
 0x6a0   : > { %v5246_v57 = vmul.f32 %v12711_v22, %v17623_v52  ;;  %v17627_v12 = vmax.f32 %v17626_v56, 0.0  ;;  %v17629_v42 = vmax.f32 %v17628_v43, 0.0  ;;  %v17631_v13 = vmax.f32 %v17630_v31, 0.0  ;;  %v17649_v43 = vld [vmem:[#allocation356_spill] sm:$0xff] }
 0x6a1   : > { %v5247_v62 = vmul.f32 %v17393_v19, %v17625_v48  ;;  %v17633_v35 = vmax.f32 %v17632_v32, 0.0  ;;  %v6749_v14 = vsel %vm15886_vm13, %v5787_v11, %v6748_v41  ;;  %vm6923_vm0 = vnez %v6896_v7  ;;  %v17647_v48 = vld [vmem:[#allocation421_spill] sm:$0xff] }
 0x6a2   : > { %v5248_v39 = vmul.f32 %v12654_v63, %v17627_v12  ;;  %v5249_v46 = vmul.f32 %v12615_v10, %v17629_v42  ;;  %v5250_v8 = vmul.f32 %v12711_v22, %v17631_v13  ;;  %v17635_v40 = vmax.f32 %v17634_v37, 0.0  ;;  %v17651_v13 = vld [vmem:[#allocation361_spill] sm:$0xff] }
 0x6a3   : > { %v5251_v1 = vmul.f32 %v17393_v19, %v17633_v35  ;;  %v17637_v26 = vmax.f32 %v17636_v55, 0.0  ;;  %v6847_v54 = vadd.f32 %v6749_v14, %v17638_v2  ;;  %v6939_v38 = vsel %vm6923_vm0, 16843009, %v17407_v59  ;;  %v17653_v14 = vld [vmem:[#allocation359_spill] sm:$0xff]  ;;  %v17655_v55 = vld [vmem:[#allocation424_spill] sm:$0xff] }
 0x6a4   : > { %v5252_v24 = vmul.f32 %v12654_v63, %v17635_v40  ;;  %v17640_v21 = vmax.f32 %v17639_v27, 0.0  ;;  %v17642_v45 = vmax.f32 %v17641_v6, 0.0  ;;  %v6955_v28 = vunpack.c.0.s8 %v6939_v38  ;;  %v17660_v27 = vld [vmem:[#allocation422_spill] sm:$0xff] }
 0x6a5   : > { %v5253_v23 = vmul.f32 %v12615_v10, %v17637_v26  ;;  %v17644_v11 = vmax.f32 %v17643_v50, 0.0  ;;  %v17646_v52 = vmax.f32 %v17645_v33, 0.0  ;;  %v17648_v56 = vmax.f32 %v17647_v48, 0.0  ;;  %v17664_v33 = vld [vmem:[#allocation362_spill] sm:$0xff] }
 0x6a6   : > { %v5254_v9 = vmul.f32 %v12711_v22, %v17640_v21  ;;  %v5255_v41 = vmul.f32 %v17393_v19, %v17642_v45  ;;  %v17650_v42 = vmax.f32 %v17649_v43, 0.0  ;;  %v17652_v32 = vmax.f32 %v17651_v13, 0.0  ;;  %v17662_v45 = vld [vmem:[#allocation364_spill] sm:$0xff]  ;;  %v17669_v13 = vld [vmem:[#allocation363_spill] sm:$0xff] }
 0x6a7   : > { %v5256_v7 = vmul.f32 %v12654_v63, %v17644_v11  ;;  %v5257_v47 = vmul.f32 %v12615_v10, %v17646_v52  ;;  %v5258_v12 = vmul.f32 %v12711_v22, %v17648_v56  ;;  %v17654_v37 = vmax.f32 %v17653_v14, 0.0 }
 0x6a8   : > { %v5259_v31 = vmul.f32 %v17393_v19, %v17650_v42  ;;  %v5260_v35 = vmul.f32 %v12654_v63, %v17652_v32  ;;  %v17656_v26 = vmax.f32 %v17655_v55, 0.0  ;;  %vm13897_vm5 = vcmp.ne.s32.totalorder %v6955_v28, 0  ;;  %v17667_v28 = vld [vmem:[#allocation425_spill] sm:$0xff] }
 0x6a9   : > { %v5261_v40 = vmul.f32 %v12615_v10, %v17654_v37  ;;  %v17657_v38 = vmov 0  ;;  %v17661_v21 = vmax.f32 %v17660_v27, 0.0  ;;  %v17663_v50 = vmax.f32 %v17662_v45, 0.0 }
 0x6aa   : > { %v5262_v2 = vmul.f32 %v12711_v22, %v17656_v26  ;;  %v17658_v38 = vsel %vm13897_vm5, 4294967295, %v17657_v38  ;;  %v17665_v52 = vmax.f32 %v17664_v33, 0.0  ;;  %v13912_v56 = vsel %vm13897_vm5, %v6847_v54, -1e+30 }
 0x6ab   : > { %17659 = vst [vmem:[#allocation277_spill] sm:$0xff] %v17658_v38  ;;  %v5263_v6 = vmul.f32 %v17393_v19, %v17661_v21  ;;  %v5264_v11 = vmul.f32 %v12654_v63, %v17663_v50  ;;  %17666 = vst [vmem:[#allocation281_spill] sm:$0xff] %v13912_v56  ;;  %v17668_v43 = vmax.f32 %v17667_v28, 0.0  ;;  %v17670_v32 = vmax.f32 %v17669_v13, 0.0  ;;  %7023 = vmax.xlane.f32.xlu1 %v13912_v56 }
 0x6ac   : > { %v5265_v48 = vmul.f32 %v12615_v10, %v17665_v52  ;;  %v6148_v37 = vadd.f32 %v5237_v30, %v5236_v34  ;;  %v6157_v55 = vadd.f32 %v5241_v58, %v5240_v5  ;;  %v6166_v26 = vadd.f32 %v5245_v18, %v5244_v60 }
 0x6ad   : > { %v5266_v42 = vmul.f32 %v12711_v22, %v17668_v43  ;;  %v5267_v14 = vmul.f32 %v17393_v19, %v17670_v32  ;;  %v6175_v27 = vadd.f32 %v5249_v46, %v5248_v39  ;;  %v6184_v21 = vadd.f32 %v5253_v23, %v5252_v24 }
 0x6ae   : > { %v6149_v45 = vadd.f32 %v6148_v37, %v5238_v20  ;;  %v6193_v50 = vadd.f32 %v5257_v47, %v5256_v7  ;;  %v6202_v33 = vadd.f32 %v5261_v40, %v5260_v35  ;;  %v6211_v54 = vadd.f32 %v5265_v48, %v5264_v11 }
 0x6af   : > { %v6158_v52 = vadd.f32 %v6157_v55, %v5242_v51  ;;  %v6167_v25 = vadd.f32 %v6166_v26, %v5246_v57  ;;  %v6176_v28 = vadd.f32 %v6175_v27, %v5250_v8  ;;  %v6185_v38 = vadd.f32 %v6184_v21, %v5254_v9 }
 0x6b0   : > { %v6150_v43 = vadd.f32 %v6149_v45, %v5239_v53  ;;  %v6194_v49 = vadd.f32 %v6193_v50, %v5258_v12  ;;  %v6203_v13 = vadd.f32 %v6202_v33, %v5262_v2  ;;  %v6212_v29 = vadd.f32 %v6211_v54, %v5266_v42 }
 0x6b1   : > { %v6159_v32 = vadd.f32 %v6158_v52, %v5243_v16  ;;  %v6168_v34 = vadd.f32 %v6167_v25, %v5247_v62  ;;  %v6177_v30 = vadd.f32 %v6176_v28, %v5251_v1  ;;  %v6186_v56 = vadd.f32 %v6185_v38, %v5255_v41 }
 0x6b2   : > { %v6151_v5 = vrot.slane %v6150_v43, 4  ;;  %v6195_v58 = vadd.f32 %v6194_v49, %v5259_v31  ;;  %v6204_v60 = vadd.f32 %v6203_v13, %v5263_v6  ;;  %v6213_v18 = vadd.f32 %v6212_v29, %v5267_v14  ;;  %v3509_v13 = vpop.permute.xlu1 %3508 }
 0x6b3   : > { %v6160_v20 = vrot.slane %v6159_v32, 4  ;;  %v6169_v39 = vrot.slane %v6168_v34, 4  ;;  %v6178_v46 = vrot.slane %v6177_v30, 4  ;;  %v6187_v24 = vrot.slane %v6186_v56, 4 }
 0x6b4   : > { %v6152_v51 = vadd.f32 %v6151_v5, %v6150_v43  ;;  %v6196_v57 = vrot.slane %v6195_v58, 4  ;;  %v6205_v8 = vrot.slane %v6204_v60, 4  ;;  %v6214_v23 = vrot.slane %v6213_v18, 4  ;;  %v3649_v43 = vpop.permute.xlu0 %3648 }
 0x6b5   : > { %v6161_v53 = vadd.f32 %v6160_v20, %v6159_v32  ;;  %v6170_v9 = vadd.f32 %v6169_v39, %v6168_v34  ;;  %v6179_v7 = vadd.f32 %v6178_v46, %v6177_v30  ;;  %v6188_v47 = vadd.f32 %v6187_v24, %v6186_v56 }
 0x6b6   : > { %v6153_v16 = vrot.slane %v6152_v51, 2  ;;  %v6197_v25 = vadd.f32 %v6196_v57, %v6195_v58  ;;  %v6206_v62 = vadd.f32 %v6205_v8, %v6204_v60  ;;  %v6215_v1 = vadd.f32 %v6214_v23, %v6213_v18 }
 0x6b7   : > { %v6162_v41 = vrot.slane %v6161_v53, 2  ;;  %v6171_v49 = vrot.slane %v6170_v9, 2  ;;  %v6180_v12 = vrot.slane %v6179_v7, 2  ;;  %v6189_v29 = vrot.slane %v6188_v47, 2 }
 0x6b8   : > { %v6154_v31 = vadd.f32 %v6153_v16, %v6152_v51  ;;  %v6198_v35 = vrot.slane %v6197_v25, 2  ;;  %v6207_v40 = vrot.slane %v6206_v62, 2  ;;  %v6216_v2 = vrot.slane %v6215_v1, 2 }
 0x6b9   : > { %v6163_v38 = vadd.f32 %v6162_v41, %v6161_v53  ;;  %v6172_v6 = vadd.f32 %v6171_v49, %v6170_v9  ;;  %v6181_v11 = vadd.f32 %v6180_v12, %v6179_v7  ;;  %v6190_v48 = vadd.f32 %v6189_v29, %v6188_v47  ;;  %v17678_v41 = vld [vmem:[#allocation156_spill] sm:$0xff] }
 0x6ba   : > { %v6155_v42 = vrot.slane %v6154_v31, 1  ;;  %v6199_v14 = vadd.f32 %v6198_v35, %v6197_v25  ;;  %v6208_v37 = vadd.f32 %v6207_v40, %v6206_v62  ;;  %v6217_v56 = vadd.f32 %v6216_v2, %v6215_v1  ;;  %v17676_v25 = vld [vmem:[#allocation159_spill] sm:$0xff]  ;;  %v17680_v40 = vld [vmem:[#allocation161_spill] sm:$0xff] }
 0x6bb   : > { %v17671_v55 = vrot.slane %v13423_v17, 1  ;;  %v6164_v27 = vrot.slane %v6163_v38, 1  ;;  %v6173_v21 = vrot.slane %v6172_v6, 1  ;;  %v6182_v45 = vrot.slane %v6181_v11, 1 }
 0x6bc   : > { %v17672_v50 = vmax.f32 %v13437_v36, 0.0  ;;  %v6156_v54 = vadd.f32 %v6155_v42, %v6154_v31  ;;  %v6191_v52 = vrot.slane %v6190_v48, 1  ;;  %v6200_v28 = vrot.slane %v6199_v14, 1 }
 0x6bd   : > { %v13924_v26 = vadd.f32 %v17671_v55, %v13423_v17  ;;  %v6165_v32 = vadd.f32 %v6164_v27, %v6163_v38  ;;  %v6174_v34 = vadd.f32 %v6173_v21, %v6172_v6  ;;  %v6209_v30 = vrot.slane %v6208_v37, 1  ;;  %v17673_v17 = vld [vmem:[#allocation324_spill] sm:$0xff]  ;;  %v17686_v21 = vld [vmem:[#allocation258_spill] sm:$0xff] }
 0x6be   : > { %v13929_v33 = vmul.f32 %v12615_v10, %v17672_v50  ;;  %v6218_v5 = vrot.slane %v6217_v56, 1  ;;  %v13933_v58 = vadd.f32 %v17673_v17, %v13675_v15  ;;  %v17675_v60 = vrot.slane %v13796_v61, 1  ;;  %v17687_v50 = vld [vmem:[#allocation160_spill] sm:$0xff] }
 0x6bf   : > { %v6881_v20 = vunpack.c.2.s8 %v17528_v0  ;;  %v6183_v39 = vadd.f32 %v6182_v45, %v6181_v11  ;;  %v6785_v46 = vsel %vm15877_vm7, %v6165_v32, %v6156_v54  ;;  %v13944_v24 = vadd.f32 %v3649_v43, %v17530_v4  ;;  %v17682_v11 = vld [vmem:[#allocation158_spill] sm:$0xff]  ;;  %v17690_v32 = vld [vmem:[#allocation165_spill] sm:$0xff] }
 0x6c0   : > { %17674 = vst [vmem:[#allocation285_spill] sm:$0xff] %v13933_v58  ;;  %v13938_v36 = vadd.f32 %v17675_v60, %v13796_v61  ;;  %v4291_v51 = vadd.f32 %v3509_v13, %v17529_v3  ;;  %v6192_v57 = vadd.f32 %v6191_v52, %v6190_v48  ;;  %v6201_v15 = vadd.f32 %v6200_v28, %v6199_v14  ;;  %v17684_v14 = vld [vmem:[#allocation163_spill] sm:$0xff]  ;;  %v17689_v28 = vld [vmem:[#allocation345_spill] sm:$0xff] }
 0x6c1   : > { %v6786_v8 = vsel %vm15903_vm8, %v6174_v34, %v6785_v46  ;;  %v6907_v23 = vpack.c.b16 %v6881_v20, %v6881_v20  ;;  %v6210_v53 = vadd.f32 %v6209_v30, %v6208_v37  ;;  %v6219_v61 = vadd.f32 %v6218_v5, %v6217_v56  ;;  %v17692_v5 = vld [vmem:[#allocation162_spill] sm:$0xff] }
 0x6c2   : > { %v6787_v9 = vsel %vm15900_vm9, %v6183_v39, %v6786_v8  ;;  %v4803_v7 = vmax.f32 %v4291_v51, 0.0  ;;  %v17677_v62 = vmax.f32 %v17676_v25, 0.0  ;;  %v17679_v49 = vmax.f32 %v17678_v41, 0.0  ;;  %v17694_v39 = vld [vmem:[#allocation167_spill] sm:$0xff] }
 0x6c3   : > { %v6788_v47 = vsel %vm15873_vm10, %v6192_v57, %v6787_v9  ;;  %v6908_v16 = vpack.c.b8 %v6907_v23, %v6907_v23  ;;  %v17681_v2 = vmax.f32 %v17680_v40, 0.0  ;;  %v17683_v48 = vmax.f32 %v17682_v11, 0.0  ;;  %v17696_v57 = vld [vmem:[#allocation164_spill] sm:$0xff]  ;;  %v17698_v23 = vld [vmem:[#allocation169_spill] sm:$0xff]  ;;  %v17705_v25 = vld [vmem:[#allocation171_spill] sm:$0xff] }
 0x6c4   : > { %v5076_v1 = vmul.f32 %v12654_v63, %v17677_v62  ;;  %v5077_v12 = vmul.f32 %v12615_v10, %v17679_v49  ;;  %v6789_v29 = vsel %vm15899_vm11, %v6201_v15, %v6788_v47  ;;  %v5355_v35 = vmul.f32 %v17393_v19, %v4803_v7  ;;  %v17703_v7 = vld [vmem:[#allocation166_spill] sm:$0xff]  ;;  %v17707_v49 = vld [vmem:[#allocation168_spill] sm:$0xff] }
 0x6c5   : > { %v5078_v38 = vmul.f32 %v12711_v22, %v17681_v2  ;;  %v6790_v6 = vsel %vm15887_vm12, %v6210_v53, %v6789_v29  ;;  %vm6929_vm0 = vnez %v6908_v16  ;;  %v5079_v42 = vmul.f32 %v17393_v19, %v17683_v48 }
 0x6c6   : > { %v17685_v37 = vmax.f32 %v17684_v14, 0.0  ;;  %v6791_v55 = vsel %vm15886_vm13, %v6219_v61, %v6790_v6  ;;  %v6945_v27 = vsel %vm6929_vm0, 16843009, %v17407_v59  ;;  %v6411_v45 = vadd.f32 %v17686_v21, %v5355_v35  ;;  %v17710_v6 = vld [vmem:[#allocation173_spill] sm:$0xff]  ;;  %v17712_v14 = vld [vmem:[#allocation170_spill] sm:$0xff] }
 0x6c7   : > { %v17688_v54 = vmax.f32 %v17687_v50, 0.0  ;;  %v6853_v43 = vadd.f32 %v6791_v55, %v17689_v28  ;;  %v6961_v13 = vunpack.c.0.s8 %v6945_v27  ;;  %v17691_v34 = vmax.f32 %v17690_v32, 0.0  ;;  %v17714_v27 = vld [vmem:[#allocation175_spill] sm:$0xff] }
 0x6c8   : > { %v5080_v56 = vmul.f32 %v12654_v63, %v17685_v37  ;;  %v17693_v17 = vmax.f32 %v17692_v5, 0.0  ;;  %v6412_v20 = vrot.slane %v6411_v45, 4  ;;  %v17695_v46 = vmax.f32 %v17694_v39, 0.0 }
 0x6c9   : > { %v5081_v52 = vmul.f32 %v12615_v10, %v17688_v54  ;;  %v5082_v30 = vmul.f32 %v12711_v22, %v17691_v34  ;;  %v17697_v15 = vmax.f32 %v17696_v57, 0.0  ;;  %v17699_v53 = vmax.f32 %v17698_v23, 0.0  ;;  %v17716_v54 = vld [vmem:[#allocation172_spill] sm:$0xff]  ;;  %v17720_v34 = vld [vmem:[#allocation174_spill] sm:$0xff] }
 0x6ca   : > { %v5083_v60 = vmul.f32 %v17393_v19, %v17693_v17  ;;  %v5084_v51 = vmul.f32 %v12654_v63, %v17695_v46  ;;  %vm13991_vm0 = vcmp.ne.s32.totalorder %v6961_v13, 0  ;;  %v17700_v9 = vmov 0  ;;  %v17724_v57 = vld [vmem:[#allocation176_spill] sm:$0xff] }
 0x6cb   : > { %v5085_v8 = vmul.f32 %v12615_v10, %v17697_v15  ;;  %v5086_v61 = vmul.f32 %v12711_v22, %v17699_v53  ;;  %v17701_v9 = vsel %vm13991_vm0, 4294967295, %v17700_v9  ;;  %v17704_v47 = vmax.f32 %v17703_v7, 0.0  ;;  %v17726_v53 = vld [vmem:[#allocation181_spill] sm:$0xff] }
 0x6cc   : > { %17702 = vst [vmem:[#allocation420_spill] sm:$0xff] %v17701_v9  ;;  %v17706_v62 = vmax.f32 %v17705_v25, 0.0  ;;  %v17708_v29 = vmax.f32 %v17707_v49, 0.0  ;;  %v14006_v40 = vsel %vm13991_vm0, %v6853_v43, -1e+30  ;;  %v14008_v2 = vadd.f32 %v6412_v20, %v6411_v45  ;;  %v17718_v45 = vld [vmem:[#allocation177_spill] sm:$0xff] }
 0x6cd   : > { %v5087_v16 = vmul.f32 %v17393_v19, %v17704_v47  ;;  %17709 = vst [vmem:[#allocation429_spill] sm:$0xff] %v14006_v40  ;;  %v17711_v11 = vmax.f32 %v17710_v6, 0.0  ;;  %v17713_v37 = vmax.f32 %v17712_v14, 0.0  ;;  %7035 = vmax.xlane.f32.xlu0 %v14006_v40  ;;  %v17715_v21 = vmax.f32 %v17714_v27, 0.0  ;;  %v17722_v20 = vld [vmem:[#allocation179_spill] sm:$0xff]  ;;  %v17733_v27 = vld [vmem:[#allocation180_spill] sm:$0xff] }
 0x6ce   : > { %v5088_v41 = vmul.f32 %v12654_v63, %v17706_v62  ;;  %v5089_v35 = vmul.f32 %v12615_v10, %v17708_v29  ;;  %v17717_v28 = vmax.f32 %v17716_v54, 0.0  ;;  %v17719_v13 = vmax.f32 %v17718_v45, 0.0  ;;  %v17728_v25 = vld [vmem:[#allocation183_spill] sm:$0xff]  ;;  %v964_v29 = vld [vmem:[%s17730_s17 + $0x18] sm:$0xff] }
 0x6cf   : > { %v5090_v48 = vmul.f32 %v12711_v22, %v17711_v11  ;;  %v5091_v55 = vmul.f32 %v17393_v19, %v17713_v37  ;;  %v5092_v50 = vmul.f32 %v12654_v63, %v17715_v21  ;;  %v17721_v5 = vmax.f32 %v17720_v34, 0.0  ;;  %v17731_v11 = vld [vmem:[#allocation178_spill] sm:$0xff]  ;;  %8189 = vmatprep.subr.mxu0 %v964_v29 }
 0x6d0   : > { %v5093_v43 = vmul.f32 %v12615_v10, %v17717_v28  ;;  %v5094_v32 = vmul.f32 %v12711_v22, %v17719_v13  ;;  %v17723_v39 = vmax.f32 %v17722_v20, 0.0  ;;  %v17725_v15 = vmax.f32 %v17724_v57, 0.0  ;;  %v17735_v28 = vld [vmem:[#allocation185_spill] sm:$0xff]  ;;  %v17737_v34 = vld [vmem:[#allocation182_spill] sm:$0xff]  ;;  %8190 = vmatpush3.msra.mxu0 %v964_v29 }
 0x6d1   : > { %v5095_v17 = vmul.f32 %v17393_v19, %v17721_v5  ;;  %v17727_v7 = vmax.f32 %v17726_v53, 0.0  ;;  %v17729_v62 = vmax.f32 %v17728_v25, 0.0  ;;  %v17732_v14 = vmax.f32 %v17731_v11, 0.0  ;;  %v17741_v53 = vld [vmem:[#allocation184_spill] sm:$0xff] }
 0x6d2   : > { %v5096_v46 = vmul.f32 %v12654_v63, %v17723_v39  ;;  %v5097_v23 = vmul.f32 %v12615_v10, %v17725_v15  ;;  %v17734_v21 = vmax.f32 %v17733_v27, 0.0  ;;  %v17736_v45 = vmax.f32 %v17735_v28, 0.0  ;;  %v17739_v39 = vld [vmem:[#allocation187_spill] sm:$0xff]  ;;  %v17743_v28 = vld [vmem:[#allocation189_spill] sm:$0xff] }
 0x6d3   : > { %v5098_v47 = vmul.f32 %v12711_v22, %v17727_v7  ;;  %v5100_v49 = vmul.f32 %v12654_v63, %v17729_v62  ;;  %v5099_v37 = vmul.f32 %v17393_v19, %v17732_v14  ;;  %v17738_v5 = vmax.f32 %v17737_v34, 0.0 }
 0x6d4   : > { %v5101_v54 = vmul.f32 %v12615_v10, %v17734_v21  ;;  %v5102_v13 = vmul.f32 %v12711_v22, %v17736_v45  ;;  %v17740_v57 = vmax.f32 %v17739_v39, 0.0  ;;  %v17742_v7 = vmax.f32 %v17741_v53, 0.0  ;;  %v17745_v53 = vld [vmem:[#allocation186_spill] sm:$0xff] }
 0x6d5   : > { %v5103_v20 = vmul.f32 %v17393_v19, %v17738_v5  ;;  %v5788_v62 = vadd.f32 %v5077_v12, %v5076_v1  ;;  %v5797_v11 = vadd.f32 %v5081_v52, %v5080_v56  ;;  %v5806_v14 = vadd.f32 %v5085_v8, %v5084_v51 }
 0x6d6   : > { %v5104_v15 = vmul.f32 %v12654_v63, %v17740_v57  ;;  %v5105_v25 = vmul.f32 %v12615_v10, %v17742_v7  ;;  %v5815_v27 = vadd.f32 %v5089_v35, %v5088_v41  ;;  %v5824_v21 = vadd.f32 %v5093_v43, %v5092_v50 }
 0x6d7   : > { %v17744_v45 = vmax.f32 %v17743_v28, 0.0  ;;  %v5789_v31 = vadd.f32 %v5788_v62, %v5078_v38  ;;  %v5833_v5 = vadd.f32 %v5097_v23, %v5096_v46  ;;  %v5842_v18 = vadd.f32 %v5101_v54, %v5100_v49 }
 0x6d8   : > { %v5798_v39 = vadd.f32 %v5797_v11, %v5082_v30  ;;  %v5807_v6 = vadd.f32 %v5806_v14, %v5086_v61  ;;  %v5816_v57 = vadd.f32 %v5815_v27, %v5090_v48  ;;  %v5825_v9 = vadd.f32 %v5824_v21, %v5094_v32 }
 0x6d9   : > { %v5106_v34 = vmul.f32 %v12711_v22, %v17744_v45  ;;  %v17746_v40 = vmax.f32 %v17745_v53, 0.0  ;;  %v5790_v12 = vadd.f32 %v5789_v31, %v5079_v42  ;;  %v5834_v56 = vadd.f32 %v5833_v5, %v5098_v47 }
 0x6da   : > { %v5843_v52 = vadd.f32 %v5842_v18, %v5102_v13  ;;  %v5799_v51 = vadd.f32 %v5798_v39, %v5083_v60  ;;  %v5808_v8 = vadd.f32 %v5807_v6, %v5087_v16  ;;  %v5817_v41 = vadd.f32 %v5816_v57, %v5091_v55 }
 0x6db   : > { %v5107_v1 = vmul.f32 %v17393_v19, %v17746_v40  ;;  %v5826_v35 = vadd.f32 %v5825_v9, %v5095_v17  ;;  %v5791_v50 = vrot.slane %v5790_v12, 4  ;;  %v5835_v43 = vadd.f32 %v5834_v56, %v5099_v37 }
 0x6dc   : > { %v5844_v38 = vadd.f32 %v5843_v52, %v5103_v20  ;;  %v5851_v46 = vadd.f32 %v5105_v25, %v5104_v15  ;;  %v5800_v23 = vrot.slane %v5799_v51, 4  ;;  %v5809_v30 = vrot.slane %v5808_v8, 4 }
 0x6dd   : > { %v5818_v61 = vrot.slane %v5817_v41, 4  ;;  %v5827_v48 = vrot.slane %v5826_v35, 4  ;;  %v5792_v32 = vadd.f32 %v5791_v50, %v5790_v12  ;;  %v5836_v49 = vrot.slane %v5835_v43, 4 }
 0x6de   : > { %v5845_v29 = vrot.slane %v5844_v38, 4  ;;  %v5852_v54 = vadd.f32 %v5851_v46, %v5106_v34  ;;  %v5801_v40 = vadd.f32 %v5800_v23, %v5799_v51  ;;  %v5810_v31 = vadd.f32 %v5809_v30, %v5808_v8  ;;  %v17748_v30 = vld [vmem:[#allocation368_spill] sm:$0xff] }
 0x6df   : > { %v5819_v42 = vadd.f32 %v5818_v61, %v5817_v41  ;;  %v5828_v18 = vadd.f32 %v5827_v48, %v5826_v35  ;;  %v5793_v60 = vrot.slane %v5792_v32, 2  ;;  %v5837_v16 = vadd.f32 %v5836_v49, %v5835_v43 }
 0x6e0   : > { %v5846_v55 = vadd.f32 %v5845_v29, %v5844_v38  ;;  %v5853_v9 = vadd.f32 %v5852_v54, %v5107_v1  ;;  %v5802_v17 = vrot.slane %v5801_v40, 2  ;;  %v5811_v47 = vrot.slane %v5810_v31, 2  ;;  %v17747_v38 = vld [vmem:[#allocation273_spill] sm:$0xff]  ;;  %v17752_v54 = vld [vmem:[#allocation372_spill] sm:$0xff] }
 0x6e1   : > { %v5820_v6 = vrot.slane %v5819_v42, 2  ;;  %v5829_v37 = vrot.slane %v5828_v18, 2  ;;  %v5794_v13 = vadd.f32 %v5793_v60, %v5792_v32  ;;  %v5838_v20 = vrot.slane %v5837_v16, 2  ;;  %v17750_v32 = vld [vmem:[#allocation366_spill] sm:$0xff] }
 0x6e2   : > { %v5847_v15 = vrot.slane %v5846_v55, 2  ;;  %v5854_v7 = vrot.slane %v5853_v9, 4  ;;  %v5803_v25 = vadd.f32 %v5802_v17, %v5801_v40  ;;  %v5812_v62 = vadd.f32 %v5811_v47, %v5810_v31  ;;  %v17756_v47 = vld [vmem:[#allocation374_spill] sm:$0xff] }
 0x6e3   : > { %v5821_v11 = vadd.f32 %v5820_v6, %v5819_v42  ;;  %v5830_v14 = vadd.f32 %v5829_v37, %v5828_v18  ;;  %v5795_v27 = vrot.slane %v5794_v13, 1  ;;  %v5839_v21 = vadd.f32 %v5838_v20, %v5837_v16  ;;  %v17754_v16 = vld [vmem:[#allocation367_spill] sm:$0xff] }
 0x6e4   : > { %v5848_v28 = vadd.f32 %v5847_v15, %v5846_v55  ;;  %v5855_v45 = vadd.f32 %v5854_v7, %v5853_v9  ;;  %v5804_v34 = vrot.slane %v5803_v25, 1  ;;  %v5813_v5 = vrot.slane %v5812_v62, 1  ;;  %v17760_v7 = vld [vmem:[#allocation376_spill] sm:$0xff] }
 0x6e5   : > { %v5822_v39 = vrot.slane %v5821_v11, 1  ;;  %v5831_v57 = vrot.slane %v5830_v14, 1  ;;  %v5796_v53 = vadd.f32 %v5795_v27, %v5794_v13  ;;  %v5840_v1 = vrot.slane %v5839_v21, 1  ;;  %v17758_v13 = vld [vmem:[#allocation371_spill] sm:$0xff] }
 0x6e6   : > { %v5849_v12 = vrot.slane %v5848_v28, 1  ;;  %v5856_v56 = vrot.slane %v5855_v45, 2  ;;  %v5805_v52 = vadd.f32 %v5804_v34, %v5803_v25  ;;  %v5814_v51 = vadd.f32 %v5813_v5, %v5812_v62  ;;  %v17764_v5 = vld [vmem:[#allocation378_spill] sm:$0xff] }
 0x6e7   : > { %v5823_v8 = vadd.f32 %v5822_v39, %v5821_v11  ;;  %v5832_v41 = vadd.f32 %v5831_v57, %v5830_v14  ;;  %v5841_v35 = vadd.f32 %v5840_v1, %v5839_v21  ;;  %v6876_v46 = vunpack.c.1.s8 %v17747_v38  ;;  %v17762_v21 = vld [vmem:[#allocation373_spill] sm:$0xff] }
 0x6e8   : > { %v5850_v50 = vadd.f32 %v5849_v12, %v5848_v28  ;;  %v5857_v43 = vadd.f32 %v5856_v56, %v5855_v45  ;;  %v6750_v23 = vsel %vm15877_vm7, %v5805_v52, %v5796_v53  ;;  %v17749_v61 = vmax.f32 %v17748_v30, 0.0  ;;  %v17766_v53 = vld [vmem:[#allocation375_spill] sm:$0xff]  ;;  %v17768_v56 = vld [vmem:[#allocation380_spill] sm:$0xff] }
 0x6e9   : > { %v17751_v49 = vmax.f32 %v17750_v32, 0.0  ;;  %v17753_v40 = vmax.f32 %v17752_v54, 0.0  ;;  %v6751_v18 = vsel %vm15903_vm8, %v5814_v51, %v6750_v23  ;;  %v6897_v60 = vpack.c.b16 %v6876_v46, %v6876_v46 }
 0x6ea   : > { %v5268_v48 = vmul.f32 %v12654_v63, %v17749_v61  ;;  %v5858_v42 = vrot.slane %v5857_v43, 1  ;;  %v17755_v55 = vmax.f32 %v17754_v16, 0.0  ;;  %v6752_v17 = vsel %vm15900_vm9, %v5823_v8, %v6751_v18 }
 0x6eb   : > { %v5269_v29 = vmul.f32 %v12615_v10, %v17751_v49  ;;  %v5270_v31 = vmul.f32 %v12711_v22, %v17753_v40  ;;  %v17757_v6 = vmax.f32 %v17756_v47, 0.0  ;;  %v17759_v20 = vmax.f32 %v17758_v13, 0.0  ;;  %v17774_v49 = vld [vmem:[#allocation379_spill] sm:$0xff]  ;;  %v17781_v13 = vld [vmem:[#allocation386_spill] sm:$0xff] }
 0x6ec   : > { %v14084_v9 = vmul.f32 %v17393_v19, %v17755_v55  ;;  %v17761_v25 = vmax.f32 %v17760_v7, 0.0  ;;  %v5859_v11 = vadd.f32 %v5858_v42, %v5857_v43  ;;  %v6753_v14 = vsel %vm15873_vm10, %v5832_v41, %v6752_v17  ;;  %v17770_v41 = vld [vmem:[#allocation377_spill] sm:$0xff]  ;;  %v17776_v42 = vld [vmem:[#allocation384_spill] sm:$0xff] }
 0x6ed   : > { %v5272_v37 = vmul.f32 %v12654_v63, %v17757_v6  ;;  %v5273_v15 = vmul.f32 %v12615_v10, %v17759_v20  ;;  %v6898_v27 = vpack.c.b8 %v6897_v60, %v6897_v60  ;;  %v17763_v28 = vmax.f32 %v17762_v21, 0.0  ;;  %v17778_v60 = vld [vmem:[#allocation348_spill] sm:$0xff]  ;;  %v17779_v17 = vld [vmem:[#allocation381_spill] sm:$0xff] }
 0x6ee   : > { %v5274_v62 = vmul.f32 %v12711_v22, %v17761_v25  ;;  %v6754_v34 = vsel %vm15899_vm11, %v5841_v35, %v6753_v14  ;;  %v17765_v39 = vmax.f32 %v17764_v5, 0.0  ;;  %v17767_v1 = vmax.f32 %v17766_v53, 0.0  ;;  %v17772_v35 = vld [vmem:[#allocation382_spill] sm:$0xff]  ;;  %v17783_v25 = vld [vmem:[#allocation383_spill] sm:$0xff] }
 0x6ef   : > { %v5275_v45 = vmul.f32 %v17393_v19, %v17763_v28  ;;  %v17769_v52 = vmax.f32 %v17768_v56, 0.0  ;;  %v6755_v8 = vsel %vm15887_vm12, %v5850_v50, %v6754_v34  ;;  %vm6924_vm10 = vnez %v6898_v27  ;;  %v17785_v27 = vld [vmem:[#allocation388_spill] sm:$0xff]  ;;  %v17787_v34 = vld [vmem:[#allocation385_spill] sm:$0xff]  ;;  %v17789_v53 = vld [vmem:[#allocation390_spill] sm:$0xff] }
 0x6f0   : > { %v5276_v57 = vmul.f32 %v12654_v63, %v17765_v39  ;;  %v5277_v12 = vmul.f32 %v12615_v10, %v17767_v1  ;;  %v17771_v43 = vmax.f32 %v17770_v41, 0.0  ;;  %v17773_v23 = vmax.f32 %v17772_v35, 0.0  ;;  %v17796_v35 = vld [vmem:[#allocation392_spill] sm:$0xff] }
 0x6f1   : > { %v5278_v51 = vmul.f32 %v12711_v22, %v17769_v52  ;;  %v6756_v61 = vsel %vm15886_vm13, %v5859_v11, %v6755_v8  ;;  %v6940_v32 = vsel %vm6924_vm10, 16843009, %v17407_v59  ;;  %v17775_v54 = vmax.f32 %v17774_v49, 0.0  ;;  %v17794_v8 = vld [vmem:[#allocation387_spill] sm:$0xff] }
 0x6f2   : > { %v5279_v46 = vmul.f32 %v17393_v19, %v17771_v43  ;;  %v5280_v30 = vmul.f32 %v12654_v63, %v17773_v23  ;;  %v17777_v18 = vmax.f32 %v17776_v42, 0.0  ;;  %v6848_v16 = vadd.f32 %v6756_v61, %v17778_v60 }
 0x6f3   : > { %v5281_v40 = vmul.f32 %v12615_v10, %v17775_v54  ;;  %v6956_v55 = vunpack.c.0.s8 %v6940_v32  ;;  %v17780_v47 = vmax.f32 %v17779_v17, 0.0  ;;  %v17782_v20 = vmax.f32 %v17781_v13, 0.0  ;;  %v17798_v32 = vld [vmem:[#allocation389_spill] sm:$0xff]  ;;  %v17803_v17 = vld [vmem:[#allocation391_spill] sm:$0xff] }
 0x6f4   : > { %v5282_v50 = vmul.f32 %v12711_v22, %v17777_v18  ;;  %v17784_v11 = vmax.f32 %v17783_v25, 0.0  ;;  %v17786_v21 = vmax.f32 %v17785_v27, 0.0  ;;  %v17788_v5 = vmax.f32 %v17787_v34, 0.0  ;;  %v17801_v18 = vld [vmem:[#allocation394_spill] sm:$0xff]  ;;  %v963_v27 = vld [vmem:[%s17730_s17 + $0x10] sm:$0xff] }
 0x6f5   : > { %v5283_v6 = vmul.f32 %v17393_v19, %v17780_v47  ;;  %v5284_v7 = vmul.f32 %v12654_v63, %v17782_v20  ;;  %v17790_v1 = vmax.f32 %v17789_v53, 0.0  ;;  %vm14144_vm10 = vcmp.ne.s32.totalorder %v6956_v55, 0  ;;  %v17805_v20 = vld [vmem:[#allocation397_spill] sm:$0xff]  ;;  %8191 = vmatprep.subr.mxu0 %v963_v27 }
 0x6f6   : > { %v5285_v14 = vmul.f32 %v12615_v10, %v17784_v11  ;;  %v5286_v28 = vmul.f32 %v12711_v22, %v17786_v21  ;;  %v5287_v39 = vmul.f32 %v17393_v19, %v17788_v5  ;;  %v17791_v52 = vmov 0  ;;  %v17809_v5 = vld [vmem:[#allocation400_spill] sm:$0xff]  ;;  %8192 = vmatpush3.msra.mxu0 %v963_v27 }
 0x6f7   : > { %v5288_v56 = vmul.f32 %v12654_v63, %v17790_v1  ;;  %v17792_v52 = vsel %vm14144_vm10, 4294967295, %v17791_v52  ;;  %v17795_v41 = vmax.f32 %v17794_v8, 0.0  ;;  %v17797_v23 = vmax.f32 %v17796_v35, 0.0  ;;  %v17811_v8 = vld [vmem:[#allocation395_spill] sm:$0xff] }
 0x6f8   : > { %17793 = vst [vmem:[#allocation423_spill] sm:$0xff] %v17792_v52  ;;  %v17799_v49 = vmax.f32 %v17798_v32, 0.0  ;;  %v14159_v42 = vsel %vm14144_vm10, %v6848_v16, -1e+30  ;;  %v17802_v60 = vmax.f32 %v17801_v18, 0.0  ;;  %v17804_v47 = vmax.f32 %v17803_v17, 0.0 }
 0x6f9   : > { %v5289_v43 = vmul.f32 %v12615_v10, %v17795_v41  ;;  %v5290_v61 = vmul.f32 %v12711_v22, %v17797_v23  ;;  %17800 = vst [vmem:[#allocation430_spill] sm:$0xff] %v14159_v42  ;;  %v17806_v25 = vmax.f32 %v17805_v20, 0.0  ;;  %7025 = vmax.xlane.f32.xlu1 %v14159_v42  ;;  %v17807_v16 = vld [vmem:[#allocation393_spill] sm:$0xff]  ;;  %v17810_v53 = vmax.f32 %v17809_v5, 0.0  ;;  %v962_v18 = vld [vmem:[%s17730_s17 + $0x8] sm:$0xff] }
 0x6fa   : > { %v5291_v54 = vmul.f32 %v17393_v19, %v17799_v49  ;;  %v5292_v55 = vmul.f32 %v12654_v63, %v17802_v60  ;;  %v5293_v13 = vmul.f32 %v12615_v10, %v17804_v47  ;;  %v17808_v21 = vmax.f32 %v17807_v16, 0.0  ;;  %v17813_v23 = vld [vmem:[#allocation401_spill] sm:$0xff]  ;;  %v17815_v60 = vld [vmem:[#allocation398_spill] sm:$0xff]  ;;  %8193 = vmatprep.subr.mxu0 %v962_v18 }
 0x6fb   : > { %v5294_v11 = vmul.f32 %v12711_v22, %v17806_v25  ;;  %v5296_v1 = vmul.f32 %v12654_v63, %v17810_v53  ;;  %v17812_v41 = vmax.f32 %v17811_v8, 0.0  ;;  %v17814_v32 = vmax.f32 %v17813_v23, 0.0  ;;  %8194 = vmatpush3.msra.mxu0 %v962_v18 }
 0x6fc   : > { %v5295_v34 = vmul.f32 %v17393_v19, %v17808_v21  ;;  %v17816_v17 = vmax.f32 %v17815_v60, 0.0  ;;  %v6220_v20 = vadd.f32 %v5269_v29, %v5268_v48  ;;  %v6229_v25 = vadd.f32 %v5273_v15, %v5272_v37 }
 0x6fd   : > { %v5297_v35 = vmul.f32 %v12615_v10, %v17812_v41  ;;  %v5298_v49 = vmul.f32 %v12711_v22, %v17814_v32  ;;  %v6238_v16 = vadd.f32 %v5277_v12, %v5276_v57  ;;  %v6247_v21 = vadd.f32 %v5281_v40, %v5280_v30  ;;  %v945_v12 = vld [vmem:[%s8798_s20] sm:$0xff] }
 0x6fe   : > { %v5299_v47 = vmul.f32 %v17393_v19, %v17816_v17  ;;  %v6256_v5 = vadd.f32 %v5285_v14, %v5284_v7  ;;  %v6265_v53 = vadd.f32 %v5289_v43, %v5288_v56  ;;  %v6274_v8 = vadd.f32 %v5293_v13, %v5292_v55  ;;  %v947_v7 = vld [vmem:[%s8798_s20 + $0x10] sm:$0xff]  ;;  %8197 = vmatprep.mubr.msk.f32.mxu0 %vm15881_vm2, %v945_v12 }
 0x6ff   : > { %v6221_v41 = vadd.f32 %v6220_v20, %v5270_v31  ;;  %v6230_v23 = vadd.f32 %v6229_v25, %v5274_v62  ;;  %v6239_v32 = vadd.f32 %v6238_v16, %v5278_v51  ;;  %v6283_v52 = vadd.f32 %v5297_v35, %v5296_v1  ;;  %v961_v31 = vld [vmem:[%s17730_s17] sm:$0xff]  ;;  %v946_v62 = vld [vmem:[%s8798_s20 + $0x8] sm:$0xff] }
 0x700   : > { %v6248_v42 = vadd.f32 %v6247_v21, %v5282_v50  ;;  %v6257_v60 = vadd.f32 %v6256_v5, %v5286_v28  ;;  %v6266_v17 = vadd.f32 %v6265_v53, %v5290_v61  ;;  %v6275_v48 = vadd.f32 %v6274_v8, %v5294_v11  ;;  %8195 = vmatprep.subr.mxu0 %v961_v31 }
 0x701   : > { %v6222_v29 = vadd.f32 %v6221_v41, %v14084_v9  ;;  %v6231_v37 = vadd.f32 %v6230_v23, %v5275_v45  ;;  %v6240_v15 = vadd.f32 %v6239_v32, %v5279_v46  ;;  %v6284_v57 = vadd.f32 %v6283_v52, %v5298_v49  ;;  %8196 = vmatpush3.msra.mxu0 %v961_v31 }
 0x702   : > { %v6249_v51 = vadd.f32 %v6248_v42, %v5283_v6  ;;  %v6258_v30 = vadd.f32 %v6257_v60, %v5287_v39  ;;  %v6267_v40 = vadd.f32 %v6266_v17, %v5291_v54  ;;  %v6276_v50 = vadd.f32 %v6275_v48, %v5295_v34  ;;  %8198 = vmatmul.mubr.msk.f32.vlgmr.msra.gmra.mxu0 %vm15881_vm2, %v946_v62  ;;  %v948_v42 = vld [vmem:[%s8798_s20 + $0x18] sm:$0xff]  ;;  %v3752_v62 = vpop.permute.xlu0 %3751 }
 0x703   : > { %v6223_v14 = vrot.slane %v6222_v29, 4  ;;  %v6232_v28 = vrot.slane %v6231_v37, 4  ;;  %v6241_v56 = vrot.slane %v6240_v15, 4  ;;  %v6285_v9 = vadd.f32 %v6284_v57, %v5299_v47  ;;  %8200 = vmatprep.mubr.msk.f32.mxu0 %vm15881_vm2, %v947_v7 }
 0x704   : > { %v6250_v45 = vrot.slane %v6249_v51, 4  ;;  %v6259_v46 = vrot.slane %v6258_v30, 4  ;;  %v6268_v52 = vrot.slane %v6267_v40, 4  ;;  %v6277_v43 = vrot.slane %v6276_v50, 4 }
 0x705   : > { %v6224_v6 = vadd.f32 %v6223_v14, %v6222_v29  ;;  %v6233_v39 = vadd.f32 %v6232_v28, %v6231_v37  ;;  %v6242_v61 = vadd.f32 %v6241_v56, %v6240_v15  ;;  %v6286_v54 = vrot.slane %v6285_v9, 4  ;;  %v3604_v28 = vpop.permute.xlu1 %3603  ;;  %v951_v56 = vld [vmem:[%s8798_s20 + $0x30] sm:$0xff] }
 0x706   : > { %v6251_v55 = vadd.f32 %v6250_v45, %v6249_v51  ;;  %v6260_v13 = vadd.f32 %v6259_v46, %v6258_v30  ;;  %v6269_v11 = vadd.f32 %v6268_v52, %v6267_v40  ;;  %v6278_v27 = vadd.f32 %v6277_v43, %v6276_v50  ;;  %8201 = vmatmul.mubr.msk.f32.gmra.mxu0 %vm15881_vm2, %v948_v42  ;;  %v949_v51 = vld [vmem:[%s8798_s20 + $0x20] sm:$0xff]  ;;  %v950_v30 = vld [vmem:[%s8798_s20 + $0x28] sm:$0xff] }
 0x707   : > { %v6225_v34 = vrot.slane %v6224_v6, 2  ;;  %v6234_v1 = vrot.slane %v6233_v39, 2  ;;  %v6243_v35 = vrot.slane %v6242_v61, 2  ;;  %v6287_v49 = vadd.f32 %v6286_v54, %v6285_v9  ;;  %8203 = vmatprep.mubr.msk.f32.mxu0 %vm15881_vm2, %v949_v51 }
 0x708   : > { %v6252_v18 = vrot.slane %v6251_v55, 2  ;;  %v6261_v47 = vrot.slane %v6260_v13, 2  ;;  %v6270_v20 = vrot.slane %v6269_v11, 2  ;;  %v6279_v25 = vrot.slane %v6278_v27, 2 }
 0x709   : > { %v6226_v16 = vadd.f32 %v6225_v34, %v6224_v6  ;;  %v6235_v21 = vadd.f32 %v6234_v1, %v6233_v39  ;;  %v6244_v5 = vadd.f32 %v6243_v35, %v6242_v61  ;;  %v6288_v53 = vrot.slane %v6287_v49, 2 }
 0x70a   : > { %v6253_v8 = vadd.f32 %v6252_v18, %v6251_v55  ;;  %v6262_v41 = vadd.f32 %v6261_v47, %v6260_v13  ;;  %v6271_v23 = vadd.f32 %v6270_v20, %v6269_v11  ;;  %v6280_v32 = vadd.f32 %v6279_v25, %v6278_v27  ;;  %8204 = vmatmul.mubr.msk.f32.gmra.mxu0 %vm15881_vm2, %v950_v30  ;;  %v953_v13 = vld [vmem:[%s8798_s20 + $0x40] sm:$0xff] }
 0x70b   : > { %v6227_v60 = vrot.slane %v6226_v16, 1  ;;  %v6236_v17 = vrot.slane %v6235_v21, 1  ;;  %v6245_v48 = vrot.slane %v6244_v5, 1  ;;  %v6289_v29 = vadd.f32 %v6288_v53, %v6287_v49  ;;  %8206 = vmatprep.mubr.msk.f32.mxu0 %vm15881_vm2, %v951_v56  ;;  %v17824_v18 = vld [vmem:[#allocation191_spill] sm:$0xff] }
 0x70c   : > { %v17817_v37 = vrot.slane %v14008_v2, 2  ;;  %v6254_v57 = vrot.slane %v6253_v8, 1  ;;  %v6263_v31 = vrot.slane %v6262_v41, 1  ;;  %v6272_v12 = vrot.slane %v6271_v23, 1 }
 0x70d   : > { %v6228_v40 = vadd.f32 %v6227_v60, %v6226_v16  ;;  %v6237_v50 = vadd.f32 %v6236_v17, %v6235_v21  ;;  %v6246_v7 = vadd.f32 %v6245_v48, %v6244_v5  ;;  %v6281_v14 = vrot.slane %v6280_v32, 1  ;;  %v17826_v5 = vld [vmem:[#allocation188_spill] sm:$0xff]  ;;  %v17828_v60 = vld [vmem:[#allocation193_spill] sm:$0xff] }
 0x70e   : > { %v14207_v15 = vadd.f32 %v17817_v37, %v14008_v2  ;;  %v14216_v2 = vsel %vm15877_vm7, %v13938_v36, %v13924_v26  ;;  %v17819_v9 = vmax.f32 %v13684_v44, 0.0  ;;  %v17821_v46 = vmax.f32 %v13944_v24, 0.0  ;;  %v17822_v26 = vld [vmem:[#allocation289_spill] sm:$0xff]  ;;  %v952_v44 = vld [vmem:[%s8798_s20 + $0x38] sm:$0xff] }
 0x70f   : > { %17818 = vst [vmem:[#allocation329_spill] sm:$0xff] %v14216_v2  ;;  %v6290_v43 = vrot.slane %v6289_v29, 1  ;;  %v6255_v6 = vadd.f32 %v6254_v57, %v6253_v8  ;;  %v6792_v39 = vsel %vm15877_vm7, %v6237_v50, %v6228_v40  ;;  %v6882_v61 = vunpack.c.3.s8 %v17528_v0  ;;  %8207 = vmatmul.mubr.msk.f32.gmra.mxu0 %vm15881_vm2, %v952_v44  ;;  %v17834_v40 = vld [vmem:[#allocation192_spill] sm:$0xff]  ;;  %v17840_v44 = vld [vmem:[#allocation194_spill] sm:$0xff] }
 0x710   : > { %v14221_v45 = vmul.f32 %v12654_v63, %v17819_v9  ;;  %v14226_v52 = vmul.f32 %v12654_v63, %v17821_v46  ;;  %v14232_v36 = vadd.f32 %v3752_v62, %v17822_v26  ;;  %v6264_v24 = vadd.f32 %v6263_v31, %v6262_v41  ;;  %8209 = vmatprep.mubr.msk.f32.mxu0 %vm15881_vm2, %v953_v13  ;;  %v954_v41 = vld [vmem:[%s8798_s20 + $0x48] sm:$0xff]  ;;  %v955_v31 = vld [vmem:[%s8798_s20 + $0x50] sm:$0xff]  ;;  %v17832_v62 = vld [vmem:[#allocation195_spill] sm:$0xff] }
 0x711   : > { %v6793_v42 = vsel %vm15903_vm8, %v6246_v7, %v6792_v39  ;;  %v4311_v55 = vadd.f32 %v3604_v28, %v17529_v3  ;;  %v6273_v11 = vadd.f32 %v6272_v12, %v6271_v23  ;;  %v6282_v27 = vadd.f32 %v6281_v14, %v6280_v32  ;;  %v17836_v14 = vld [vmem:[#allocation353_spill] sm:$0xff]  ;;  %v17837_v9 = vld [vmem:[#allocation263_spill] sm:$0xff] }
 0x712   : > { %17820 = vst [vmem:[#allocation309_spill] sm:$0xff] %v14221_v45  ;;  %v6794_v34 = vsel %vm15900_vm9, %v6255_v6, %v6793_v42  ;;  %v6909_v0 = vpack.c.b16 %v6882_v61, %v6882_v61  ;;  %v6291_v1 = vadd.f32 %v6290_v43, %v6289_v29  ;;  %vm17823_vm7 = vcmask 1044484   ;;  %v17830_v29 = vld [vmem:[#allocation190_spill] sm:$0xff]  ;;  %v17838_v43 = vld [vmem:[#allocation197_spill] sm:$0xff] }
 0x713   : > { %v6795_v35 = vsel %vm17823_vm7, %v6264_v24, %v6794_v34  ;;  %v4823_v49 = vmax.f32 %v4311_v55, 0.0  ;;  %v17825_v47 = vmax.f32 %v17824_v18, 0.0  ;;  %v17827_v53 = vmax.f32 %v17826_v5, 0.0  ;;  %8210 = vmatmul.mubr.msk.f32.gmra.mxu0 %vm15881_vm2, %v954_v41  ;;  %v17842_v55 = vld [vmem:[#allocation199_spill] sm:$0xff] }
 0x714   : > { %v6796_v25 = vsel %vm15899_vm11, %v6273_v11, %v6795_v35  ;;  %v6910_v16 = vpack.c.b8 %v6909_v0, %v6909_v0  ;;  %v17829_v17 = vmax.f32 %v17828_v60, 0.0  ;;  %v17831_v37 = vmax.f32 %v17830_v29, 0.0  ;;  %8212 = vmatprep.mubr.msk.f32.mxu0 %vm15881_vm2, %v955_v31  ;;  %v17855_v60 = vld [vmem:[#allocation200_spill] sm:$0xff] }
 0x715   : > { %v5108_v20 = vmul.f32 %v12654_v63, %v17825_v47  ;;  %v5109_v8 = vmul.f32 %v12615_v10, %v17827_v53  ;;  %v6797_v23 = vsel %vm15887_vm12, %v6282_v27, %v6796_v25  ;;  %v5375_v32 = vmul.f32 %v17393_v19, %v4823_v49  ;;  %v17844_v27 = vld [vmem:[#allocation196_spill] sm:$0xff]  ;;  %v17846_v49 = vld [vmem:[#allocation201_spill] sm:$0xff]  ;;  %v17848_v25 = vld [vmem:[#allocation198_spill] sm:$0xff] }
 0x716   : > { %v5110_v48 = vmul.f32 %v12711_v22, %v17829_v17  ;;  %v14261_v57 = vmul.f32 %v17393_v19, %v17831_v37  ;;  %v6798_v12 = vsel %vm15886_vm13, %v6291_v1, %v6797_v23  ;;  %vm6930_vm7 = vnez %v6910_v16  ;;  %v956_v1 = vld [vmem:[%s8798_s20 + $0x58] sm:$0xff]  ;;  %v17850_v53 = vld [vmem:[#allocation203_spill] sm:$0xff]  ;;  %v17857_v37 = vld [vmem:[#allocation205_spill] sm:$0xff] }
 0x717   : > { %v17833_v51 = vmax.f32 %v17832_v62, 0.0  ;;  %v17835_v50 = vmax.f32 %v17834_v40, 0.0  ;;  %v6854_v28 = vadd.f32 %v6798_v12, %v17836_v14  ;;  %v6946_v56 = vsel %vm6930_vm7, 16843009, %v17407_v59  ;;  %v17859_v62 = vld [vmem:[#allocation202_spill] sm:$0xff]  ;;  %8213 = vmatmul.mubr.msk.f32.gmra.mxu0 %vm15881_vm2, %v956_v1 }
 0x718   : > { %v6456_v46 = vadd.f32 %v17837_v9, %v5375_v32  ;;  %v17839_v6 = vmax.f32 %v17838_v43, 0.0  ;;  %v6962_v61 = vunpack.c.0.s8 %v6946_v56  ;;  %v17841_v24 = vmax.f32 %v17840_v44, 0.0  ;;  %v17862_v9 = vld [vmem:[#allocation207_spill] sm:$0xff] }
 0x719   : > { %v5112_v30 = vmul.f32 %v12654_v63, %v17833_v51  ;;  %v5113_v7 = vmul.f32 %v12615_v10, %v17835_v50  ;;  %v17843_v13 = vmax.f32 %v17842_v55, 0.0  ;;  %v17845_v34 = vmax.f32 %v17844_v27, 0.0  ;;  %v957_v50 = vld [vmem:[%s8798_s20 + $0x60] sm:$0xff]  ;;  %v17866_v55 = vld [vmem:[#allocation209_spill] sm:$0xff]  ;;  %v17868_v27 = vld [vmem:[#allocation206_spill] sm:$0xff] }
 0x71a   : > { %v5114_v39 = vmul.f32 %v12711_v22, %v17839_v6  ;;  %v5115_v42 = vmul.f32 %v17393_v19, %v17841_v24  ;;  %v6457_v35 = vrot.slane %v6456_v46, 4  ;;  %v17847_v18 = vmax.f32 %v17846_v49, 0.0  ;;  %8215 = vmatprep.mubr.msk.f32.mxu0 %vm15881_vm2, %v957_v50 }
 0x71b   : > { %v5116_v11 = vmul.f32 %v12654_v63, %v17843_v13  ;;  %v5117_v0 = vmul.f32 %v12615_v10, %v17845_v34  ;;  %v17849_v16 = vmax.f32 %v17848_v25, 0.0  ;;  %v17851_v41 = vmax.f32 %v17850_v53, 0.0  ;;  %v17872_v25 = vld [vmem:[#allocation215_spill] sm:$0xff] }
 0x71c   : > { %v5118_v47 = vmul.f32 %v12711_v22, %v17847_v18  ;;  %vm14298_vm7 = vcmp.ne.s32.totalorder %v6962_v61, 0  ;;  %v17852_v32 = vmov 0  ;;  %v17856_v17 = vmax.f32 %v17855_v60, 0.0  ;;  %v17864_v61 = vld [vmem:[#allocation204_spill] sm:$0xff] }
 0x71d   : > { %v5119_v5 = vmul.f32 %v17393_v19, %v17849_v16  ;;  %v5120_v23 = vmul.f32 %v12654_v63, %v17851_v41  ;;  %v17853_v32 = vsel %vm14298_vm7, 4294967295, %v17852_v32  ;;  %v17858_v31 = vmax.f32 %v17857_v37, 0.0  ;;  %v958_v41 = vld [vmem:[%s8798_s20 + $0x68] sm:$0xff] }
 0x71e   : > { %17854 = vst [vmem:[#allocation316_spill] sm:$0xff] %v17853_v32  ;;  %v5121_v29 = vmul.f32 %v12615_v10, %v17856_v17  ;;  %v17860_v51 = vmax.f32 %v17859_v62, 0.0  ;;  %v14314_v14 = vsel %vm14298_vm7, %v6854_v28, -1e+30  ;;  %v14316_v56 = vadd.f32 %v6457_v35, %v6456_v46  ;;  %v17870_v35 = vld [vmem:[#allocation211_spill] sm:$0xff]  ;;  %v17874_v60 = vld [vmem:[#allocation208_spill] sm:$0xff]  ;;  %8216 = vmatmul.mubr.msk.f32.gmra.mxu0 %vm15881_vm2, %v958_v41 }
 0x71f   : > { %v5122_v12 = vmul.f32 %v12711_v22, %v17858_v31  ;;  %17861 = vst [vmem:[#allocation311_spill] sm:$0xff] %v14314_v14  ;;  %v17863_v43 = vmax.f32 %v17862_v9, 0.0  ;;  %v17865_v44 = vmax.f32 %v17864_v61, 0.0  ;;  %7037 = vmax.xlane.f32.xlu0 %v14314_v14  ;;  %v17867_v13 = vmax.f32 %v17866_v55, 0.0  ;;  %v17876_v31 = vld [vmem:[#allocation213_spill] sm:$0xff]  ;;  %v17878_v9 = vld [vmem:[#allocation210_spill] sm:$0xff] }
 0x720   : > { %v5123_v40 = vmul.f32 %v17393_v19, %v17860_v51  ;;  %v17869_v34 = vmax.f32 %v17868_v27, 0.0  ;;  %v17871_v49 = vmax.f32 %v17870_v35, 0.0  ;;  %v17873_v16 = vmax.f32 %v17872_v25, 0.0  ;;  %v17880_v55 = vld [vmem:[#allocation212_spill] sm:$0xff]  ;;  %v17884_v25 = vld [vmem:[#allocation214_spill] sm:$0xff] }
 0x721   : > { %v5124_v6 = vmul.f32 %v12654_v63, %v17863_v43  ;;  %v5125_v24 = vmul.f32 %v12615_v10, %v17865_v44  ;;  %v5126_v28 = vmul.f32 %v12711_v22, %v17867_v13  ;;  %v17875_v17 = vmax.f32 %v17874_v60, 0.0  ;;  %v959_v44 = vld [vmem:[%s8798_s20 + $0x70] sm:$0xff] }
 0x722   : > { %v5127_v46 = vmul.f32 %v17393_v19, %v17869_v34  ;;  %v5128_v18 = vmul.f32 %v12654_v63, %v17871_v49  ;;  %v5132_v53 = vmul.f32 %v12654_v63, %v17873_v16  ;;  %v17877_v62 = vmax.f32 %v17876_v31, 0.0  ;;  %v17882_v34 = vld [vmem:[#allocation217_spill] sm:$0xff]  ;;  %8218 = vmatprep.mubr.msk.f32.mxu0 %vm15881_vm2, %v959_v44 }
 0x723   : > { %v5129_v37 = vmul.f32 %v12615_v10, %v17875_v17  ;;  %v17879_v43 = vmax.f32 %v17878_v9, 0.0  ;;  %v17881_v13 = vmax.f32 %v17880_v55, 0.0  ;;  %v17883_v35 = vmax.f32 %v17882_v34, 0.0  ;;  %v17886_v17 = vld [vmem:[#allocation219_spill] sm:$0xff]  ;;  %v17888_v9 = vld [vmem:[#allocation216_spill] sm:$0xff] }
 0x724   : > { %v5130_v51 = vmul.f32 %v12711_v22, %v17877_v62  ;;  %v17885_v16 = vmax.f32 %v17884_v25, 0.0  ;;  %v17887_v31 = vmax.f32 %v17886_v17, 0.0  ;;  %v17889_v50 = vmax.f32 %v17888_v9, 0.0  ;;  %v960_v25 = vld [vmem:[%s8798_s20 + $0x78] sm:$0xff] }
 0x725   : > { %v5131_v61 = vmul.f32 %v17393_v19, %v17879_v43  ;;  %v5133_v27 = vmul.f32 %v12615_v10, %v17881_v13  ;;  %v5134_v49 = vmul.f32 %v12711_v22, %v17883_v35  ;;  %v5860_v1 = vadd.f32 %v5109_v8, %v5108_v20  ;;  %8219 = vmatmul.mubr.msk.f32.gmra.mxu0 %vm15881_vm2, %v960_v25 }
 0x726   : > { %v5135_v60 = vmul.f32 %v17393_v19, %v17885_v16  ;;  %v5136_v62 = vmul.f32 %v12654_v63, %v17887_v31  ;;  %v5137_v43 = vmul.f32 %v12615_v10, %v17889_v50  ;;  %v5869_v55 = vadd.f32 %v5113_v7, %v5112_v30  ;;  %v17890_v16 = vld [vmem:[#allocation221_spill] sm:$0xff]  ;;  %v17892_v7 = vld [vmem:[#allocation218_spill] sm:$0xff] }
 0x727   : > { %v5878_v21 = vadd.f32 %v5117_v0, %v5116_v11  ;;  %v5887_v13 = vadd.f32 %v5121_v29, %v5120_v23  ;;  %v5896_v34 = vadd.f32 %v5125_v24, %v5124_v6  ;;  %v5905_v35 = vadd.f32 %v5129_v37, %v5128_v18 }
 0x728   : > { %v5914_v54 = vadd.f32 %v5133_v27, %v5132_v53  ;;  %v17891_v17 = vmax.f32 %v17890_v16, 0.0  ;;  %v5861_v32 = vadd.f32 %v5860_v1, %v5110_v48  ;;  %v5870_v9 = vadd.f32 %v5869_v55, %v5114_v39 }
 0x729   : > { %v5879_v14 = vadd.f32 %v5878_v21, %v5118_v47  ;;  %v5888_v50 = vadd.f32 %v5887_v13, %v5122_v12  ;;  %v5897_v20 = vadd.f32 %v5896_v34, %v5126_v28  ;;  %v5906_v8 = vadd.f32 %v5905_v35, %v5130_v51 }
 0x72a   : > { %v5138_v31 = vmul.f32 %v12711_v22, %v17891_v17  ;;  %v5915_v30 = vadd.f32 %v5914_v54, %v5134_v49  ;;  %v17893_v11 = vmax.f32 %v17892_v7, 0.0  ;;  %v5862_v23 = vadd.f32 %v5861_v32, %v14261_v57 }
 0x72b   : > { %v5871_v29 = vadd.f32 %v5870_v9, %v5115_v42  ;;  %v5880_v6 = vadd.f32 %v5879_v14, %v5119_v5  ;;  %v5889_v24 = vadd.f32 %v5888_v50, %v5123_v40  ;;  %v5898_v18 = vadd.f32 %v5897_v20, %v5127_v46 }
 0x72c   : > { %v5139_v0 = vmul.f32 %v17393_v19, %v17893_v11  ;;  %v5907_v53 = vadd.f32 %v5906_v8, %v5131_v61  ;;  %v5916_v48 = vadd.f32 %v5915_v30, %v5135_v60  ;;  %v5863_v39 = vrot.slane %v5862_v23, 4 }
 0x72d   : > { %v5872_v21 = vrot.slane %v5871_v29, 4  ;;  %v5881_v47 = vrot.slane %v5880_v6, 4  ;;  %v5923_v12 = vadd.f32 %v5137_v43, %v5136_v62  ;;  %v5890_v28 = vrot.slane %v5889_v24, 4 }
 0x72e   : > { %v5899_v54 = vrot.slane %v5898_v18, 4  ;;  %v5908_v41 = vrot.slane %v5907_v53, 4  ;;  %v5917_v1 = vrot.slane %v5916_v48, 4  ;;  %v5864_v37 = vadd.f32 %v5863_v39, %v5862_v23 }
 0x72f   : > { %v5873_v51 = vadd.f32 %v5872_v21, %v5871_v29  ;;  %v5882_v44 = vadd.f32 %v5881_v47, %v5880_v6  ;;  %v5924_v57 = vadd.f32 %v5923_v12, %v5138_v31  ;;  %v5891_v42 = vadd.f32 %v5890_v28, %v5889_v24  ;;  %v17895_v28 = vld [vmem:[#allocation404_spill] sm:$0xff] }
 0x730   : > { %v5900_v5 = vadd.f32 %v5899_v54, %v5898_v18  ;;  %v5909_v32 = vadd.f32 %v5908_v41, %v5907_v53  ;;  %v5918_v14 = vadd.f32 %v5917_v1, %v5916_v48  ;;  %v5865_v40 = vrot.slane %v5864_v37, 2 }
 0x731   : > { %v5874_v46 = vrot.slane %v5873_v51, 2  ;;  %v5883_v61 = vrot.slane %v5882_v44, 2  ;;  %v5925_v27 = vadd.f32 %v5924_v57, %v5139_v0  ;;  %v5892_v49 = vrot.slane %v5891_v42, 2  ;;  %v17899_v57 = vld [vmem:[#allocation432_spill] sm:$0xff] }
 0x732   : > { %v5901_v60 = vrot.slane %v5900_v5, 2  ;;  %v5910_v55 = vrot.slane %v5909_v32, 2  ;;  %v5919_v62 = vrot.slane %v5918_v14, 2  ;;  %v5866_v43 = vadd.f32 %v5865_v40, %v5864_v37  ;;  %v17897_v37 = vld [vmem:[#allocation428_spill] sm:$0xff] }
 0x733   : > { %v5875_v13 = vadd.f32 %v5874_v46, %v5873_v51  ;;  %v5884_v34 = vadd.f32 %v5883_v61, %v5882_v44  ;;  %v5926_v35 = vrot.slane %v5925_v27, 4  ;;  %v5893_v25 = vadd.f32 %v5892_v49, %v5891_v42  ;;  %v17903_v49 = vld [vmem:[#allocation435_spill] sm:$0xff] }
 0x734   : > { %v5902_v16 = vadd.f32 %v5901_v60, %v5900_v5  ;;  %v5911_v17 = vadd.f32 %v5910_v55, %v5909_v32  ;;  %v5920_v31 = vadd.f32 %v5919_v62, %v5918_v14  ;;  %v5867_v9 = vrot.slane %v5866_v43, 1  ;;  %v17901_v32 = vld [vmem:[#allocation403_spill] sm:$0xff]  ;;  %v14396_v62 = vpop.permute.xlu0 %3785 }
 0x735   : > { %v5876_v50 = vrot.slane %v5875_v13, 1  ;;  %v5885_v20 = vrot.slane %v5884_v34, 1  ;;  %v5927_v8 = vadd.f32 %v5926_v35, %v5925_v27  ;;  %v5894_v30 = vrot.slane %v5893_v25, 1 }
 0x736   : > { %v5903_v7 = vrot.slane %v5902_v16, 1  ;;  %v5912_v11 = vrot.slane %v5911_v17, 1  ;;  %v5921_v0 = vrot.slane %v5920_v31, 1  ;;  %v5868_v23 = vadd.f32 %v5867_v9, %v5866_v43 }
 0x737   : > { %v5877_v29 = vadd.f32 %v5876_v50, %v5875_v13  ;;  %v5886_v6 = vadd.f32 %v5885_v20, %v5884_v34  ;;  %v5928_v24 = vrot.slane %v5927_v8, 2  ;;  %v5895_v18 = vadd.f32 %v5894_v30, %v5893_v25  ;;  %v17906_v13 = vld [vmem:[#allocation431_spill] sm:$0xff]  ;;  %v17908_v25 = vld [vmem:[#allocation437_spill] sm:$0xff] }
 0x738   : > { %v5904_v53 = vadd.f32 %v5903_v7, %v5902_v16  ;;  %v5913_v48 = vadd.f32 %v5912_v11, %v5911_v17  ;;  %v5922_v39 = vadd.f32 %v5921_v0, %v5920_v31  ;;  %vm17894_vm2 = vcmask 1041409   ;;  %v17910_v31 = vld [vmem:[#allocation433_spill] sm:$0xff]  ;;  %v17912_v7 = vld [vmem:[#allocation439_spill] sm:$0xff] }
 0x739   : > { %v5929_v21 = vadd.f32 %v5928_v24, %v5927_v8  ;;  %v6757_v47 = vsel %vm17894_vm2, %v5877_v29, %v5868_v23  ;;  %v6877_v12 = vunpack.c.2.s8 %v17747_v38  ;;  %v17896_v54 = vmax.f32 %v17895_v28, 0.0  ;;  %v17914_v29 = vld [vmem:[#allocation436_spill] sm:$0xff] }
 0x73a   : > { %v6758_v1 = vsel %vm15903_vm8, %v5886_v6, %v6757_v47  ;;  %v17898_v51 = vmax.f32 %v17897_v37, 0.0  ;;  %v17900_v42 = vmax.f32 %v17899_v57, 0.0  ;;  %v17902_v14 = vmax.f32 %v17901_v32, 0.0 }
 0x73b   : > { %v5300_v41 = vmul.f32 %v12654_v63, %v17896_v54  ;;  %v5930_v46 = vrot.slane %v5929_v21, 1  ;;  %v6759_v61 = vsel %vm15900_vm9, %v5895_v18, %v6758_v1  ;;  %v6899_v27 = vpack.c.b16 %v6877_v12, %v6877_v12  ;;  %v17916_v18 = vld [vmem:[#allocation441_spill] sm:$0xff]  ;;  %v17918_v12 = vld [vmem:[#allocation438_spill] sm:$0xff]  ;;  %v17920_v54 = vld [vmem:[#allocation443_spill] sm:$0xff] }
 0x73c   : > { %v5301_v44 = vmul.f32 %v12615_v10, %v17898_v51  ;;  %v5302_v5 = vmul.f32 %v12711_v22, %v17900_v42  ;;  %v5303_v40 = vmul.f32 %v17393_v19, %v17902_v14  ;;  %v17904_v60 = vmax.f32 %v17903_v49, 0.0  ;;  %v17924_v42 = vld [vmem:[#allocation357_spill] sm:$0xff]  ;;  %v17927_v49 = vld [vmem:[#allocation442_spill] sm:$0xff] }
 0x73d   : > { %vm17905_vm2 = vcmask 1044484   ;;  %v17907_v34 = vmax.f32 %v17906_v13, 0.0  ;;  %v17909_v16 = vmax.f32 %v17908_v25, 0.0  ;;  %v17911_v9 = vmax.f32 %v17910_v31, 0.0  ;;  %v17931_v31 = vld [vmem:[#allocation444_spill] sm:$0xff] }
 0x73e   : > { %v5304_v55 = vmul.f32 %v12654_v63, %v17904_v60  ;;  %v6760_v43 = vsel %vm17905_vm2, %v5904_v53, %v6759_v61  ;;  %v5931_v20 = vadd.f32 %v5930_v46, %v5929_v21  ;;  %v6900_v30 = vpack.c.b8 %v6899_v27, %v6899_v27  ;;  %v17925_v46 = vld [vmem:[#allocation445_spill] sm:$0xff] }
 0x73f   : > { %v5305_v35 = vmul.f32 %v12615_v10, %v17907_v34  ;;  %v5306_v17 = vmul.f32 %v12711_v22, %v17909_v16  ;;  %v5307_v50 = vmul.f32 %v17393_v19, %v17911_v9  ;;  %v6761_v8 = vsel %vm15899_vm11, %v5913_v48, %v6760_v43  ;;  %v17929_v34 = vld [vmem:[#allocation447_spill] sm:$0xff] }
 0x740   : > { %v17913_v11 = vmax.f32 %v17912_v7, 0.0  ;;  %v6762_v23 = vsel %vm15887_vm12, %v5922_v39, %v6761_v8  ;;  %v17915_v6 = vmax.f32 %v17914_v29, 0.0  ;;  %v17917_v53 = vmax.f32 %v17916_v18, 0.0  ;;  %v17922_v39 = vld [vmem:[#allocation440_spill] sm:$0xff]  ;;  %v17933_v8 = vld [vmem:[#allocation449_spill] sm:$0xff]  ;;  %v17938_v18 = vld [vmem:[#allocation451_spill] sm:$0xff] }
 0x741   : > { %v17919_v28 = vmax.f32 %v17918_v12, 0.0  ;;  %v6763_v48 = vsel %vm15886_vm13, %v5931_v20, %v6762_v23  ;;  %vm6925_vm2 = vnez %v6900_v30  ;;  %v17921_v1 = vmax.f32 %v17920_v54, 0.0  ;;  %v17936_v23 = vld [vmem:[#allocation446_spill] sm:$0xff] }
 0x742   : > { %v5308_v0 = vmul.f32 %v12654_v63, %v17913_v11  ;;  %v5309_v24 = vmul.f32 %v12615_v10, %v17915_v6  ;;  %v5310_v47 = vmul.f32 %v12711_v22, %v17917_v53  ;;  %v17923_v51 = vmax.f32 %v17922_v39, 0.0  ;;  %v14446_v11 = vpop.permute.xlu0 %3542 }
 0x743   : > { %v5311_v21 = vmul.f32 %v17393_v19, %v17919_v28  ;;  %v5312_v37 = vmul.f32 %v12654_v63, %v17921_v1  ;;  %v6849_v32 = vadd.f32 %v6763_v48, %v17924_v42  ;;  %v6941_v14 = vsel %vm6925_vm2, 16843009, %v17407_v59  ;;  %17935 = vst [vmem:[#allocation310_spill] sm:$0xff] %v14446_v11  ;;  %v17940_v28 = vld [vmem:[#allocation448_spill] sm:$0xff]  ;;  %v17942_v1 = vld [vmem:[#allocation453_spill] sm:$0xff] }
 0x744   : > { %v5313_v57 = vmul.f32 %v12615_v10, %v17923_v51  ;;  %v17926_v61 = vmax.f32 %v17925_v46, 0.0  ;;  %v17928_v60 = vmax.f32 %v17927_v49, 0.0  ;;  %v6957_v13 = vunpack.c.0.s8 %v6941_v14  ;;  %v17947_v14 = vld [vmem:[#allocation450_spill] sm:$0xff]  ;;  %v17949_v49 = vld [vmem:[#allocation455_spill] sm:$0xff] }
 0x745   : > { %v17930_v25 = vmax.f32 %v17929_v34, 0.0  ;;  %v17932_v9 = vmax.f32 %v17931_v31, 0.0  ;;  %v17934_v30 = vmax.f32 %v17933_v8, 0.0  ;;  %v17937_v29 = vmax.f32 %v17936_v23, 0.0 }
 0x746   : > { %v5314_v27 = vmul.f32 %v12711_v22, %v17926_v61  ;;  %v5315_v43 = vmul.f32 %v17393_v19, %v17928_v60  ;;  %v17939_v53 = vmax.f32 %v17938_v18, 0.0  ;;  %v17941_v48 = vmax.f32 %v17940_v28, 0.0  ;;  %v17958_v28 = vld [vmem:[#allocation459_spill] sm:$0xff] }
 0x747   : > { %v5316_v16 = vmul.f32 %v12654_v63, %v17930_v25  ;;  %v5317_v20 = vmul.f32 %v12615_v10, %v17932_v9  ;;  %v5318_v7 = vmul.f32 %v12711_v22, %v17934_v30  ;;  %v5319_v6 = vmul.f32 %v17393_v19, %v17937_v29  ;;  %v17951_v25 = vld [vmem:[#allocation452_spill] sm:$0xff]  ;;  %v17956_v29 = vld [vmem:[#allocation454_spill] sm:$0xff] }
 0x748   : > { %v5320_v12 = vmul.f32 %v12654_v63, %v17939_v53  ;;  %v5321_v54 = vmul.f32 %v12615_v10, %v17941_v48  ;;  %v17943_v39 = vmax.f32 %v17942_v1, 0.0  ;;  %vm14460_vm2 = vcmp.ne.s32.totalorder %v6957_v13, 0  ;;  %v17954_v13 = vld [vmem:[#allocation457_spill] sm:$0xff] }
 0x749   : > { %v17944_v42 = vmov 0  ;;  %v17948_v46 = vmax.f32 %v17947_v14, 0.0  ;;  %v17950_v60 = vmax.f32 %v17949_v49, 0.0  ;;  %v17952_v31 = vmax.f32 %v17951_v25, 0.0  ;;  %v17964_v25 = vld [vmem:[#allocation458_spill] sm:$0xff] }
 0x74a   : > { %v5322_v51 = vmul.f32 %v12711_v22, %v17943_v39  ;;  %v17945_v42 = vsel %vm14460_vm2, 4294967295, %v17944_v42  ;;  %v14475_v8 = vsel %vm14460_vm2, %v6849_v32, -1e+30  ;;  %v17955_v30 = vmax.f32 %v17954_v13, 0.0  ;;  %v17960_v39 = vld [vmem:[#allocation456_spill] sm:$0xff] }
 0x74b   : > { %17946 = vst [vmem:[#allocation317_spill] sm:$0xff] %v17945_v42  ;;  %v5323_v61 = vmul.f32 %v17393_v19, %v17948_v46  ;;  %v5324_v34 = vmul.f32 %v12654_v63, %v17950_v60  ;;  %v5325_v9 = vmul.f32 %v12615_v10, %v17952_v31  ;;  %17953 = vst [vmem:[#allocation312_spill] sm:$0xff] %v14475_v8  ;;  %v17957_v18 = vmax.f32 %v17956_v29, 0.0  ;;  %v17962_v32 = vld [vmem:[#allocation460_spill] sm:$0xff] }
 0x74c   : > { %v5326_v23 = vmul.f32 %v12711_v22, %v17955_v30  ;;  %v17959_v48 = vmax.f32 %v17958_v28, 0.0  ;;  %7027 = vmax.xlane.f32.xlu1 %v14475_v8  ;;  %v17961_v14 = vmax.f32 %v17960_v39, 0.0  ;;  %v17963_v49 = vmax.f32 %v17962_v32, 0.0 }
 0x74d   : > { %v5327_v53 = vmul.f32 %v17393_v19, %v17957_v18  ;;  %v17965_v31 = vmax.f32 %v17964_v25, 0.0  ;;  %v6292_v30 = vadd.f32 %v5301_v44, %v5300_v41  ;;  %v6301_v29 = vadd.f32 %v5305_v35, %v5304_v55 }
 0x74e   : > { %v5328_v1 = vmul.f32 %v12654_v63, %v17959_v48  ;;  %v5329_v46 = vmul.f32 %v12615_v10, %v17961_v14  ;;  %v5330_v60 = vmul.f32 %v12711_v22, %v17963_v49  ;;  %v6310_v18 = vadd.f32 %v5309_v24, %v5308_v0  ;;  %v14496_v48 = vpop.permute.xlu1 %3667  ;;  %v14498_v14 = vpop.permute.xlu0 %3637 }
 0x74f   : > { %v5331_v13 = vmul.f32 %v17393_v19, %v17965_v31  ;;  %v6319_v28 = vadd.f32 %v5313_v57, %v5312_v37  ;;  %v6328_v42 = vadd.f32 %v5317_v20, %v5316_v16  ;;  %v6293_v8 = vadd.f32 %v6292_v30, %v5302_v5 }
 0x750   : > { %v6337_v2 = vadd.f32 %v5321_v54, %v5320_v12  ;;  %v6346_v39 = vadd.f32 %v5325_v9, %v5324_v34  ;;  %v6355_v58 = vadd.f32 %v5329_v46, %v5328_v1  ;;  %v6302_v32 = vadd.f32 %v6301_v29, %v5306_v17 }
 0x751   : > { %v6311_v45 = vadd.f32 %v6310_v18, %v5310_v47  ;;  %v6320_v49 = vadd.f32 %v6319_v28, %v5314_v27  ;;  %v6329_v3 = vadd.f32 %v6328_v42, %v5318_v7  ;;  %v6294_v25 = vadd.f32 %v6293_v8, %v5303_v40 }
 0x752   : > { %v6338_v11 = vadd.f32 %v6337_v2, %v5322_v51  ;;  %v6347_v31 = vadd.f32 %v6346_v39, %v5326_v23  ;;  %v6356_v41 = vadd.f32 %v6355_v58, %v5330_v60  ;;  %v6303_v44 = vadd.f32 %v6302_v32, %v5307_v50  ;;  %v14500_v17 = vpop.permute.xlu1 %3717  ;;  %v14502_v7 = vpop.permute.xlu0 %3671 }
 0x753   : > { %v6312_v55 = vadd.f32 %v6311_v45, %v5311_v21  ;;  %v6321_v35 = vadd.f32 %v6320_v49, %v5315_v43  ;;  %v6330_v0 = vadd.f32 %v6329_v3, %v5319_v6  ;;  %v6295_v24 = vrot.slane %v6294_v25, 4 }
 0x754   : > { %v6339_v37 = vadd.f32 %v6338_v11, %v5323_v61  ;;  %v6348_v5 = vadd.f32 %v6347_v31, %v5327_v53  ;;  %v6357_v57 = vadd.f32 %v6356_v41, %v5331_v13  ;;  %v6304_v16 = vrot.slane %v6303_v44, 4 }
 0x755   : > { %v6313_v20 = vrot.slane %v6312_v55, 4  ;;  %v6322_v12 = vrot.slane %v6321_v35, 4  ;;  %v6331_v54 = vrot.slane %v6330_v0, 4  ;;  %v6296_v47 = vadd.f32 %v6295_v24, %v6294_v25 }
 0x756   : > { %v6340_v27 = vrot.slane %v6339_v37, 4  ;;  %v6349_v40 = vrot.slane %v6348_v5, 4  ;;  %v6358_v2 = vrot.slane %v6357_v57, 4  ;;  %v6305_v58 = vadd.f32 %v6304_v16, %v6303_v44  ;;  %v14504_v30 = vpop.permute.xlu1 %3770  ;;  %v14506_v32 = vpop.permute.xlu0 %3736  ;;  %v6862_v44 = vld [vmem:[%s8807_s24 + $0x18] sm:$0xff] }
 0x757   : > { %v6314_v45 = vadd.f32 %v6313_v20, %v6312_v55  ;;  %v6323_v50 = vadd.f32 %v6322_v12, %v6321_v35  ;;  %v6332_v3 = vadd.f32 %v6331_v54, %v6330_v0  ;;  %v6297_v21 = vrot.slane %v6296_v47, 2  ;;  %17966 = vst [vmem:[#allocation319_spill] sm:$0xff] %v14506_v32 }
 0x758   : > { %v6341_v43 = vadd.f32 %v6340_v27, %v6339_v37  ;;  %v6350_v11 = vadd.f32 %v6349_v40, %v6348_v5  ;;  %v6359_v6 = vadd.f32 %v6358_v2, %v6357_v57  ;;  %v6306_v51 = vrot.slane %v6305_v58, 2  ;;  %v17975_v2 = vld [vmem:[#allocation288_spill] sm:$0xff] }
 0x759   : > { %v6315_v42 = vrot.slane %v6314_v45, 2  ;;  %v6324_v61 = vrot.slane %v6323_v50, 2  ;;  %v6333_v34 = vrot.slane %v6332_v3, 2  ;;  %v6298_v9 = vadd.f32 %v6297_v21, %v6296_v47 }
 0x75a   : > { %v6342_v8 = vrot.slane %v6341_v43, 2  ;;  %v6351_v23 = vrot.slane %v6350_v11, 2  ;;  %v6360_v53 = vrot.slane %v6359_v6, 2  ;;  %v6307_v1 = vadd.f32 %v6306_v51, %v6305_v58  ;;  %v14540_v21 = vpop.permute.xlu0 %3800  ;;  %v17978_v51 = vld [vmem:[#allocation223_spill] sm:$0xff] }
 0x75b   : > { %v6316_v46 = vadd.f32 %v6315_v42, %v6314_v45  ;;  %v6325_v60 = vadd.f32 %v6324_v61, %v6323_v50  ;;  %v6334_v13 = vadd.f32 %v6333_v34, %v6332_v3  ;;  %v6299_v29 = vrot.slane %v6298_v9, 1  ;;  %17977 = vst [vmem:[#allocation328_spill] sm:$0xff] %v14540_v21 }
 0x75c   : > { %v6343_v18 = vadd.f32 %v6342_v8, %v6341_v43  ;;  %v6352_v28 = vadd.f32 %v6351_v23, %v6350_v11  ;;  %v6361_v39 = vadd.f32 %v6360_v53, %v6359_v6  ;;  %v6308_v49 = vrot.slane %v6307_v1, 1  ;;  %v17981_v8 = vld [vmem:[#allocation220_spill] sm:$0xff] }
 0x75d   : > { %v6317_v25 = vrot.slane %v6316_v46, 1  ;;  %v6326_v31 = vrot.slane %v6325_v60, 1  ;;  %v6335_v41 = vrot.slane %v6334_v13, 1  ;;  %v14511_v55 = vadd.f32 %v13929_v33, %v14226_v52 }
 0x75e   : > { %v6300_v35 = vadd.f32 %v6299_v29, %v6298_v9  ;;  %v6344_v0 = vrot.slane %v6343_v18, 1  ;;  %v6353_v24 = vrot.slane %v6352_v28, 1  ;;  %v17968_v37 = vrot.slane %v14207_v15, 1  ;;  %v18042_v9 = vld [vmem:[#allocation246_spill] sm:$0xff] }
 0x75f   : > { %17967 = vst [vmem:[#allocation321_spill] sm:$0xff] %v14511_v55  ;;  %v6309_v57 = vadd.f32 %v6308_v49, %v6307_v1  ;;  %v6318_v16 = vadd.f32 %v6317_v25, %v6316_v46  ;;  %v6362_v20 = vrot.slane %v6361_v39, 1  ;;  %v17970_v12 = vmax.f32 %v14232_v36, 0.0  ;;  %v14536_v36 = vpop.permute.xlu1 %3804  ;;  %v17983_v46 = vld [vmem:[#allocation225_spill] sm:$0xff]  ;;  %v18051_v55 = vld [vmem:[#allocation250_spill] sm:$0xff] }
 0x760   : > { %v14516_v5 = vadd.f32 %v17968_v37, %v14207_v15  ;;  %v17972_v33 = vrot.slane %v14316_v56, 2  ;;  %v6327_v47 = vadd.f32 %v6326_v31, %v6325_v60  ;;  %vm6866_vm13 = vnez %v6862_v44  ;;  %17976 = vst [vmem:[#allocation322_spill] sm:$0xff] %v14536_v36 }
 0x761   : > { %v14521_v54 = vmul.f32 %v12711_v22, %v17970_v12  ;;  %v6336_v27 = vadd.f32 %v6335_v41, %v6334_v13  ;;  %vm17973_vm12 = vcmask 1041409   ;;  %v14530_v15 = vsel %vm6866_vm13, 16843009, %v17407_v59  ;;  %v17985_v13 = vld [vmem:[#allocation222_spill] sm:$0xff]  ;;  %v17990_v41 = vld [vmem:[#allocation224_spill] sm:$0xff] }
 0x762   : > { %17969 = vst [vmem:[#allocation318_spill] sm:$0xff] %v14516_v5  ;;  %v14526_v52 = vadd.f32 %v17972_v33, %v14316_v56  ;;  %v6799_v40 = vsel %vm17973_vm12, %v6309_v57, %v6300_v35  ;;  %17974 = vst [vmem:[#allocation325_spill] sm:$0xff] %v14530_v15  ;;  %v14534_v58 = vadd.f32 %v14396_v62, %v17975_v2  ;;  %v6883_v56 = vunpack.c.0.s8 %v14530_v15  ;;  %v17997_v33 = vld [vmem:[#allocation231_spill] sm:$0xff]  ;;  %v18049_v15 = vld [vmem:[#allocation253_spill] sm:$0xff] }
 0x763   : > { %17971 = vst [vmem:[#allocation323_spill] sm:$0xff] %v14521_v54  ;;  %v6345_v45 = vadd.f32 %v6344_v0, %v6343_v18  ;;  %v6354_v50 = vadd.f32 %v6353_v24, %v6352_v28  ;;  %v6800_v3 = vsel %vm15903_vm8, %v6318_v16, %v6799_v40  ;;  %v6363_v43 = vadd.f32 %v6362_v20, %v6361_v39  ;;  %v17987_v28 = vld [vmem:[#allocation227_spill] sm:$0xff]  ;;  %v17992_v0 = vld [vmem:[#allocation229_spill] sm:$0xff]  ;;  %v17995_v16 = vld [vmem:[#allocation226_spill] sm:$0xff] }
 0x764   : > { %v6801_v11 = vsel %vm15900_vm9, %v6327_v47, %v6800_v3  ;;  %v14545_v6 = vadd.f32 %v14496_v48, %v17530_v4  ;;  %v17979_v62 = vmax.f32 %v17978_v51, 0.0  ;;  %vm17980_vm12 = vcmask 1044484   ;;  %v17999_v40 = vld [vmem:[#allocation228_spill] sm:$0xff]  ;;  %v14582_v3 = vpop.permute.xlu1 %3622  ;;  %v18003_v51 = vld [vmem:[#allocation233_spill] sm:$0xff] }
 0x765   : > { %v6802_v61 = vsel %vm17980_vm12, %v6336_v27, %v6801_v11  ;;  %v6911_v34 = vpack.c.b16 %v6883_v56, %v6883_v56  ;;  %v17982_v23 = vmax.f32 %v17981_v8, 0.0  ;;  %v17984_v60 = vmax.f32 %v17983_v46, 0.0  ;;  %18001 = vst [vmem:[#allocation18_spill] sm:$0xff] %v14582_v3  ;;  %v18002_v56 = vld [vmem:[#allocation360_spill] sm:$0xff]  ;;  %v18008_v46 = vld [vmem:[#allocation235_spill] sm:$0xff] }
 0x766   : > { %v5140_v42 = vmul.f32 %v12654_v63, %v17979_v62  ;;  %v6803_v1 = vsel %vm15899_vm11, %v6345_v45, %v6802_v61  ;;  %v17986_v29 = vmax.f32 %v17985_v13, 0.0  ;;  %v17988_v39 = vmax.f32 %v17987_v28, 0.0  ;;  %v18005_v61 = vld [vmem:[#allocation230_spill] sm:$0xff] }
 0x767   : > { %v5141_v53 = vmul.f32 %v12615_v10, %v17982_v23  ;;  %v5142_v48 = vmul.f32 %v12711_v22, %v17984_v60  ;;  %vm17989_vm13 = vcmask 1046534   ;;  %v6912_v31 = vpack.c.b8 %v6911_v34, %v6911_v34  ;;  %v14591_v23 = vpop.permute.xlu0 %3527 }
 0x768   : > { %v5143_v18 = vmul.f32 %v17393_v19, %v17986_v29  ;;  %v5144_v49 = vmul.f32 %v12654_v63, %v17988_v39  ;;  %v6804_v25 = vsel %vm17989_vm13, %v6354_v50, %v6803_v1  ;;  %v17991_v44 = vmax.f32 %v17990_v41, 0.0  ;;  %18007 = vst [vmem:[#allocation327_spill] sm:$0xff] %v14591_v23  ;;  %v18010_v29 = vld [vmem:[#allocation232_spill] sm:$0xff]  ;;  %v14650_v5 = vpop.permute.xlu1 %3686 }
 0x769   : > { %v17993_v24 = vmax.f32 %v17992_v0, 0.0  ;;  %vm17994_vm12 = vcmask 1047559   ;;  %v17996_v20 = vmax.f32 %v17995_v16, 0.0  ;;  %v17998_v47 = vmax.f32 %v17997_v33, 0.0  ;;  %v18014_v0 = vld [vmem:[#allocation234_spill] sm:$0xff]  ;;  %v18016_v16 = vld [vmem:[#allocation239_spill] sm:$0xff] }
 0x76a   : > { %v5145_v35 = vmul.f32 %v12615_v10, %v17991_v44  ;;  %v6805_v57 = vsel %vm17994_vm12, %v6363_v43, %v6804_v25  ;;  %v18000_v45 = vmax.f32 %v17999_v40, 0.0  ;;  %vm6931_vm13 = vnez %v6912_v31  ;;  %v18012_v25 = vld [vmem:[#allocation237_spill] sm:$0xff]  ;;  %18044 = vst [vmem:[#allocation22_spill] sm:$0xff] %v14650_v5 }
 0x76b   : > { %v5146_v37 = vmul.f32 %v12711_v22, %v17993_v24  ;;  %v5147_v12 = vmul.f32 %v17393_v19, %v17996_v20  ;;  %v5148_v27 = vmul.f32 %v12654_v63, %v17998_v47  ;;  %v6855_v11 = vadd.f32 %v6805_v57, %v18002_v56  ;;  %v18018_v47 = vld [vmem:[#allocation236_spill] sm:$0xff]  ;;  %v18020_v56 = vld [vmem:[#allocation241_spill] sm:$0xff]  ;;  %v14665_v23 = vpop.permute.xlu0 %3656 }
 0x76c   : > { %v5149_v50 = vmul.f32 %v12615_v10, %v18000_v45  ;;  %v18004_v62 = vmax.f32 %v18003_v51, 0.0  ;;  %v18006_v34 = vmax.f32 %v18005_v61, 0.0  ;;  %v6947_v1 = vsel %vm6931_vm13, 16843009, %v17407_v59  ;;  %v18022_v61 = vld [vmem:[#allocation238_spill] sm:$0xff]  ;;  %18053 = vst [vmem:[#allocation19_spill] sm:$0xff] %v14665_v23 }
 0x76d   : > { %v18009_v60 = vmax.f32 %v18008_v46, 0.0  ;;  %v18011_v28 = vmax.f32 %v18010_v29, 0.0  ;;  %v18013_v31 = vmax.f32 %v18012_v25, 0.0  ;;  %v6963_v44 = vunpack.c.0.s8 %v6947_v1  ;;  %v18024_v46 = vld [vmem:[#allocation243_spill] sm:$0xff] }
 0x76e   : > { %v5150_v43 = vmul.f32 %v12711_v22, %v18004_v62  ;;  %v5151_v8 = vmul.f32 %v17393_v19, %v18006_v34  ;;  %v18015_v24 = vmax.f32 %v18014_v0, 0.0  ;;  %v18017_v20 = vmax.f32 %v18016_v16, 0.0 }
 0x76f   : > { %v5152_v13 = vmul.f32 %v12654_v63, %v18009_v60  ;;  %v5153_v39 = vmul.f32 %v12615_v10, %v18011_v28  ;;  %v5154_v41 = vmul.f32 %v12711_v22, %v18013_v31  ;;  %v18019_v40 = vmax.f32 %v18018_v47, 0.0  ;;  %v18026_v28 = vld [vmem:[#allocation240_spill] sm:$0xff]  ;;  %v18033_v47 = vld [vmem:[#allocation242_spill] sm:$0xff] }
 0x770   : > { %v5155_v57 = vmul.f32 %v17393_v19, %v18015_v24  ;;  %v5156_v33 = vmul.f32 %v12654_v63, %v18017_v20  ;;  %v18021_v51 = vmax.f32 %v18020_v56, 0.0  ;;  %v18023_v34 = vmax.f32 %v18022_v61, 0.0  ;;  %v18031_v24 = vld [vmem:[#allocation245_spill] sm:$0xff] }
 0x771   : > { %v5157_v45 = vmul.f32 %v12615_v10, %v18019_v40  ;;  %v18025_v60 = vmax.f32 %v18024_v46, 0.0  ;;  %v18027_v25 = vmax.f32 %v18026_v28, 0.0  ;;  %vm14624_vm12 = vcmp.ne.s32.totalorder %v6963_v44, 0  ;;  %v18038_v44 = vld [vmem:[#allocation244_spill] sm:$0xff] }
 0x772   : > { %v5158_v62 = vmul.f32 %v12711_v22, %v18021_v51  ;;  %v5159_v1 = vmul.f32 %v17393_v19, %v18023_v34  ;;  %v18028_v0 = vmov 0  ;;  %v18032_v16 = vmax.f32 %v18031_v24, 0.0  ;;  %v18035_v51 = vld [vmem:[#allocation247_spill] sm:$0xff] }
 0x773   : > { %v5160_v29 = vmul.f32 %v12654_v63, %v18025_v60  ;;  %v5161_v31 = vmul.f32 %v12615_v10, %v18027_v25  ;;  %v18029_v0 = vsel %vm14624_vm12, 4294967295, %v18028_v0  ;;  %v18034_v40 = vmax.f32 %v18033_v47, 0.0  ;;  %v18040_v25 = vld [vmem:[#allocation249_spill] sm:$0xff] }
 0x774   : > { %18030 = vst [vmem:[#allocation20_spill] sm:$0xff] %v18029_v0  ;;  %v5162_v20 = vmul.f32 %v12711_v22, %v18032_v16  ;;  %v18036_v61 = vmax.f32 %v18035_v51, 0.0  ;;  %v14639_v46 = vsel %vm14624_vm12, %v6855_v11, -1e+30  ;;  %v18039_v60 = vmax.f32 %v18038_v44, 0.0  ;;  %v18045_v51 = vld [vmem:[#allocation251_spill] sm:$0xff] }
 0x775   : > { %v5163_v56 = vmul.f32 %v17393_v19, %v18034_v40  ;;  %18037 = vst [vmem:[#allocation17_spill] sm:$0xff] %v14639_v46  ;;  %v18041_v24 = vmax.f32 %v18040_v25, 0.0  ;;  %v18043_v47 = vmax.f32 %v18042_v9, 0.0  ;;  %7039 = vmax.xlane.f32.xlu0 %v14639_v46  ;;  %v18047_v0 = vld [vmem:[#allocation248_spill] sm:$0xff]  ;;  %v18050_v25 = vmax.f32 %v18049_v15, 0.0 }
 0x776   : > { %v5164_v34 = vmul.f32 %v12654_v63, %v18036_v61  ;;  %v5165_v28 = vmul.f32 %v12615_v10, %v18039_v60  ;;  %v18046_v61 = vmax.f32 %v18045_v51, 0.0  ;;  %v18048_v44 = vmax.f32 %v18047_v0, 0.0 }
 0x777   : > { %v5166_v16 = vmul.f32 %v12711_v22, %v18041_v24  ;;  %v5167_v40 = vmul.f32 %v17393_v19, %v18043_v47  ;;  %v5170_v24 = vmul.f32 %v12711_v22, %v18050_v25  ;;  %v18052_v9 = vmax.f32 %v18051_v55, 0.0 }
 0x778   : > { %v5168_v11 = vmul.f32 %v12654_v63, %v18046_v61  ;;  %v5169_v60 = vmul.f32 %v12615_v10, %v18048_v44  ;;  %v5932_v5 = vadd.f32 %v5141_v53, %v5140_v42  ;;  %v5941_v46 = vadd.f32 %v5145_v35, %v5144_v49  ;;  %v14667_v42 = vpop.permute.xlu1 %3755 }
 0x779   : > { %v5171_v47 = vmul.f32 %v17393_v19, %v18052_v9  ;;  %v5950_v21 = vadd.f32 %v5149_v50, %v5148_v27  ;;  %v5959_v51 = vadd.f32 %v5153_v39, %v5152_v13  ;;  %v5968_v4 = vadd.f32 %v5157_v45, %v5156_v33  ;;  %v14669_v50 = vpop.permute.xlu0 %3690 }
 0x77a   : > { %v5977_v61 = vadd.f32 %v5161_v31, %v5160_v29  ;;  %v5986_v3 = vadd.f32 %v5165_v28, %v5164_v34  ;;  %v5995_v0 = vadd.f32 %v5169_v60, %v5168_v11  ;;  %v5933_v32 = vadd.f32 %v5932_v5, %v5142_v48 }
 0x77b   : > { %v5942_v44 = vadd.f32 %v5941_v46, %v5146_v37  ;;  %v5951_v36 = vadd.f32 %v5950_v21, %v5150_v43  ;;  %v5960_v15 = vadd.f32 %v5959_v51, %v5154_v41  ;;  %v5969_v59 = vadd.f32 %v5968_v4, %v5158_v62 }
 0x77c   : > { %v5978_v25 = vadd.f32 %v5977_v61, %v5162_v20  ;;  %v5987_v22 = vadd.f32 %v5986_v3, %v5166_v16  ;;  %v5996_v55 = vadd.f32 %v5995_v0, %v5170_v24  ;;  %v5934_v63 = vadd.f32 %v5933_v32, %v5143_v18  ;;  %v14671_v62 = vpop.permute.xlu1 %3819 }
 0x77d   : > { %v5943_v9 = vadd.f32 %v5942_v44, %v5147_v12  ;;  %v5952_v54 = vadd.f32 %v5951_v36, %v5151_v8  ;;  %v5961_v23 = vadd.f32 %v5960_v15, %v5155_v57  ;;  %v5970_v53 = vadd.f32 %v5969_v59, %v5159_v1 }
 0x77e   : > { %v5979_v49 = vadd.f32 %v5978_v25, %v5163_v56  ;;  %v5988_v35 = vadd.f32 %v5987_v22, %v5167_v40  ;;  %v5997_v27 = vadd.f32 %v5996_v55, %v5171_v47  ;;  %v5935_v5 = vrot.slane %v5934_v63, 4  ;;  %v14673_v56 = vpop.permute.xlu0 %3789 }
 0x77f   : > { %v5944_v48 = vrot.slane %v5943_v9, 4  ;;  %v5953_v21 = vrot.slane %v5952_v54, 4  ;;  %v5962_v37 = vrot.slane %v5961_v23, 4  ;;  %v5971_v4 = vrot.slane %v5970_v53, 4 }
 0x780   : > { %v5980_v43 = vrot.slane %v5979_v49, 4  ;;  %v5989_v3 = vrot.slane %v5988_v35, 4  ;;  %v5998_v13 = vrot.slane %v5997_v27, 4  ;;  %v5936_v32 = vadd.f32 %v5935_v5, %v5934_v63 }
 0x781   : > { %v5945_v18 = vadd.f32 %v5944_v48, %v5943_v9  ;;  %v5954_v36 = vadd.f32 %v5953_v21, %v5952_v54  ;;  %v5963_v12 = vadd.f32 %v5962_v37, %v5961_v23  ;;  %v5972_v8 = vadd.f32 %v5971_v4, %v5970_v53  ;;  %v14676_v53 = vpop.permute.xlu1 %3546 }
 0x782   : > { %v5981_v39 = vadd.f32 %v5980_v43, %v5979_v49  ;;  %v5990_v59 = vadd.f32 %v5989_v3, %v5988_v35  ;;  %v5999_v41 = vadd.f32 %v5998_v13, %v5997_v27  ;;  %v5937_v22 = vrot.slane %v5936_v32, 2  ;;  %v14682_v21 = vpop.permute.xlu0 %3823  ;;  %v18056_v43 = vld [vmem:[#allocation310_spill] sm:$0xff]  ;;  %v18057_v13 = vld [vmem:[#allocation293_spill] sm:$0xff] }
 0x783   : > { %v5946_v57 = vrot.slane %v5945_v18, 2  ;;  %v5955_v33 = vrot.slane %v5954_v36, 2  ;;  %v5964_v45 = vrot.slane %v5963_v12, 2  ;;  %v5973_v1 = vrot.slane %v5972_v8, 2 }
 0x784   : > { %v5982_v29 = vrot.slane %v5981_v39, 2  ;;  %v5991_v31 = vrot.slane %v5990_v59, 2  ;;  %v6000_v20 = vrot.slane %v5999_v41, 2  ;;  %v5938_v63 = vadd.f32 %v5937_v22, %v5936_v32 }
 0x785   : > { %v5947_v34 = vadd.f32 %v5946_v57, %v5945_v18  ;;  %v5956_v54 = vadd.f32 %v5955_v33, %v5954_v36  ;;  %v5965_v23 = vadd.f32 %v5964_v45, %v5963_v12  ;;  %v5974_v46 = vadd.f32 %v5973_v1, %v5972_v8  ;;  %v14701_v1 = vpop.permute.xlu1 %3675 }
 0x786   : > { %v5983_v28 = vadd.f32 %v5982_v29, %v5981_v39  ;;  %v5992_v16 = vadd.f32 %v5991_v31, %v5990_v59  ;;  %v6001_v40 = vadd.f32 %v6000_v20, %v5999_v41  ;;  %v5939_v11 = vrot.slane %v5938_v63, 1  ;;  %v18059_v29 = vld [vmem:[#allocation323_spill] sm:$0xff]  ;;  %v18060_v31 = vld [vmem:[#allocation262_spill] sm:$0xff] }
 0x787   : > { %v5948_v60 = vrot.slane %v5947_v34, 1  ;;  %v5957_v24 = vrot.slane %v5956_v54, 1  ;;  %v5966_v47 = vrot.slane %v5965_v23, 1  ;;  %v6461_v51 = vrot.slane %v14526_v52, 1 }
 0x788   : > { %v5975_v61 = vrot.slane %v5974_v46, 1  ;;  %v5984_v0 = vrot.slane %v5983_v28, 1  ;;  %v5993_v44 = vrot.slane %v5992_v16, 1  ;;  %v5940_v15 = vadd.f32 %v5939_v11, %v5938_v63  ;;  %v18066_v11 = vld [vmem:[#allocation365_spill] sm:$0xff] }
 0x789   : > { %v5949_v25 = vadd.f32 %v5948_v60, %v5947_v34  ;;  %v5958_v55 = vadd.f32 %v5957_v24, %v5956_v54  ;;  %v6002_v9 = vrot.slane %v6001_v40, 1  ;;  %v18054_v49 = vmax.f32 %v14534_v58, 0.0  ;;  %v18061_v34 = vld [vmem:[#allocation256_spill] sm:$0xff] }
 0x78a   : > { %v4836_v27 = vmax.f32 %v14545_v6, 0.0  ;;  %v5967_v5 = vadd.f32 %v5966_v47, %v5965_v23  ;;  %v5976_v48 = vadd.f32 %v5975_v61, %v5974_v46  ;;  %vm18055_vm13 = vcmask 1041409   ;;  %v18063_v23 = vld [vmem:[#allocation309_spill] sm:$0xff] }
 0x78b   : > { %v5413_v35 = vmul.f32 %v12615_v10, %v18054_v49  ;;  %v6764_v37 = vsel %vm18055_vm13, %v5949_v25, %v5940_v15  ;;  %v6878_v4 = vunpack.c.3.s8 %v17747_v38  ;;  %v4298_v3 = vadd.f32 %v18056_v43, %v17822_v26  ;;  %v18070_v49 = vld [vmem:[#allocation319_spill] sm:$0xff] }
 0x78c   : > { %v4335_v32 = vadd.f32 %v14500_v17, %v18057_v13  ;;  %v5985_v18 = vadd.f32 %v5984_v0, %v5983_v28  ;;  %v5994_v58 = vadd.f32 %v5993_v44, %v5992_v16  ;;  %v6765_v36 = vsel %vm15903_vm8, %v5958_v55, %v6764_v37  ;;  %v18065_v16 = vld [vmem:[#allocation259_spill] sm:$0xff]  ;;  %v18068_v0 = vld [vmem:[#allocation276_spill] sm:$0xff]  ;;  %v18069_v55 = vld [vmem:[#allocation322_spill] sm:$0xff] }
 0x78d   : > { %v4318_v6 = vadd.f32 %v14498_v14, %v17822_v26  ;;  %v6003_v12 = vadd.f32 %v6002_v9, %v6001_v40  ;;  %v6766_v8 = vsel %vm15900_vm9, %v5967_v5, %v6765_v36  ;;  %v6901_v39 = vpack.c.b16 %v6878_v4, %v6878_v4  ;;  %v18073_v37 = vld [vmem:[#allocation328_spill] sm:$0xff] }
 0x78e   : > { %v4847_v59 = vmax.f32 %v4335_v32, 0.0  ;;  %vm18058_vm13 = vcmask 1044484   ;;  %v4810_v41 = vmax.f32 %v4298_v3, 0.0  ;;  %v4346_v22 = vadd.f32 %v14504_v30, %v17822_v26  ;;  %v18076_v32 = vld [vmem:[#allocation22_spill] sm:$0xff] }
 0x78f   : > { %v6767_v38 = vsel %vm18058_vm13, %v5976_v48, %v6766_v8  ;;  %v4325_v17 = vadd.f32 %v14502_v7, %v17975_v2  ;;  %v6902_v33 = vpack.c.b8 %v6901_v39, %v6901_v39  ;;  %v4830_v14 = vmax.f32 %v4318_v6, 0.0  ;;  %v14712_v7 = vpop.permute.xlu0 %3641  ;;  %v18072_v48 = vld [vmem:[#allocation287_spill] sm:$0xff]  ;;  %v14739_v6 = vpop.permute.xlu1 %3808 }
 0x790   : > { %v6768_v57 = vsel %vm15899_vm11, %v5985_v18, %v6767_v38  ;;  %v5399_v45 = vmul.f32 %v17393_v19, %v4847_v59  ;;  %v14705_v20 = vadd.f32 %v18060_v31, %v18059_v29  ;;  %v14708_v63 = vadd.f32 %v6461_v51, %v14526_v52 }
 0x791   : > { %v5388_v30 = vmul.f32 %v18061_v34, %v4836_v27  ;;  %vm18062_vm13 = vcmask 1046534   ;;  %v14715_v46 = vadd.f32 %v5413_v35, %v18063_v23  ;;  %vm18064_vm11 = vcmask 1047559   ;;  %v18071_v27 = vld [vmem:[#allocation18_spill] sm:$0xff] }
 0x792   : > { %v6769_v54 = vsel %vm18062_vm13, %v5994_v58, %v6768_v57  ;;  %vm6926_vm9 = vnez %v6902_v33  ;;  %v6510_v40 = vadd.f32 %v18065_v16, %v5399_v45  ;;  %v18067_v24 = vmov 0   ;;  %v18077_v58 = vld [vmem:[#allocation327_spill] sm:$0xff] }
 0x793   : > { %v6770_v28 = vsel %vm18064_vm11, %v6003_v12, %v6769_v54  ;;  %v6942_v47 = vsel %vm6926_vm9, 16843009, %v18067_v24  ;;  %v4858_v52 = vmax.f32 %v4346_v22, 0.0  ;;  %v4837_v51 = vmax.f32 %v4325_v17, 0.0  ;;  %v14746_v38 = vpop.permute.xlu0 %3774  ;;  %v18079_v45 = vld [vmem:[#allocation271_spill] sm:$0xff] }
 0x794   : > { %v6850_v60 = vadd.f32 %v6770_v28, %v18066_v11  ;;  %v6958_v61 = vunpack.c.0.s8 %v6942_v47  ;;  %v5362_v44 = vmul.f32 %v18068_v0, %v4810_v41  ;;  %v6511_v15 = vrot.slane %v6510_v40, 4  ;;  %v18078_v41 = vld [vmem:[#allocation255_spill] sm:$0xff]  ;;  %v18080_v11 = vld [vmem:[#allocation270_spill] sm:$0xff]  ;;  %v18081_v47 = vld [vmem:[#allocation265_spill] sm:$0xff] }
 0x795   : > { %v5382_v25 = vmul.f32 %v18068_v0, %v4830_v14  ;;  %v4353_v9 = vadd.f32 %v18069_v55, %v17975_v2  ;;  %v4339_v35 = vadd.f32 %v18070_v49, %v18057_v13  ;;  %v4315_v5 = vadd.f32 %v18071_v27, %v18057_v13 }
 0x796   : > { %v4352_v4 = vadd.f32 %v18073_v37, %v18072_v48  ;;  %vm14731_vm9 = vcmp.ne.s32.totalorder %v6958_v61, 0  ;;  %v18074_v43 = vmov 0  ;;  %v6512_v3 = vadd.f32 %v6511_v15, %v6510_v40  ;;  %v18082_v61 = vld [vmem:[#allocation19_spill] sm:$0xff] }
 0x797   : > { %v18075_v43 = vsel %vm14731_vm9, 4294967295, %v18074_v43  ;;  %v4328_v18 = vadd.f32 %v18076_v32, %v18072_v48  ;;  %v4295_v36 = vadd.f32 %v18077_v58, %v18057_v13  ;;  %v14743_v12 = vsel %vm14731_vm9, %v6850_v60, -1e+30  ;;  %v14776_v32 = vpop.permute.xlu0 %3838 }
 0x798   : > { %v5410_v8 = vmul.f32 %v18068_v0, %v4858_v52  ;;  %v4851_v39 = vmax.f32 %v4339_v35, 0.0  ;;  %v4827_v59 = vmax.f32 %v4315_v5, 0.0  ;;  %7029 = vmax.xlane.f32.xlu1 %v14743_v12  ;;  %v14750_v22 = vadd.f32 %v18078_v41, %v5362_v44  ;;  %v14771_v35 = vpop.permute.xlu1 %3842 }
 0x799   : > { %v6513_v17 = vrot.slane %v6512_v3, 2  ;;  %v5389_v57 = vmul.f32 %v12615_v10, %v4837_v51  ;;  %v4807_v33 = vmax.f32 %v4295_v36, 0.0  ;;  %v14754_v14 = vadd.f32 %v18079_v45, %v5382_v25  ;;  %v18083_v25 = vld [vmem:[#allocation261_spill] sm:$0xff] }
 0x79a   : > { %v5403_v29 = vmul.f32 %v17393_v19, %v4851_v39  ;;  %v5379_v31 = vmul.f32 %v17393_v19, %v4827_v59  ;;  %v4343_v54 = vadd.f32 %v14667_v42, %v18057_v13  ;;  %v4865_v23 = vmax.f32 %v4353_v9, 0.0  ;;  %v18084_v42 = vld [vmem:[#allocation285_spill] sm:$0xff] }
 0x79b   : > { %v4864_v28 = vmax.f32 %v4352_v4, 0.0  ;;  %v4840_v16 = vmax.f32 %v4328_v18, 0.0  ;;  %v5359_v40 = vmul.f32 %v17393_v19, %v4807_v33  ;;  %v4322_v44 = vadd.f32 %v18082_v61, %v17822_v26 }
 0x79c   : > { %v6519_v60 = vadd.f32 %v18080_v11, %v5403_v29  ;;  %v6465_v52 = vadd.f32 %v18081_v47, %v5379_v31  ;;  %v4855_v51 = vmax.f32 %v4343_v54, 0.0  ;;  %v6514_v15 = vadd.f32 %v6513_v17, %v6512_v3  ;;  %v3661_v47 = vpop.permute.xlu0 %3660 }
 0x79d   : > { %v14766_v55 = vadd.f32 %v18083_v25, %v5410_v8  ;;  %v14768_v49 = vadd.f32 %v5389_v57, %v5388_v30  ;;  %v6420_v9 = vadd.f32 %v18084_v42, %v5359_v40  ;;  %v4329_v4 = vadd.f32 %v14669_v50, %v17975_v2 }
 0x79e   : > { %v6520_v27 = vrot.slane %v6519_v60, 4  ;;  %v6466_v5 = vrot.slane %v6465_v52, 4  ;;  %v5407_v37 = vmul.f32 %v17393_v19, %v4855_v51  ;;  %v5417_v3 = vmul.f32 %v12615_v10, %v4865_v23 }
 0x79f   : > { %v5416_v18 = vmul.f32 %v18061_v34, %v4864_v28  ;;  %v5392_v30 = vmul.f32 %v18061_v34, %v4840_v16  ;;  %v6421_v58 = vrot.slane %v6420_v9, 4  ;;  %v4834_v59 = vmax.f32 %v4322_v44, 0.0  ;;  %v3695_v16 = vpop.permute.xlu1 %3694 }
 0x7a0   : > { %v6521_v36 = vadd.f32 %v6520_v27, %v6519_v60  ;;  %v6467_v8 = vadd.f32 %v6466_v5, %v6465_v52  ;;  %v6528_v39 = vadd.f32 %v14705_v20, %v5407_v37  ;;  %v4356_v17 = vadd.f32 %v14671_v62, %v18072_v48 }
 0x7a1   : > { %v6422_v41 = vadd.f32 %v6421_v58, %v6420_v9  ;;  %v4841_v57 = vmax.f32 %v4329_v4, 0.0  ;;  %v4299_v50 = vadd.f32 %v14676_v53, %v18057_v13  ;;  %v6515_v33 = vrot.slane %v6514_v15, 1  ;;  %v18085_v58 = vld [vmem:[#allocation321_spill] sm:$0xff] }
 0x7a2   : > { %v6522_v45 = vrot.slane %v6521_v36, 2  ;;  %v6468_v29 = vrot.slane %v6467_v8, 2  ;;  %v6529_v31 = vrot.slane %v6528_v39, 4  ;;  %v4350_v28 = vadd.f32 %v14673_v56, %v17822_v26 }
 0x7a3   : > { %v6423_v54 = vrot.slane %v6422_v41, 2  ;;  %v4811_v23 = vmax.f32 %v4299_v50, 0.0  ;;  %v4326_v20 = vadd.f32 %v14701_v1, %v17822_v26  ;;  %v5386_v60 = vmul.f32 %v18068_v0, %v4834_v59 }
 0x7a4   : > { %v6523_v40 = vadd.f32 %v6522_v45, %v6521_v36  ;;  %v6469_v11 = vadd.f32 %v6468_v29, %v6467_v8  ;;  %v6530_v62 = vadd.f32 %v6529_v31, %v6528_v39  ;;  %v4868_v52 = vmax.f32 %v4356_v17, 0.0 }
 0x7a5   : > { %v6424_v53 = vadd.f32 %v6423_v54, %v6422_v41  ;;  %v5393_v51 = vmul.f32 %v12615_v10, %v4841_v57  ;;  %v5363_v61 = vmul.f32 %v17393_v19, %v4811_v23  ;;  %v4862_v25 = vmax.f32 %v4350_v28, 0.0  ;;  %v3828_v57 = vpop.permute.xlu1 %3827 }
 0x7a6   : > { %v6531_v44 = vrot.slane %v6530_v62, 2  ;;  %v4838_v42 = vmax.f32 %v4326_v20, 0.0  ;;  %v4357_v56 = vadd.f32 %v14682_v21, %v17975_v2  ;;  %v6516_v1 = vadd.f32 %v6515_v33, %v6514_v15 }
 0x7a7   : > { %v6524_v9 = vrot.slane %v6523_v40, 1  ;;  %v14795_v27 = vadd.f32 %v5417_v3, %v5416_v18  ;;  %v6429_v5 = vadd.f32 %v14750_v22, %v5363_v61  ;;  %v6470_v37 = vrot.slane %v6469_v11, 1  ;;  %v3794_v3 = vpop.permute.xlu0 %3793 }
 0x7a8   : > { %v6532_v4 = vadd.f32 %v6531_v44, %v6530_v62  ;;  %v14799_v36 = vadd.f32 %v18085_v58, %v5386_v60  ;;  %v4869_v8 = vmax.f32 %v4357_v56, 0.0  ;;  %v6425_v39 = vrot.slane %v6424_v53, 1 }
 0x7a9   : > { %v5420_v59 = vmul.f32 %v18061_v34, %v4868_v52  ;;  %v6499_v41 = vadd.f32 %v5393_v51, %v5392_v30  ;;  %v6430_v17 = vrot.slane %v6429_v5, 4  ;;  %v5414_v21 = vmul.f32 %v18068_v0, %v4862_v25 }
 0x7aa   : > { %v6533_v50 = vrot.slane %v6532_v4, 1  ;;  %v5390_v15 = vmul.f32 %v18068_v0, %v4838_v42  ;;  %v4354_v22 = vadd.f32 %v14739_v6, %v17822_v26  ;;  %v6525_v18 = vadd.f32 %v6524_v9, %v6523_v40 }
 0x7ab   : > { %v6431_v33 = vadd.f32 %v6430_v17, %v6429_v5  ;;  %v4319_v45 = vadd.f32 %v14712_v7, %v18057_v13  ;;  %v4347_v29 = vadd.f32 %v14746_v38, %v18057_v13  ;;  %v14810_v30 = vadd.f32 %v6470_v37, %v6469_v11  ;;  %v14829_v25 = vpop.permute.xlu0 %3679 }
 0x7ac   : > { %v5421_v31 = vmul.f32 %v12615_v10, %v4869_v8  ;;  %v4361_v54 = vadd.f32 %v14771_v35, %v17975_v2  ;;  %v4330_v23 = vadd.f32 %v3695_v16, %v17822_v26  ;;  %v6534_v28 = vadd.f32 %v6533_v50, %v6532_v4  ;;  %v3813_v16 = vpop.permute.xlu1 %3812 }
 0x7ad   : > { %v6432_v6 = vrot.slane %v6431_v33, 2  ;;  %v4831_v20 = vmax.f32 %v4319_v45, 0.0  ;;  %v4859_v40 = vmax.f32 %v4347_v29, 0.0  ;;  %v14816_v62 = vadd.f32 %v6425_v39, %v6424_v53 }
 0x7ae   : > { %v4866_v60 = vmax.f32 %v4354_v22, 0.0  ;;  %v4842_v7 = vmax.f32 %v4330_v23, 0.0  ;;  %v4360_v38 = vadd.f32 %v14776_v32, %v18072_v48  ;;  %v6545_v11 = vadd.f32 %v14715_v46, %v5414_v21 }
 0x7af   : > { %v14822_v52 = vadd.f32 %v14768_v49, %v5390_v15  ;;  %v5383_v2 = vmul.f32 %v17393_v19, %v4831_v20  ;;  %v5411_v35 = vmul.f32 %v17393_v19, %v4859_v40  ;;  %vm18086_vm11 = vcmask 1041409   ;;  %v3847_v45 = vpop.permute.xlu0 %3846 }
 0x7b0   : > { %v6820_v51 = vsel %vm18086_vm11, %v6525_v18, %v6516_v1  ;;  %v6433_v61 = vadd.f32 %v6432_v6, %v6431_v33  ;;  %v14827_v53 = vadd.f32 %v5421_v31, %v5420_v59  ;;  %v4873_v44 = vmax.f32 %v4361_v54, 0.0  ;;  %v3699_v21 = vpop.permute.xlu1 %3698  ;;  %v18087_v33 = vld [vmem:[#allocation325_spill] sm:$0xff] }
 0x7b1   : > { %v14832_v48 = vsel %vm15903_vm8, %v6534_v28, %v6820_v51  ;;  %v6474_v46 = vadd.f32 %v14754_v14, %v5383_v2  ;;  %v6537_v49 = vadd.f32 %v14766_v55, %v5411_v35  ;;  %v4323_v32 = vadd.f32 %v3661_v47, %v18057_v13 }
 0x7b2   : > { %v5418_v42 = vmul.f32 %v18068_v0, %v4866_v60  ;;  %v5394_v56 = vmul.f32 %v18068_v0, %v4842_v7  ;;  %v4872_v1 = vmax.f32 %v4360_v38, 0.0  ;;  %v4355_v9 = vadd.f32 %v3813_v16, %v18057_v13  ;;  %v18088_v7 = vld [vmem:[#allocation308_spill] sm:$0xff]  ;;  %v18089_v38 = vld [vmem:[#allocation254_spill] sm:$0xff] }
 0x7b3   : > { %v6475_v5 = vrot.slane %v6474_v46, 4  ;;  %v6538_v37 = vrot.slane %v6537_v49, 4  ;;  %v4835_v4 = vmax.f32 %v4323_v32, 0.0  ;;  %v4351_v58 = vadd.f32 %v3794_v3, %v18057_v13 }
 0x7b4   : > { %v6434_v8 = vrot.slane %v6433_v61, 1  ;;  %v14842_v39 = vmul.f32 %v12615_v10, %v4873_v44  ;;  %v4358_v14 = vadd.f32 %v3828_v57, %v17822_v26  ;;  %v4867_v55 = vmax.f32 %v4355_v9, 0.0  ;;  %v18090_v44 = vld [vmem:[#allocation267_spill] sm:$0xff] }
 0x7b5   : > { %v6476_v47 = vadd.f32 %v6475_v5, %v6474_v46  ;;  %v6539_v59 = vadd.f32 %v6538_v37, %v6537_v49  ;;  %v5387_v17 = vmul.f32 %v17393_v19, %v4835_v4  ;;  %v4863_v50 = vmax.f32 %v4351_v58, 0.0  ;;  %v3851_v49 = vpop.permute.xlu1 %3850  ;;  %v18094_v37 = vld [vmem:[#allocation318_spill] sm:$0xff] }
 0x7b6   : > { %v6554_v15 = vadd.f32 %v14795_v27, %v5418_v42  ;;  %v6500_v22 = vadd.f32 %v6499_v41, %v5394_v56  ;;  %v5419_v18 = vmul.f32 %v17393_v19, %v4867_v55  ;;  %v6884_v3 = vunpack.c.1.s8 %v18087_v33  ;;  %v18092_v42 = vld [vmem:[#allocation283_spill] sm:$0xff] }
 0x7b7   : > { %v6477_v29 = vrot.slane %v6476_v47, 2  ;;  %v5424_v10 = vmul.f32 %v18061_v34, %v4872_v1  ;;  %v6483_v57 = vadd.f32 %v14799_v36, %v5387_v17  ;;  %v5415_v31 = vmul.f32 %v17393_v19, %v4863_v50 }
 0x7b8   : > { %v4870_v54 = vmax.f32 %v4358_v14, 0.0  ;;  %v6555_v23 = vadd.f32 %v6554_v15, %v5419_v18  ;;  %v6913_v28 = vpack.c.b16 %v6884_v3, %v6884_v3  ;;  %v4331_v6 = vadd.f32 %v3699_v21, %v18057_v13  ;;  %v18098_v18 = vld [vmem:[#allocation369_spill] sm:$0xff] }
 0x7b9   : > { %v6540_v20 = vrot.slane %v6539_v59, 2  ;;  %v6484_v27 = vrot.slane %v6483_v57, 4  ;;  %v6546_v41 = vadd.f32 %v6545_v11, %v5415_v31  ;;  %v6435_v40 = vadd.f32 %v6434_v8, %v6433_v61  ;;  %v3832_v61 = vpop.permute.xlu0 %3831  ;;  %v7032_v15 = vpop.xlane.xlu1 %7031 }
 0x7ba   : > { %v6556_v60 = vrot.slane %v6555_v23, 4  ;;  %v6807_v2 = vsel %vm15903_vm8, %v18089_v38, %v18088_v7  ;;  %v6914_v35 = vpack.c.b8 %v6913_v28, %v6913_v28  ;;  %v4843_v34 = vmax.f32 %v4331_v6, 0.0 }
 0x7bb   : > { %v6478_v16 = vadd.f32 %v6477_v29, %v6476_v47  ;;  %v6485_v36 = vadd.f32 %v6484_v27, %v6483_v57  ;;  %v6547_v51 = vrot.slane %v6546_v41, 4  ;;  %vm18091_vm13 = vcmask 1043459  }
 0x7bc   : > { %v6808_v46 = vsel %vm18091_vm13, %v18090_v44, %v6807_v2  ;;  %v6557_v32 = vadd.f32 %v6556_v60, %v6555_v23  ;;  %vm18093_vm11 = vcmask 1044484   ;;  %vm6932_vm9 = vnez %v6914_v35 }
 0x7bd   : > { %v6809_v56 = vsel %vm18093_vm11, %v18092_v42, %v6808_v46  ;;  %v5395_v11 = vmul.f32 %v17393_v19, %v4843_v34  ;;  %v6541_v1 = vadd.f32 %v6540_v20, %v6539_v59  ;;  %v6486_v9 = vrot.slane %v6485_v36, 2  ;;  %v7016_v31 = vpop.xlane.xlu0 %7015  ;;  %v7020_v46 = vpop.xlane.xlu1 %7019 }
 0x7be   : > { %v6548_v5 = vadd.f32 %v6547_v51, %v6546_v41  ;;  %vm18095_vm8 = vcmask 1045509   ;;  %v6558_v58 = vrot.slane %v6557_v32, 2  ;;  %vm18096_vm2 = vcmask 1046534  }
 0x7bf   : > { %v6810_v4 = vsel %vm18095_vm8, %v18094_v37, %v6809_v56  ;;  %v6948_v14 = vsel %vm6932_vm9, 16843009, %v18067_v24  ;;  %v6501_v55 = vadd.f32 %v6500_v22, %v5395_v11  ;;  %v6487_v47 = vadd.f32 %v6486_v9, %v6485_v36 }
 0x7c0   : > { %v6811_v8 = vsel %vm18096_vm2, %v14816_v62, %v6810_v4  ;;  %v6549_v17 = vrot.slane %v6548_v5, 2  ;;  %vm18097_vm13 = vcmask 1047559   ;;  %v6964_v21 = vunpack.c.0.s8 %v6948_v14  ;;  %v14900_v4 = vld [vmem:[#allocation2 + $0x40] sm:$0xff] }
 0x7c1   : > { %v6812_v50 = vsel %vm18097_vm13, %v6435_v40, %v6811_v8  ;;  %v5422_v59 = vmul.f32 %v18068_v0, %v4870_v54  ;;  %v6502_v29 = vrot.slane %v6501_v55, 4  ;;  %v4327_v57 = vadd.f32 %v14829_v25, %v18057_v13  ;;  %v14889_v11 = vpop.xlane.xlu0 %7017 }
 0x7c2   : > { %v6856_v3 = vadd.f32 %v6812_v50, %v18098_v18  ;;  %v6479_v23 = vrot.slane %v6478_v16, 1  ;;  %v6550_v62 = vadd.f32 %v6549_v17, %v6548_v5  ;;  %vm14871_vm8 = vcmp.ne.s32.totalorder %v6964_v21, 0 }
 0x7c3   : > { %v4363_v22 = vadd.f32 %v3851_v49, %v18057_v13  ;;  %v6542_v6 = vrot.slane %v6541_v1, 1  ;;  %v6503_v54 = vadd.f32 %v6502_v29, %v6501_v55  ;;  %v4839_v27 = vmax.f32 %v4327_v57, 0.0 }
 0x7c4   : > { %v14878_v20 = vsel %vm14871_vm8, %v6856_v3, -1e+30  ;;  %v6488_v41 = vrot.slane %v6487_v47, 1  ;;  %v14880_v40 = vadd.f32 %v6558_v58, %v6557_v32  ;;  %v6551_v25 = vrot.slane %v6550_v62, 1  ;;  %v14902_v58 = vld [vmem:[#allocation2] sm:$0xff] }
 0x7c5   : > { %7041 = vmax.xlane.f32.xlu0 %v14878_v20  ;;  %v4362_v60 = vadd.f32 %v3847_v45, %v17822_v26  ;;  %v6504_v7 = vrot.slane %v6503_v54, 2  ;;  %v5391_v38 = vmul.f32 %v17393_v19, %v4839_v27  ;;  %v4875_v2 = vmax.f32 %v4363_v22, 0.0  ;;  %v7034_v3 = vpop.xlane.xlu0 %7033 }
 0x7c6   : > { %v4359_v35 = vadd.f32 %v3832_v61, %v18057_v13  ;;  %v6480_v34 = vadd.f32 %v6479_v23, %v6478_v16  ;;  %v6571_v36 = vadd.f32 %v14842_v39, %v5424_v10  ;;  %v6563_v51 = vadd.f32 %v14827_v53, %v5422_v59 }
 0x7c7   : > { %v4874_v44 = vmax.f32 %v4362_v60, 0.0  ;;  %v6543_v49 = vadd.f32 %v6542_v6, %v6541_v1  ;;  %v6505_v32 = vadd.f32 %v6504_v7, %v6503_v54  ;;  %v6492_v42 = vadd.f32 %v14822_v52, %v5391_v38  ;;  %v18101_v1 = vld [vmem:[#allocation329_spill] sm:$0xff]  ;;  %v14931_v7 = vld [vmem:[#allocation2 + $0x8] sm:$0xff]  ;;  %v18138_v6 = vld [vmem:[#allocation311_spill] sm:$0xff] }
 0x7c8   : > { %v4871_v56 = vmax.f32 %v4359_v35, 0.0  ;;  %v6489_v26 = vadd.f32 %v6488_v41, %v6487_v47  ;;  %v6560_v45 = vrot.slane %v14880_v40, 1  ;;  %v6885_v13 = vunpack.c.2.s8 %v18087_v33  ;;  %v14906_v47 = vld [vmem:[#allocation2 + $0x10] sm:$0xff] }
 0x7c9   : > { %v5426_v9 = vmul.f32 %v18068_v0, %v4874_v44  ;;  %v6552_v16 = vadd.f32 %v6551_v25, %v6550_v62  ;;  %v6493_v39 = vrot.slane %v6492_v42, 4  ;;  %v5427_v53 = vmul.f32 %v17393_v19, %v4875_v2 }
 0x7ca   : > { %v5423_v10 = vmul.f32 %v17393_v19, %v4871_v56  ;;  %vm18102_vm2 = vcmask 1042434   ;;  %v6915_v5 = vpack.c.b16 %v6885_v13, %v6885_v13  ;;  %v6886_v37 = vunpack.c.3.s8 %v18087_v33 }
 0x7cb   : > { %v6572_v61 = vadd.f32 %v6571_v36, %v5426_v9  ;;  %v6814_v52 = vsel %vm18102_vm2, %v14708_v63, %v18101_v1  ;;  %v6506_v0 = vrot.slane %v6505_v32, 1  ;;  %v6494_v8 = vadd.f32 %v6493_v39, %v6492_v42  ;;  %v7022_v63 = vpop.xlane.xlu1 %7021 }
 0x7cc   : > { %v6564_v14 = vadd.f32 %v6563_v51, %v5423_v10  ;;  %vm18103_vm9 = vcmask 1043459   ;;  %v6916_v17 = vpack.c.b8 %v6915_v5, %v6915_v5  ;;  %v6917_v50 = vpack.c.b16 %v6886_v37, %v6886_v37  ;;  %v14936_v51 = vld [vmem:[#allocation2 + $0x18] sm:$0xff] }
 0x7cd   : > { %v6815_v55 = vsel %vm18103_vm9, %v14810_v30, %v6814_v52  ;;  %v6573_v19 = vadd.f32 %v6572_v61, %v5427_v53  ;;  %vm15906_vm11 = vcmask 7168   ;;  %v6495_v21 = vrot.slane %v6494_v8, 2  ;;  %v14956_v53 = vld [vmem:[#allocation2 + $0x20] sm:$0xff]  ;;  %v18113_v52 = vld [vmem:[#allocation16_spill] sm:$0xff] }
 0x7ce   : > { %v6565_v59 = vrot.slane %v6564_v14, 4  ;;  %v14909_v33 = vmax.f32 %v14900_v4, %v7032_v15  ;;  %v14912_v18 = vmax.f32 %v14902_v58, %v7016_v31  ;;  %vm6933_vm13 = vnez %v6916_v17 }
 0x7cf   : > { %v6574_v29 = vrot.slane %v6573_v19, 4  ;;  %v6918_v57 = vpack.c.b8 %v6917_v50, %v6917_v50  ;;  %v14915_v30 = vmax.f32 %v14906_v47, %v7020_v46  ;;  %v6496_v23 = vadd.f32 %v6495_v21, %v6494_v8  ;;  %v7024_v44 = vpop.xlane.xlu1 %7023 }
 0x7d0   : > { %v6566_v62 = vadd.f32 %v6565_v59, %v6564_v14  ;;  %v6949_v22 = vsel %vm6933_vm13, 16843009, %v18067_v24  ;;  %7649 = vst.msk [vmem:[#allocation2 + $0x40] sm:$0xff] %vm15906_vm11, %v14909_v33  ;;  %7641 = vst.msk [vmem:[#allocation2] sm:$0xff] %vm15906_vm11, %v14912_v18  ;;  %7113 = vperm.xlu1 %8408, %v14912_v18   ;;  %v7063_v54 = vsub.f32 %v14902_v58, %v14912_v18  ;;  %vm18104_vm9 = vcmask 1044484  }
 0x7d1   : > { %v6575_v15 = vadd.f32 %v6574_v29, %v6573_v19  ;;  %v6965_v31 = vunpack.c.0.s8 %v6949_v22  ;;  %vm6934_vm2 = vnez %v6918_v57  ;;  %7643 = vst.msk [vmem:[#allocation2 + $0x10] sm:$0xff] %vm15906_vm11, %v14915_v30  ;;  %v6561_v27 = vadd.f32 %v6560_v45, %v14880_v40  ;;  %v7036_v45 = vpop.xlane.xlu0 %7035 }
 0x7d2   : > { %v6497_v41 = vrot.slane %v6496_v23, 1  ;;  %v6567_v25 = vrot.slane %v6566_v62, 2  ;;  %v6816_v60 = vsel %vm18104_vm9, %v6480_v34, %v6815_v55  ;;  %v6507_v2 = vadd.f32 %v6506_v0, %v6505_v32  ;;  %v14941_v34 = vld [vmem:[#allocation2 + $0x48] sm:$0xff]  ;;  %v18114_v0 = vld [vmem:[#allocation370_spill] sm:$0xff] }
 0x7d3   : > { %v6576_v38 = vrot.slane %v6575_v15, 2  ;;  %vm18105_vm13 = vcmask 1043459   ;;  %v6950_v36 = vsel %vm6934_vm2, 16843009, %v18067_v24  ;;  %vm18106_vm11 = vcmask 1045509   ;;  %v7026_v21 = vpop.xlane.xlu1 %7025 }
 0x7d4   : > { %v6822_v35 = vsel %vm18105_vm13, %v6543_v49, %v14832_v48  ;;  %v6498_v46 = vadd.f32 %v6497_v41, %v6496_v23  ;;  %v6568_v42 = vadd.f32 %v6567_v25, %v6566_v62  ;;  %v6817_v40 = vsel %vm18106_vm11, %v6489_v26, %v6816_v60  ;;  %v14994_v62 = vld [vmem:[#allocation2 + $0x58] sm:$0xff] }
 0x7d5   : > { %v7065_v56 = vsub.f32 %v14906_v47, %v14915_v30  ;;  %v6577_v9 = vadd.f32 %v6576_v38, %v6575_v15  ;;  %vm14943_vm9 = vcmp.ne.s32.totalorder %v6965_v31, 0  ;;  %v18107_v32 = vmov 0  ;;  %v7038_v22 = vpop.xlane.xlu0 %7037 }
 0x7d6   : > { %v18108_v32 = vsel %vm14943_vm9, 4294967295, %v18107_v32  ;;  %vm18109_vm13 = vcmask 1044484   ;;  %v14950_v48 = vmax.f32 %v14931_v7, %v14889_v11  ;;  %v6569_v49 = vrot.slane %v6568_v42, 1 }
 0x7d7   : > { %v6823_v24 = vsel %vm18109_vm13, %v6552_v16, %v6822_v35  ;;  %vm18110_vm2 = vcmask 1046534   ;;  %v6966_v13 = vunpack.c.0.s8 %v6950_v36  ;;  %v14954_v39 = vmax.f32 %v14936_v51, %v7022_v63  ;;  %v14967_v16 = vld [vmem:[#allocation2 + $0x50] sm:$0xff]  ;;  %v14983_v63 = vld [vmem:[#allocation2 + $0x28] sm:$0xff]  ;;  %v18140_v35 = vld [vmem:[#allocation274_spill] sm:$0xff] }
 0x7d8   : > { %v6818_v26 = vsel %vm18110_vm2, %v6498_v46, %v6817_v40  ;;  %vm18111_vm11 = vcmask 1047559   ;;  %v6578_v61 = vrot.slane %v6577_v9, 1  ;;  %vm18112_vm13 = vcmask 7168   ;;  %7118 = vperm.xlu1 %8408, %v14950_v48   ;;  %v15034_v46 = vpop.f32.mrf.mxu0 }
 0x7d9   : > { %v6819_v10 = vsel %vm18111_vm11, %v6507_v2, %v6818_v26  ;;  %7642 = vst.msk [vmem:[#allocation2 + $0x8] sm:$0xff] %vm18112_vm13, %v14950_v48  ;;  %v14965_v11 = vmax.f32 %v14941_v34, %v7034_v3  ;;  %v1385_v5 = vmul.f32 0.2, %v18113_v52  ;;  %v6570_v37 = vadd.f32 %v6569_v49, %v6568_v42  ;;  %vm18115_vm2 = vmmov %vm18112_vm13  ;;  %v18118_v3 = vld [vmem:[#allocation326_spill] sm:$0xff]  ;;  %v7028_v42 = vpop.xlane.xlu1 %7027 }
 0x7da   : > { %v6857_v8 = vadd.f32 %v6819_v10, %v18114_v0  ;;  %7644 = vst.msk [vmem:[#allocation2 + $0x18] sm:$0xff] %vm18115_vm2, %v14954_v39  ;;  %v6579_v55 = vadd.f32 %v6578_v61, %v6577_v9  ;;  %vm18116_vm11 = vcmask 1045509   ;;  %vm18117_vm13 = vmmov %vm18115_vm2  ;;  %v14981_v50 = vmax.f32 %v14956_v53, %v7024_v44  ;;  %v15032_v44 = vld [vmem:[#allocation2 + $0x30] sm:$0xff] }
 0x7db   : > { %v6824_v19 = vsel %vm18116_vm11, %v6561_v27, %v6823_v24  ;;  %7650 = vst.msk [vmem:[#allocation2 + $0x48] sm:$0xff] %vm18117_vm13, %v14965_v11  ;;  %v4895_v29 = vadd.f32 %v18118_v3, %v1385_v5  ;;  %vm18119_vm2 = vcmask 1046534   ;;  %v14992_v23 = vmax.f32 %v14967_v16, %v7036_v45  ;;  %v15039_v45 = vpop.f32.mrf.mxu0  ;;  %v15062_v3 = vld [vmem:[#allocation2 + $0x60] sm:$0xff] }
 0x7dc   : > { %v14987_v59 = vsel %vm14943_vm9, %v6857_v8, -1e+30  ;;  %v6825_v57 = vsel %vm18119_vm2, %v6570_v37, %v6824_v19  ;;  %vm18120_vm11 = vcmask 1047559   ;;  %vm14998_vm13 = vcmp.ne.s32.totalorder %v6966_v13, 0  ;;  %7158 = vperm.xlu1 %8408, %v14965_v11  }
 0x7dd   : > { %7043 = vmax.xlane.f32.xlu0 %v14987_v59  ;;  %v6826_v15 = vsel %vm18120_vm11, %v6579_v55, %v6825_v57  ;;  %vm18123_vm2 = vcmask 7168   ;;  %v15012_v60 = vmax.f32 %v14983_v63, %v7026_v21  ;;  %v15015_v38 = vmax.f32 %v14994_v62, %v7038_v22  ;;  %v15045_v24 = vpop.f32.mrf.mxu0  ;;  %v15059_v55 = vld [vmem:[%s18127_s15] ss:$0 sm:$0xff] }
 0x7de   : > { %7645 = vst.msk [vmem:[#allocation2 + $0x20] sm:$0xff] %vm18123_vm2, %v14981_v50  ;;  %v6858_v41 = vadd.f32 %v6826_v15, %v4895_v29  ;;  %vm18124_vm9 = vmmov %vm18123_vm2  ;;  %v15037_v40 = vmax.f32 %v15032_v44, %v7028_v42 }
 0x7df   : > { %7651 = vst.msk [vmem:[#allocation2 + $0x50] sm:$0xff] %vm18124_vm9, %v14992_v23  ;;  %vm18125_vm11 = vmmov %vm18123_vm2  ;;  %v15047_v49 = vpop.f32.mrf.mxu0  ;;  %v18162_v47 = vsub.f32 %v14983_v63, %v15012_v60 }
 0x7e0   : > { %v15019_v2 = vsel %vm14998_vm13, %v6858_v41, -1e+30  ;;  %7646 = vst.msk [vmem:[#allocation2 + $0x28] sm:$0xff] %vm18125_vm11, %v15012_v60  ;;  %7163 = vperm.xlu1 %8408, %v14992_v23   ;;  %vm18126_vm9 = vmmov %vm18123_vm2 }
 0x7e1   : > { %7045 = vmax.xlane.f32.xlu0 %v15019_v2  ;;  %7652 = vst.msk [vmem:[#allocation2 + $0x58] sm:$0xff] %vm18126_vm9, %v15015_v38  ;;  %v15049_v26 = vpop.f32.mrf.mxu0  ;;  %vm18128_vm11 = vmmov %vm18123_vm2 }
 0x7e2   : > { %7647 = vst.msk [vmem:[#allocation2 + $0x30] sm:$0xff] %vm18123_vm2, %v15037_v40  ;;  %vm18129_vm9 = vmmov %vm18123_vm2 }
 0x7e3   : > { %v15051_v13 = vpop.f32.mrf.mxu0 }
 0x7e4   : > { %7168 = vperm.xlu1 %8408, %v15015_v38  }
 0x7e5   : > { %v8208_v10 = vpop.f32.mrf.mxu0 }
 0x7e7   : > { %v1117_v61 = vpop.f32.mrf.mxu0 }
 0x7e9   : > { %v8211_v52 = vpop.f32.mrf.mxu0 }
 0x7eb   : > { %v1127_v5 = vpop.f32.mrf.mxu0 }
 0x7ed   : > { %v8214_v37 = vpop.f32.mrf.mxu0 }
 0x7ef   : > { %v1137_v0 = vpop.f32.mrf.mxu0 }
 0x7f1   : > { %v8217_v8 = vpop.f32.mrf.mxu0 }
 0x7f2   : > { %v1153_v15 = vadd.f32 %v8217_v8, %v15059_v55  ;;  %v1143_v8 = vadd.f32 %v8214_v37, %v15059_v55  ;;  %v1123_v37 = vadd.f32 %v8208_v10, %v15059_v55  ;;  %v1103_v10 = vadd.f32 %v15045_v24, %v15059_v55 }
 0x7f3   : > { %v1147_v19 = vpop.f32.mrf.mxu0  ;;  %v1088_v24 = vadd.f32 %v15059_v55, %v15039_v45 }
 0x7f4   : > { %v1148_v25 = vadd.f32 %v15059_v55, %v1147_v19  ;;  %v1138_v19 = vadd.f32 %v15059_v55, %v1137_v0  ;;  %v1118_v0 = vadd.f32 %v15059_v55, %v1117_v61 }
 0x7f5   : > { %v8220_v21 = vpop.f32.mrf.mxu0 }
 0x7f6   : > { %v1163_v29 = vadd.f32 %v8220_v21, %v15059_v55 }
 0x7f7   : > { %7153 = vperm.xlu0 %8409, %v14909_v33   ;;  %v1157_v57 = vpop.f32.mrf.mxu0 }
 0x7f8   : > { %v1158_v41 = vadd.f32 %v15059_v55, %v1157_v57  ;;  %8235 = vmatprep.subr.mxu0 %v1163_v29  ;;  %8299 = vmatprep.subr.mxu1 %v1163_v29  ;;  %v1128_v57 = vadd.f32 %v15059_v55, %v1127_v5 }
 0x7f9   : > { %8236 = vmatpush3.msra.mxu0 %v1163_v29  ;;  %8315 = vmatpush3.msra.mxu1 %v1163_v29  ;;  %v1133_v29 = vadd.f32 %v8211_v52, %v15059_v55  ;;  %v1113_v52 = vadd.f32 %v15049_v26, %v15059_v55  ;;  %v1098_v26 = vadd.f32 %v15059_v55, %v15047_v49  ;;  %v15096_v49 = vld [vmem:[#allocation2 + $0x38] sm:$0xff] }
 0x7fa   : > { %8237 = vmatprep.subr.mxu0 %v1158_v41  ;;  %8300 = vmatprep.subr.mxu1 %v1158_v41 }
 0x7fb   : > { %7123 = vperm.xlu0 %8409, %v14915_v30   ;;  %8238 = vmatpush3.msra.mxu0 %v1158_v41  ;;  %v7089_v30 = vmul.f32 1.442695, %v18162_v47  ;;  %v7265_v47 = vld [vmem:[#allocation3 + $0x50] sm:$0xff] }
 0x7fc   : > { %8239 = vmatprep.subr.mxu0 %v1153_v15  ;;  %8316 = vmatpush3.msra.mxu1 %v1158_v41 }
 0x7fd   : > { %8240 = vmatpush3.msra.mxu0 %v1153_v15  ;;  %8301 = vmatprep.subr.mxu1 %v1153_v15 }
 0x7fe   : > { %v7040_v22 = vpop.xlane.xlu0 %7039  ;;  %8241 = vmatprep.subr.mxu0 %v1148_v25  ;;  %8317 = vmatpush3.msra.mxu1 %v1153_v15 }
 0x7ff   : > { %7128 = vperm.xlu0 %8409, %v14954_v39   ;;  %v15069_v42 = vmax.f32 %v15062_v3, %v7040_v22  ;;  %8242 = vmatpush3.msra.mxu0 %v1148_v25  ;;  %v18130_v22 = vld [vmem:[#allocation257_spill] sm:$0xff] }
 0x800   : > { %8243 = vmatprep.subr.mxu0 %v1143_v8  ;;  %8302 = vmatprep.subr.mxu1 %v1148_v25 }
 0x801   : > { %7653 = vst.msk [vmem:[#allocation2 + $0x60] sm:$0xff] %vm18128_vm11, %v15069_v42  ;;  %7173 = vperm.xlu1 %8408, %v15069_v42   ;;  %8244 = vmatpush3.msra.mxu0 %v1143_v8  ;;  %vm18135_vm11 = vmmov %vm18123_vm2 }
 0x802   : > { %8245 = vmatprep.subr.mxu0 %v1138_v19  ;;  %8318 = vmatpush3.msra.mxu1 %v1148_v25  ;;  %v1108_v25 = vadd.f32 %v15059_v55, %v15051_v13  ;;  %v1093_v13 = vadd.f32 %v15034_v46, %v15059_v55  ;;  %v15106_v55 = vld [vmem:[#allocation2 + $0x68] sm:$0xff] }
 0x803   : > { %7133 = vperm.xlu0 %8409, %v14981_v50   ;;  %8246 = vmatpush3.msra.mxu0 %v1138_v19 }
 0x804   : > { %8303 = vmatprep.subr.mxu1 %v1143_v8  ;;  %8247 = vmatprep.subr.mxu0 %v1133_v29 }
 0x805   : > { %8319 = vmatpush3.msra.mxu1 %v1143_v8  ;;  %8248 = vmatpush3.msra.mxu0 %v1133_v29 }
 0x806   : > { %8304 = vmatprep.subr.mxu1 %v1138_v19  ;;  %8249 = vmatprep.subr.mxu0 %v1128_v57 }
 0x807   : > { %7138 = vperm.xlu0 %8409, %v15012_v60   ;;  %8320 = vmatpush3.msra.mxu1 %v1138_v19 }
 0x808   : > { %8250 = vmatpush3.msra.mxu0 %v1128_v57  ;;  %8305 = vmatprep.subr.mxu1 %v1133_v29 }
 0x809   : > { %8251 = vmatprep.subr.mxu0 %v1123_v37  ;;  %8321 = vmatpush3.msra.mxu1 %v1133_v29 }
 0x80a   : > { %8252 = vmatpush3.msra.mxu0 %v1123_v37  ;;  %8306 = vmatprep.subr.mxu1 %v1128_v57 }
 0x80b   : > { %7143 = vperm.xlu0 %8409, %v15037_v40   ;;  %8253 = vmatprep.subr.mxu0 %v1118_v0 }
 0x80c   : > { %8322 = vmatpush3.msra.mxu1 %v1128_v57  ;;  %8254 = vmatpush3.msra.mxu0 %v1118_v0 }
 0x80d   : > { %8307 = vmatprep.subr.mxu1 %v1123_v37  ;;  %8255 = vmatprep.subr.mxu0 %v1113_v52 }
 0x80e   : > { %8323 = vmatpush3.msra.mxu1 %v1123_v37  ;;  %8256 = vmatpush3.msra.mxu0 %v1113_v52  ;;  %v18131_v37 = vld [vmem:[#allocation427_spill] sm:$0xff] }
 0x80f   : > { %8308 = vmatprep.subr.mxu1 %v1118_v0  ;;  %8257 = vmatprep.subr.mxu0 %v1108_v25 }
 0x810   : > { %8324 = vmatpush3.msra.mxu1 %v1118_v0  ;;  %8258 = vmatpush3.msra.mxu0 %v1108_v25 }
 0x811   : > { %8309 = vmatprep.subr.mxu1 %v1113_v52  ;;  %8259 = vmatprep.subr.mxu0 %v1103_v10 }
 0x812   : > { %8325 = vmatpush3.msra.mxu1 %v1113_v52  ;;  %8260 = vmatpush3.msra.mxu0 %v1103_v10 }
 0x813   : > { %8310 = vmatprep.subr.mxu1 %v1108_v25  ;;  %8261 = vmatprep.subr.mxu0 %v1098_v26 }
 0x814   : > { %8326 = vmatpush3.msra.mxu1 %v1108_v25  ;;  %8262 = vmatpush3.msra.mxu0 %v1098_v26 }
 0x815   : > { %8311 = vmatprep.subr.mxu1 %v1103_v10  ;;  %8263 = vmatprep.subr.mxu0 %v1093_v13 }
 0x816   : > { %8327 = vmatpush3.msra.mxu1 %v1103_v10  ;;  %8264 = vmatpush3.msra.mxu0 %v1093_v13 }
 0x817   : > { %8312 = vmatprep.subr.mxu1 %v1098_v26  ;;  %8265 = vmatprep.subr.mxu0 %v1088_v24 }
 0x818   : > { %8328 = vmatpush3.msra.mxu1 %v1098_v26  ;;  %8266 = vmatpush3.msra.mxu0 %v1088_v24 }
 0x819   : > { %8313 = vmatprep.subr.mxu1 %v1093_v13 }
 0x81a   : > { %8329 = vmatpush3.msra.mxu1 %v1093_v13 }
 0x81b   : > { %8314 = vmatprep.subr.mxu1 %v1088_v24 }
 0x81c   : > { %8330 = vmatpush3.msra.mxu1 %v1088_v24  ;;  %v15122_v24 = vld [vmem:[#allocation2 + $0x70] sm:$0xff] }
 0x821   : > { %v7030_v46 = vpop.xlane.xlu1 %7029 }
 0x822   : > { %v15099_v61 = vmax.f32 %v15096_v49, %v7030_v46 }
 0x824   : > { %7648 = vst.msk [vmem:[#allocation2 + $0x38] sm:$0xff] %vm18129_vm9, %v15099_v61  ;;  %7148 = vperm.xlu0 %8409, %v15099_v61  }
 0x84b   : > { %v7114_v5 = vpop.permute.xlu1 %7113 }
 0x84c   : > { %v7191_v15 = vsub.f32 %v18130_v22, %v7114_v5 }
 0x84e   : > { %v7042_v41 = vpop.xlane.xlu0 %7041  ;;  %v7207_v8 = vmul.f32 1.442695, %v7191_v15 }
 0x84f   : > { %v15110_v19 = vmax.f32 %v15106_v55, %v7042_v41  ;;  %v15132_v41 = vld [vmem:[#allocation2 + $0x78] sm:$0xff] }
 0x850   : > { %8410 = vpow2.f32 %v7207_v8 }
 0x851   : > { %7654 = vst.msk [vmem:[#allocation2 + $0x68] sm:$0xff] %vm18123_vm2, %v15110_v19  ;;  %7178 = vperm.xlu1 %8408, %v15110_v19  }
 0x853   : > { %v7119_v57 = vpop.permute.xlu1 %7118 }
 0x854   : > { %v7192_v0 = vsub.f32 %v18131_v37, %v7119_v57 }
 0x856   : > { %v7209_v52 = vmul.f32 1.442695, %v7192_v0 }
 0x857   : > { %v7159_v13 = vpop.permute.xlu1 %7158 }
 0x858   : > { %8412 = vpow2.f32 %v7209_v52 }
 0x85b   : > { %v7164_v57 = vpop.permute.xlu1 %7163 }
 0x85d   : > { %v8411_v25 = vpop.eup %8410 }
 0x85e   : > { %8267 = vmatprep.mubr.msk.f32.mxu0 %vm13175_vm15, %v8411_v25  ;;  %v7239_v26 = vsel %vm13175_vm15, %v8411_v25, 0.0  ;;  %vm18134_vm15 = vmmov %vm18123_vm2  ;;  %v18136_v25 = vld [vmem:[#allocation282_spill] sm:$0xff] }
 0x85f   : > { %7287 = vadd.xlane.f32.xlu0 %v7239_v26  ;;  %v7200_v10 = vsub.f32 %v18136_v25, %v7159_v13  ;;  %v18137_v26 = vld [vmem:[#allocation429_spill] sm:$0xff]  ;;  %v7169_v8 = vpop.permute.xlu1 %7168 }
 0x860   : > { %v7202_v17 = vsub.f32 %v18138_v6, %v7169_v8  ;;  %v18142_v6 = vld [vmem:[#allocation281_spill] sm:$0xff] }
 0x861   : > { %v7225_v21 = vmul.f32 1.442695, %v7200_v10 }
 0x862   : > { %v7229_v27 = vmul.f32 1.442695, %v7202_v17  ;;  %v18143_v17 = vld [vmem:[#allocation430_spill] sm:$0xff] }
 0x863   : > { %8414 = vpow2.f32 %v7225_v21 }
 0x865   : > { %v15124_v46 = vpop.eup %8412 }
 0x866   : > { %v7044_v5 = vpop.xlane.xlu0 %7043  ;;  %8268 = vmatmul.mubr.msk.f32.vlgmr.msra.gmra.mxu0 %vm13503_vm4, %v15124_v46 }
 0x867   : > { %v15127_v22 = vmax.f32 %v15122_v24, %v7044_v5  ;;  %v7201_v5 = vsub.f32 %v18137_v26, %v7164_v57  ;;  %v18141_v57 = vld [vmem:[#allocation278_spill] sm:$0xff] }
 0x869   : > { %7655 = vst.msk [vmem:[#allocation2 + $0x70] sm:$0xff] %vm18134_vm15, %v15127_v22  ;;  %7183 = vperm.xlu1 %8408, %v15127_v22   ;;  %v7227_v36 = vmul.f32 1.442695, %v7201_v5 }
 0x86a   : > { %v7046_v37 = vpop.xlane.xlu0 %7045 }
 0x86b   : > { %v15140_v0 = vmax.f32 %v15132_v41, %v7046_v37  ;;  %v18139_v37 = vld [vmem:[#allocation307_spill] sm:$0xff]  ;;  %8416 = vpow2.f32 %v7227_v36 }
 0x86d   : > { %7656 = vst.msk [vmem:[#allocation2 + $0x78] sm:$0xff] %vm18135_vm11, %v15140_v0  ;;  %7188 = vperm.xlu1 %8408, %v15140_v0  }
 0x872   : > { %v7154_v29 = vpop.permute.xlu0 %7153 }
 0x873   : > { %v7199_v9 = vsub.f32 %v18139_v37, %v7154_v29 }
 0x875   : > { %v7223_v45 = vmul.f32 1.442695, %v7199_v9  ;;  %v8415_v9 = vpop.eup %8414 }
 0x876   : > { %v7124_v52 = vpop.permute.xlu0 %7123 }
 0x877   : > { %8418 = vpow2.f32 %v7223_v45  ;;  %v7193_v1 = vsub.f32 %v18140_v35, %v7124_v52 }
 0x878   : > { %8420 = vpow2.f32 %v7229_v27  ;;  %v8417_v5 = vpop.eup %8416  ;;  %v18145_v27 = vld [vmem:[#allocation17_spill] sm:$0xff] }
 0x879   : > { %v7211_v14 = vmul.f32 1.442695, %v7193_v1 }
 0x87a   : > { %v7129_v13 = vpop.permute.xlu0 %7128 }
 0x87b   : > { %8422 = vpow2.f32 %v7211_v14  ;;  %v7194_v25 = vsub.f32 %v18141_v57, %v7129_v13 }
 0x87c   : > { %v7174_v14 = vpop.permute.xlu1 %7173 }
 0x87d   : > { %v7213_v10 = vmul.f32 1.442695, %v7194_v25  ;;  %v7203_v52 = vsub.f32 %v18145_v27, %v7174_v14  ;;  %v18147_v25 = vld [vmem:[#allocation312_spill] sm:$0xff] }
 0x87e   : > { %v7134_v26 = vpop.permute.xlu0 %7133 }
 0x87f   : > { %8424 = vpow2.f32 %v7213_v10  ;;  %v7195_v8 = vsub.f32 %v18142_v6, %v7134_v26 }
 0x881   : > { %v7215_v29 = vmul.f32 1.442695, %v7195_v8  ;;  %v7231_v8 = vmul.f32 1.442695, %v7203_v52 }
 0x882   : > { %v7139_v21 = vpop.permute.xlu0 %7138 }
 0x883   : > { %8426 = vpow2.f32 %v7215_v29  ;;  %v7196_v36 = vsub.f32 %v18143_v17, %v7139_v21 }
 0x884   : > { %v8419_v45 = vpop.eup %8418 }
 0x885   : > { %v7217_v35 = vmul.f32 1.442695, %v7196_v36  ;;  %8279 = vmatprep.mubr.msk.f32.mxu1 %vm12869_vm14, %v8419_v45  ;;  %v8421_v57 = vpop.eup %8420  ;;  %v7247_v14 = vsel %vm12869_vm14, %v8419_v45, 0.0  ;;  %vm18158_vm14 = vmmov %vm18123_vm2 }
 0x886   : > { %v7144_v37 = vpop.permute.xlu0 %7143  ;;  %8280 = vmatmul.mubr.msk.f32.vlgmr.msra.gmra.mxu1 %vm13733_vm3, %v8415_v9 }
 0x887   : > { %8428 = vpow2.f32 %v7217_v35  ;;  %v7197_v10 = vsub.f32 %v18147_v25, %v7144_v37  ;;  %8282 = vmatprep.mubr.msk.f32.mxu1 %vm13991_vm0, %v8417_v5  ;;  %v7240_v37 = vsel %vm13503_vm4, %v15124_v46, 0.0  ;;  %v18155_v46 = vld [vmem:[#allocation317_spill] sm:$0xff]  ;;  %vm18157_vm4 = vnez %v18075_v43 }
 0x888   : > { %v8423_v6 = vpop.eup %8422  ;;  %8430 = vpow2.f32 %v7231_v8 }
 0x889   : > { %v7219_v29 = vmul.f32 1.442695, %v7197_v10  ;;  %8270 = vmatprep.mubr.msk.f32.mxu0 %vm13388_vm1, %v8423_v6  ;;  %v7241_v17 = vsel %vm13388_vm1, %v8423_v6, 0.0  ;;  %vm18156_vm1 = vnez %v18155_v46 }
 0x88a   : > { %7291 = vadd.xlane.f32.xlu0 %v7241_v17  ;;  %8283 = vmatmul.mubr.msk.f32.gmra.mxu1 %vm14298_vm7, %v8421_v57 }
 0x88b   : > { %8432 = vpow2.f32 %v7219_v29 }
 0x88c   : > { %v8425_v35 = vpop.eup %8424 }
 0x88d   : > { %8271 = vmatmul.mubr.msk.f32.gmra.mxu0 %vm13630_vm6, %v8425_v35  ;;  %v7242_v27 = vsel %vm13630_vm6, %v8425_v35, 0.0  ;;  %vm18159_vm6 = vnez %v18108_v32  ;;  %v18161_v32 = vsub.f32 %v14931_v7, %v14950_v48  ;;  %v18165_v7 = vsub.f32 %v15032_v44, %v15037_v40  ;;  %v7257_v44 = vld [vmem:[#allocation3 + $0x10] sm:$0xff] }
 0x88e   : > { %7293 = vadd.xlane.f32.xlu0 %v7242_v27  ;;  %v7249_v27 = vsel %vm13991_vm0, %v8417_v5, 0.0  ;;  %v7248_v5 = vsel %vm13733_vm3, %v8415_v9, 0.0  ;;  %vm18172_vm3 = vmmov %vm18123_vm2 }
 0x88f   : > { %v7091_v48 = vmul.f32 1.442695, %v18165_v7  ;;  %vm18176_vm0 = vmmov %vm18123_vm2  ;;  %v7267_v7 = vld [vmem:[#allocation3 + $0x60] sm:$0xff] }
 0x890   : > { %v8427_v52 = vpop.eup %8426  ;;  %vm18182_vm9 = vmmov %vm18176_vm0 }
 0x891   : > { %7289 = vadd.xlane.f32.xlu1 %v7240_v37  ;;  %8273 = vmatprep.mubr.msk.f32.mxu0 %vm13897_vm5, %v8427_v52  ;;  %v7243_v6 = vsel %vm13897_vm5, %v8427_v52, 0.0  ;;  %vm18175_vm5 = vmmov %vm18123_vm2 }
 0x892   : > { %vm18183_vm2 = vmmov %vm18176_vm0 }
 0x893   : > { %vm18184_vm15 = vmmov %vm18176_vm0 }
 0x894   : > { %v8429_v10 = vpop.eup %8428  ;;  %vm18185_vm11 = vmmov %vm18176_vm0 }
 0x895   : > { %7295 = vadd.xlane.f32.xlu1 %v7243_v6  ;;  %8274 = vmatmul.mubr.msk.f32.gmra.mxu0 %vm14144_vm10, %v8429_v10  ;;  %v7244_v29 = vsel %vm14144_vm10, %v8429_v10, 0.0  ;;  %v8431_v21 = vpop.eup %8430  ;;  %vm18177_vm10 = vmmov %vm18176_vm0 }
 0x896   : > { %7297 = vadd.xlane.f32.xlu0 %v7244_v29  ;;  %8285 = vmatprep.mubr.msk.f32.mxu1 %vm14624_vm12, %v8431_v21  ;;  %v7251_v25 = vsel %vm14624_vm12, %v8431_v21, 0.0  ;;  %v7079_v29 = vmul.f32 1.442695, %v7063_v54  ;;  %vm18179_vm12 = vmmov %vm18176_vm0 }
 0x898   : > { %v8433_v17 = vpop.eup %8432 }
 0x899   : > { %8276 = vmatprep.mubr.msk.f32.mxu0 %vm18156_vm1, %v8433_v17  ;;  %v7245_v35 = vsel %vm18156_vm1, %v8433_v17, 0.0  ;;  %vm18186_vm1 = vmmov %vm18176_vm0 }
 0x89a   : > { %7299 = vadd.xlane.f32.xlu1 %v7245_v35 }
 0x89e   : > { %7303 = vadd.xlane.f32.xlu1 %v7247_v14 }
 0x89f   : > { %v7149_v52 = vpop.permute.xlu0 %7148 }
 0x8a0   : > { %v7198_v37 = vsub.f32 %v14743_v12, %v7149_v52  ;;  %v7250_v12 = vsel %vm14298_vm7, %v8421_v57, 0.0  ;;  %vm18178_vm7 = vmmov %vm18176_vm0 }
 0x8a2   : > { %7307 = vadd.xlane.f32.xlu1 %v7249_v27  ;;  %v7221_v10 = vmul.f32 1.442695, %v7198_v37  ;;  %v18160_v27 = vsub.f32 %v14936_v51, %v14954_v39  ;;  %v7081_v37 = vmul.f32 1.442695, %v18161_v32  ;;  %v18166_v39 = vsub.f32 %v14941_v34, %v14965_v11 }
 0x8a3   : > { %v18169_v34 = vsub.f32 %v14967_v16, %v14992_v23 }
 0x8a4   : > { %8434 = vpow2.f32 %v7221_v10  ;;  %v7085_v52 = vmul.f32 1.442695, %v18160_v27  ;;  %v7097_v63 = vmul.f32 1.442695, %v18166_v39 }
 0x8a5   : > { %v7099_v11 = vmul.f32 1.442695, %v18169_v34 }
 0x8a6   : > { %7311 = vadd.xlane.f32.xlu1 %v7251_v25  ;;  %v18164_v25 = vsub.f32 %v15096_v49, %v15099_v61  ;;  %v18168_v49 = vsub.f32 %v14994_v62, %v15015_v38  ;;  %v18171_v38 = vsub.f32 %v15062_v3, %v15069_v42  ;;  %v18174_v3 = vsub.f32 %v15122_v24, %v15127_v22 }
 0x8a8   : > { %v7093_v51 = vmul.f32 1.442695, %v18164_v25  ;;  %v7101_v61 = vmul.f32 1.442695, %v18168_v49  ;;  %v7107_v42 = vmul.f32 1.442695, %v18174_v3 }
 0x8b1   : > { %v8435_v6 = vpop.eup %8434 }
 0x8b2   : > { %8277 = vmatmul.mubr.msk.f32.gmra.mxu0 %vm18157_vm4, %v8435_v6  ;;  %v7246_v45 = vsel %vm18157_vm4, %v8435_v6, 0.0  ;;  %vm18187_vm4 = vmmov %vm18176_vm0 }
 0x8b3   : > { %7301 = vadd.xlane.f32.xlu0 %v7246_v45 }
 0x8b7   : > { %7305 = vadd.xlane.f32.xlu0 %v7248_v5  ;;  %v7258_v5 = vld [vmem:[#allocation3 + $0x18] sm:$0xff] }
 0x8bb   : > { %7309 = vadd.xlane.f32.xlu0 %v7250_v12  ;;  %v7103_v12 = vmul.f32 1.442695, %v18171_v38 }
 0x8cc   : > { %v7179_v1 = vpop.permute.xlu1 %7178 }
 0x8cd   : > { %v7204_v26 = vsub.f32 %v14878_v20, %v7179_v1  ;;  %v7255_v20 = vld [vmem:[#allocation3] sm:$0xff] }
 0x8cf   : > { %v7233_v8 = vmul.f32 1.442695, %v7204_v26  ;;  %v7256_v26 = vld [vmem:[#allocation3 + $0x8] sm:$0xff] }
 0x8d1   : > { %8436 = vpow2.f32 %v7233_v8 }
 0x8d2   : > { %8438 = vpow2.f32 %v7079_v29 }
 0x8de   : > { %v8437_v43 = vpop.eup %8436 }
 0x8df   : > { %8286 = vmatmul.mubr.msk.f32.gmra.mxu1 %vm14871_vm8, %v8437_v43  ;;  %v7252_v9 = vsel %vm14871_vm8, %v8437_v43, 0.0  ;;  %v8439_v36 = vpop.eup %8438  ;;  %vm18180_vm8 = vmmov %vm18176_vm0 }
 0x8e0   : > { %7313 = vadd.xlane.f32.xlu0 %v7252_v9  ;;  %v7271_v18 = vmul.f32 %v8439_v36, %v7255_v20 }
 0x8e4   : > { %v7184_v13 = vpop.permute.xlu1 %7183 }
 0x8e5   : > { %v7205_v57 = vsub.f32 %v14987_v59, %v7184_v13 }
 0x8e7   : > { %v7235_v21 = vmul.f32 1.442695, %v7205_v57 }
 0x8e8   : > { %v7189_v17 = vpop.permute.xlu1 %7188  ;;  %v7288_v54 = vpop.xlane.xlu0 %7287 }
 0x8e9   : > { %8440 = vpow2.f32 %v7235_v21  ;;  %v7206_v58 = vsub.f32 %v15019_v2, %v7189_v17  ;;  %v7319_v46 = vadd.f32 %v7288_v54, %v7271_v18  ;;  %v7083_v2 = vmul.f32 1.442695, %v7065_v56  ;;  %v7261_v54 = vld [vmem:[#allocation3 + $0x30] sm:$0xff] }
 0x8ea   : > { %v18163_v56 = vsub.f32 %v14956_v53, %v14981_v50  ;;  %v18167_v53 = vsub.f32 %v14900_v4, %v14909_v33  ;;  %v18170_v4 = vsub.f32 %v15106_v55, %v15110_v19  ;;  %v18173_v55 = vsub.f32 %v15132_v41, %v15140_v0  ;;  %v7260_v41 = vld [vmem:[#allocation3 + $0x28] sm:$0xff] }
 0x8eb   : > { %v7237_v15 = vmul.f32 1.442695, %v7206_v58  ;;  %7336 = vst.msk [vmem:[#allocation3] sm:$0xff] %vm18158_vm14, %v7319_v46  ;;  %vm18188_vm14 = vmmov %vm18176_vm0 }
 0x8ec   : > { %v7087_v31 = vmul.f32 1.442695, %v18163_v56  ;;  %v7095_v50 = vmul.f32 1.442695, %v18167_v53  ;;  %v7105_v33 = vmul.f32 1.442695, %v18170_v4 }
 0x8ed   : > { %8442 = vpow2.f32 %v7237_v15  ;;  %v7109_v19 = vmul.f32 1.442695, %v18173_v55  ;;  %v7262_v53 = vld [vmem:[#allocation3 + $0x38] sm:$0xff] }
 0x8ee   : > { %8444 = vpow2.f32 %v7083_v2  ;;  %v7263_v2 = vld [vmem:[#allocation3 + $0x40] sm:$0xff] }
 0x8ef   : > { %8446 = vpow2.f32 %v7085_v52 }
 0x8f0   : > { %8448 = vpow2.f32 %v7081_v37 }
 0x8f1   : > { %8450 = vpow2.f32 %v7089_v30 }
 0x8f2   : > { %8452 = vpow2.f32 %v7087_v31 }
 0x8f3   : > { %8454 = vpow2.f32 %v7093_v51 }
 0x8f4   : > { %8456 = vpow2.f32 %v7091_v48 }
 0x8f5   : > { %8458 = vpow2.f32 %v7097_v63 }
 0x8f6   : > { %v8441_v28 = vpop.eup %8440  ;;  %8460 = vpow2.f32 %v7095_v50 }
 0x8f7   : > { %8288 = vmatprep.mubr.msk.f32.mxu1 %vm18159_vm6, %v8441_v28  ;;  %v7253_v59 = vsel %vm18159_vm6, %v8441_v28, 0.0  ;;  %8462 = vpow2.f32 %v7101_v61  ;;  %v7264_v61 = vld [vmem:[#allocation3 + $0x48] sm:$0xff]  ;;  %vm18189_vm6 = vcmask 261120  }
 0x8f8   : > { %7315 = vadd.xlane.f32.xlu1 %v7253_v59  ;;  %8464 = vpow2.f32 %v7099_v11  ;;  %v7266_v11 = vld [vmem:[#allocation3 + $0x58] sm:$0xff] }
 0x8f9   : > { %8466 = vpow2.f32 %v7105_v33 }
 0x8fa   : > { %v8443_v35 = vpop.eup %8442  ;;  %8468 = vpow2.f32 %v7103_v12  ;;  %v7269_v12 = vld [vmem:[#allocation3 + $0x70] sm:$0xff] }
 0x8fb   : > { %8289 = vmatmul.mubr.msk.f32.gmra.mxu1 %vm14998_vm13, %v8443_v35  ;;  %v7254_v14 = vsel %vm14998_vm13, %v8443_v35, 0.0  ;;  %v8445_v60 = vpop.eup %8444  ;;  %8470 = vpow2.f32 %v7109_v19  ;;  %vm18181_vm13 = vmmov %vm18176_vm0 }
 0x8fc   : > { %7317 = vadd.xlane.f32.xlu0 %v7254_v14  ;;  %v8447_v40 = vpop.eup %8446  ;;  %v7273_v6 = vmul.f32 %v8445_v60, %v7257_v44  ;;  %8472 = vpow2.f32 %v7107_v42 }
 0x8fd   : > { %v8449_v10 = vpop.eup %8448  ;;  %v7274_v23 = vmul.f32 %v8447_v40, %v7258_v5 }
 0x8fe   : > { %v8451_v62 = vpop.eup %8450  ;;  %v7272_v13 = vmul.f32 %v8449_v10, %v7256_v26  ;;  %v7270_v26 = vld [vmem:[#allocation3 + $0x78] sm:$0xff] }
 0x8ff   : > { %v8453_v16 = vpop.eup %8452  ;;  %v7276_v17 = vmul.f32 %v8451_v62, %v7260_v41 }
 0x900   : > { %v8455_v29 = vpop.eup %8454 }
 0x901   : > { %v8457_v9 = vpop.eup %8456  ;;  %v7278_v50 = vmul.f32 %v8455_v29, %v7262_v53  ;;  %v7360_v53 = vld [vmem:[#allocation4 + $0x40] sm:$0xff] }
 0x902   : > { %v8459_v0 = vpop.eup %8458  ;;  %v7277_v59 = vmul.f32 %v8457_v9, %v7261_v54 }
 0x903   : > { %v8461_v21 = vpop.eup %8460 }
 0x904   : > { %v8463_v15 = vpop.eup %8462  ;;  %v7279_v32 = vmul.f32 %v8461_v21, %v7263_v2 }
 0x905   : > { %v8465_v28 = vpop.eup %8464 }
 0x906   : > { %v8467_v14 = vpop.eup %8466  ;;  %v7281_v25 = vmul.f32 %v8465_v28, %v7265_v47  ;;  %v7359_v47 = vld [vmem:[#allocation4 + $0x38] sm:$0xff] }
 0x907   : > { %v8469_v52 = vpop.eup %8468 }
 0x908   : > { %v8471_v30 = vpop.eup %8470  ;;  %v7283_v39 = vmul.f32 %v8469_v52, %v7267_v7 }
 0x909   : > { %7370 = vperm.xlu1 %8408, %v8439_v36   ;;  %v7259_v36 = vld [vmem:[#allocation3 + $0x20] sm:$0xff]  ;;  %v8473_v31 = vpop.eup %8472 }
 0x90a   : > { %v7275_v24 = vmul.f32 %v8453_v16, %v7259_v36 }
 0x90d   : > { %7380 = vperm.xlu1 %8408, %v8445_v60  }
 0x911   : > { %7385 = vperm.xlu1 %8408, %v8447_v40   ;;  %v7280_v40 = vmul.f32 %v8459_v0, %v7264_v61 }
 0x912   : > { %7375 = vperm.xlu0 %8409, %v8449_v10  }
 0x913   : > { %v7292_v45 = vpop.xlane.xlu0 %7291 }
 0x914   : > { %v7321_v1 = vadd.f32 %v7292_v45, %v7273_v6  ;;  %v7282_v6 = vmul.f32 %v8463_v15, %v7266_v11  ;;  %v7268_v45 = vld [vmem:[#allocation3 + $0x68] sm:$0xff] }
 0x915   : > { %7395 = vperm.xlu1 %8408, %v8451_v62   ;;  %v7284_v5 = vmul.f32 %v8467_v14, %v7268_v45 }
 0x916   : > { %7338 = vst.msk [vmem:[#allocation3 + $0x10] sm:$0xff] %vm18172_vm3, %v7321_v1  ;;  %7390 = vperm.xlu0 %8409, %v8453_v16   ;;  %v7285_v16 = vmul.f32 %v8473_v31, %v7269_v12  ;;  %vm18190_vm3 = vmmov %vm18189_vm6 }
 0x917   : > { %v7294_v8 = vpop.xlane.xlu0 %7293 }
 0x918   : > { %v7322_v43 = vadd.f32 %v7294_v8, %v7274_v23  ;;  %v7352_v8 = vld [vmem:[#allocation4] sm:$0xff] }
 0x919   : > { %7405 = vperm.xlu1 %8408, %v8455_v29   ;;  %v7286_v29 = vmul.f32 %v8471_v30, %v7270_v26 }
 0x91a   : > { %7339 = vst.msk [vmem:[#allocation3 + $0x18] sm:$0xff] %vm18175_vm5, %v7322_v43  ;;  %v7290_v57 = vpop.xlane.xlu1 %7289  ;;  %7400 = vperm.xlu0 %8409, %v8457_v9   ;;  %vm18191_vm5 = vmmov %vm18190_vm3 }
 0x91b   : > { %v7320_v20 = vadd.f32 %v7290_v57, %v7272_v13  ;;  %v7354_v57 = vld [vmem:[#allocation4 + $0x10] sm:$0xff] }
 0x91d   : > { %7415 = vperm.xlu1 %8408, %v8459_v0   ;;  %7337 = vst.msk [vmem:[#allocation3 + $0x8] sm:$0xff] %vm18176_vm0, %v7320_v20  ;;  %vm18192_vm0 = vmmov %vm18190_vm3 }
 0x91e   : > { %v7296_v22 = vpop.xlane.xlu1 %7295  ;;  %7410 = vperm.xlu0 %8409, %v8461_v21   ;;  %v7355_v21 = vld [vmem:[#allocation4 + $0x18] sm:$0xff] }
 0x91f   : > { %v7323_v58 = vadd.f32 %v7296_v22, %v7275_v24  ;;  %v7298_v18 = vpop.xlane.xlu0 %7297  ;;  %v7353_v24 = vld [vmem:[#allocation4 + $0x8] sm:$0xff] }
 0x920   : > { %v7324_v46 = vadd.f32 %v7298_v18, %v7276_v17 }
 0x921   : > { %7425 = vperm.xlu1 %8408, %v8463_v15   ;;  %7340 = vst.msk [vmem:[#allocation3 + $0x20] sm:$0xff] %vm18177_vm10, %v7323_v58  ;;  %vm18193_vm10 = vmmov %vm18192_vm0 }
 0x922   : > { %7341 = vst.msk [vmem:[#allocation3 + $0x28] sm:$0xff] %vm18178_vm7, %v7324_v46  ;;  %7420 = vperm.xlu0 %8409, %v8465_v28   ;;  %v7357_v46 = vld [vmem:[#allocation4 + $0x28] sm:$0xff]  ;;  %v7356_v28 = vld [vmem:[#allocation4 + $0x20] sm:$0xff]  ;;  %vm18194_vm7 = vmmov %vm18192_vm0 }
 0x923   : > { %v7300_v35 = vpop.xlane.xlu1 %7299 }
 0x924   : > { %v7325_v27 = vadd.f32 %v7300_v35, %v7277_v59 }
 0x925   : > { %7435 = vperm.xlu1 %8408, %v8467_v14  }
 0x926   : > { %7342 = vst.msk [vmem:[#allocation3 + $0x30] sm:$0xff] %vm18179_vm12, %v7325_v27  ;;  %7430 = vperm.xlu0 %8409, %v8469_v52   ;;  %v8269_v1 = vpop.f32.mrf.mxu0  ;;  %vm18195_vm12 = vmmov %vm18192_vm0 }
 0x927   : > { %v7304_v37 = vpop.xlane.xlu1 %7303 }
 0x928   : > { %v7327_v56 = vadd.f32 %v7304_v37, %v7279_v32  ;;  %v7530_v55 = vpop.f32.mrf.mxu0 }
 0x929   : > { %7445 = vperm.xlu1 %8408, %v8471_v30   ;;  %v7358_v30 = vld [vmem:[#allocation4 + $0x30] sm:$0xff] }
 0x92a   : > { %7344 = vst.msk [vmem:[#allocation3 + $0x40] sm:$0xff] %vm18180_vm8, %v7327_v56  ;;  %7440 = vperm.xlu0 %8409, %v8473_v31   ;;  %vm18196_vm8 = vmmov %vm18192_vm0 }
 0x92b   : > { %v7308_v51 = vpop.xlane.xlu1 %7307 }
 0x92c   : > { %v7329_v48 = vadd.f32 %v7308_v51, %v7281_v25 }
 0x92e   : > { %7346 = vst.msk [vmem:[#allocation3 + $0x50] sm:$0xff] %vm18181_vm13, %v7329_v48  ;;  %vm18197_vm13 = vmmov %vm18192_vm0 }
 0x92f   : > { %v7312_v63 = vpop.xlane.xlu1 %7311 }
 0x930   : > { %v7331_v60 = vadd.f32 %v7312_v63, %v7283_v39 }
 0x932   : > { %7348 = vst.msk [vmem:[#allocation3 + $0x60] sm:$0xff] %vm18182_vm9, %v7331_v60  ;;  %v7361_v60 = vld [vmem:[#allocation4 + $0x48] sm:$0xff]  ;;  %vm18198_vm9 = vmmov %vm18192_vm0 }
 0x93c   : > { %v7302_v49 = vpop.xlane.xlu0 %7301 }
 0x93d   : > { %v7326_v44 = vadd.f32 %v7302_v49, %v7278_v50 }
 0x93f   : > { %7343 = vst.msk [vmem:[#allocation3 + $0x38] sm:$0xff] %vm18183_vm2, %v7326_v44  ;;  %vm18199_vm2 = vmmov %vm18192_vm0 }
 0x940   : > { %v7306_v34 = vpop.xlane.xlu0 %7305 }
 0x941   : > { %v7328_v10 = vadd.f32 %v7306_v34, %v7280_v40 }
 0x943   : > { %7345 = vst.msk [vmem:[#allocation3 + $0x48] sm:$0xff] %vm18184_vm15, %v7328_v10  ;;  %vm18200_vm15 = vmmov %vm18192_vm0 }
 0x944   : > { %v7310_v4 = vpop.xlane.xlu0 %7309 }
 0x945   : > { %v7330_v33 = vadd.f32 %v7310_v4, %v7282_v6  ;;  %v7363_v6 = vld [vmem:[#allocation4 + $0x58] sm:$0xff]  ;;  %v7362_v4 = vld [vmem:[#allocation4 + $0x50] sm:$0xff] }
 0x946   : > { %v8281_v56 = vpop.f32.mrf.mxu1 }
 0x947   : > { %7347 = vst.msk [vmem:[#allocation3 + $0x58] sm:$0xff] %vm18185_vm11, %v7330_v33  ;;  %vm18201_vm11 = vmmov %vm18192_vm0 }
 0x948   : > { %v7570_v50 = vpop.f32.mrf.mxu1 }
 0x94a   : > { %v8284_v10 = vpop.f32.mrf.mxu1 }
 0x94d   : > { %v8272_v43 = vpop.f32.mrf.mxu0 }
 0x94f   : > { %v7540_v41 = vpop.f32.mrf.mxu0 }
 0x955   : > { %v8275_v22 = vpop.f32.mrf.mxu0 }
 0x957   : > { %v7550_v59 = vpop.f32.mrf.mxu0 }
 0x969   : > { %v7314_v62 = vpop.xlane.xlu0 %7313 }
 0x96a   : > { %v7332_v38 = vadd.f32 %v7314_v62, %v7284_v5 }
 0x96c   : > { %7349 = vst.msk [vmem:[#allocation3 + $0x68] sm:$0xff] %vm18186_vm1, %v7332_v38  ;;  %vm18202_vm1 = vmmov %vm18192_vm0 }
 0x972   : > { %v8278_v37 = vpop.f32.mrf.mxu0 }
 0x974   : > { %v7560_v63 = vpop.f32.mrf.mxu0 }
 0x981   : > { %v7316_v23 = vpop.xlane.xlu1 %7315 }
 0x982   : > { %v7333_v19 = vadd.f32 %v7316_v23, %v7285_v16  ;;  %v7365_v16 = vld [vmem:[#allocation4 + $0x68] sm:$0xff] }
 0x984   : > { %7350 = vst.msk [vmem:[#allocation3 + $0x70] sm:$0xff] %vm18187_vm4, %v7333_v19  ;;  %vm18203_vm4 = vmmov %vm18192_vm0 }
 0x985   : > { %v7371_v3 = vpop.permute.xlu1 %7370  ;;  %v7318_v42 = vpop.xlane.xlu0 %7317 }
 0x986   : > { %v7448_v9 = vmul.f32 %v7371_v3, %v7352_v8  ;;  %v7334_v13 = vadd.f32 %v7318_v42, %v7286_v29 }
 0x988   : > { %v7609_v36 = vadd.f32 %v7530_v55, %v7448_v9  ;;  %7351 = vst.msk [vmem:[#allocation3 + $0x78] sm:$0xff] %vm18188_vm14, %v7334_v13  ;;  %v7364_v55 = vld [vmem:[#allocation4 + $0x60] sm:$0xff]  ;;  %vm18204_vm14 = vmmov %vm18192_vm0 }
 0x989   : > { %v7381_v20 = vpop.permute.xlu1 %7380 }
 0x98a   : > { %7625 = vst.msk [vmem:[#allocation4] sm:$0xff] %vm18189_vm6, %v7609_v36  ;;  %v7450_v0 = vmul.f32 %v7381_v20, %v7354_v57  ;;  %v7367_v57 = vld [vmem:[#allocation4 + $0x78] sm:$0xff]  ;;  %v7366_v20 = vld [vmem:[#allocation4 + $0x70] sm:$0xff] }
 0x98c   : > { %v7611_v17 = vadd.f32 %v7540_v41, %v7450_v0 }
 0x98d   : > { %v7386_v58 = vpop.permute.xlu1 %7385  ;;  %v7376_v18 = vpop.permute.xlu0 %7375 }
 0x98e   : > { %7627 = vst.msk [vmem:[#allocation4 + $0x10] sm:$0xff] %vm18190_vm3, %v7611_v17  ;;  %v7451_v54 = vmul.f32 %v7386_v58, %v7355_v21  ;;  %v7449_v15 = vmul.f32 %v7376_v18, %v7353_v24 }
 0x990   : > { %v7612_v35 = vadd.f32 %v8272_v43, %v7451_v54  ;;  %v7610_v2 = vadd.f32 %v8269_v1, %v7449_v15  ;;  %v7580_v1 = vpop.f32.mrf.mxu1 }
 0x991   : > { %v7396_v14 = vpop.permute.xlu1 %7395  ;;  %v7391_v27 = vpop.permute.xlu0 %7390 }
 0x992   : > { %7628 = vst.msk [vmem:[#allocation4 + $0x18] sm:$0xff] %vm18191_vm5, %v7612_v35  ;;  %v7453_v52 = vmul.f32 %v7396_v14, %v7357_v46  ;;  %v7452_v32 = vmul.f32 %v7391_v27, %v7356_v28 }
 0x993   : > { %7626 = vst.msk [vmem:[#allocation4 + $0x8] sm:$0xff] %vm18192_vm0, %v7610_v2 }
 0x994   : > { %v7614_v31 = vadd.f32 %v8275_v22, %v7453_v52  ;;  %v7613_v25 = vadd.f32 %v7550_v59, %v7452_v32 }
 0x995   : > { %v7406_v51 = vpop.permute.xlu1 %7405  ;;  %v7401_v7 = vpop.permute.xlu0 %7400 }
 0x996   : > { %7630 = vst.msk [vmem:[#allocation4 + $0x28] sm:$0xff] %vm18193_vm10, %v7614_v31  ;;  %v7455_v48 = vmul.f32 %v7406_v51, %v7359_v47  ;;  %v7454_v39 = vmul.f32 %v7401_v7, %v7358_v30 }
 0x997   : > { %7629 = vst.msk [vmem:[#allocation4 + $0x20] sm:$0xff] %vm18194_vm7, %v7613_v25 }
 0x998   : > { %v7616_v49 = vadd.f32 %v8278_v37, %v7455_v48  ;;  %v7615_v61 = vadd.f32 %v7560_v63, %v7454_v39 }
 0x999   : > { %v7416_v44 = vpop.permute.xlu1 %7415  ;;  %v7411_v40 = vpop.permute.xlu0 %7410 }
 0x99a   : > { %7632 = vst.msk [vmem:[#allocation4 + $0x38] sm:$0xff] %vm18195_vm12, %v7616_v49  ;;  %v7457_v34 = vmul.f32 %v7416_v44, %v7361_v60  ;;  %v7456_v11 = vmul.f32 %v7411_v40, %v7360_v53 }
 0x99b   : > { %7631 = vst.msk [vmem:[#allocation4 + $0x30] sm:$0xff] %vm18196_vm8, %v7615_v61 }
 0x99c   : > { %v7618_v33 = vadd.f32 %v8281_v56, %v7457_v34  ;;  %v7617_v45 = vadd.f32 %v7570_v50, %v7456_v11 }
 0x99d   : > { %v7426_v5 = vpop.permute.xlu1 %7425  ;;  %v7421_v62 = vpop.permute.xlu0 %7420 }
 0x99e   : > { %7634 = vst.msk [vmem:[#allocation4 + $0x48] sm:$0xff] %vm18197_vm13, %v7618_v33  ;;  %v7459_v38 = vmul.f32 %v7426_v5, %v7363_v6  ;;  %v7458_v12 = vmul.f32 %v7421_v62, %v7362_v4 }
 0x99f   : > { %7633 = vst.msk [vmem:[#allocation4 + $0x40] sm:$0xff] %vm18198_vm9, %v7617_v45  ;;  %v8287_v19 = vpop.f32.mrf.mxu1 }
 0x9a0   : > { %v7620_v23 = vadd.f32 %v8284_v10, %v7459_v38  ;;  %v7619_v26 = vadd.f32 %v7580_v1, %v7458_v12 }
 0x9a1   : > { %v7436_v8 = vpop.permute.xlu1 %7435  ;;  %v7431_v3 = vpop.permute.xlu0 %7430 }
 0x9a2   : > { %7636 = vst.msk [vmem:[#allocation4 + $0x58] sm:$0xff] %vm18199_vm2, %v7620_v23  ;;  %v7461_v29 = vmul.f32 %v7436_v8, %v7365_v16  ;;  %v7460_v42 = vmul.f32 %v7431_v3, %v7364_v55  ;;  %v7590_v43 = vpop.f32.mrf.mxu1 }
 0x9a3   : > { %7635 = vst.msk [vmem:[#allocation4 + $0x50] sm:$0xff] %vm18200_vm15, %v7619_v26 }
 0x9a4   : > { %v7622_v9 = vadd.f32 %v8287_v19, %v7461_v29  ;;  %v7621_v13 = vadd.f32 %v7590_v43, %v7460_v42 }
 0x9a5   : > { %v7446_v36 = vpop.permute.xlu1 %7445  ;;  %v7441_v41 = vpop.permute.xlu0 %7440 }
 0x9a6   : > { %7638 = vst.msk [vmem:[#allocation4 + $0x68] sm:$0xff] %vm18201_vm11, %v7622_v9  ;;  %v7463_v0 = vmul.f32 %v7446_v36, %v7367_v57  ;;  %v7462_v24 = vmul.f32 %v7441_v41, %v7366_v20 }
 0x9a7   : > { %7637 = vst.msk [vmem:[#allocation4 + $0x60] sm:$0xff] %vm18202_vm1, %v7621_v13 }
 0x9bb   : > { %v8290_v21 = vpop.f32.mrf.mxu1 }
 0x9bc   : > { %v7624_v22 = vadd.f32 %v8290_v21, %v7463_v0 }
 0x9bd   : > { %v7600_v17 = vpop.f32.mrf.mxu1 }
 0x9be   : > { %7640 = vst.msk [vmem:[#allocation4 + $0x78] sm:$0xff] %vm18203_vm4, %v7624_v22  ;;  %v7623_v58 = vadd.f32 %v7600_v17, %v7462_v24 }
 0x9c0   : > { %7639 = vst.msk [vmem:[#allocation4 + $0x70] sm:$0xff] %vm18204_vm14, %v7623_v58 }
 0x9c1 PF: > { %p8072_p8 = scmp.ne.s32.totalorder %s8590_s21, 1 }
 0x9c2   : > { %s18205_s4 = sld [smem:[#allocation468_spill]] (!%p8072_p8) }
 0x9c3   : > { %7660 = sbr.rel (%p8072_p8) target bundleno = 2681 (0xa79), region = 160 }
 0x9c8   : > { %v7679_v18 = vld [vmem:[#allocation3 + $0x10] sm:$0xff]  ;;  %v7677_v54 = vld [vmem:[#allocation3] sm:$0xff]  ;;  %v7680_v15 = vld [vmem:[#allocation3 + $0x18] sm:$0xff]  ;;  %v8612_v46 = vmov 0   ;;  %vm7860_vm6 = vcmask 261120  }
 0x9c9   : > { %8489 = vset.pattern.permute.xlu1 %v8612_v46  ;;  %8488 = vset.pattern.permute.xlu0 %v8612_v46  ;;  %v7695_v28 = vadd.f32 1e-16, %v7679_v18  ;;  %v7693_v59 = vadd.f32 1e-16, %v7677_v54  ;;  %v7678_v35 = vld [vmem:[#allocation3 + $0x8] sm:$0xff]  ;;  %v7681_v52 = vld [vmem:[#allocation3 + $0x20] sm:$0xff] }
 0x9ca   : > { %v7696_v2 = vadd.f32 1e-16, %v7680_v15  ;;  %v7694_v14 = vadd.f32 1e-16, %v7678_v35  ;;  %v7682_v27 = vld [vmem:[#allocation3 + $0x28] sm:$0xff]  ;;  %v7684_v47 = vld [vmem:[#allocation3 + $0x38] sm:$0xff] }
 0x9cb   : > { %7721 = vperm.xlu1 %8489, %v7695_v28   ;;  %7711 = vperm.xlu0 %8488, %v7693_v59   ;;  %v7698_v32 = vadd.f32 1e-16, %v7682_v27  ;;  %v7697_v37 = vadd.f32 1e-16, %v7681_v52  ;;  %v7683_v30 = vld [vmem:[#allocation3 + $0x30] sm:$0xff]  ;;  %v7686_v25 = vld [vmem:[#allocation3 + $0x48] sm:$0xff] }
 0x9cc   : > { %v7700_v56 = vadd.f32 1e-16, %v7684_v47  ;;  %v7699_v31 = vadd.f32 1e-16, %v7683_v30  ;;  %v7685_v51 = vld [vmem:[#allocation3 + $0x40] sm:$0xff]  ;;  %v7688_v39 = vld [vmem:[#allocation3 + $0x58] sm:$0xff] }
 0x9cd   : > { %v7702_v7 = vadd.f32 1e-16, %v7686_v25  ;;  %v7701_v48 = vadd.f32 1e-16, %v7685_v51  ;;  %v7687_v63 = vld [vmem:[#allocation3 + $0x50] sm:$0xff]  ;;  %v7690_v50 = vld [vmem:[#allocation3 + $0x68] sm:$0xff] }
 0x9ce   : > { %v7704_v60 = vadd.f32 1e-16, %v7688_v39  ;;  %v7703_v53 = vadd.f32 1e-16, %v7687_v63  ;;  %v7689_v49 = vld [vmem:[#allocation3 + $0x60] sm:$0xff]  ;;  %v7692_v40 = vld [vmem:[#allocation3 + $0x78] sm:$0xff] }
 0x9cf   : > { %7726 = vperm.xlu1 %8489, %v7696_v2   ;;  %7716 = vperm.xlu0 %8488, %v7694_v14   ;;  %v7706_v61 = vadd.f32 1e-16, %v7690_v50  ;;  %v7705_v44 = vadd.f32 1e-16, %v7689_v49  ;;  %v7691_v34 = vld [vmem:[#allocation3 + $0x70] sm:$0xff]  ;;  %v7661_v16 = vld [vmem:[#allocation4] sm:$0xff] }
 0x9d0   : > { %v7708_v11 = vadd.f32 1e-16, %v7692_v40  ;;  %v7707_v10 = vadd.f32 1e-16, %v7691_v34  ;;  %v7663_v38 = vld [vmem:[#allocation4 + $0x10] sm:$0xff]  ;;  %v7664_v29 = vld [vmem:[#allocation4 + $0x18] sm:$0xff] }
 0x9d1   : > { %v15304_v26 = vld [vmem:[%s18205_s4] ss:$0 sm:$0xff]  ;;  %v7662_v9 = vld [vmem:[#allocation4 + $0x8] sm:$0xff]  ;;  %v7668_v14 = vld [vmem:[#allocation4 + $0x38] sm:$0xff] }
 0x9d2   : > { %v7666_v24 = vld [vmem:[#allocation4 + $0x28] sm:$0xff]  ;;  %v7665_v18 = vld [vmem:[#allocation4 + $0x20] sm:$0xff] }
 0x9d3   : > { %7736 = vperm.xlu1 %8489, %v7698_v32   ;;  %7731 = vperm.xlu0 %8488, %v7697_v37   ;;  %v7667_v37 = vld [vmem:[#allocation4 + $0x30] sm:$0xff] }
 0x9d7   : > { %7746 = vperm.xlu1 %8489, %v7700_v56   ;;  %7741 = vperm.xlu0 %8488, %v7699_v31  }
 0x9db   : > { %7756 = vperm.xlu1 %8489, %v7702_v7   ;;  %7751 = vperm.xlu0 %8488, %v7701_v48   ;;  %v7670_v48 = vld [vmem:[#allocation4 + $0x48] sm:$0xff] }
 0x9df   : > { %7766 = vperm.xlu1 %8489, %v7704_v60   ;;  %7761 = vperm.xlu0 %8488, %v7703_v53   ;;  %v7669_v53 = vld [vmem:[#allocation4 + $0x40] sm:$0xff] }
 0x9e3   : > { %7776 = vperm.xlu1 %8489, %v7706_v61   ;;  %7771 = vperm.xlu0 %8488, %v7705_v44  }
 0x9e7   : > { %7786 = vperm.xlu1 %8489, %v7708_v11   ;;  %7781 = vperm.xlu0 %8488, %v7707_v10   ;;  %v7672_v10 = vld [vmem:[#allocation4 + $0x58] sm:$0xff] }
 0xa46   : > { %v7722_v6 = vpop.permute.xlu1 %7721  ;;  %v7712_v4 = vpop.permute.xlu0 %7711 }
 0xa47   : > { %8490 = vrcp.f32 %v7722_v6 }
 0xa48   : > { %8492 = vrcp.f32 %v7712_v4  ;;  %v7671_v4 = vld [vmem:[#allocation4 + $0x50] sm:$0xff] }
 0xa4a   : > { %v7727_v33 = vpop.permute.xlu1 %7726  ;;  %v7717_v45 = vpop.permute.xlu0 %7716 }
 0xa4b   : > { %8494 = vrcp.f32 %v7727_v33 }
 0xa4c   : > { %8496 = vrcp.f32 %v7717_v45 }
 0xa4e   : > { %v7737_v5 = vpop.permute.xlu1 %7736  ;;  %v7732_v62 = vpop.permute.xlu0 %7731 }
 0xa4f   : > { %8498 = vrcp.f32 %v7737_v5 }
 0xa50   : > { %8500 = vrcp.f32 %v7732_v62 }
 0xa52   : > { %v7747_v12 = vpop.permute.xlu1 %7746  ;;  %v7742_v1 = vpop.permute.xlu0 %7741 }
 0xa53   : > { %8502 = vrcp.f32 %v7747_v12 }
 0xa54   : > { %v8491_v23 = vpop.eup %8490  ;;  %8504 = vrcp.f32 %v7742_v1 }
 0xa55   : > { %v8493_v55 = vpop.eup %8492  ;;  %v7794_v19 = vmul.f32 %v8491_v23, %v7663_v38 }
 0xa56   : > { %v7790_v8 = vmul.f32 %v8493_v55, %v7661_v16  ;;  %v7757_v3 = vpop.permute.xlu1 %7756  ;;  %v7752_v42 = vpop.permute.xlu0 %7751  ;;  %v7674_v16 = vld [vmem:[#allocation4 + $0x68] sm:$0xff]  ;;  %v7673_v55 = vld [vmem:[#allocation4 + $0x60] sm:$0xff] }
 0xa57   : > { %v7830_v43 = vadd.f32 %v15304_v26, %v7794_v19  ;;  %8506 = vrcp.f32 %v7757_v3 }
 0xa58   : > { %v8495_v13 = vpop.eup %8494  ;;  %v7828_v57 = vadd.f32 %v15304_v26, %v7790_v8  ;;  %8508 = vrcp.f32 %v7752_v42 }
 0xa59   : > { %v8497_v36 = vpop.eup %8496  ;;  %v7846_v20 = vmax.f32 %v7830_v43, 0.0  ;;  %v7796_v41 = vmul.f32 %v8495_v13, %v7664_v29  ;;  %v7676_v13 = vld [vmem:[#allocation4 + $0x78] sm:$0xff] }
 0xa5a   : > { %v7844_v0 = vmax.f32 %v7828_v57, 0.0  ;;  %v7792_v21 = vmul.f32 %v8497_v36, %v7662_v9  ;;  %v7767_v22 = vpop.permute.xlu1 %7766  ;;  %v7762_v17 = vpop.permute.xlu0 %7761  ;;  %v7675_v36 = vld [vmem:[#allocation4 + $0x70] sm:$0xff] }
 0xa5b   : > { %7863 = vst.msk [vmem:[%s8803_s28 + $0x10] sm:$0xff] %vm7860_vm6, %v7846_v20  ;;  %v7831_v58 = vadd.f32 %v15304_v26, %v7796_v41  ;;  %8510 = vrcp.f32 %v7767_v22 }
 0xa5c   : > { %v8499_v54 = vpop.eup %8498  ;;  %7861 = vst.msk [vmem:[%s8803_s28] sm:$0xff] %vm7860_vm6, %v7844_v0  ;;  %v7829_v15 = vadd.f32 %v15304_v26, %v7792_v21  ;;  %8512 = vrcp.f32 %v7762_v17 }
 0xa5d   : > { %v8501_v46 = vpop.eup %8500  ;;  %v7847_v28 = vmax.f32 %v7831_v58, 0.0  ;;  %v7800_v59 = vmul.f32 %v8499_v54, %v7666_v24 }
 0xa5e   : > { %v7845_v35 = vmax.f32 %v7829_v15, 0.0  ;;  %v7798_v2 = vmul.f32 %v8501_v46, %v7665_v18  ;;  %v7777_v27 = vpop.permute.xlu1 %7776  ;;  %v7772_v52 = vpop.permute.xlu0 %7771 }
 0xa5f   : > { %7864 = vst.msk [vmem:[%s8803_s28 + $0x18] sm:$0xff] %vm7860_vm6, %v7847_v28  ;;  %v7833_v32 = vadd.f32 %v15304_v26, %v7800_v59  ;;  %8514 = vrcp.f32 %v7777_v27 }
 0xa60   : > { %v8503_v47 = vpop.eup %8502  ;;  %7862 = vst.msk [vmem:[%s8803_s28 + $0x8] sm:$0xff] %vm7860_vm6, %v7845_v35  ;;  %v7832_v30 = vadd.f32 %v15304_v26, %v7798_v2  ;;  %8516 = vrcp.f32 %v7772_v52 }
 0xa61   : > { %v8505_v56 = vpop.eup %8504  ;;  %v7849_v31 = vmax.f32 %v7833_v32, 0.0  ;;  %v7804_v25 = vmul.f32 %v8503_v47, %v7668_v14 }
 0xa62   : > { %v7848_v51 = vmax.f32 %v7832_v30, 0.0  ;;  %v7802_v7 = vmul.f32 %v8505_v56, %v7667_v37  ;;  %v7787_v39 = vpop.permute.xlu1 %7786  ;;  %v7782_v63 = vpop.permute.xlu0 %7781 }
 0xa63   : > { %7866 = vst.msk [vmem:[%s8803_s28 + $0x28] sm:$0xff] %vm7860_vm6, %v7849_v31  ;;  %v7835_v60 = vadd.f32 %v15304_v26, %v7804_v25  ;;  %8518 = vrcp.f32 %v7787_v39 }
 0xa64   : > { %v8507_v50 = vpop.eup %8506  ;;  %7865 = vst.msk [vmem:[%s8803_s28 + $0x20] sm:$0xff] %vm7860_vm6, %v7848_v51  ;;  %v7834_v49 = vadd.f32 %v15304_v26, %v7802_v7  ;;  %8520 = vrcp.f32 %v7782_v63 }
 0xa65   : > { %v8509_v61 = vpop.eup %8508  ;;  %v7851_v44 = vmax.f32 %v7835_v60, 0.0  ;;  %v7808_v40 = vmul.f32 %v8507_v50, %v7670_v48 }
 0xa66   : > { %v7850_v34 = vmax.f32 %v7834_v49, 0.0  ;;  %v7806_v11 = vmul.f32 %v8509_v61, %v7669_v53 }
 0xa67   : > { %7868 = vst.msk [vmem:[%s8803_s28 + $0x38] sm:$0xff] %vm7860_vm6, %v7851_v44  ;;  %v7837_v6 = vadd.f32 %v15304_v26, %v7808_v40 }
 0xa68   : > { %v8511_v33 = vpop.eup %8510  ;;  %7867 = vst.msk [vmem:[%s8803_s28 + $0x30] sm:$0xff] %vm7860_vm6, %v7850_v34  ;;  %v7836_v45 = vadd.f32 %v15304_v26, %v7806_v11 }
 0xa69   : > { %v8513_v5 = vpop.eup %8512  ;;  %v7853_v62 = vmax.f32 %v7837_v6, 0.0  ;;  %v7812_v38 = vmul.f32 %v8511_v33, %v7672_v10 }
 0xa6a   : > { %v7852_v12 = vmax.f32 %v7836_v45, 0.0  ;;  %v7810_v1 = vmul.f32 %v8513_v5, %v7671_v4 }
 0xa6b   : > { %7870 = vst.msk [vmem:[%s8803_s28 + $0x48] sm:$0xff] %vm7860_vm6, %v7853_v62  ;;  %v7839_v23 = vadd.f32 %v15304_v26, %v7812_v38 }
 0xa6c   : > { %v8515_v19 = vpop.eup %8514  ;;  %7869 = vst.msk [vmem:[%s8803_s28 + $0x40] sm:$0xff] %vm7860_vm6, %v7852_v12  ;;  %v7838_v8 = vadd.f32 %v15304_v26, %v7810_v1 }
 0xa6d   : > { %v8517_v29 = vpop.eup %8516  ;;  %v7855_v3 = vmax.f32 %v7839_v23, 0.0  ;;  %v7816_v42 = vmul.f32 %v8515_v19, %v7674_v16 }
 0xa6e   : > { %v7854_v43 = vmax.f32 %v7838_v8, 0.0  ;;  %v7814_v9 = vmul.f32 %v8517_v29, %v7673_v55 }
 0xa6f   : > { %7872 = vst.msk [vmem:[%s8803_s28 + $0x58] sm:$0xff] %vm7860_vm6, %v7855_v3  ;;  %v7841_v57 = vadd.f32 %v15304_v26, %v7816_v42 }
 0xa70   : > { %v8519_v20 = vpop.eup %8518  ;;  %7871 = vst.msk [vmem:[%s8803_s28 + $0x50] sm:$0xff] %vm7860_vm6, %v7854_v43  ;;  %v7840_v41 = vadd.f32 %v15304_v26, %v7814_v9 }
 0xa71   : > { %v8521_v0 = vpop.eup %8520  ;;  %v7857_v21 = vmax.f32 %v7841_v57, 0.0  ;;  %v7820_v24 = vmul.f32 %v8519_v20, %v7676_v13 }
 0xa72   : > { %v7856_v22 = vmax.f32 %v7840_v41, 0.0  ;;  %v7818_v17 = vmul.f32 %v8521_v0, %v7675_v36 }
 0xa73   : > { %7874 = vst.msk [vmem:[%s8803_s28 + $0x68] sm:$0xff] %vm7860_vm6, %v7857_v21  ;;  %v7843_v58 = vadd.f32 %v15304_v26, %v7820_v24 }
 0xa74   : > { %7873 = vst.msk [vmem:[%s8803_s28 + $0x60] sm:$0xff] %vm7860_vm6, %v7856_v22  ;;  %v7842_v18 = vadd.f32 %v15304_v26, %v7818_v17 }
 0xa75   : > { %v7859_v54 = vmax.f32 %v7843_v58, 0.0 }
 0xa76   : > { %v7858_v15 = vmax.f32 %v7842_v18, 0.0 }
 0xa77   : > { %7876 = vst.msk [vmem:[%s8803_s28 + $0x78] sm:$0xff] %vm7860_vm6, %v7859_v54 }
 0xa78   : > { %7875 = vst.msk [vmem:[%s8803_s28 + $0x70] sm:$0xff] %vm7860_vm6, %v7858_v15 }
 0xa79 PF: > { %s30_s25 = sadd.s32 1, %s8606_s25   ;;  %s18206_s10 = sld [smem:[#allocation14_spill]] }
 0xa7a   : > { %p27_p9 = scmp.ge.s32.totalorder %s30_s25, 6   ;;  %s18207_s22 = sld [smem:[#allocation11_spill]] }
 0xa7b   : > { %s18208_s16 = sld [smem:[#allocation12_spill]]  ;;  %s18210_s18 = smov %s8578_s19 }
 0xa7c   : > { %s18209_s24 = sld [smem:[#allocation13_spill]]  ;;  %s18211_s19 = smov %s8766_s26 }
 0xa7d   : > { %s18212_s20 = smov %s8586_s0  ;;  %s18214_s21 = smov %s8598_s23 }
 0xa7e   :  { %29 = sbr.rel (!%p27_p9) target bundleno = 22 (0x16), region = 209 }
 0xa7f   : > { %s18213_s0 = smov %s18206_s10 }
 0xa81   : > { %s18215_s23 = smov %s18208_s16 }

</bundles_post_ra>
